<compile_context>
chip_gen: v5e
topology: v5e:2x2
jax: 0.10.0
libtpu: 0.0.40
codegen_flags: <defaults>
</compile_context>

<pallas_src>
import functools

import jax
import jax.numpy as jnp
from jax.experimental import pallas as pl
from jax.experimental.pallas import tpu as pltpu

BN_EPS = 1e-5


def _conv_bn_relu_pool_kernel(p_ref, w_ref, gamma_ref, beta_ref, out_ref):
    """Fused conv-as-matmul + BatchNorm(train) + ReLU + MaxPool2x2 for one Cout block.

    p_ref:     (4*R, 9*Cin) bf16  im2col patches, rows ordered k*R + r (k = pool pos)
    w_ref:     (9*Cin, Cb)  bf16  conv weight block
    gamma_ref: (1, Cb)      f32   BN affine scale block
    beta_ref:  (1, Cb)      f32   BN affine shift block
    out_ref:   (R, Cb)      bf16  pooled output block, rows ordered (n, oh, ow)
    """
    # Single MXU matmul for all four pool-window positions (f32 accumulation).
    y = jnp.dot(p_ref[...], w_ref[...], preferred_element_type=jnp.float32)   # (4R, Cb)
    four_r = y.shape[0]
    r = four_r // 4
    inv_n = 1.0 / float(four_r)

    # One-pass training-mode batch statistics over all 4R pre-pool positions.
    s = jnp.sum(y, axis=0, keepdims=True)
    ss = jnp.sum(y * y, axis=0, keepdims=True)
    mean = s * inv_n
    var = jnp.maximum(ss * inv_n - mean * mean, 0.0)          # clamp: no NaN from rsqrt
    scale = jax.lax.rsqrt(var + BN_EPS) * gamma_ref[...]
    shift = beta_ref[...] - mean * scale

    h = jnp.maximum(y * scale + shift, 0.0)                   # (4R, Cb)
    # MaxPool2x2: max over the 4 pool-position row groups.
    pooled = jnp.maximum(jnp.maximum(h[0:r], h[r:2 * r]),
                         jnp.maximum(h[2 * r:3 * r], h[3 * r:4 * r]))
    out_ref[...] = pooled.astype(out_ref.dtype)               # bf16 layer output


def _im2col_pool_major(x_nhwc):
    """(N, H, W, C) bf16 -> (4*R, 9*C) bf16, rows ordered pool-position-major (k*R + r).

    Cheap XLA glue (fused under jit).  The input is a few hundred KiB at most here.
    # TODO(synk): fold this into the conv kernel (input fits in VMEM) to drop one XLA
    # fusion + HBM round trip of the patch matrix; modest dispatch-count win.
    """
    n, h, w, c = x_nhwc.shape
    ho, wo = h // 2, w // 2
    k = 9 * c
    xp = jnp.pad(x_nhwc, ((0, 0), (1, 1), (1, 1), (0, 0)))
    cols = [xp[:, dy:dy + h, dx:dx + w, :] for dy in range(3) for dx in range(3)]
    patches = jnp.concatenate(cols, axis=-1)                        # (N, H, W, 9*C)
    pwin = patches.reshape(n, ho, 2, wo, 2, k).transpose(2, 4, 0, 1, 3, 5)
    return pwin.reshape(4 * n * ho * wo, k)                         # (4R, 9*C)


def conv_bn_relu_pool(x_nhwc, w_mat, gamma, beta, *, cout_block):
    """One Sequential(Conv3x3 pad=1 no-bias, BN(train), ReLU, MaxPool2) layer.

    x_nhwc: (N, H, W, Cin) bf16;  w_mat: (9*Cin, Cout) bf16 (pre-materialized at init).
    Returns (N, H/2, W/2, Cout) bf16.
    """
    n, h, w, cin = x_nhwc.shape
    k, cout = w_mat.shape
    assert k == 9 * cin and cout % cout_block == 0
    ho, wo = h // 2, w // 2
    r = n * ho * wo

    p = _im2col_pool_major(x_nhwc)                              # (4R, 9*Cin) bf16

    out = pl.pallas_call(
        _conv_bn_relu_pool_kernel,
        out_shape=jax.ShapeDtypeStruct((r, cout), jnp.bfloat16),
        grid_spec=pltpu.PrefetchScalarGridSpec(
            num_scalar_prefetch=0,
            grid=(cout // cout_block,),
            in_specs=[
                pl.BlockSpec((4 * r, k), lambda j: (0, 0)),         # patches: resident
                pl.BlockSpec((k, cout_block), lambda j: (0, j)),    # weights: streamed
                pl.BlockSpec((1, cout_block), lambda j: (0, j)),
                pl.BlockSpec((1, cout_block), lambda j: (0, j)),
            ],
            out_specs=pl.BlockSpec((r, cout_block), lambda j: (0, j)),
        ),
        compiler_params=pltpu.CompilerParams(
            dimension_semantics=("parallel",)),                     # Cout steps across TCs
    )(p, w_mat, gamma, beta)
    return out.reshape(n, ho, wo, cout)                             # NHWC bf16


def relation_network_forward(x_nchw, params, *, cout_block=256):
    x = jnp.transpose(x_nchw, (0, 2, 3, 1)).astype(jnp.bfloat16)    # NCHW -> NHWC bf16
    x = conv_bn_relu_pool(x, params["w1_mat"], params["gamma1"], params["beta1"],
                          cout_block=cout_block)
    x = conv_bn_relu_pool(x, params["w2_mat"], params["gamma2"], params["beta2"],
                          cout_block=cout_block)
    n = x.shape[0]
    flat = x.reshape(n, -1).astype(jnp.float32)                     # (N, 512): spatial 1x1
    # fc1 -> fc2 -> sigmoid in plain jnp: ~64 KFLOPs, XLA fuses it; a dedicated
    # pallas_call's dispatch overhead exceeds the compute by orders of magnitude.
    h = flat @ params["w_fc1"] + params["b_fc1"]                    # no activation (module)
    o = h @ params["w_fc2"] + params["b_fc2"]
    return jax.nn.sigmoid(o)


def _pick_cout_block():
    """512-wide blocks (grid=(1,)) on v6e; 256 (grid=(2,)) on v5e/v7x/others."""
    try:
        kind = jax.devices()[0].device_kind.lower()
    except Exception:
        return 256
    return 512 if "v6" in kind else 256


def init_params(key, hidden_size):
    """Deterministic synthetic parameters matching the module's shapes.

    Conv weights are stored pre-reshaped to (9*Cin, Cout) AND pre-cast to bf16, so the
    traced forward reads them once at 2 bytes/elt whether params are jit constants or
    real jit arguments.  Linear weights stored as (in, out) == torch weight.T.
    BN affine init matches PyTorch defaults (gamma=1, beta=0).
    """
    c = 512
    ks = jax.random.split(key, 6)

    def u(k, shape, fan_in):
        bound = 1.0 / jnp.sqrt(jnp.float32(fan_in))
        return jax.random.uniform(k, shape, jnp.float32, -bound, bound)

    w1 = u(ks[0], (3, 3, c, c), 9 * c).reshape(9 * c, c).astype(jnp.bfloat16)
    w2 = u(ks[1], (3, 3, c, c), 9 * c).reshape(9 * c, c).astype(jnp.bfloat16)
    return dict(
        w1_mat=w1,
        gamma1=jnp.ones((1, c), jnp.float32), beta1=jnp.zeros((1, c), jnp.float32),
        w2_mat=w2,
        gamma2=jnp.ones((1, c), jnp.float32), beta2=jnp.zeros((1, c), jnp.float32),
        w_fc1=u(ks[2], (c, hidden_size), c),
        b_fc1=u(ks[3], (1, hidden_size), c),
        w_fc2=u(ks[4], (hidden_size, 1), hidden_size),
        b_fc2=u(ks[5], (1, 1), hidden_size),
    )


def reference_forward(x_nchw, params):
    """Pure-JAX reference of the same forward pass.

    Mirrors the kernel's declared numerics (bf16 conv operands, f32 accumulation,
    f32 BN/ReLU/pool, bf16 layer outputs, f32 fc) so the check isolates kernel structure.
    """
    x = jnp.transpose(x_nchw, (0, 2, 3, 1)).astype(jnp.bfloat16)

    def layer(x, wmat, g, b):
        n, h, w, cin = x.shape
        cout = wmat.shape[-1]
        xp = jnp.pad(x, ((0, 0), (1, 1), (1, 1), (0, 0)))
        cols = [xp[:, dy:dy + h, dx:dx + w, :] for dy in range(3) for dx in range(3)]
        pat = jnp.concatenate(cols, -1).reshape(n * h * w, 9 * cin)
        y = jnp.dot(pat, wmat, preferred_element_type=jnp.float32)
        mean = y.mean(0, keepdims=True)
        var = ((y - mean) ** 2).mean(0, keepdims=True)
        y = jnp.maximum((y - mean) * jax.lax.rsqrt(var + BN_EPS) * g + b, 0.0)
        y = y.reshape(n, h // 2, 2, w // 2, 2, cout).max(axis=(2, 4))
        return y.astype(jnp.bfloat16)

    x = layer(x, params["w1_mat"], params["gamma1"], params["beta1"])
    x = layer(x, params["w2_mat"], params["gamma2"], params["beta2"])
    flat = x.reshape(x.shape[0], -1).astype(jnp.float32)
    h = flat @ params["w_fc1"] + params["b_fc1"]
    o = h @ params["w_fc2"] + params["b_fc2"]
    return jax.nn.sigmoid(o)


if __name__ == "__main__":
    key = jax.random.PRNGKey(0)
    kx, kp = jax.random.split(key)
    hidden_size = 32

    # Module hard-codes 512 channels; 4x4 spatial so that two MaxPool(2) stages leave
    # 1x1 and out.view(N, -1) yields exactly 512 features for fc1 = Linear(512, hidden).
    x = jax.random.normal(kx, (2, 512, 4, 4), jnp.float32)          # NCHW, like PyTorch
    params = init_params(kp, hidden_size)

    cout_block = _pick_cout_block()
    fwd = jax.jit(functools.partial(relation_network_forward, cout_block=cout_block))
    out = jax.block_until_ready(fwd(x, params))                     # params are real jit args
    ref = reference_forward(x, params)

    assert out.shape == (2, 1), out.shape
    assert jnp.allclose(out, ref, rtol=1e-3, atol=1e-3), (out, ref)
    print("KERNEL_OK")
</pallas_src>

<mosaic_0001>
module attributes {stable_mosaic.version = 11 : i64} {
  func.func @_conv_bn_relu_pool_kernel(%arg0: i32, %arg1: memref<32x4608xbf16, #tpu.memory_space<vmem>>, %arg2: memref<4608x256xbf16, #tpu.memory_space<vmem>>, %arg3: memref<1x256xf32, #tpu.memory_space<vmem>>, %arg4: memref<1x256xf32, #tpu.memory_space<vmem>>, %arg5: memref<8x256xbf16, #tpu.memory_space<vmem>>) attributes {dimension_semantics = [#tpu.dimension_semantics<parallel>], iteration_bounds = array<i64: 2>, scalar_prefetch = 0 : i64, scratch_operands = 0 : i64, tpu.core_type = #tpu.core_type<tc>, window_params = [{pipeline_mode = #tpu.pipeline_mode<synchronous>, transform_indices = @transform_0, window_bounds = array<i64: 32, 4608>}, {transform_indices = @transform_1, window_bounds = array<i64: 4608, 256>}, {transform_indices = @transform_2, window_bounds = array<i64: 1, 256>}, {transform_indices = @transform_3, window_bounds = array<i64: 1, 256>}, {transform_indices = @transform_4, window_bounds = array<i64: 8, 256>}]} {
    %c0 = arith.constant 0 : index
    %c0_0 = arith.constant 0 : index
    %0 = vector.load %arg1[%c0, %c0_0] : memref<32x4608xbf16, #tpu.memory_space<vmem>>, vector<32x4608xbf16>
    %c0_1 = arith.constant 0 : index
    %c0_2 = arith.constant 0 : index
    %1 = vector.load %arg2[%c0_1, %c0_2] : memref<4608x256xbf16, #tpu.memory_space<vmem>>, vector<4608x256xbf16>
    %cst = arith.constant dense<0.000000e+00> : vector<32x256xf32>
    %2 = tpu.matmul %0, %1, %cst {dimension_numbers = #tpu.dot_dimension_numbers<[1], [0], [0], [1], [0, 0, 1, 1], [], []>} : vector<32x4608xbf16>, vector<4608x256xbf16>, vector<32x256xf32> -> vector<32x256xf32>
    %cst_3 = arith.constant dense<0.000000e+00> : vector<256xf32>
    %3 = vector.multi_reduction <add>, %2, %cst_3 [0] : vector<32x256xf32> to vector<256xf32>
    %4 = vector.shape_cast %3 : vector<256xf32> to vector<1x256xf32>
    %5 = arith.mulf %2, %2 : vector<32x256xf32>
    %cst_4 = arith.constant dense<0.000000e+00> : vector<256xf32>
    %6 = vector.multi_reduction <add>, %5, %cst_4 [0] : vector<32x256xf32> to vector<256xf32>
    %7 = vector.shape_cast %6 : vector<256xf32> to vector<1x256xf32>
    %cst_5 = arith.constant 3.125000e-02 : f32
    %8 = vector.broadcast %cst_5 : f32 to vector<1x256xf32>
    %9 = arith.mulf %4, %8 : vector<1x256xf32>
    %cst_6 = arith.constant 3.125000e-02 : f32
    %10 = vector.broadcast %cst_6 : f32 to vector<1x256xf32>
    %11 = arith.mulf %7, %10 : vector<1x256xf32>
    %12 = arith.mulf %9, %9 : vector<1x256xf32>
    %13 = arith.subf %11, %12 : vector<1x256xf32>
    %cst_7 = arith.constant 0.000000e+00 : f32
    %14 = vector.broadcast %cst_7 : f32 to vector<1x256xf32>
    %15 = arith.maximumf %13, %14 : vector<1x256xf32>
    %cst_8 = arith.constant 9.99999974E-6 : f32
    %16 = vector.broadcast %cst_8 : f32 to vector<1x256xf32>
    %17 = arith.addf %15, %16 : vector<1x256xf32>
    %18 = math.rsqrt %17 : vector<1x256xf32>
    %c0_9 = arith.constant 0 : index
    %c0_10 = arith.constant 0 : index
    %19 = vector.load %arg3[%c0_9, %c0_10] : memref<1x256xf32, #tpu.memory_space<vmem>>, vector<1x256xf32>
    %20 = arith.mulf %18, %19 : vector<1x256xf32>
    %c0_11 = arith.constant 0 : index
    %c0_12 = arith.constant 0 : index
    %21 = vector.load %arg4[%c0_11, %c0_12] : memref<1x256xf32, #tpu.memory_space<vmem>>, vector<1x256xf32>
    %22 = arith.mulf %9, %20 : vector<1x256xf32>
    %23 = arith.subf %21, %22 : vector<1x256xf32>
    %24 = vector.broadcast %20 : vector<1x256xf32> to vector<32x256xf32>
    %25 = arith.mulf %2, %24 : vector<32x256xf32>
    %26 = vector.broadcast %23 : vector<1x256xf32> to vector<32x256xf32>
    %27 = arith.addf %25, %26 : vector<32x256xf32>
    %cst_13 = arith.constant 0.000000e+00 : f32
    %28 = vector.broadcast %cst_13 : f32 to vector<32x256xf32>
    %29 = arith.maximumf %27, %28 : vector<32x256xf32>
    %30 = vector.extract_strided_slice %29 {offsets = [0, 0], sizes = [8, 256], strides = [1, 1]} : vector<32x256xf32> to vector<8x256xf32>
    %31 = vector.extract_strided_slice %29 {offsets = [8, 0], sizes = [8, 256], strides = [1, 1]} : vector<32x256xf32> to vector<8x256xf32>
    %32 = arith.maximumf %30, %31 : vector<8x256xf32>
    %33 = vector.extract_strided_slice %29 {offsets = [16, 0], sizes = [8, 256], strides = [1, 1]} : vector<32x256xf32> to vector<8x256xf32>
    %34 = vector.extract_strided_slice %29 {offsets = [24, 0], sizes = [8, 256], strides = [1, 1]} : vector<32x256xf32> to vector<8x256xf32>
    %35 = arith.maximumf %33, %34 : vector<8x256xf32>
    %36 = arith.maximumf %32, %35 : vector<8x256xf32>
    %37 = arith.truncf %36 : vector<8x256xf32> to vector<8x256xbf16>
    %c0_14 = arith.constant 0 : index
    %c0_15 = arith.constant 0 : index
    %38 = vector.load %arg5[%c0_14, %c0_15] : memref<8x256xbf16, #tpu.memory_space<vmem>>, vector<8x256xbf16>
    tpu.vector_store %arg5[%c0_14, %c0_15], %37 {strides = array<i32>} : memref<8x256xbf16, #tpu.memory_space<vmem>>, vector<8x256xbf16>,
    return
  }
  func.func @transform_0(%arg0: i32) -> (i32, i32) {
    %c0_i32 = arith.constant 0 : i32
    %c0_i32_0 = arith.constant 0 : i32
    %c0_i32_1 = arith.constant 0 : i32
    return %c0_i32, %c0_i32_0 : i32, i32
  }
  func.func @transform_1(%arg0: i32) -> (i32, i32) {
    %c0_i32 = arith.constant 0 : i32
    %c0_i32_0 = arith.constant 0 : i32
    return %c0_i32, %arg0 : i32, i32
  }
  func.func @transform_2(%arg0: i32) -> (i32, i32) {
    %c0_i32 = arith.constant 0 : i32
    %c0_i32_0 = arith.constant 0 : i32
    return %c0_i32, %arg0 : i32, i32
  }
  func.func @transform_3(%arg0: i32) -> (i32, i32) {
    %c0_i32 = arith.constant 0 : i32
    %c0_i32_0 = arith.constant 0 : i32
    return %c0_i32, %arg0 : i32, i32
  }
  func.func @transform_4(%arg0: i32) -> (i32, i32) {
    %c0_i32 = arith.constant 0 : i32
    %c0_i32_0 = arith.constant 0 : i32
    return %c0_i32, %arg0 : i32, i32
  }
}

module attributes {stable_mosaic.version = 11 : i64} {
  func.func @_conv_bn_relu_pool_kernel(%arg0: i32, %arg1: memref<8x4608xbf16, #tpu.memory_space<vmem>>, %arg2: memref<4608x256xbf16, #tpu.memory_space<vmem>>, %arg3: memref<1x256xf32, #tpu.memory_space<vmem>>, %arg4: memref<1x256xf32, #tpu.memory_space<vmem>>, %arg5: memref<2x256xbf16, #tpu.memory_space<vmem>>) attributes {dimension_semantics = [#tpu.dimension_semantics<parallel>], iteration_bounds = array<i64: 2>, scalar_prefetch = 0 : i64, scratch_operands = 0 : i64, tpu.core_type = #tpu.core_type<tc>, window_params = [{pipeline_mode = #tpu.pipeline_mode<synchronous>, transform_indices = @transform_0, window_bounds = array<i64: 8, 4608>}, {transform_indices = @transform_1, window_bounds = array<i64: 4608, 256>}, {transform_indices = @transform_2, window_bounds = array<i64: 1, 256>}, {transform_indices = @transform_3, window_bounds = array<i64: 1, 256>}, {transform_indices = @transform_4, window_bounds = array<i64: 2, 256>}]} {
    %c0 = arith.constant 0 : index
    %c0_0 = arith.constant 0 : index
    %0 = vector.load %arg1[%c0, %c0_0] : memref<8x4608xbf16, #tpu.memory_space<vmem>>, vector<8x4608xbf16>
    %c0_1 = arith.constant 0 : index
    %c0_2 = arith.constant 0 : index
    %1 = vector.load %arg2[%c0_1, %c0_2] : memref<4608x256xbf16, #tpu.memory_space<vmem>>, vector<4608x256xbf16>
    %cst = arith.constant dense<0.000000e+00> : vector<8x256xf32>
    %2 = tpu.matmul %0, %1, %cst {dimension_numbers = #tpu.dot_dimension_numbers<[1], [0], [0], [1], [0, 0, 1, 1], [], []>} : vector<8x4608xbf16>, vector<4608x256xbf16>, vector<8x256xf32> -> vector<8x256xf32>
    %cst_3 = arith.constant dense<0.000000e+00> : vector<256xf32>
    %3 = vector.multi_reduction <add>, %2, %cst_3 [0] : vector<8x256xf32> to vector<256xf32>
    %4 = vector.shape_cast %3 : vector<256xf32> to vector<1x256xf32>
    %5 = arith.mulf %2, %2 : vector<8x256xf32>
    %cst_4 = arith.constant dense<0.000000e+00> : vector<256xf32>
    %6 = vector.multi_reduction <add>, %5, %cst_4 [0] : vector<8x256xf32> to vector<256xf32>
    %7 = vector.shape_cast %6 : vector<256xf32> to vector<1x256xf32>
    %cst_5 = arith.constant 1.250000e-01 : f32
    %8 = vector.broadcast %cst_5 : f32 to vector<1x256xf32>
    %9 = arith.mulf %4, %8 : vector<1x256xf32>
    %cst_6 = arith.constant 1.250000e-01 : f32
    %10 = vector.broadcast %cst_6 : f32 to vector<1x256xf32>
    %11 = arith.mulf %7, %10 : vector<1x256xf32>
    %12 = arith.mulf %9, %9 : vector<1x256xf32>
    %13 = arith.subf %11, %12 : vector<1x256xf32>
    %cst_7 = arith.constant 0.000000e+00 : f32
    %14 = vector.broadcast %cst_7 : f32 to vector<1x256xf32>
    %15 = arith.maximumf %13, %14 : vector<1x256xf32>
    %cst_8 = arith.constant 9.99999974E-6 : f32
    %16 = vector.broadcast %cst_8 : f32 to vector<1x256xf32>
    %17 = arith.addf %15, %16 : vector<1x256xf32>
    %18 = math.rsqrt %17 : vector<1x256xf32>
    %c0_9 = arith.constant 0 : index
    %c0_10 = arith.constant 0 : index
    %19 = vector.load %arg3[%c0_9, %c0_10] : memref<1x256xf32, #tpu.memory_space<vmem>>, vector<1x256xf32>
    %20 = arith.mulf %18, %19 : vector<1x256xf32>
    %c0_11 = arith.constant 0 : index
    %c0_12 = arith.constant 0 : index
    %21 = vector.load %arg4[%c0_11, %c0_12] : memref<1x256xf32, #tpu.memory_space<vmem>>, vector<1x256xf32>
    %22 = arith.mulf %9, %20 : vector<1x256xf32>
    %23 = arith.subf %21, %22 : vector<1x256xf32>
    %24 = vector.broadcast %20 : vector<1x256xf32> to vector<8x256xf32>
    %25 = arith.mulf %2, %24 : vector<8x256xf32>
    %26 = vector.broadcast %23 : vector<1x256xf32> to vector<8x256xf32>
    %27 = arith.addf %25, %26 : vector<8x256xf32>
    %cst_13 = arith.constant 0.000000e+00 : f32
    %28 = vector.broadcast %cst_13 : f32 to vector<8x256xf32>
    %29 = arith.maximumf %27, %28 : vector<8x256xf32>
    %30 = vector.extract_strided_slice %29 {offsets = [0, 0], sizes = [2, 256], strides = [1, 1]} : vector<8x256xf32> to vector<2x256xf32>
    %31 = vector.extract_strided_slice %29 {offsets = [2, 0], sizes = [2, 256], strides = [1, 1]} : vector<8x256xf32> to vector<2x256xf32>
    %32 = arith.maximumf %30, %31 : vector<2x256xf32>
    %33 = vector.extract_strided_slice %29 {offsets = [4, 0], sizes = [2, 256], strides = [1, 1]} : vector<8x256xf32> to vector<2x256xf32>
    %34 = vector.extract_strided_slice %29 {offsets = [6, 0], sizes = [2, 256], strides = [1, 1]} : vector<8x256xf32> to vector<2x256xf32>
    %35 = arith.maximumf %33, %34 : vector<2x256xf32>
    %36 = arith.maximumf %32, %35 : vector<2x256xf32>
    %37 = arith.truncf %36 : vector<2x256xf32> to vector<2x256xbf16>
    %c0_14 = arith.constant 0 : index
    %c0_15 = arith.constant 0 : index
    %38 = vector.load %arg5[%c0_14, %c0_15] : memref<2x256xbf16, #tpu.memory_space<vmem>>, vector<2x256xbf16>
    tpu.vector_store %arg5[%c0_14, %c0_15], %37 {strides = array<i32>} : memref<2x256xbf16, #tpu.memory_space<vmem>>, vector<2x256xbf16>,
    return
  }
  func.func @transform_0(%arg0: i32) -> (i32, i32) {
    %c0_i32 = arith.constant 0 : i32
    %c0_i32_0 = arith.constant 0 : i32
    %c0_i32_1 = arith.constant 0 : i32
    return %c0_i32, %c0_i32_0 : i32, i32
  }
  func.func @transform_1(%arg0: i32) -> (i32, i32) {
    %c0_i32 = arith.constant 0 : i32
    %c0_i32_0 = arith.constant 0 : i32
    return %c0_i32, %arg0 : i32, i32
  }
  func.func @transform_2(%arg0: i32) -> (i32, i32) {
    %c0_i32 = arith.constant 0 : i32
    %c0_i32_0 = arith.constant 0 : i32
    return %c0_i32, %arg0 : i32, i32
  }
  func.func @transform_3(%arg0: i32) -> (i32, i32) {
    %c0_i32 = arith.constant 0 : i32
    %c0_i32_0 = arith.constant 0 : i32
    return %c0_i32, %arg0 : i32, i32
  }
  func.func @transform_4(%arg0: i32) -> (i32, i32) {
    %c0_i32 = arith.constant 0 : i32
    %c0_i32_0 = arith.constant 0 : i32
    return %c0_i32, %arg0 : i32, i32
  }
}

</mosaic_0001>

<bundles_post_ra>
// kernel: relation_network_forward.2
= control target key start
LH: loop header
LB: loop body
LE: loop exit
PB: predicated region body
PF: predicated region fallthrough
CT: control target
= control target key end

     0   :  { %s11511_s0 = inlined_call_operand.vmem [shape: bf16[32,4608], index: 0, kind: input, shape index: {}]   ;;  %s11512_s1 = inlined_call_operand.hbm [shape: bf16[4608,512], index: 1, kind: input, shape index: {}]   ;;  %s11513_s2 = inlined_call_operand.hbm [shape: f32[1,512], index: 2, kind: input, shape index: {}]   ;;  %s11514_s3 = inlined_call_operand.hbm [shape: f32[1,512], index: 3, kind: input, shape index: {}]   ;;  %s11515_s4 = inlined_call_operand.vmem [shape: bf16[8,512], index: 4, kind: output, shape index: {}]  }
   0x1   :  { %11558 = sst [smem:[#allocation51_spill]] %s11512_s1 }
   0x2   :  { %9 = vsyncpa [#allocation3], 0 }
   0x3   :  { %11 = vsyncpa [#allocation3 + $0x1], 0 }
   0x4   :  { %12 = vsyncpa [#allocation5], 0 }
   0x5   :  { %14 = vsyncpa [#allocation5 + $0x1], 0  ;;  %s9273_s15 = smov 0   ;;  %s9275_s16 = smov 0  }
   0x6   :  { %s9277_s17 = smov 0   ;;  %s9279_s18 = smov 0  }
   0x7 LB: > { %s9292_s19 = sadd.s32 4294967295, %s9243_s18   ;;  %s9295_s20 = sadd.s32 1, %s9243_s18   ;;  %s9243_s18 = sphi %s9279_s18, %s11650_s18   ;;  %s9239_s17 = sphi %s9277_s17, %s11649_s17   ;;  %s9235_s16 = sphi %s9275_s16, %s11648_s16   ;;  %s9231_s15 = sphi %s9273_s15, %s11647_s15  }
   0x8   : > { %s45_s21 = ssub.s32 %s9243_s18, %s9295_s20  ;;  %s48_s22 = sadd.s32 1, %s9239_s17 }
   0x9   : > { %p46_p0 = scmp.eq.s32.totalorder %s45_s21, 0  ;;  %p55_p1 = scmp.ne.s32.totalorder %s9239_s17, %s9235_s16 }
   0xa   : > { %p56_p2 = scmp.eq.s32.totalorder %s9243_s18, 0  ;;  %p61_p3 = scmp.ne.s32.totalorder %s9235_s16, %s9231_s15 }
   0xb   : > { %s9305_s23 = scalar_select %p46_p0, %s9239_s17, %s48_s22  }
   0xc   : > { %p57_p4 = por %p56_p2, %p55_p1  ;;  %p62_p5 = scmp.eq.s32.totalorder %s9292_s19, 0 }
   0xd   : > { %p9074_p6 = scmp.lt.s32.totalorder %s9243_s18, 2  ;;  %s9314_s25 = sand.u32 1, %s9239_s17  }
   0xe   : > { %p9309_p7 = por %p62_p5, %p61_p3  ;;  %s9056_s26 = smul.u32 4608, %s9314_s25 }
   0xf   : > { %p9317_p8 = pnand %p9074_p6, %p57_p4  ;;  %s188_s28 = sand.u32 1, %s9243_s18  }
  0x10   : > { %s170_s29 = scalar_lea.vmem [#allocation2], %s9056_s26  ;;  %s5804_s5 = sshll.u32 %s9314_s25, 1 }
  0x11   : > { %s178_s30 = sshll.u32 %s170_s29, 4  ;;  %s5805_s6 = sshll.u32 %s9243_s18, 1  ;;  %s9322_s30 = int_to_ptr.vmem [resolvable:$true] %s178_s30 }
  0x12   : > { %s196_s9 = scalar_lea.hbm %s11513_s2, %s5805_s6  ;;  %s192_s10 = scalar_lea.vmem [#allocation4], %s5804_s5 }
  0x13   : > { %s200_s11 = sshll.u32 %s192_s10, 4  ;;  %s198_s12 = sshll.u32 %s196_s9, 4  ;;  %s201_s11 = int_to_ptr.vmem [resolvable:$true] %s200_s11  ;;  %s199_s12 = int_to_ptr.hbm [resolvable:$true] %s198_s12 }
  0x14   : > { %s9331_s13 = scalar_lea.sflag [#allocation5], %s188_s28  ;;  %s9115_s14 = sshra.s32 %s199_s12, 4  ;;  %s9116_s14 = int_to_ptr.hbm [resolvable:$true] %s9115_s14 }
  0x15   : > { %s9117_s15 = scalar_lea.hbm %s9116_s14, 2  ;;  %p9119_p10 = pneg %p9317_p8 }
  0x16   : > { %p9118_p9 = scmp.ne.s32.totalorder %s9116_s14, %s9117_s15  ;;  %s9122_s26 = scalar_lea.hbm %s11513_s2, 4 }
  0x17   : > { %p9123_p13 = scmp.lt.s32.totalorder %s9116_s14, %s11513_s2  ;;  %p9124_p0 = scmp.lt.s32.totalorder %s9122_s26, %s9117_s15 }
  0x18   : > { %p9120_p11 = pnand %p9119_p10, %p9118_p9 }
  0x19   : > { %p9125_p1 = por %p9124_p0, %p9123_p13 }
  0x1a   : > { %p9121_p12 = pneg %p9120_p11 }
  0x1c   : > { %p9126_p2 = pnand %p9125_p1, %p9121_p12 }
  0x1e   : > { %9129 = shalt.err (!%p9126_p2)
}
  0x1f   : > { %9070 = dma.hbm_to_vmem [thread:$0]  (!%p9317_p8), %s199_s12, 32, %s201_s11, %s9331_s13  }
  0x20   : > { %s9350_s9 = scalar_lea.hbm %s11514_s3, %s5805_s6  ;;  %p5808_p3 = scmp.ge.s32.totalorder %s9243_s18, 1 }
  0x21   : > { %p224_p4 = scmp.lt.s32.totalorder %s9243_s18, 3  ;;  %s8407_s10 = sshll.u32 %s9243_s18, 3 }
  0x22   : > { %s11561_s1 = sld [smem:[#allocation51_spill]]  ;;  %s217_s11 = sshll.u32 %s9350_s9, 4  ;;  %s218_s11 = int_to_ptr.hbm [resolvable:$true] %s217_s11 }
  0x23   : > { %p9358_p5 = pnand %p5808_p3, %p224_p4  ;;  %s167_s12 = scalar_lea.sflag [#allocation3], %s9314_s25 }
  0x28   : > { %s175_s21 = scalar_lea.hbm %s11561_s1, %s8407_s10  ;;  %s9152_s28 = scalar_lea.hbm %s11561_s1, 9216 }
  0x29   : > { %s176_s26 = sshll.u32 %s175_s21, 4  ;;  %s177_s26 = int_to_ptr.hbm [resolvable:$true] %s176_s26 }
  0x2a   : > { %s9145_s29 = sshra.s32 %s177_s26, 4  ;;  %s9146_s29 = int_to_ptr.hbm [resolvable:$true] %s9145_s29 }
  0x2b   : > { %s9147_s6 = scalar_lea.hbm %s9146_s29, 4608  ;;  %p9153_p12 = scmp.lt.s32.totalorder %s9146_s29, %s11561_s1 }
  0x2c   : > { %p9148_p6 = scmp.ne.s32.totalorder %s9146_s29, %s9147_s6  ;;  %p9154_p13 = scmp.lt.s32.totalorder %s9152_s28, %s9147_s6 }
  0x2e   : > { %p9150_p9 = pnand %p9148_p6, %p9119_p10  ;;  %p9155_p0 = por %p9154_p13, %p9153_p12 }
  0x30   : > { %p9151_p11 = pneg %p9150_p9 }
  0x32   : > { %p9156_p1 = pnand %p9155_p0, %p9151_p11 }
  0x34   : > { %9159 = shalt.err (!%p9156_p1)
}
  0x35   : > { %s9245_s9 = smov 256   ;;  %s9246_s14 = smov 128  }
  0x36   : > { %s9247_s15 = smov 8   ;;  %s211_s21 = scalar_lea.vmem [#allocation6], %s5804_s5 }
  0x37   : > { %9067 = dma.hbm_to_vmem [thread:$0]  (!%p9317_p8), %s177_s26, 73728, %s9322_s30, %s167_s12, %s9245_s9, %s9246_s14, %s9247_s15  }
  0x38   : > { %s219_s18 = sshll.u32 %s211_s21, 4  ;;  %s9175_s7 = sshra.s32 %s218_s11, 4  ;;  %s220_s18 = int_to_ptr.vmem [resolvable:$true] %s219_s18  ;;  %s9176_s7 = int_to_ptr.hbm [resolvable:$true] %s9175_s7 }
  0x39   : > { %s9177_s29 = scalar_lea.hbm %s9176_s7, 2  ;;  %s9182_s8 = scalar_lea.hbm %s11514_s3, 4 }
  0x3a   : > { %p9178_p2 = scmp.ne.s32.totalorder %s9176_s7, %s9177_s29  ;;  %p9183_p6 = scmp.lt.s32.totalorder %s9176_s7, %s11514_s3 }
  0x3b   : > { %p9184_p9 = scmp.lt.s32.totalorder %s9182_s8, %s9177_s29 }
  0x3c   : > { %p9180_p3 = pnand %p9178_p2, %p9119_p10 }
  0x3d   : > { %p9185_p11 = por %p9184_p9, %p9183_p6 }
  0x3e   : > { %p9181_p4 = pneg %p9180_p3 }
  0x40   : > { %p9186_p12 = pnand %p9185_p11, %p9181_p4 }
  0x42   : > { %9189 = shalt.err (!%p9186_p12)
}
  0x43   : > { %9073 = dma.hbm_to_vmem [thread:$0]  (!%p9317_p8), %s218_s11, 32, %s220_s18, %s9331_s13  }
  0x44   : > { %228 = sbr.rel (%p9358_p5) target bundleno = 892 (0x37c), region = 36 }
  0x49   : > { %s9393_s25 = sand.u32 1, %s9235_s16  }
  0x4a   : > { %s9057_s30 = smul.u32 4608, %s9393_s25  ;;  %s231_s1 = scalar_lea.sflag [#allocation3], %s9393_s25 }
  0x4c   : > { %s9397_s5 = scalar_lea.vmem [#allocation2], %s9057_s30 }
  0x4d   : > { %9222 = dma.done.wait (%p9309_p7), %s231_s1, 73728  }
  0x4e   : > { %9224 = vsyncadd (%p9309_p7), %s231_s1, 4294893568  ;;  %s240_s27 = sand.u32 1, %s9292_s19   ;;  %s5809_s13 = sshll.u32 %s9393_s25, 1 }
  0x4f   : > { %s241_s22 = scalar_lea.sflag [#allocation5], %s240_s27  ;;  %s9407_s26 = scalar_lea.vmem [#allocation4], %s5809_s13 }
  0x50   : > { %9226 = dma.done.wait (%p9309_p7), %s241_s22, 64  }
  0x51   : > { %9228 = vsyncadd (%p9309_p7), %s241_s22, 4294967232  ;;  %v6159_v0 = vld [vmem:[%s9397_s5 + $0x70] sm:$0xf]  ;;  %v8495_v1 = vld [vmem:[%s9397_s5 + $0x74] sm:$0xf0]  ;;  %vm5645_vm6 = vcmask 1040384  }
  0x52   : > { %v6223_v2 = vld [vmem:[%s9397_s5 + $0xf0] sm:$0xf]  ;;  %v6160_v3 = vor.u32 %v8495_v1, %v6159_v0  ;;  %v8511_v4 = vld [vmem:[%s9397_s5 + $0xf4] sm:$0xf0]  ;;  %v6151_v11 = vld [vmem:[%s9397_s5 + $0x60] sm:$0xf] }
  0x53   : > { %v6287_v5 = vld [vmem:[%s9397_s5 + $0x170] sm:$0xf]  ;;  %v8527_v6 = vld [vmem:[%s9397_s5 + $0x174] sm:$0xf0]  ;;  %v6224_v7 = vor.u32 %v8511_v4, %v6223_v2  ;;  %v8493_v13 = vld [vmem:[%s9397_s5 + $0x64] sm:$0xf0] }
  0x54   : > { %v6288_v8 = vor.u32 %v8527_v6, %v6287_v5  ;;  %v6351_v9 = vld [vmem:[%s9397_s5 + $0x1f0] sm:$0xf]  ;;  %v8543_v10 = vld [vmem:[%s9397_s5 + $0x1f4] sm:$0xf0]  ;;  %4187 = vmatpush.bf16.msra.mxu0 %v6160_v3  ;;  %v6215_v14 = vld [vmem:[%s9397_s5 + $0xe0] sm:$0xf]  ;;  %v6152_v16 = vor.u32 %v8493_v13, %v6151_v11 }
  0x55   : > { %v6352_v12 = vor.u32 %v8543_v10, %v6351_v9  ;;  %v8509_v15 = vld [vmem:[%s9397_s5 + $0xe4] sm:$0xf0]  ;;  %4206 = vmatpush.bf16.msra.mxu1 %v6224_v7  ;;  %v6279_v18 = vld [vmem:[%s9397_s5 + $0x160] sm:$0xf]  ;;  %v6143_v23 = vld [vmem:[%s9397_s5 + $0x50] sm:$0xf] }
  0x56   : > { %4225 = vmatpush.bf16.msra.mxu2 %v6288_v8  ;;  %v6216_v17 = vor.u32 %v8509_v15, %v6215_v14  ;;  %v8525_v19 = vld [vmem:[%s9397_s5 + $0x164] sm:$0xf0]  ;;  %v6343_v20 = vld [vmem:[%s9397_s5 + $0x1e0] sm:$0xf]  ;;  %v8491_v24 = vld [vmem:[%s9397_s5 + $0x54] sm:$0xf0] }
  0x57   : > { %4244 = vmatpush.bf16.msra.mxu3 %v6352_v12  ;;  %v6280_v21 = vor.u32 %v8525_v19, %v6279_v18  ;;  %v8541_v22 = vld [vmem:[%s9397_s5 + $0x1e4] sm:$0xf0]  ;;  %v6207_v26 = vld [vmem:[%s9397_s5 + $0xd0] sm:$0xf]  ;;  %v8507_v27 = vld [vmem:[%s9397_s5 + $0xd4] sm:$0xf0]  ;;  %v6144_v29 = vor.u32 %v8491_v24, %v6143_v23 }
  0x58   : > { %v6344_v25 = vor.u32 %v8541_v22, %v6343_v20  ;;  %v6271_v28 = vld [vmem:[%s9397_s5 + $0x150] sm:$0xf]  ;;  %4188 = vmatpush.bf16.msra.mxu0 %v6152_v16  ;;  %v8523_v30 = vld [vmem:[%s9397_s5 + $0x154] sm:$0xf0]  ;;  %v6208_v33 = vor.u32 %v8507_v27, %v6207_v26  ;;  %v6135_v35 = vld [vmem:[%s9397_s5 + $0x40] sm:$0xf] }
  0x59   : > { %v6335_v31 = vld [vmem:[%s9397_s5 + $0x1d0] sm:$0xf]  ;;  %v8539_v32 = vld [vmem:[%s9397_s5 + $0x1d4] sm:$0xf0]  ;;  %4207 = vmatpush.bf16.msra.mxu1 %v6216_v17  ;;  %v6272_v34 = vor.u32 %v8523_v30, %v6271_v28  ;;  %v8489_v36 = vld [vmem:[%s9397_s5 + $0x44] sm:$0xf0] }
  0x5a   : > { %4226 = vmatpush.bf16.msra.mxu2 %v6280_v21  ;;  %v6199_v37 = vld [vmem:[%s9397_s5 + $0xc0] sm:$0xf]  ;;  %v6336_v38 = vor.u32 %v8539_v32, %v6335_v31  ;;  %v8505_v39 = vld [vmem:[%s9397_s5 + $0xc4] sm:$0xf0]  ;;  %v6136_v44 = vor.u32 %v8489_v36, %v6135_v35  ;;  %v6127_v47 = vld [vmem:[%s9397_s5 + $0x30] sm:$0xf] }
  0x5b   : > { %4245 = vmatpush.bf16.msra.mxu3 %v6344_v25  ;;  %v6263_v40 = vld [vmem:[%s9397_s5 + $0x140] sm:$0xf]  ;;  %v8521_v41 = vld [vmem:[%s9397_s5 + $0x144] sm:$0xf0]  ;;  %v6200_v45 = vor.u32 %v8505_v39, %v6199_v37  ;;  %v8487_v48 = vld [vmem:[%s9397_s5 + $0x34] sm:$0xf0] }
  0x5c   : > { %v6327_v42 = vld [vmem:[%s9397_s5 + $0x1c0] sm:$0xf]  ;;  %v8537_v43 = vld [vmem:[%s9397_s5 + $0x1c4] sm:$0xf0]  ;;  %4189 = vmatpush.bf16.msra.mxu0 %v6144_v29  ;;  %v6264_v46 = vor.u32 %v8521_v41, %v6263_v40  ;;  %v6191_v49 = vld [vmem:[%s9397_s5 + $0xb0] sm:$0xf]  ;;  %v6128_v56 = vor.u32 %v8487_v48, %v6127_v47 }
  0x5d   : > { %4208 = vmatpush.bf16.msra.mxu1 %v6208_v33  ;;  %v6328_v50 = vor.u32 %v8537_v43, %v6327_v42  ;;  %v8503_v51 = vld [vmem:[%s9397_s5 + $0xb4] sm:$0xf0]  ;;  %v6255_v52 = vld [vmem:[%s9397_s5 + $0x130] sm:$0xf]  ;;  %v6119_v59 = vld [vmem:[%s9397_s5 + $0x20] sm:$0xf] }
  0x5e   : > { %4227 = vmatpush.bf16.msra.mxu2 %v6272_v34  ;;  %v8519_v53 = vld [vmem:[%s9397_s5 + $0x134] sm:$0xf0]  ;;  %v6319_v54 = vld [vmem:[%s9397_s5 + $0x1b0] sm:$0xf]  ;;  %v6192_v57 = vor.u32 %v8503_v51, %v6191_v49  ;;  %v8485_v60 = vld [vmem:[%s9397_s5 + $0x24] sm:$0xf0] }
  0x5f   : > { %4246 = vmatpush.bf16.msra.mxu3 %v6336_v38  ;;  %v8535_v55 = vld [vmem:[%s9397_s5 + $0x1b4] sm:$0xf0]  ;;  %v6256_v58 = vor.u32 %v8519_v53, %v6255_v52  ;;  %v6183_v61 = vld [vmem:[%s9397_s5 + $0xa0] sm:$0xf]  ;;  %v8501_v63 = vld [vmem:[%s9397_s5 + $0xa4] sm:$0xf0]  ;;  %v6120_v4 = vor.u32 %v8485_v60, %v6119_v59 }
  0x60   : > { %4190 = vmatpush.bf16.msra.mxu0 %v6136_v44  ;;  %v6320_v62 = vor.u32 %v8535_v55, %v6319_v54  ;;  %v6247_v0 = vld [vmem:[%s9397_s5 + $0x120] sm:$0xf]  ;;  %v8517_v1 = vld [vmem:[%s9397_s5 + $0x124] sm:$0xf0]  ;;  %v6184_v5 = vor.u32 %v8501_v63, %v6183_v61  ;;  %v6111_v7 = vld [vmem:[%s9397_s5 + $0x10] sm:$0xf] }
  0x61   : > { %4209 = vmatpush.bf16.msra.mxu1 %v6200_v45  ;;  %v6311_v2 = vld [vmem:[%s9397_s5 + $0x1a0] sm:$0xf]  ;;  %v8533_v3 = vld [vmem:[%s9397_s5 + $0x1a4] sm:$0xf0]  ;;  %v6248_v6 = vor.u32 %v8517_v1, %v6247_v0  ;;  %v8483_v8 = vld [vmem:[%s9397_s5 + $0x14] sm:$0xf0] }
  0x62   : > { %4228 = vmatpush.bf16.msra.mxu2 %v6264_v46  ;;  %v6175_v9 = vld [vmem:[%s9397_s5 + $0x90] sm:$0xf]  ;;  %v6312_v10 = vor.u32 %v8533_v3, %v6311_v2  ;;  %v8499_v11 = vld [vmem:[%s9397_s5 + $0x94] sm:$0xf0]  ;;  %v6103_v16 = vld [vmem:[%s9397_s5] sm:$0xf]  ;;  %v6112_v17 = vor.u32 %v8483_v8, %v6111_v7 }
  0x63   : > { %4247 = vmatpush.bf16.msra.mxu3 %v6328_v50  ;;  %v6239_v12 = vld [vmem:[%s9397_s5 + $0x110] sm:$0xf]  ;;  %v8515_v13 = vld [vmem:[%s9397_s5 + $0x114] sm:$0xf0]  ;;  %v8481_v18 = vld [vmem:[%s9397_s5 + $0x4] sm:$0xf0]  ;;  %v6176_v21 = vor.u32 %v8499_v11, %v6175_v9 }
  0x64   : > { %4191 = vmatpush.bf16.msra.mxu0 %v6128_v56  ;;  %v6303_v14 = vld [vmem:[%s9397_s5 + $0x190] sm:$0xf]  ;;  %v8531_v15 = vld [vmem:[%s9397_s5 + $0x194] sm:$0xf0]  ;;  %v6167_v19 = vld [vmem:[%s9397_s5 + $0x80] sm:$0xf]  ;;  %v6240_v22 = vor.u32 %v8515_v13, %v6239_v12  ;;  %v6104_v34 = vor.u32 %v8481_v18, %v6103_v16 }
  0x65   : > { %4210 = vmatpush.bf16.msra.mxu1 %v6192_v57  ;;  %v8497_v20 = vld [vmem:[%s9397_s5 + $0x84] sm:$0xf0]  ;;  %v6231_v23 = vld [vmem:[%s9397_s5 + $0x100] sm:$0xf]  ;;  %v6304_v26 = vor.u32 %v8531_v15, %v6303_v14  ;;  %v8426_v29 = vld [vmem:[%s11511_s0 + $0x8c] sm:$0xf0] }
  0x66   : > { %4229 = vmatpush.bf16.msra.mxu2 %v6256_v58  ;;  %v8513_v24 = vld [vmem:[%s9397_s5 + $0x104] sm:$0xf0]  ;;  %v6295_v25 = vld [vmem:[%s9397_s5 + $0x180] sm:$0xf]  ;;  %v8408_v30 = vld [vmem:[%s11511_s0 + $0x4] sm:$0xf]  ;;  %v6168_v38 = vor.u32 %v8497_v20, %v6167_v19 }
  0x67   : > { %4248 = vmatpush.bf16.msra.mxu3 %v6320_v62  ;;  %v8529_v27 = vld [vmem:[%s9397_s5 + $0x184] sm:$0xf0]  ;;  %v5815_v28 = vld [vmem:[%s11511_s0] sm:$0xf]  ;;  %v5817_v31 = vld [vmem:[%s11511_s0 + $0x90] sm:$0xf0]  ;;  %v6232_v39 = vor.u32 %v8513_v24, %v6231_v23 }
  0x68   : > { %4192 = vmatpush.bf16.msra.mxu0 %v6120_v4  ;;  %v6543_v32 = vld [vmem:[%s9397_s5 + $0x370] sm:$0xf]  ;;  %v8591_v33 = vld [vmem:[%s9397_s5 + $0x374] sm:$0xf0]  ;;  %v5823_v35 = vld [vmem:[%s11511_s0 + $0x8] sm:$0xf]  ;;  %v6296_v43 = vor.u32 %v8529_v27, %v6295_v25  ;;  %v9508_v48 = vor.u32 %v8426_v29, %v5815_v28  ;;  %v9513_v53 = vor.u32 %v8408_v30, %v5817_v31 }
  0x69   : > { %4211 = vmatpush.bf16.msra.mxu1 %v6184_v5  ;;  %v6479_v36 = vld [vmem:[%s9397_s5 + $0x2f0] sm:$0xf]  ;;  %v8575_v37 = vld [vmem:[%s9397_s5 + $0x2f4] sm:$0xf0]  ;;  %v8409_v41 = vld [vmem:[%s11511_s0 + $0xc] sm:$0xf]  ;;  %v6544_v44 = vor.u32 %v8591_v33, %v6543_v32 }
  0x6a   : > { %4230 = vmatpush.bf16.msra.mxu2 %v6248_v6  ;;  %v8427_v40 = vld [vmem:[%s11511_s0 + $0x94] sm:$0xf0]  ;;  %v5825_v42 = vld [vmem:[%s11511_s0 + $0x98] sm:$0xf0]  ;;  %v6415_v45 = vld [vmem:[%s9397_s5 + $0x270] sm:$0xf]  ;;  %v6480_v49 = vor.u32 %v8575_v37, %v6479_v36 }
  0x6b   : > { %4249 = vmatpush.bf16.msra.mxu3 %v6312_v10  ;;  %v8559_v46 = vld [vmem:[%s9397_s5 + $0x274] sm:$0xf0]  ;;  %v6607_v47 = vld [vmem:[%s9397_s5 + $0x3f0] sm:$0xf]  ;;  %v6535_v51 = vld [vmem:[%s9397_s5 + $0x360] sm:$0xf]  ;;  %v9515_v54 = vor.u32 %v8427_v40, %v5823_v35  ;;  %v9519_v57 = vor.u32 %v8409_v41, %v5825_v42 }
  0x6c   : > { %4193 = vmatpush.bf16.msra.mxu0 %v6112_v17  ;;  %v8607_v50 = vld [vmem:[%s9397_s5 + $0x3f4] sm:$0xf0]  ;;  %v8589_v52 = vld [vmem:[%s9397_s5 + $0x364] sm:$0xf0]  ;;  %v6471_v55 = vld [vmem:[%s9397_s5 + $0x2e0] sm:$0xf]  ;;  %v6416_v58 = vor.u32 %v8559_v46, %v6415_v45 }
  0x6d   : > { %4212 = vmatpush.bf16.msra.mxu1 %v6176_v21  ;;  %v8573_v56 = vld [vmem:[%s9397_s5 + $0x2e4] sm:$0xf0]  ;;  %v6608_v59 = vor.u32 %v8607_v50, %v6607_v47  ;;  %v6536_v60 = vor.u32 %v8589_v52, %v6535_v51  ;;  %v6407_v61 = vld [vmem:[%s9397_s5 + $0x260] sm:$0xf]  ;;  %v6527_v2 = vld [vmem:[%s9397_s5 + $0x350] sm:$0xf] }
  0x6e   : > { %4231 = vmatpush.bf16.msra.mxu2 %v6240_v22  ;;  %v8557_v62 = vld [vmem:[%s9397_s5 + $0x264] sm:$0xf0]  ;;  %v6599_v63 = vld [vmem:[%s9397_s5 + $0x3e0] sm:$0xf]  ;;  %v6472_v0 = vor.u32 %v8573_v56, %v6471_v55  ;;  %v8587_v3 = vld [vmem:[%s9397_s5 + $0x354] sm:$0xf0] }
  0x6f   : > { %4250 = vmatpush.bf16.msra.mxu3 %v6304_v26  ;;  %v8605_v1 = vld [vmem:[%s9397_s5 + $0x3e4] sm:$0xf0]  ;;  %v6463_v4 = vld [vmem:[%s9397_s5 + $0x2d0] sm:$0xf]  ;;  %v8571_v5 = vld [vmem:[%s9397_s5 + $0x2d4] sm:$0xf0]  ;;  %v6408_v6 = vor.u32 %v8557_v62, %v6407_v61  ;;  %v6528_v8 = vor.u32 %v8587_v3, %v6527_v2 }
  0x70   : > { %4194 = vmatpush.bf16.msra.mxu0 %v6104_v34  ;;  %v6600_v7 = vor.u32 %v8605_v1, %v6599_v63  ;;  %v6399_v9 = vld [vmem:[%s9397_s5 + $0x250] sm:$0xf]  ;;  %v8555_v10 = vld [vmem:[%s9397_s5 + $0x254] sm:$0xf0]  ;;  %v6464_v12 = vor.u32 %v8571_v5, %v6463_v4  ;;  %v6519_v14 = vld [vmem:[%s9397_s5 + $0x340] sm:$0xf] }
  0x71   : > { %4213 = vmatpush.bf16.msra.mxu1 %v6168_v38  ;;  %v6591_v11 = vld [vmem:[%s9397_s5 + $0x3d0] sm:$0xf]  ;;  %v8603_v13 = vld [vmem:[%s9397_s5 + $0x3d4] sm:$0xf0]  ;;  %v8585_v15 = vld [vmem:[%s9397_s5 + $0x344] sm:$0xf0]  ;;  %v6400_v18 = vor.u32 %v8555_v10, %v6399_v9 }
  0x72   : > { %4232 = vmatpush.bf16.msra.mxu2 %v6232_v39  ;;  %v6455_v16 = vld [vmem:[%s9397_s5 + $0x2c0] sm:$0xf]  ;;  %v8569_v17 = vld [vmem:[%s9397_s5 + $0x2c4] sm:$0xf0]  ;;  %v6592_v22 = vor.u32 %v8603_v13, %v6591_v11  ;;  %v6520_v23 = vor.u32 %v8585_v15, %v6519_v14  ;;  %v8462_v26 = vld [vmem:[%s11511_s0 + $0x1ac] sm:$0xf0] }
  0x73   : > { %4251 = vmatpush.bf16.msra.mxu3 %v6296_v43  ;;  %4195 = vmatmul.bf16.vlgmr.msra.gmra.mxu0 %v9508_v48  ;;  %v6391_v19 = vld [vmem:[%s9397_s5 + $0x240] sm:$0xf]  ;;  %v8553_v20 = vld [vmem:[%s9397_s5 + $0x244] sm:$0xf0]  ;;  %v6456_v27 = vor.u32 %v8569_v17, %v6455_v16  ;;  %v8444_v28 = vld [vmem:[%s11511_s0 + $0x124] sm:$0xf] }
  0x74   : > { %4214 = vmatmul.bf16.vlgmr.msra.gmra.mxu1 %v9513_v53  ;;  %4263 = vmatpush.bf16.msrb.mxu0 %v6416_v58  ;;  %v6583_v21 = vld [vmem:[%s9397_s5 + $0x3c0] sm:$0xf]  ;;  %v8601_v24 = vld [vmem:[%s9397_s5 + $0x3c4] sm:$0xf0]  ;;  %v5961_v29 = vld [vmem:[%s11511_s0 + $0x1b0] sm:$0xf0]  ;;  %v6392_v35 = vor.u32 %v8553_v20, %v6391_v19 }
  0x75   : > { %4282 = vmatpush.bf16.msrb.mxu1 %v6480_v49  ;;  %4233 = vmatmul.bf16.vlgmr.msra.gmra.mxu2 %v9515_v54  ;;  %v5959_v25 = vld [vmem:[%s11511_s0 + $0x120] sm:$0xf]  ;;  %v6511_v30 = vld [vmem:[%s9397_s5 + $0x330] sm:$0xf]  ;;  %v8583_v31 = vld [vmem:[%s9397_s5 + $0x334] sm:$0xf0]  ;;  %v6584_v39 = vor.u32 %v8601_v24, %v6583_v21  ;;  %v9581_v50 = vor.u32 %v8444_v28, %v5961_v29 }
  0x76   : > { %4301 = vmatpush.bf16.msrb.mxu2 %v6544_v44  ;;  %4252 = vmatmul.bf16.vlgmr.msra.gmra.mxu3 %v9519_v57  ;;  %v5967_v32 = vld [vmem:[%s11511_s0 + $0x128] sm:$0xf]  ;;  %v6447_v33 = vld [vmem:[%s9397_s5 + $0x2b0] sm:$0xf]  ;;  %v8567_v34 = vld [vmem:[%s9397_s5 + $0x2b4] sm:$0xf0]  ;;  %v6512_v40 = vor.u32 %v8583_v31, %v6511_v30  ;;  %v9576_v44 = vor.u32 %v8462_v26, %v5959_v25 }
  0x77   : > { %4320 = vmatpush.bf16.msrb.mxu3 %v6608_v59  ;;  %v8463_v36 = vld [vmem:[%s11511_s0 + $0x1b4] sm:$0xf0]  ;;  %v8445_v37 = vld [vmem:[%s11511_s0 + $0x12c] sm:$0xf]  ;;  %v5969_v38 = vld [vmem:[%s11511_s0 + $0x1b8] sm:$0xf0]  ;;  %v6448_v45 = vor.u32 %v8567_v34, %v6447_v33 }
  0x78   : > { %4264 = vmatpush.bf16.msrb.mxu0 %v6408_v6  ;;  %v6383_v41 = vld [vmem:[%s9397_s5 + $0x230] sm:$0xf]  ;;  %v8551_v42 = vld [vmem:[%s9397_s5 + $0x234] sm:$0xf0]  ;;  %v6503_v47 = vld [vmem:[%s9397_s5 + $0x320] sm:$0xf]  ;;  %v9583_v51 = vor.u32 %v8463_v36, %v5967_v32  ;;  %v9587_v56 = vor.u32 %v8445_v37, %v5969_v38 }
  0x79   : > { %4283 = vmatpush.bf16.msrb.mxu1 %v6472_v0  ;;  %v6575_v43 = vld [vmem:[%s9397_s5 + $0x3b0] sm:$0xf]  ;;  %v8599_v46 = vld [vmem:[%s9397_s5 + $0x3b4] sm:$0xf0]  ;;  %v8581_v49 = vld [vmem:[%s9397_s5 + $0x324] sm:$0xf0]  ;;  %v6384_v58 = vor.u32 %v8551_v42, %v6383_v41 }
  0x7a   : > { %4302 = vmatpush.bf16.msrb.mxu2 %v6536_v60  ;;  %v6439_v52 = vld [vmem:[%s9397_s5 + $0x2a0] sm:$0xf]  ;;  %v8565_v55 = vld [vmem:[%s9397_s5 + $0x2a4] sm:$0xf0]  ;;  %v6576_v59 = vor.u32 %v8599_v46, %v6575_v43  ;;  %v6504_v60 = vor.u32 %v8581_v49, %v6503_v47  ;;  %v6495_v2 = vld [vmem:[%s9397_s5 + $0x310] sm:$0xf] }
  0x7b   : > { %4321 = vmatpush.bf16.msrb.mxu3 %v6600_v7  ;;  %v6375_v61 = vld [vmem:[%s9397_s5 + $0x220] sm:$0xf]  ;;  %v8549_v62 = vld [vmem:[%s9397_s5 + $0x224] sm:$0xf0]  ;;  %v6440_v0 = vor.u32 %v8565_v55, %v6439_v52  ;;  %v8579_v3 = vld [vmem:[%s9397_s5 + $0x314] sm:$0xf0] }
  0x7c   : > { %4265 = vmatpush.bf16.msrb.mxu0 %v6400_v18  ;;  %v6567_v63 = vld [vmem:[%s9397_s5 + $0x3a0] sm:$0xf]  ;;  %v8597_v1 = vld [vmem:[%s9397_s5 + $0x3a4] sm:$0xf0]  ;;  %v6431_v4 = vld [vmem:[%s9397_s5 + $0x290] sm:$0xf]  ;;  %v6376_v6 = vor.u32 %v8549_v62, %v6375_v61  ;;  %v6496_v9 = vor.u32 %v8579_v3, %v6495_v2 }
  0x7d   : > { %4284 = vmatpush.bf16.msrb.mxu1 %v6464_v12  ;;  %v8563_v5 = vld [vmem:[%s9397_s5 + $0x294] sm:$0xf0]  ;;  %v6367_v7 = vld [vmem:[%s9397_s5 + $0x210] sm:$0xf]  ;;  %v6487_v14 = vld [vmem:[%s9397_s5 + $0x300] sm:$0xf] }
  0x7e   : > { %4303 = vmatpush.bf16.msrb.mxu2 %v6528_v8  ;;  %v6568_v8 = vor.u32 %v8597_v1, %v6567_v63  ;;  %v8547_v10 = vld [vmem:[%s9397_s5 + $0x214] sm:$0xf0]  ;;  %v6559_v11 = vld [vmem:[%s9397_s5 + $0x390] sm:$0xf]  ;;  %v6432_v13 = vor.u32 %v8563_v5, %v6431_v4  ;;  %v8577_v15 = vld [vmem:[%s9397_s5 + $0x304] sm:$0xf0] }
  0x7f   : > { %4322 = vmatpush.bf16.msrb.mxu3 %v6592_v22  ;;  %v8595_v12 = vld [vmem:[%s9397_s5 + $0x394] sm:$0xf0]  ;;  %v6423_v16 = vld [vmem:[%s9397_s5 + $0x280] sm:$0xf]  ;;  %v8561_v17 = vld [vmem:[%s9397_s5 + $0x284] sm:$0xf0]  ;;  %v6368_v20 = vor.u32 %v8547_v10, %v6367_v7  ;;  %v6488_v25 = vor.u32 %v8577_v15, %v6487_v14 }
  0x80   : > { %4266 = vmatpush.bf16.msrb.mxu0 %v6392_v35  ;;  %v6799_v18 = vld [vmem:[%s9397_s5 + $0x570] sm:$0xf]  ;;  %v8655_v19 = vld [vmem:[%s9397_s5 + $0x574] sm:$0xf0]  ;;  %v6359_v21 = vld [vmem:[%s9397_s5 + $0x200] sm:$0xf]  ;;  %v6560_v24 = vor.u32 %v8595_v12, %v6559_v11  ;;  %v6424_v29 = vor.u32 %v8561_v17, %v6423_v16 }
  0x81   : > { %4285 = vmatpush.bf16.msrb.mxu1 %v6456_v27  ;;  %v6735_v22 = vld [vmem:[%s9397_s5 + $0x4f0] sm:$0xf]  ;;  %v8545_v26 = vld [vmem:[%s9397_s5 + $0x204] sm:$0xf0]  ;;  %v6551_v27 = vld [vmem:[%s9397_s5 + $0x380] sm:$0xf]  ;;  %v6800_v34 = vor.u32 %v8655_v19, %v6799_v18 }
  0x82   : > { %4304 = vmatpush.bf16.msrb.mxu2 %v6520_v23  ;;  %v8639_v23 = vld [vmem:[%s9397_s5 + $0x4f4] sm:$0xf0]  ;;  %v8593_v28 = vld [vmem:[%s9397_s5 + $0x384] sm:$0xf0]  ;;  %v5831_v30 = vld [vmem:[%s11511_s0 + $0x10] sm:$0xf]  ;;  %v6360_v42 = vor.u32 %v8545_v26, %v6359_v21 }
  0x83   : > { %4323 = vmatpush.bf16.msrb.mxu3 %v6584_v39  ;;  %4200 = vmatmul.bf16.gmra.mxu0 %v9576_v44  ;;  %v8428_v31 = vld [vmem:[%s11511_s0 + $0x9c] sm:$0xf0]  ;;  %v8410_v32 = vld [vmem:[%s11511_s0 + $0x14] sm:$0xf]  ;;  %v5833_v33 = vld [vmem:[%s11511_s0 + $0xa0] sm:$0xf0]  ;;  %v6736_v38 = vor.u32 %v8639_v23, %v6735_v22  ;;  %v6552_v47 = vor.u32 %v8593_v28, %v6551_v27 }
  0x84   : > { %4219 = vmatmul.bf16.gmra.mxu1 %v9581_v50  ;;  %4267 = vmatpush.bf16.msrb.mxu0 %v6384_v58  ;;  %v6671_v35 = vld [vmem:[%s9397_s5 + $0x470] sm:$0xf]  ;;  %v8623_v36 = vld [vmem:[%s9397_s5 + $0x474] sm:$0xf0]  ;;  %v8653_v41 = vld [vmem:[%s9397_s5 + $0x564] sm:$0xf0]  ;;  %v9654_v1 = vor.u32 %v8410_v32, %v5833_v33 }
  0x85   : > { %4286 = vmatpush.bf16.msrb.mxu1 %v6448_v45  ;;  %4238 = vmatmul.bf16.gmra.mxu2 %v9583_v51  ;;  %v6863_v37 = vld [vmem:[%s9397_s5 + $0x5f0] sm:$0xf]  ;;  %v8671_v39 = vld [vmem:[%s9397_s5 + $0x5f4] sm:$0xf0]  ;;  %v8429_v45 = vld [vmem:[%s11511_s0 + $0xa4] sm:$0xf0]  ;;  %v6672_v52 = vor.u32 %v8623_v36, %v6671_v35 }
  0x86   : > { %4305 = vmatpush.bf16.msrb.mxu2 %v6512_v40  ;;  %4257 = vmatmul.bf16.gmra.mxu3 %v9587_v56  ;;  %v6791_v40 = vld [vmem:[%s9397_s5 + $0x560] sm:$0xf]  ;;  %v5839_v43 = vld [vmem:[%s11511_s0 + $0x18] sm:$0xf]  ;;  %v8411_v46 = vld [vmem:[%s11511_s0 + $0x1c] sm:$0xf] }
  0x87   : > { %4324 = vmatpush.bf16.msrb.mxu3 %v6576_v59  ;;  %v5841_v49 = vld [vmem:[%s11511_s0 + $0xa8] sm:$0xf0]  ;;  %v6663_v55 = vld [vmem:[%s9397_s5 + $0x460] sm:$0xf]  ;;  %v8621_v58 = vld [vmem:[%s9397_s5 + $0x464] sm:$0xf0]  ;;  %v6864_v59 = vor.u32 %v8671_v39, %v6863_v37  ;;  %v9659_v5 = vor.u32 %v8429_v45, %v5839_v43 }
  0x88   : > { %4268 = vmatpush.bf16.msrb.mxu0 %v6376_v6  ;;  %v6727_v61 = vld [vmem:[%s9397_s5 + $0x4e0] sm:$0xf]  ;;  %v8637_v62 = vld [vmem:[%s9397_s5 + $0x4e4] sm:$0xf0]  ;;  %v6783_v3 = vld [vmem:[%s9397_s5 + $0x550] sm:$0xf]  ;;  %v9661_v6 = vor.u32 %v8411_v46, %v5841_v49  ;;  %v6664_v7 = vor.u32 %v8621_v58, %v6663_v55 }
  0x89   : > { %4287 = vmatpush.bf16.msrb.mxu1 %v6440_v0  ;;  %v6855_v63 = vld [vmem:[%s9397_s5 + $0x5e0] sm:$0xf]  ;;  %v9652_v0 = vor.u32 %v8428_v31, %v5831_v30  ;;  %v8669_v2 = vld [vmem:[%s9397_s5 + $0x5e4] sm:$0xf0]  ;;  %v8651_v4 = vld [vmem:[%s9397_s5 + $0x554] sm:$0xf0] }
  0x8a   : > { %4306 = vmatpush.bf16.msrb.mxu2 %v6504_v60  ;;  %v6792_v60 = vor.u32 %v8653_v41, %v6791_v40  ;;  %v8619_v10 = vld [vmem:[%s9397_s5 + $0x454] sm:$0xf0]  ;;  %v6856_v11 = vor.u32 %v8669_v2, %v6855_v63  ;;  %v6784_v12 = vor.u32 %v8651_v4, %v6783_v3  ;;  %v6847_v15 = vld [vmem:[%s9397_s5 + $0x5d0] sm:$0xf]  ;;  %v6775_v17 = vld [vmem:[%s9397_s5 + $0x540] sm:$0xf] }
  0x8b   : > { %4325 = vmatpush.bf16.msrb.mxu3 %v6568_v8  ;;  %v6728_v8 = vor.u32 %v8637_v62, %v6727_v61  ;;  %v8635_v14 = vld [vmem:[%s9397_s5 + $0x4d4] sm:$0xf0]  ;;  %v8649_v18 = vld [vmem:[%s9397_s5 + $0x544] sm:$0xf0]  ;;  %v6647_v21 = vld [vmem:[%s9397_s5 + $0x440] sm:$0xf] }
  0x8c   : > { %4269 = vmatpush.bf16.msrb.mxu0 %v6368_v20  ;;  %v8667_v16 = vld [vmem:[%s9397_s5 + $0x5d4] sm:$0xf0]  ;;  %v8617_v22 = vld [vmem:[%s9397_s5 + $0x444] sm:$0xf0]  ;;  %v6839_v27 = vld [vmem:[%s9397_s5 + $0x5c0] sm:$0xf] }
  0x8d   : > { %4288 = vmatpush.bf16.msrb.mxu1 %v6432_v13  ;;  %v6719_v13 = vld [vmem:[%s9397_s5 + $0x4d0] sm:$0xf]  ;;  %v6848_v23 = vor.u32 %v8667_v16, %v6847_v15  ;;  %v8633_v26 = vld [vmem:[%s9397_s5 + $0x4c4] sm:$0xf0]  ;;  %v8647_v30 = vld [vmem:[%s9397_s5 + $0x534] sm:$0xf0]  ;;  %v6648_v31 = vor.u32 %v8617_v22, %v6647_v21 }
  0x8e   : > { %4307 = vmatpush.bf16.msrb.mxu2 %v6496_v9  ;;  %v6655_v9 = vld [vmem:[%s9397_s5 + $0x450] sm:$0xf]  ;;  %v6720_v20 = vor.u32 %v8635_v14, %v6719_v13  ;;  %v8665_v28 = vld [vmem:[%s9397_s5 + $0x5c4] sm:$0xf0]  ;;  %v8464_v37 = vld [vmem:[%s11511_s0 + $0x1bc] sm:$0xf0] }
  0x8f   : > { %4326 = vmatpush.bf16.msrb.mxu3 %v6560_v24  ;;  %v6656_v19 = vor.u32 %v8619_v10, %v6655_v9  ;;  %v6776_v24 = vor.u32 %v8649_v18, %v6775_v17  ;;  %v6639_v33 = vld [vmem:[%s9397_s5 + $0x430] sm:$0xf]  ;;  %v6840_v35 = vor.u32 %v8665_v28, %v6839_v27  ;;  %v5977_v39 = vld [vmem:[%s11511_s0 + $0x1c0] sm:$0xf0]  ;;  %v8663_v45 = vld [vmem:[%s9397_s5 + $0x5b4] sm:$0xf0] }
  0x90   : > { %4270 = vmatpush.bf16.msrb.mxu0 %v6360_v42  ;;  %v5975_v36 = vld [vmem:[%s11511_s0 + $0x130] sm:$0xf]  ;;  %v8631_v42 = vld [vmem:[%s9397_s5 + $0x4b4] sm:$0xf0]  ;;  %v6759_v46 = vld [vmem:[%s9397_s5 + $0x520] sm:$0xf] }
  0x91   : > { %4289 = vmatpush.bf16.msrb.mxu1 %v6424_v29  ;;  %v6767_v29 = vld [vmem:[%s9397_s5 + $0x530] sm:$0xf]  ;;  %v5983_v49 = vld [vmem:[%s11511_s0 + $0x138] sm:$0xf]  ;;  %v8447_v55 = vld [vmem:[%s11511_s0 + $0x13c] sm:$0xf] }
  0x92   : > { %4308 = vmatpush.bf16.msrb.mxu2 %v6488_v25  ;;  %v6711_v25 = vld [vmem:[%s9397_s5 + $0x4c0] sm:$0xf]  ;;  %v6768_v40 = vor.u32 %v8647_v30, %v6767_v29  ;;  %v6703_v41 = vld [vmem:[%s9397_s5 + $0x4b0] sm:$0xf]  ;;  %v5985_v58 = vld [vmem:[%s11511_s0 + $0x1c8] sm:$0xf0] }
  0x93   : > { %4327 = vmatpush.bf16.msrb.mxu3 %v6552_v47  ;;  %4271 = vmatmul.bf16.vlgmr.msrb.gmra.mxu0 %v9652_v0  ;;  %v6712_v32 = vor.u32 %v8633_v26, %v6711_v25  ;;  %v6831_v43 = vld [vmem:[%s9397_s5 + $0x5b0] sm:$0xf]  ;;  %v8645_v47 = vld [vmem:[%s9397_s5 + $0x524] sm:$0xf0]  ;;  %v6631_v61 = vld [vmem:[%s9397_s5 + $0x420] sm:$0xf]  ;;  %v9729_v14 = vor.u32 %v8447_v55, %v5985_v58 }
  0x94   : > { %4339 = vmatpush.bf16.msra.mxu0 %v6672_v52  ;;  %4290 = vmatmul.bf16.vlgmr.msrb.gmra.mxu1 %v9654_v1  ;;  %v8465_v52 = vld [vmem:[%s11511_s0 + $0x1c4] sm:$0xf0]  ;;  %v6832_v63 = vor.u32 %v8663_v45, %v6831_v43  ;;  %v6760_v2 = vor.u32 %v8645_v47, %v6759_v46  ;;  %v6695_v3 = vld [vmem:[%s9397_s5 + $0x4a0] sm:$0xf]  ;;  %v6623_v17 = vld [vmem:[%s9397_s5 + $0x410] sm:$0xf] }
  0x95   : > { %4358 = vmatpush.bf16.msra.mxu1 %v6736_v38  ;;  %4309 = vmatmul.bf16.vlgmr.msrb.gmra.mxu2 %v9659_v5  ;;  %v8446_v38 = vld [vmem:[%s11511_s0 + $0x134] sm:$0xf]  ;;  %v8613_v62 = vld [vmem:[%s9397_s5 + $0x424] sm:$0xf0]  ;;  %v9727_v13 = vor.u32 %v8465_v52, %v5983_v49  ;;  %v8611_v18 = vld [vmem:[%s9397_s5 + $0x414] sm:$0xf0] }
  0x96   : > { %4377 = vmatpush.bf16.msra.mxu2 %v6800_v34  ;;  %4328 = vmatmul.bf16.vlgmr.msrb.gmra.mxu3 %v9661_v6  ;;  %v8615_v34 = vld [vmem:[%s9397_s5 + $0x434] sm:$0xf0]  ;;  %v8629_v4 = vld [vmem:[%s9397_s5 + $0x4a4] sm:$0xf0]  ;;  %v9722_v9 = vor.u32 %v8446_v38, %v5977_v39  ;;  %v6632_v15 = vor.u32 %v8613_v62, %v6631_v61  ;;  %v6687_v21 = vld [vmem:[%s9397_s5 + $0x490] sm:$0xf]  ;;  %v6624_v29 = vor.u32 %v8611_v18, %v6623_v17 }
  0x97   : > { %4396 = vmatpush.bf16.msra.mxu3 %v6864_v59  ;;  %v6640_v59 = vor.u32 %v8615_v34, %v6639_v33  ;;  %v8661_v10 = vld [vmem:[%s9397_s5 + $0x5a4] sm:$0xf0]  ;;  %v6696_v16 = vor.u32 %v8629_v4, %v6695_v3  ;;  %v8627_v22 = vld [vmem:[%s9397_s5 + $0x494] sm:$0xf0]  ;;  %v6743_v25 = vld [vmem:[%s9397_s5 + $0x500] sm:$0xf] }
  0x98   : > { %4340 = vmatpush.bf16.msra.mxu0 %v6664_v7  ;;  %v6823_v7 = vld [vmem:[%s9397_s5 + $0x5a0] sm:$0xf]  ;;  %v8641_v26 = vld [vmem:[%s9397_s5 + $0x504] sm:$0xf0]  ;;  %v7055_v27 = vld [vmem:[%s9397_s5 + $0x770] sm:$0xf]  ;;  %v6688_v30 = vor.u32 %v8627_v22, %v6687_v21 }
  0x99   : > { %4359 = vmatpush.bf16.msra.mxu1 %v6728_v8  ;;  %v9720_v8 = vor.u32 %v8464_v37, %v5975_v36  ;;  %v8719_v28 = vld [vmem:[%s9397_s5 + $0x774] sm:$0xf0]  ;;  %v6679_v33 = vld [vmem:[%s9397_s5 + $0x480] sm:$0xf]  ;;  %v8625_v36 = vld [vmem:[%s9397_s5 + $0x484] sm:$0xf0] }
  0x9a   : > { %4378 = vmatpush.bf16.msra.mxu2 %v6792_v60  ;;  %v6704_v60 = vor.u32 %v8631_v42, %v6703_v41  ;;  %v6807_v37 = vld [vmem:[%s9397_s5 + $0x580] sm:$0xf]  ;;  %v8657_v38 = vld [vmem:[%s9397_s5 + $0x584] sm:$0xf0]  ;;  %v7056_v39 = vor.u32 %v8719_v28, %v7055_v27  ;;  %v8687_v41 = vld [vmem:[%s9397_s5 + $0x674] sm:$0xf0]  ;;  %v6680_v49 = vor.u32 %v8625_v36, %v6679_v33 }
  0x9b   : > { %4397 = vmatpush.bf16.msra.mxu3 %v6856_v11  ;;  %v6751_v11 = vld [vmem:[%s9397_s5 + $0x510] sm:$0xf]  ;;  %v8703_v43 = vld [vmem:[%s9397_s5 + $0x6f4] sm:$0xf0]  ;;  %v7047_v52 = vld [vmem:[%s9397_s5 + $0x760] sm:$0xf]  ;;  %v6808_v58 = vor.u32 %v8657_v38, %v6807_v37 }
  0x9c   : > { %4341 = vmatpush.bf16.msra.mxu0 %v6656_v19  ;;  %v6824_v19 = vor.u32 %v8661_v10, %v6823_v7  ;;  %v6991_v42 = vld [vmem:[%s9397_s5 + $0x6f0] sm:$0xf]  ;;  %v8735_v46 = vld [vmem:[%s9397_s5 + $0x7f4] sm:$0xf0]  ;;  %v8717_v55 = vld [vmem:[%s9397_s5 + $0x764] sm:$0xf0] }
  0x9d   : > { %4360 = vmatpush.bf16.msra.mxu1 %v6720_v20  ;;  %v7119_v45 = vld [vmem:[%s9397_s5 + $0x7f0] sm:$0xf]  ;;  %v8412_v61 = vld [vmem:[%s11511_s0 + $0x24] sm:$0xf]  ;;  %v6919_v4 = vld [vmem:[%s9397_s5 + $0x660] sm:$0xf] }
  0x9e   : > { %4379 = vmatpush.bf16.msra.mxu2 %v6784_v12  ;;  %v8643_v12 = vld [vmem:[%s9397_s5 + $0x514] sm:$0xf0]  ;;  %v7120_v3 = vor.u32 %v8735_v46, %v7119_v45  ;;  %v8685_v7 = vld [vmem:[%s9397_s5 + $0x664] sm:$0xf0]  ;;  %v6983_v17 = vld [vmem:[%s9397_s5 + $0x6e0] sm:$0xf] }
  0x9f   : > { %4398 = vmatpush.bf16.msra.mxu3 %v6848_v23  ;;  %v6752_v20 = vor.u32 %v8643_v12, %v6751_v11  ;;  %v6815_v23 = vld [vmem:[%s9397_s5 + $0x590] sm:$0xf]  ;;  %v5855_v10 = vld [vmem:[%s11511_s0 + $0x28] sm:$0xf]  ;;  %v8431_v11 = vld [vmem:[%s11511_s0 + $0xb4] sm:$0xf0] }
  0xa0   : > { %4342 = vmatpush.bf16.msra.mxu0 %v6648_v31  ;;  %v6615_v31 = vld [vmem:[%s9397_s5 + $0x400] sm:$0xf]  ;;  %v8413_v12 = vld [vmem:[%s11511_s0 + $0x2c] sm:$0xf]  ;;  %v8701_v18 = vld [vmem:[%s9397_s5 + $0x6e4] sm:$0xf0]  ;;  %v9797_v28 = vor.u32 %v8431_v11, %v5855_v10 }
  0xa1   : > { %4361 = vmatpush.bf16.msra.mxu1 %v6712_v32  ;;  %v8609_v32 = vld [vmem:[%s9397_s5 + $0x404] sm:$0xf0]  ;;  %v7039_v22 = vld [vmem:[%s9397_s5 + $0x750] sm:$0xf]  ;;  %v8683_v27 = vld [vmem:[%s9397_s5 + $0x654] sm:$0xf0] }
  0xa2   : > { %4380 = vmatpush.bf16.msra.mxu2 %v6776_v24  ;;  %v8659_v24 = vld [vmem:[%s9397_s5 + $0x594] sm:$0xf0]  ;;  %v6616_v47 = vor.u32 %v8609_v32, %v6615_v31  ;;  %v8733_v21 = vld [vmem:[%s9397_s5 + $0x7e4] sm:$0xf0]  ;;  %v6975_v32 = vld [vmem:[%s9397_s5 + $0x6d0] sm:$0xf] }
  0xa3   : > { %4399 = vmatpush.bf16.msra.mxu3 %v6840_v35  ;;  %4276 = vmatmul.bf16.gmra.mxu0 %v9720_v8  ;;  %v6816_v34 = vor.u32 %v8659_v24, %v6815_v23  ;;  %v6744_v35 = vor.u32 %v8641_v26, %v6743_v25  ;;  %v8715_v25 = vld [vmem:[%s9397_s5 + $0x754] sm:$0xf0]  ;;  %v6911_v26 = vld [vmem:[%s9397_s5 + $0x650] sm:$0xf]  ;;  %v7031_v38 = vld [vmem:[%s9397_s5 + $0x740] sm:$0xf] }
  0xa4   : > { %4343 = vmatpush.bf16.msra.mxu0 %v6640_v59  ;;  %4295 = vmatmul.bf16.gmra.mxu1 %v9722_v9  ;;  %v5847_v59 = vld [vmem:[%s11511_s0 + $0x20] sm:$0xf]  ;;  %v8699_v33 = vld [vmem:[%s9397_s5 + $0x6d4] sm:$0xf0]  ;;  %v7103_v36 = vld [vmem:[%s9397_s5 + $0x7d0] sm:$0xf] }
  0xa5   : > { %4362 = vmatpush.bf16.msra.mxu1 %v6704_v60  ;;  %4314 = vmatmul.bf16.gmra.mxu2 %v9727_v13  ;;  %v8430_v60 = vld [vmem:[%s11511_s0 + $0xac] sm:$0xf0]  ;;  %v8731_v37 = vld [vmem:[%s9397_s5 + $0x7d4] sm:$0xf0]  ;;  %v6967_v45 = vld [vmem:[%s9397_s5 + $0x6c0] sm:$0xf] }
  0xa6   : > { %4381 = vmatpush.bf16.msra.mxu2 %v6768_v40  ;;  %4333 = vmatmul.bf16.gmra.mxu3 %v9729_v14  ;;  %v6927_v40 = vld [vmem:[%s9397_s5 + $0x670] sm:$0xf]  ;;  %v9790_v23 = vor.u32 %v8430_v60, %v5847_v59  ;;  %v8697_v46 = vld [vmem:[%s9397_s5 + $0x6c4] sm:$0xf0]  ;;  %v8711_v59 = vld [vmem:[%s9397_s5 + $0x734] sm:$0xf0] }
  0xa7   : > { %4400 = vmatpush.bf16.msra.mxu3 %v6832_v63  ;;  %v6928_v62 = vor.u32 %v8687_v41, %v6927_v40  ;;  %v5849_v63 = vld [vmem:[%s11511_s0 + $0xb0] sm:$0xf0]  ;;  %v6903_v40 = vld [vmem:[%s9397_s5 + $0x640] sm:$0xf]  ;;  %v8681_v41 = vld [vmem:[%s9397_s5 + $0x644] sm:$0xf0] }
  0xa8   : > { %4344 = vmatpush.bf16.msra.mxu0 %v6632_v15  ;;  %v7048_v15 = vor.u32 %v8717_v55, %v7047_v52  ;;  %v9792_v24 = vor.u32 %v8412_v61, %v5849_v63  ;;  %v7095_v52 = vld [vmem:[%s9397_s5 + $0x7c0] sm:$0xf]  ;;  %v8729_v55 = vld [vmem:[%s9397_s5 + $0x7c4] sm:$0xf0]  ;;  %v6895_v60 = vld [vmem:[%s9397_s5 + $0x630] sm:$0xf] }
  0xa9   : > { %4363 = vmatpush.bf16.msra.mxu1 %v6696_v16  ;;  %v5857_v16 = vld [vmem:[%s11511_s0 + $0xb8] sm:$0xf0]  ;;  %v8679_v61 = vld [vmem:[%s9397_s5 + $0x634] sm:$0xf0]  ;;  %v7096_v63 = vor.u32 %v8729_v55, %v7095_v52  ;;  %v8448_v10 = vld [vmem:[%s11511_s0 + $0x144] sm:$0xf] }
  0xaa   : > { %4382 = vmatpush.bf16.msra.mxu2 %v6760_v2  ;;  %v6992_v2 = vor.u32 %v8703_v43, %v6991_v42  ;;  %v6976_v42 = vor.u32 %v8699_v33, %v6975_v32  ;;  %v7104_v43 = vor.u32 %v8731_v37, %v7103_v36  ;;  %v5993_v11 = vld [vmem:[%s11511_s0 + $0x1d0] sm:$0xf0]  ;;  %v6951_v32 = vld [vmem:[%s9397_s5 + $0x6a0] sm:$0xf]  ;;  %v8693_v33 = vld [vmem:[%s9397_s5 + $0x6a4] sm:$0xf0] }
  0xab   : > { %4401 = vmatpush.bf16.msra.mxu3 %v6824_v19  ;;  %v6920_v19 = vor.u32 %v8685_v7, %v6919_v4  ;;  %v5991_v4 = vld [vmem:[%s11511_s0 + $0x140] sm:$0xf]  ;;  %v8466_v7 = vld [vmem:[%s11511_s0 + $0x1cc] sm:$0xf0]  ;;  %v8725_v37 = vld [vmem:[%s9397_s5 + $0x7a4] sm:$0xf0] }
  0xac   : > { %4345 = vmatpush.bf16.msra.mxu0 %v6624_v29  ;;  %v9799_v29 = vor.u32 %v8413_v12, %v5857_v16  ;;  %v7087_v16 = vld [vmem:[%s9397_s5 + $0x7b0] sm:$0xf]  ;;  %v7079_v36 = vld [vmem:[%s9397_s5 + $0x7a0] sm:$0xf]  ;;  %v8691_v55 = vld [vmem:[%s9397_s5 + $0x694] sm:$0xf0] }
  0xad   : > { %4364 = vmatpush.bf16.msra.mxu1 %v6688_v30  ;;  %v6984_v30 = vor.u32 %v8701_v18, %v6983_v17  ;;  %v8727_v17 = vld [vmem:[%s9397_s5 + $0x7b4] sm:$0xf0]  ;;  %v7015_v18 = vld [vmem:[%s9397_s5 + $0x720] sm:$0xf]  ;;  %v6943_v52 = vld [vmem:[%s9397_s5 + $0x690] sm:$0xf] }
  0xae   : > { %4383 = vmatpush.bf16.msra.mxu2 %v6752_v20  ;;  %v7111_v20 = vld [vmem:[%s9397_s5 + $0x7e0] sm:$0xf] }
  0xaf   : > { %4402 = vmatpush.bf16.msra.mxu3 %v6816_v34  ;;  %v7112_v31 = vor.u32 %v8733_v21, %v7111_v20  ;;  %v7040_v34 = vor.u32 %v8715_v25, %v7039_v22  ;;  %v6887_v20 = vld [vmem:[%s9397_s5 + $0x620] sm:$0xf]  ;;  %v8677_v21 = vld [vmem:[%s9397_s5 + $0x624] sm:$0xf0]  ;;  %v8467_v25 = vld [vmem:[%s11511_s0 + $0x1d4] sm:$0xf0] }
  0xb0   : > { %4346 = vmatpush.bf16.msra.mxu0 %v6616_v47  ;;  %v5999_v22 = vld [vmem:[%s11511_s0 + $0x148] sm:$0xf] }
  0xb1   : > { %4365 = vmatpush.bf16.msra.mxu1 %v6680_v49  ;;  %v6904_v49 = vor.u32 %v8681_v41, %v6903_v40  ;;  %v9860_v40 = vor.u32 %v8448_v10, %v5993_v11  ;;  %v8707_v41 = vld [vmem:[%s9397_s5 + $0x714] sm:$0xf0]  ;;  %v7183_v10 = vld [vmem:[%s9397_s5 + $0x870] sm:$0xf] }
  0xb2   : > { %4384 = vmatpush.bf16.msra.mxu2 %v6744_v35  ;;  %v6912_v35 = vor.u32 %v8683_v27, %v6911_v26  ;;  %v8449_v26 = vld [vmem:[%s11511_s0 + $0x14c] sm:$0xf]  ;;  %v6001_v27 = vld [vmem:[%s11511_s0 + $0x1d8] sm:$0xf0]  ;;  %v8751_v11 = vld [vmem:[%s9397_s5 + $0x874] sm:$0xf0] }
  0xb3   : > { %4403 = vmatpush.bf16.msra.mxu3 %v6808_v58  ;;  %4347 = vmatmul.bf16.vlgmr.msra.gmra.mxu0 %v9790_v23  ;;  %v7023_v58 = vld [vmem:[%s9397_s5 + $0x730] sm:$0xf] }
  0xb4   : > { %4415 = vmatpush.bf16.msrb.mxu0 %v6928_v62  ;;  %4366 = vmatmul.bf16.vlgmr.msra.gmra.mxu1 %v9792_v24  ;;  %v6968_v62 = vor.u32 %v8697_v46, %v6967_v45  ;;  %v7024_v12 = vor.u32 %v8711_v59, %v7023_v58  ;;  %v9865_v45 = vor.u32 %v8467_v25, %v5999_v22  ;;  %v7071_v58 = vld [vmem:[%s9397_s5 + $0x790] sm:$0xf]  ;;  %v8767_v25 = vld [vmem:[%s9397_s5 + $0x8f4] sm:$0xf0] }
  0xb5   : > { %4434 = vmatpush.bf16.msrb.mxu1 %v6992_v2  ;;  %4385 = vmatmul.bf16.vlgmr.msra.gmra.mxu2 %v9797_v28  ;;  %v6959_v2 = vld [vmem:[%s9397_s5 + $0x6b0] sm:$0xf]  ;;  %v9867_v46 = vor.u32 %v8449_v26, %v6001_v27  ;;  %v7184_v27 = vor.u32 %v8751_v11, %v7183_v10 }
  0xb6   : > { %4453 = vmatpush.bf16.msrb.mxu2 %v7056_v39  ;;  %v8713_v39 = vld [vmem:[%s9397_s5 + $0x744] sm:$0xf0]  ;;  %4404 = vmatmul.bf16.vlgmr.msra.gmra.mxu3 %v9799_v29  ;;  %v7247_v22 = vld [vmem:[%s9397_s5 + $0x8f0] sm:$0xf] }
  0xb7   : > { %4472 = vmatpush.bf16.msrb.mxu3 %v7120_v3  ;;  %v7032_v47 = vor.u32 %v8713_v39, %v7031_v38  ;;  %v8695_v3 = vld [vmem:[%s9397_s5 + $0x6b4] sm:$0xf0]  ;;  %v7007_v38 = vld [vmem:[%s9397_s5 + $0x710] sm:$0xf]  ;;  %v9858_v39 = vor.u32 %v8466_v7, %v5991_v4 }
  0xb8   : > { %4416 = vmatpush.bf16.msrb.mxu0 %v6920_v19  ;;  %v8709_v19 = vld [vmem:[%s9397_s5 + $0x724] sm:$0xf0]  ;;  %v7008_v59 = vor.u32 %v8707_v41, %v7007_v38  ;;  %v7311_v4 = vld [vmem:[%s9397_s5 + $0x970] sm:$0xf]  ;;  %v8783_v7 = vld [vmem:[%s9397_s5 + $0x974] sm:$0xf0] }
  0xb9   : > { %4435 = vmatpush.bf16.msrb.mxu1 %v6984_v30  ;;  %v6960_v30 = vor.u32 %v8695_v3, %v6959_v2  ;;  %v6871_v2 = vld [vmem:[%s9397_s5 + $0x600] sm:$0xf]  ;;  %v8673_v3 = vld [vmem:[%s9397_s5 + $0x604] sm:$0xf0]  ;;  %v7312_v26 = vor.u32 %v8783_v7, %v7311_v4  ;;  %v5863_v38 = vld [vmem:[%s11511_s0 + $0x30] sm:$0xf] }
  0xba   : > { %4454 = vmatpush.bf16.msrb.mxu2 %v7048_v15  ;;  %v6896_v15 = vor.u32 %v8679_v61, %v6895_v60  ;;  %v8723_v61 = vld [vmem:[%s9397_s5 + $0x794] sm:$0xf0]  ;;  %v8432_v41 = vld [vmem:[%s11511_s0 + $0xbc] sm:$0xf0]  ;;  %v7295_v4 = vld [vmem:[%s9397_s5 + $0x950] sm:$0xf] }
  0xbb   : > { %4473 = vmatpush.bf16.msrb.mxu3 %v7112_v31  ;;  %v7088_v31 = vor.u32 %v8727_v17, %v7087_v16  ;;  %v6935_v16 = vld [vmem:[%s9397_s5 + $0x680] sm:$0xf]  ;;  %v8689_v17 = vld [vmem:[%s9397_s5 + $0x684] sm:$0xf0]  ;;  %v8779_v7 = vld [vmem:[%s9397_s5 + $0x954] sm:$0xf0] }
  0xbc   : > { %4417 = vmatpush.bf16.msrb.mxu0 %v6912_v35  ;;  %v6888_v35 = vor.u32 %v8677_v21, %v6887_v20  ;;  %v6872_v20 = vor.u32 %v8673_v3, %v6871_v2  ;;  %v8721_v21 = vld [vmem:[%s9397_s5 + $0x784] sm:$0xf0]  ;;  %v8415_v2 = vld [vmem:[%s11511_s0 + $0x3c] sm:$0xf]  ;;  %v5873_v3 = vld [vmem:[%s11511_s0 + $0xc8] sm:$0xf0] }
  0xbd   : > { %4436 = vmatpush.bf16.msrb.mxu1 %v6976_v42  ;;  %v6879_v42 = vld [vmem:[%s9397_s5 + $0x610] sm:$0xf] }
  0xbe   : > { %4455 = vmatpush.bf16.msrb.mxu2 %v7040_v34  ;;  %v7016_v34 = vor.u32 %v8709_v19, %v7015_v18  ;;  %v7063_v18 = vld [vmem:[%s9397_s5 + $0x780] sm:$0xf] }
  0xbf   : > { %4474 = vmatpush.bf16.msrb.mxu3 %v7104_v43  ;;  %v8675_v43 = vld [vmem:[%s9397_s5 + $0x614] sm:$0xf0] }
  0xc0   : > { %4418 = vmatpush.bf16.msrb.mxu0 %v6904_v49  ;;  %v7080_v49 = vor.u32 %v8725_v37, %v7079_v36  ;;  %v6880_v60 = vor.u32 %v8675_v43, %v6879_v42  ;;  %v6936_v36 = vor.u32 %v8689_v17, %v6935_v16  ;;  %v7064_v37 = vor.u32 %v8721_v21, %v7063_v18  ;;  %v8414_v42 = vld [vmem:[%s11511_s0 + $0x34] sm:$0xf]  ;;  %v5865_v43 = vld [vmem:[%s11511_s0 + $0xc0] sm:$0xf0]  ;;  %v7231_v16 = vld [vmem:[%s9397_s5 + $0x8d0] sm:$0xf] }
  0xc1   : > { %4437 = vmatpush.bf16.msrb.mxu1 %v6968_v62  ;;  %v6999_v62 = vld [vmem:[%s9397_s5 + $0x700] sm:$0xf]  ;;  %v9930_v17 = vor.u32 %v8432_v41, %v5863_v38  ;;  %v9932_v18 = vor.u32 %v8414_v42, %v5865_v43  ;;  %v8795_v21 = vld [vmem:[%s9397_s5 + $0x9d4] sm:$0xf0]  ;;  %v8793_v41 = vld [vmem:[%s9397_s5 + $0x9c4] sm:$0xf0] }
  0xc2   : > { %4456 = vmatpush.bf16.msrb.mxu2 %v7032_v47  ;;  %v6952_v47 = vor.u32 %v8693_v33, %v6951_v32  ;;  %v7303_v32 = vld [vmem:[%s9397_s5 + $0x960] sm:$0xf]  ;;  %v8781_v33 = vld [vmem:[%s9397_s5 + $0x964] sm:$0xf0] }
  0xc3   : > { %4475 = vmatpush.bf16.msrb.mxu3 %v7096_v63  ;;  %v8705_v63 = vld [vmem:[%s9397_s5 + $0x704] sm:$0xf0]  ;;  %4352 = vmatmul.bf16.gmra.mxu0 %v9858_v39  ;;  %v7351_v38 = vld [vmem:[%s9397_s5 + $0x9c0] sm:$0xf] }
  0xc4   : > { %4419 = vmatpush.bf16.msrb.mxu0 %v6896_v15  ;;  %4371 = vmatmul.bf16.gmra.mxu1 %v9860_v40  ;;  %v7072_v15 = vor.u32 %v8723_v61, %v7071_v58  ;;  %v7000_v19 = vor.u32 %v8705_v63, %v6999_v62  ;;  %v8797_v61 = vld [vmem:[%s9397_s5 + $0x9e4] sm:$0xf0]  ;;  %v5871_v62 = vld [vmem:[%s11511_s0 + $0x38] sm:$0xf] }
  0xc5   : > { %4438 = vmatpush.bf16.msrb.mxu1 %v6960_v30  ;;  %4390 = vmatmul.bf16.gmra.mxu2 %v9865_v45  ;;  %v7375_v30 = vld [vmem:[%s9397_s5 + $0x9f0] sm:$0xf]  ;;  %v8433_v63 = vld [vmem:[%s11511_s0 + $0xc4] sm:$0xf0] }
  0xc6   : > { %4457 = vmatpush.bf16.msrb.mxu2 %v7024_v12  ;;  %4409 = vmatmul.bf16.gmra.mxu3 %v9867_v46  ;;  %v6944_v12 = vor.u32 %v8691_v55, %v6943_v52  ;;  %v7239_v52 = vld [vmem:[%s9397_s5 + $0x8e0] sm:$0xf]  ;;  %v7304_v55 = vor.u32 %v8781_v33, %v7303_v32 }
  0xc7   : > { %4476 = vmatpush.bf16.msrb.mxu3 %v7088_v31  ;;  %v8799_v31 = vld [vmem:[%s9397_s5 + $0x9f4] sm:$0xf0] }
  0xc8   : > { %4420 = vmatpush.bf16.msrb.mxu0 %v6888_v35  ;;  %v8749_v35 = vld [vmem:[%s9397_s5 + $0x864] sm:$0xf0] }
  0xc9   : > { %4439 = vmatpush.bf16.msrb.mxu1 %v6952_v47  ;;  %v7248_v47 = vor.u32 %v8767_v25, %v7247_v22  ;;  %v9937_v22 = vor.u32 %v8433_v63, %v5871_v62  ;;  %v9939_v25 = vor.u32 %v8415_v2, %v5873_v3  ;;  %v7343_v62 = vld [vmem:[%s9397_s5 + $0x9b0] sm:$0xf]  ;;  %v8791_v63 = vld [vmem:[%s9397_s5 + $0x9b4] sm:$0xf0] }
  0xca   : > { %4458 = vmatpush.bf16.msrb.mxu2 %v7016_v34  ;;  %v7175_v34 = vld [vmem:[%s9397_s5 + $0x860] sm:$0xf] }
  0xcb   : > { %4477 = vmatpush.bf16.msrb.mxu3 %v7080_v49  ;;  %v7376_v49 = vor.u32 %v8799_v31, %v7375_v30  ;;  %v7176_v58 = vor.u32 %v8749_v35, %v7175_v34  ;;  %v7287_v30 = vld [vmem:[%s9397_s5 + $0x940] sm:$0xf]  ;;  %v8777_v31 = vld [vmem:[%s9397_s5 + $0x944] sm:$0xf0] }
  0xcc   : > { %4421 = vmatpush.bf16.msrb.mxu0 %v6880_v60  ;;  %v7367_v60 = vld [vmem:[%s9397_s5 + $0x9e0] sm:$0xf]  ;;  %v8745_v35 = vld [vmem:[%s9397_s5 + $0x844] sm:$0xf0]  ;;  %v7288_v42 = vor.u32 %v8777_v31, %v7287_v30 }
  0xcd   : > { %4440 = vmatpush.bf16.msrb.mxu1 %v6944_v12  ;;  %v7368_v11 = vor.u32 %v8797_v61, %v7367_v60  ;;  %v7167_v12 = vld [vmem:[%s9397_s5 + $0x850] sm:$0xf]  ;;  %v7159_v34 = vld [vmem:[%s9397_s5 + $0x840] sm:$0xf]  ;;  %v8759_v61 = vld [vmem:[%s9397_s5 + $0x8b4] sm:$0xf0] }
  0xce   : > { %4459 = vmatpush.bf16.msrb.mxu2 %v7008_v59  ;;  %v8765_v59 = vld [vmem:[%s9397_s5 + $0x8e4] sm:$0xf0]  ;;  %v7160_v43 = vor.u32 %v8745_v35, %v7159_v34  ;;  %v7215_v60 = vld [vmem:[%s9397_s5 + $0x8b0] sm:$0xf]  ;;  %v7335_v30 = vld [vmem:[%s9397_s5 + $0x9a0] sm:$0xf] }
  0xcf   : > { %4478 = vmatpush.bf16.msrb.mxu3 %v7072_v15  ;;  %v7240_v10 = vor.u32 %v8765_v59, %v7239_v52  ;;  %v8747_v15 = vld [vmem:[%s9397_s5 + $0x854] sm:$0xf0]  ;;  %v8789_v31 = vld [vmem:[%s9397_s5 + $0x9a4] sm:$0xf0]  ;;  %v8451_v34 = vld [vmem:[%s11511_s0 + $0x15c] sm:$0xf] }
  0xd0   : > { %4422 = vmatpush.bf16.msrb.mxu0 %v6872_v20  ;;  %v7359_v20 = vld [vmem:[%s9397_s5 + $0x9d0] sm:$0xf]  ;;  %v8743_v59 = vld [vmem:[%s9397_s5 + $0x834] sm:$0xf0]  ;;  %v6017_v35 = vld [vmem:[%s11511_s0 + $0x1e8] sm:$0xf0] }
  0xd1   : > { %4441 = vmatpush.bf16.msrb.mxu1 %v6936_v36  ;;  %v7360_v33 = vor.u32 %v8795_v21, %v7359_v20  ;;  %v7223_v36 = vld [vmem:[%s9397_s5 + $0x8c0] sm:$0xf]  ;;  %v8741_v21 = vld [vmem:[%s9397_s5 + $0x824] sm:$0xf0] }
  0xd2   : > { %4460 = vmatpush.bf16.msrb.mxu2 %v7000_v19  ;;  %v8763_v19 = vld [vmem:[%s9397_s5 + $0x8d4] sm:$0xf0]  ;;  %v7143_v20 = vld [vmem:[%s9397_s5 + $0x820] sm:$0xf] }
  0xd3   : > { %4479 = vmatpush.bf16.msrb.mxu3 %v7064_v37  ;;  %v7232_v32 = vor.u32 %v8763_v19, %v7231_v16  ;;  %4423 = vmatmul.bf16.vlgmr.msrb.gmra.mxu0 %v9930_v17  ;;  %v8761_v37 = vld [vmem:[%s9397_s5 + $0x8c4] sm:$0xf0]  ;;  %v7216_v16 = vor.u32 %v8759_v61, %v7215_v60  ;;  %v7344_v19 = vor.u32 %v8791_v63, %v7343_v62  ;;  %v7327_v60 = vld [vmem:[%s9397_s5 + $0x990] sm:$0xf]  ;;  %v8787_v61 = vld [vmem:[%s9397_s5 + $0x994] sm:$0xf0] }
  0xd4   : > { %4491 = vmatpush.bf16.msra.mxu0 %v7184_v27  ;;  %v7168_v27 = vor.u32 %v8747_v15, %v7167_v12  ;;  %4442 = vmatmul.bf16.vlgmr.msrb.gmra.mxu1 %v9932_v18  ;;  %v7224_v52 = vor.u32 %v8761_v37, %v7223_v36  ;;  %v8450_v12 = vld [vmem:[%s11511_s0 + $0x154] sm:$0xf]  ;;  %v6009_v15 = vld [vmem:[%s11511_s0 + $0x1e0] sm:$0xf0]  ;;  %v7144_v37 = vor.u32 %v8741_v21, %v7143_v20  ;;  %v7319_v20 = vld [vmem:[%s9397_s5 + $0x980] sm:$0xf] }
  0xd5   : > { %4510 = vmatpush.bf16.msra.mxu1 %v7248_v47  ;;  %4461 = vmatmul.bf16.vlgmr.msrb.gmra.mxu2 %v9937_v22  ;;  %v7279_v47 = vld [vmem:[%s9397_s5 + $0x930] sm:$0xf]  ;;  %v10007_v63 = vor.u32 %v8451_v34, %v6017_v35  ;;  %v8785_v21 = vld [vmem:[%s9397_s5 + $0x984] sm:$0xf0]  ;;  %v8831_v35 = vld [vmem:[%s9397_s5 + $0xaf4] sm:$0xf0] }
  0xd6   : > { %4529 = vmatpush.bf16.msra.mxu2 %v7312_v26  ;;  %v7296_v26 = vor.u32 %v8779_v7, %v7295_v4  ;;  %4480 = vmatmul.bf16.vlgmr.msrb.gmra.mxu3 %v9939_v25  ;;  %v7271_v4 = vld [vmem:[%s9397_s5 + $0x920] sm:$0xf]  ;;  %v8773_v7 = vld [vmem:[%s9397_s5 + $0x924] sm:$0xf0] }
  0xd7   : > { %4548 = vmatpush.bf16.msra.mxu3 %v7376_v49  ;;  %v8775_v49 = vld [vmem:[%s9397_s5 + $0x934] sm:$0xf0]  ;;  %v7272_v36 = vor.u32 %v8773_v7, %v7271_v4  ;;  %11566 = vst [vmem:[#allocation12_spill] sm:$0xff] %v10007_v63  ;;  %v8769_v7 = vld [vmem:[%s9397_s5 + $0x904] sm:$0xf0] }
  0xd8   : > { %4492 = vmatpush.bf16.msra.mxu0 %v7176_v58  ;;  %v7151_v58 = vld [vmem:[%s9397_s5 + $0x830] sm:$0xf]  ;;  %v7280_v2 = vor.u32 %v8775_v49, %v7279_v47  ;;  %v8739_v49 = vld [vmem:[%s9397_s5 + $0x814] sm:$0xf0] }
  0xd9   : > { %4511 = vmatpush.bf16.msra.mxu1 %v7240_v10  ;;  %v7152_v3 = vor.u32 %v8743_v59, %v7151_v58  ;;  %v6007_v10 = vld [vmem:[%s11511_s0 + $0x150] sm:$0xf]  ;;  %v10000_v58 = vor.u32 %v8450_v12, %v6009_v15  ;;  %v8755_v59 = vld [vmem:[%s9397_s5 + $0x894] sm:$0xf0]  ;;  %v7328_v15 = vor.u32 %v8787_v61, %v7327_v60  ;;  %v7431_v60 = vld [vmem:[%s9397_s5 + $0xa60] sm:$0xf] }
  0xda   : > { %4530 = vmatpush.bf16.msra.mxu2 %v7304_v55  ;;  %v7352_v55 = vor.u32 %v8793_v41, %v7351_v38  ;;  %v7263_v38 = vld [vmem:[%s9397_s5 + $0x910] sm:$0xf]  ;;  %v8771_v41 = vld [vmem:[%s9397_s5 + $0x914] sm:$0xf0]  ;;  %v8813_v61 = vld [vmem:[%s9397_s5 + $0xa64] sm:$0xf0] }
  0xdb   : > { %4549 = vmatpush.bf16.msra.mxu3 %v7368_v11  ;;  %v8468_v11 = vld [vmem:[%s11511_s0 + $0x1dc] sm:$0xf0]  ;;  %v7135_v47 = vld [vmem:[%s9397_s5 + $0x810] sm:$0xf]  ;;  %11564 = vst [vmem:[#allocation10_spill] sm:$0xff] %v10000_v58 }
  0xdc   : > { %4493 = vmatpush.bf16.msra.mxu0 %v7168_v27  ;;  %v8757_v27 = vld [vmem:[%s9397_s5 + $0x8a4] sm:$0xf0]  ;;  %v7136_v4 = vor.u32 %v8739_v49, %v7135_v47  ;;  %v7559_v47 = vld [vmem:[%s9397_s5 + $0xb60] sm:$0xf] }
  0xdd   : > { %4512 = vmatpush.bf16.msra.mxu1 %v7232_v32  ;;  %v6015_v32 = vld [vmem:[%s11511_s0 + $0x158] sm:$0xf]  ;;  %v8845_v49 = vld [vmem:[%s9397_s5 + $0xb64] sm:$0xf0] }
  0xde   : > { %4531 = vmatpush.bf16.msra.mxu2 %v7296_v26  ;;  %v7207_v26 = vld [vmem:[%s9397_s5 + $0x8a0] sm:$0xf] }
  0xdf   : > { %4550 = vmatpush.bf16.msra.mxu3 %v7360_v33  ;;  %v8469_v33 = vld [vmem:[%s11511_s0 + $0x1e4] sm:$0xf0] }
  0xe0   : > { %4494 = vmatpush.bf16.msra.mxu0 %v7160_v43  ;;  %v7336_v43 = vor.u32 %v8789_v31, %v7335_v30  ;;  %v10005_v62 = vor.u32 %v8469_v33, %v6015_v32  ;;  %v7439_v30 = vld [vmem:[%s9397_s5 + $0xa70] sm:$0xf]  ;;  %v8815_v31 = vld [vmem:[%s9397_s5 + $0xa74] sm:$0xf0] }
  0xe1   : > { %4513 = vmatpush.bf16.msra.mxu1 %v7224_v52  ;;  %v7199_v52 = vld [vmem:[%s9397_s5 + $0x890] sm:$0xf] }
  0xe2   : > { %4532 = vmatpush.bf16.msra.mxu2 %v7288_v42  ;;  %v7208_v42 = vor.u32 %v8757_v27, %v7207_v26  ;;  %11565 = vst [vmem:[#allocation11_spill] sm:$0xff] %v10005_v62  ;;  %v7200_v12 = vor.u32 %v8755_v59, %v7199_v52  ;;  %v7567_v26 = vld [vmem:[%s9397_s5 + $0xb70] sm:$0xf]  ;;  %v8847_v27 = vld [vmem:[%s9397_s5 + $0xb74] sm:$0xf0] }
  0xe3   : > { %4551 = vmatpush.bf16.msra.mxu3 %v7352_v55  ;;  %v9998_v55 = vor.u32 %v8468_v11, %v6007_v10  ;;  %v7127_v10 = vld [vmem:[%s9397_s5 + $0x800] sm:$0xf]  ;;  %v8737_v11 = vld [vmem:[%s9397_s5 + $0x804] sm:$0xf0]  ;;  %v7503_v32 = vld [vmem:[%s9397_s5 + $0xaf0] sm:$0xf] }
  0xe4   : > { %4495 = vmatpush.bf16.msra.mxu0 %v7152_v3  ;;  %v7264_v3 = vor.u32 %v8771_v41, %v7263_v38  ;;  %4447 = vmatmul.bf16.gmra.mxu1 %v10000_v58  ;;  %v7128_v34 = vor.u32 %v8737_v11, %v7127_v10  ;;  %v7320_v41 = vor.u32 %v8785_v21, %v7319_v20  ;;  %v5879_v10 = vld [vmem:[%s11511_s0 + $0x40] sm:$0xf]  ;;  %v8434_v11 = vld [vmem:[%s11511_s0 + $0xcc] sm:$0xf0]  ;;  %v5887_v20 = vld [vmem:[%s11511_s0 + $0x48] sm:$0xf] }
  0xe5   : > { %4514 = vmatpush.bf16.msra.mxu1 %v7216_v16  ;;  %11563 = vst [vmem:[#allocation9_spill] sm:$0xff] %v9998_v55  ;;  %v7191_v16 = vld [vmem:[%s9397_s5 + $0x880] sm:$0xf]  ;;  %4428 = vmatmul.bf16.gmra.mxu0 %v9998_v55  ;;  %v7504_v52 = vor.u32 %v8831_v35, %v7503_v32  ;;  %v8435_v21 = vld [vmem:[%s11511_s0 + $0xd4] sm:$0xf0] }
  0xe6   : > { %4533 = vmatpush.bf16.msra.mxu2 %v7280_v2  ;;  %v7255_v2 = vld [vmem:[%s9397_s5 + $0x900] sm:$0xf]  ;;  %4485 = vmatmul.bf16.gmra.mxu3 %v10007_v63  ;;  %v7551_v32 = vld [vmem:[%s9397_s5 + $0xb50] sm:$0xf]  ;;  %v8811_v35 = vld [vmem:[%s9397_s5 + $0xa54] sm:$0xf0] }
  0xe7   : > { %4552 = vmatpush.bf16.msra.mxu3 %v7344_v19  ;;  %v8753_v19 = vld [vmem:[%s9397_s5 + $0x884] sm:$0xf0]  ;;  %4466 = vmatmul.bf16.gmra.mxu2 %v10005_v62  ;;  %v7256_v33 = vor.u32 %v8769_v7, %v7255_v2  ;;  %v7495_v2 = vld [vmem:[%s9397_s5 + $0xae0] sm:$0xf] }
  0xe8   : > { %4496 = vmatpush.bf16.msra.mxu0 %v7144_v37  ;;  %v8863_v37 = vld [vmem:[%s9397_s5 + $0xbf4] sm:$0xf0]  ;;  %v7192_v38 = vor.u32 %v8753_v19, %v7191_v16  ;;  %v8861_v7 = vld [vmem:[%s9397_s5 + $0xbe4] sm:$0xf0]  ;;  %v7560_v16 = vor.u32 %v8845_v49, %v7559_v47  ;;  %v7432_v19 = vor.u32 %v8813_v61, %v7431_v60 }
  0xe9   : > { %4515 = vmatpush.bf16.msra.mxu1 %v7208_v42  ;;  %v7568_v42 = vor.u32 %v8847_v27, %v7567_v26  ;;  %v8417_v26 = vld [vmem:[%s11511_s0 + $0x4c] sm:$0xf]  ;;  %v8859_v47 = vld [vmem:[%s9397_s5 + $0xbd4] sm:$0xf0] }
  0xea   : > { %4534 = vmatpush.bf16.msra.mxu2 %v7272_v36  ;;  %v7631_v36 = vld [vmem:[%s9397_s5 + $0xbf0] sm:$0xf] }
  0xeb   : > { %4553 = vmatpush.bf16.msra.mxu3 %v7336_v43  ;;  %v7440_v43 = vor.u32 %v8815_v31, %v7439_v30  ;;  %v7632_v59 = vor.u32 %v8863_v37, %v7631_v36  ;;  %v5889_v31 = vld [vmem:[%s11511_s0 + $0xd8] sm:$0xf0]  ;;  %v7487_v36 = vld [vmem:[%s9397_s5 + $0xad0] sm:$0xf] }
  0xec   : > { %4497 = vmatpush.bf16.msra.mxu0 %v7136_v4  ;;  %v7623_v4 = vld [vmem:[%s9397_s5 + $0xbe0] sm:$0xf] }
  0xed   : > { %4516 = vmatpush.bf16.msra.mxu1 %v7200_v12  ;;  %v8416_v12 = vld [vmem:[%s11511_s0 + $0x44] sm:$0xf]  ;;  %v7624_v30 = vor.u32 %v8861_v7, %v7623_v4  ;;  %v8841_v4 = vld [vmem:[%s9397_s5 + $0xb44] sm:$0xf0] }
  0xee   : > { %4535 = vmatpush.bf16.msra.mxu2 %v7264_v3  ;;  %v8829_v3 = vld [vmem:[%s9397_s5 + $0xae4] sm:$0xf0] }
  0xef   : > { %4554 = vmatpush.bf16.msra.mxu3 %v7328_v15  ;;  %v5881_v15 = vld [vmem:[%s11511_s0 + $0xd0] sm:$0xf0]  ;;  %v7496_v27 = vor.u32 %v8829_v3, %v7495_v2  ;;  %v7543_v3 = vld [vmem:[%s9397_s5 + $0xb40] sm:$0xf] }
  0xf0   : > { %4498 = vmatpush.bf16.msra.mxu0 %v7128_v34  ;;  %v7423_v34 = vld [vmem:[%s9397_s5 + $0xa50] sm:$0xf]  ;;  %v4196_v37 = vpop.f32.mrf.mxu0 }
  0xf1   : > { %4517 = vmatpush.bf16.msra.mxu1 %v7192_v38  ;;  %v10066_v38 = vor.u32 %v8434_v11, %v5879_v10  ;;  %v4215_v49 = vpop.f32.mrf.mxu1  ;;  %v7424_v2 = vor.u32 %v8811_v35, %v7423_v34  ;;  %v7415_v11 = vld [vmem:[%s9397_s5 + $0xa40] sm:$0xf]  ;;  %v7407_v34 = vld [vmem:[%s9397_s5 + $0xa30] sm:$0xf]  ;;  %v8807_v35 = vld [vmem:[%s9397_s5 + $0xa34] sm:$0xf0] }
  0xf2   : > { %4536 = vmatpush.bf16.msra.mxu2 %v7256_v33  ;;  %v8843_v33 = vld [vmem:[%s9397_s5 + $0xb54] sm:$0xf0]  ;;  %v4216_v60 = vadd.f32 %v4215_v49, %v4196_v37  ;;  %v7599_v49 = vld [vmem:[%s9397_s5 + $0xbb0] sm:$0xf] }
  0xf3   : > { %4555 = vmatpush.bf16.msra.mxu3 %v7320_v41  ;;  %11567 = vst [vmem:[#allocation13_spill] sm:$0xff] %v10066_v38  ;;  %v10068_v41 = vor.u32 %v8416_v12, %v5881_v15  ;;  %v7552_v61 = vor.u32 %v8843_v33, %v7551_v32  ;;  %v8809_v12 = vld [vmem:[%s9397_s5 + $0xa44] sm:$0xf0]  ;;  %v7479_v15 = vld [vmem:[%s9397_s5 + $0xac0] sm:$0xf] }
  0xf4   : > { %4567 = vmatpush.bf16.msrb.mxu0 %v7440_v43  ;;  %v7615_v43 = vld [vmem:[%s9397_s5 + $0xbd0] sm:$0xf] }
  0xf5   : > { %4586 = vmatpush.bf16.msrb.mxu1 %v7504_v52  ;;  %11568 = vst [vmem:[#allocation14_spill] sm:$0xff] %v10068_v41  ;;  %v10073_v52 = vor.u32 %v8435_v21, %v5887_v20  ;;  %v7616_v10 = vor.u32 %v8859_v47, %v7615_v43  ;;  %4499 = vmatmul.bf16.vlgmr.msra.gmra.mxu0 %v10066_v38  ;;  %v8857_v20 = vld [vmem:[%s9397_s5 + $0xbc4] sm:$0xf0]  ;;  %v8823_v47 = vld [vmem:[%s9397_s5 + $0xab4] sm:$0xf0] }
  0xf6   : > { %4605 = vmatpush.bf16.msrb.mxu2 %v7568_v42  ;;  %v8827_v42 = vld [vmem:[%s9397_s5 + $0xad4] sm:$0xf0]  ;;  %4518 = vmatmul.bf16.vlgmr.msra.gmra.mxu1 %v10068_v41  ;;  %v7544_v21 = vor.u32 %v8841_v4, %v7543_v3  ;;  %v7455_v38 = vld [vmem:[%s9397_s5 + $0xa90] sm:$0xf] }
  0xf7   : > { %4624 = vmatpush.bf16.msrb.mxu3 %v7632_v59  ;;  %11569 = vst [vmem:[#allocation15_spill] sm:$0xff] %v10073_v52  ;;  %v10075_v59 = vor.u32 %v8417_v26, %v5889_v31  ;;  %v7488_v7 = vor.u32 %v8827_v42, %v7487_v36  ;;  %4537 = vmatmul.bf16.vlgmr.msra.gmra.mxu2 %v10073_v52  ;;  %v7471_v36 = vld [vmem:[%s9397_s5 + $0xab0] sm:$0xf]  ;;  %v8803_v41 = vld [vmem:[%s9397_s5 + $0xa14] sm:$0xf0] }
  0xf8   : > { %4568 = vmatpush.bf16.msrb.mxu0 %v7432_v19  ;;  %v7607_v19 = vld [vmem:[%s9397_s5 + $0xbc0] sm:$0xf]  ;;  %v7416_v26 = vor.u32 %v8809_v12, %v7415_v11  ;;  %v4234_v31 = vpop.f32.mrf.mxu2  ;;  %v4198_v43 = vpop.f32.mrf.mxu0  ;;  %v8837_v11 = vld [vmem:[%s9397_s5 + $0xb24] sm:$0xf0]  ;;  %v7391_v52 = vld [vmem:[%s9397_s5 + $0xa10] sm:$0xf] }
  0xf9   : > { %11570 = vst [vmem:[#allocation16_spill] sm:$0xff] %v10075_v59  ;;  %4587 = vmatpush.bf16.msrb.mxu1 %v7496_v27  ;;  %4556 = vmatmul.bf16.vlgmr.msra.gmra.mxu3 %v10075_v59  ;;  %v7535_v27 = vld [vmem:[%s9397_s5 + $0xb30] sm:$0xf]  ;;  %v7608_v33 = vor.u32 %v8857_v20, %v7607_v19  ;;  %v4235_v37 = vadd.f32 %v4234_v31, %v4216_v60  ;;  %v4253_v42 = vpop.f32.mrf.mxu3  ;;  %v7527_v60 = vld [vmem:[%s9397_s5 + $0xb20] sm:$0xf] }
  0xfa   : > { %4606 = vmatpush.bf16.msrb.mxu2 %v7560_v16  ;;  %v8825_v16 = vld [vmem:[%s9397_s5 + $0xac4] sm:$0xf0]  ;;  %v6023_v12 = vld [vmem:[%s11511_s0 + $0x160] sm:$0xf]  ;;  %v6025_v19 = vld [vmem:[%s11511_s0 + $0x1f0] sm:$0xf0]  ;;  %v7472_v20 = vor.u32 %v8823_v47, %v7471_v36 }
  0xfb   : > { %4625 = vmatpush.bf16.msrb.mxu3 %v7624_v30  ;;  %v8839_v30 = vld [vmem:[%s9397_s5 + $0xb34] sm:$0xf0]  ;;  %v7480_v32 = vor.u32 %v8825_v16, %v7479_v15  ;;  %v10097_v4 = vadd.f32 %v4253_v42, %v4235_v37  ;;  %v8470_v15 = vld [vmem:[%s11511_s0 + $0x1ec] sm:$0xf0]  ;;  %v8452_v16 = vld [vmem:[%s11511_s0 + $0x164] sm:$0xf]  ;;  %v7528_v42 = vor.u32 %v8837_v11, %v7527_v60 }
  0xfc   : > { %4569 = vmatpush.bf16.msrb.mxu0 %v7424_v2  ;;  %v4217_v2 = vpop.f32.mrf.mxu1  ;;  %v7536_v3 = vor.u32 %v8839_v30, %v7535_v27  ;;  %v8805_v27 = vld [vmem:[%s9397_s5 + $0xa24] sm:$0xf0]  ;;  %v7463_v30 = vld [vmem:[%s9397_s5 + $0xaa0] sm:$0xf]  ;;  %v8453_v36 = vld [vmem:[%s11511_s0 + $0x16c] sm:$0xf]  ;;  %v10138_v60 = vor.u32 %v8452_v16, %v6025_v19 }
  0xfd   : > { %4588 = vmatpush.bf16.msrb.mxu1 %v7488_v7  ;;  %v4218_v7 = vadd.f32 %v4217_v2, %v4198_v43  ;;  %v8821_v31 = vld [vmem:[%s9397_s5 + $0xaa4] sm:$0xf0]  ;;  %v6033_v37 = vld [vmem:[%s11511_s0 + $0x1f8] sm:$0xf0]  ;;  %v7519_v47 = vld [vmem:[%s9397_s5 + $0xb10] sm:$0xf] }
  0xfe   : > { %4607 = vmatpush.bf16.msrb.mxu2 %v7552_v61  ;;  %v8855_v61 = vld [vmem:[%s9397_s5 + $0xbb4] sm:$0xf0]  ;;  %v7464_v2 = vor.u32 %v8821_v31, %v7463_v30  ;;  %11572 = vst [vmem:[#allocation18_spill] sm:$0xff] %v10138_v60  ;;  %v10145_v30 = vor.u32 %v8453_v36, %v6033_v37  ;;  %v7511_v31 = vld [vmem:[%s9397_s5 + $0xb00] sm:$0xf] }
  0xff   : > { %4626 = vmatpush.bf16.msrb.mxu3 %v7616_v10  ;;  %v7408_v10 = vor.u32 %v8807_v35, %v7407_v34  ;;  %v6031_v34 = vld [vmem:[%s11511_s0 + $0x168] sm:$0xf]  ;;  %v8471_v35 = vld [vmem:[%s11511_s0 + $0x1f4] sm:$0xf0]  ;;  %v7383_v19 = vld [vmem:[%s9397_s5 + $0xa00] sm:$0xf] }
 0x100   : > { %4570 = vmatpush.bf16.msrb.mxu0 %v7416_v26  ;;  %v7399_v26 = vld [vmem:[%s9397_s5 + $0xa20] sm:$0xf]  ;;  %v8819_v11 = vld [vmem:[%s9397_s5 + $0xa94] sm:$0xf0]  ;;  %11574 = vst [vmem:[#allocation20_spill] sm:$0xff] %v10145_v30 }
 0x101   : > { %4589 = vmatpush.bf16.msrb.mxu1 %v7480_v32  ;;  %v7591_v32 = vld [vmem:[%s9397_s5 + $0xba0] sm:$0xf]  ;;  %v7400_v43 = vor.u32 %v8805_v27, %v7399_v26  ;;  %v4255_v62 = vpop.f32.mrf.mxu3  ;;  %v7583_v26 = vld [vmem:[%s9397_s5 + $0xb90] sm:$0xf]  ;;  %v10143_v27 = vor.u32 %v8471_v35, %v6031_v34  ;;  %v8833_v16 = vld [vmem:[%s9397_s5 + $0xb04] sm:$0xf0]  ;;  %v7456_v34 = vor.u32 %v8819_v11, %v7455_v38 }
 0x102   : > { %4608 = vmatpush.bf16.msrb.mxu2 %v7544_v21  ;;  %v7600_v21 = vor.u32 %v8855_v61, %v7599_v49  ;;  %v8835_v49 = vld [vmem:[%s9397_s5 + $0xb14] sm:$0xf0]  ;;  %v4236_v61 = vpop.f32.mrf.mxu2  ;;  %v7447_v36 = vld [vmem:[%s9397_s5 + $0xa80] sm:$0xf] }
 0x103   : > { %4627 = vmatpush.bf16.msrb.mxu3 %v7608_v33  ;;  %v8853_v33 = vld [vmem:[%s9397_s5 + $0xba4] sm:$0xf0]  ;;  %v4237_v63 = vadd.f32 %v4236_v61, %v4218_v7  ;;  %11573 = vst [vmem:[#allocation19_spill] sm:$0xff] %v10143_v27  ;;  %v7520_v7 = vor.u32 %v8835_v49, %v7519_v47  ;;  %v8911_v37 = vld [vmem:[%s9397_s5 + $0xd74] sm:$0xf0] }
 0x104   : > { %4571 = vmatpush.bf16.msrb.mxu0 %v7408_v10  ;;  %v7592_v59 = vor.u32 %v8853_v33, %v7591_v32  ;;  %v10136_v10 = vor.u32 %v8470_v15, %v6023_v12  ;;  %v7392_v15 = vor.u32 %v8803_v41, %v7391_v52  ;;  %v8801_v33 = vld [vmem:[%s9397_s5 + $0xa04] sm:$0xf0]  ;;  %v7823_v52 = vld [vmem:[%s9397_s5 + $0xd70] sm:$0xf]  ;;  %v8879_v38 = vld [vmem:[%s9397_s5 + $0xc74] sm:$0xf0] }
 0x105   : > { %4590 = vmatpush.bf16.msrb.mxu1 %v7472_v20  ;;  %v8851_v20 = vld [vmem:[%s9397_s5 + $0xb94] sm:$0xf0]  ;;  %v10148_v32 = vadd.f32 %v4255_v62, %v4237_v63  ;;  %v8817_v62 = vld [vmem:[%s9397_s5 + $0xa84] sm:$0xf0]  ;;  %v7575_v63 = vld [vmem:[%s9397_s5 + $0xb80] sm:$0xf]  ;;  %v7384_v47 = vor.u32 %v8801_v33, %v7383_v19 }
 0x106   : > { %4609 = vmatpush.bf16.msrb.mxu2 %v7536_v3  ;;  %v4201_v3 = vpop.f32.mrf.mxu0  ;;  %11571 = vst [vmem:[#allocation17_spill] sm:$0xff] %v10136_v10  ;;  %v7584_v35 = vor.u32 %v8851_v20, %v7583_v26  ;;  %4504 = vmatmul.bf16.gmra.mxu0 %v10136_v10  ;;  %v8849_v41 = vld [vmem:[%s9397_s5 + $0xb84] sm:$0xf0]  ;;  %v8895_v49 = vld [vmem:[%s9397_s5 + $0xcf4] sm:$0xf0]  ;;  %v7448_v11 = vor.u32 %v8817_v62, %v7447_v36 }
 0x107   : > { %4628 = vmatpush.bf16.msrb.mxu3 %v7600_v21  ;;  %v4220_v21 = vpop.f32.mrf.mxu1  ;;  %4523 = vmatmul.bf16.gmra.mxu1 %v10138_v60  ;;  %v7887_v61 = vld [vmem:[%s9397_s5 + $0xdf0] sm:$0xf]  ;;  %v7576_v26 = vor.u32 %v8849_v41, %v7575_v63  ;;  %v8909_v19 = vld [vmem:[%s9397_s5 + $0xd64] sm:$0xf0]  ;;  %v7687_v60 = vld [vmem:[%s9397_s5 + $0xc60] sm:$0xf] }
 0x108   : > { %v4221_v12 = vadd.f32 %v4220_v21, %v4201_v3  ;;  %4572 = vmatpush.bf16.msrb.mxu0 %v7400_v43  ;;  %4542 = vmatmul.bf16.gmra.mxu2 %v10143_v27  ;;  %v7512_v43 = vor.u32 %v8833_v16, %v7511_v31  ;;  %v7815_v16 = vld [vmem:[%s9397_s5 + $0xd60] sm:$0xf]  ;;  %v8877_v10 = vld [vmem:[%s9397_s5 + $0xc64] sm:$0xf0]  ;;  %v5895_v63 = vld [vmem:[%s11511_s0 + $0x50] sm:$0xf] }
 0x109   : > { %4591 = vmatpush.bf16.msrb.mxu1 %v7464_v2  ;;  %4561 = vmatmul.bf16.gmra.mxu3 %v10145_v30  ;;  %v8927_v2 = vld [vmem:[%s9397_s5 + $0xdf4] sm:$0xf0]  ;;  %v4258_v21 = vpop.f32.mrf.mxu3  ;;  %v7879_v36 = vld [vmem:[%s9397_s5 + $0xde0] sm:$0xf]  ;;  %v8925_v62 = vld [vmem:[%s9397_s5 + $0xde4] sm:$0xf0] }
 0x10a   : > { %4610 = vmatpush.bf16.msrb.mxu2 %v7528_v42  ;;  %v7759_v42 = vld [vmem:[%s9397_s5 + $0xcf0] sm:$0xf]  ;;  %v4239_v3 = vpop.f32.mrf.mxu2  ;;  %v7888_v27 = vor.u32 %v8927_v2, %v7887_v61  ;;  %v8436_v41 = vld [vmem:[%s11511_s0 + $0xdc] sm:$0xf0]  ;;  %v7880_v61 = vor.u32 %v8925_v62, %v7879_v36  ;;  %v8907_v2 = vld [vmem:[%s9397_s5 + $0xd54] sm:$0xf0] }
 0x10b   : > { %4629 = vmatpush.bf16.msrb.mxu3 %v7592_v59  ;;  %v7695_v59 = vld [vmem:[%s9397_s5 + $0xc70] sm:$0xf]  ;;  %v4240_v20 = vadd.f32 %v4239_v3, %v4221_v12  ;;  %v7760_v30 = vor.u32 %v8895_v49, %v7759_v42  ;;  %v8893_v12 = vld [vmem:[%s9397_s5 + $0xce4] sm:$0xf0]  ;;  %v5903_v42 = vld [vmem:[%s11511_s0 + $0x58] sm:$0xf] }
 0x10c   : > { %4573 = vmatpush.bf16.msrb.mxu0 %v7392_v15  ;;  %v7824_v15 = vor.u32 %v8911_v37, %v7823_v52  ;;  %v7696_v31 = vor.u32 %v8879_v38, %v7695_v59  ;;  %v8418_v52 = vld [vmem:[%s11511_s0 + $0x54] sm:$0xf]  ;;  %v5897_v37 = vld [vmem:[%s11511_s0 + $0xe0] sm:$0xf0]  ;;  %v7816_v59 = vor.u32 %v8909_v19, %v7815_v16  ;;  %v7688_v38 = vor.u32 %v8877_v10, %v7687_v60  ;;  %v5905_v10 = vld [vmem:[%s11511_s0 + $0xe8] sm:$0xf0] }
 0x10d   : > { %4592 = vmatpush.bf16.msrb.mxu1 %v7456_v34  ;;  %v7751_v34 = vld [vmem:[%s9397_s5 + $0xce0] sm:$0xf]  ;;  %v10174_v58 = vadd.f32 %v4258_v21, %v4240_v20  ;;  %v7807_v60 = vld [vmem:[%s9397_s5 + $0xd50] sm:$0xf]  ;;  %v8923_v16 = vld [vmem:[%s9397_s5 + $0xdd4] sm:$0xf0] }
 0x10e   : > { %4611 = vmatpush.bf16.msrb.mxu2 %v7520_v7  ;;  %v4203_v7 = vpop.f32.mrf.mxu0  ;;  %v7752_v49 = vor.u32 %v8893_v12, %v7751_v34  ;;  %v7743_v20 = vld [vmem:[%s9397_s5 + $0xcd0] sm:$0xf]  ;;  %v7808_v62 = vor.u32 %v8907_v2, %v7807_v60 }
 0x10f   : > { %4630 = vmatpush.bf16.msrb.mxu3 %v7584_v35  ;;  %v4222_v33 = vpop.f32.mrf.mxu1  ;;  %v7791_v2 = vld [vmem:[%s9397_s5 + $0xd30] sm:$0xf] }
 0x110   : > { %v4223_v35 = vadd.f32 %v4222_v33, %v4203_v7  ;;  %4574 = vmatpush.bf16.msrb.mxu0 %v7384_v47  ;;  %v8419_v47 = vld [vmem:[%s11511_s0 + $0x5c] sm:$0xf] }
 0x111   : > { %4593 = vmatpush.bf16.msrb.mxu1 %v7448_v11  ;;  %v7679_v11 = vld [vmem:[%s9397_s5 + $0xc50] sm:$0xf]  ;;  %v4260_v7 = vpop.f32.mrf.mxu3 }
 0x112   : > { %4612 = vmatpush.bf16.msrb.mxu2 %v7512_v43  ;;  %v8437_v43 = vld [vmem:[%s11511_s0 + $0xe4] sm:$0xf0]  ;;  %v4241_v3 = vpop.f32.mrf.mxu2 }
 0x113   : > { %4631 = vmatpush.bf16.msrb.mxu3 %v7576_v26  ;;  %v8875_v26 = vld [vmem:[%s9397_s5 + $0xc54] sm:$0xf0]  ;;  %v4242_v21 = vadd.f32 %v4241_v3, %v4223_v35  ;;  %v10215_v34 = vor.u32 %v8437_v43, %v5903_v42  ;;  %v10217_v35 = vor.u32 %v8419_v47, %v5905_v10  ;;  %v8873_v42 = vld [vmem:[%s9397_s5 + $0xc44] sm:$0xf0]  ;;  %v7735_v43 = vld [vmem:[%s9397_s5 + $0xcc0] sm:$0xf] }
 0x114   : > { %4643 = vmatpush.bf16.msra.mxu0 %v7696_v31  ;;  %v7871_v31 = vld [vmem:[%s9397_s5 + $0xdd0] sm:$0xf]  ;;  %v8903_v3 = vld [vmem:[%s9397_s5 + $0xd34] sm:$0xf0] }
 0x115   : > { %4662 = vmatpush.bf16.msra.mxu1 %v7760_v30  ;;  %v8891_v30 = vld [vmem:[%s9397_s5 + $0xcd4] sm:$0xf0]  ;;  %11577 = vst [vmem:[#allocation23_spill] sm:$0xff] %v10215_v34  ;;  %v10219_v12 = vadd.f32 %v4260_v7, %v4242_v21  ;;  %v7727_v7 = vld [vmem:[%s9397_s5 + $0xcb0] sm:$0xf] }
 0x116   : > { %4681 = vmatpush.bf16.msra.mxu2 %v7824_v15  ;;  %v10208_v15 = vor.u32 %v8436_v41, %v5895_v63  ;;  %v4272_v19 = vpop.f32.mrf.mxu0  ;;  %11578 = vst [vmem:[#allocation24_spill] sm:$0xff] %v10217_v35  ;;  %v7680_v63 = vor.u32 %v8875_v26, %v7679_v11  ;;  %v7799_v41 = vld [vmem:[%s9397_s5 + $0xd40] sm:$0xf]  ;;  %v8871_v21 = vld [vmem:[%s9397_s5 + $0xc34] sm:$0xf0] }
 0x117   : > { %4700 = vmatpush.bf16.msra.mxu3 %v7888_v27  ;;  %v10210_v27 = vor.u32 %v8418_v52, %v5897_v37  ;;  %v4291_v33 = vpop.f32.mrf.mxu1  ;;  %v4273_v36 = vadd.f32 %v4272_v19, %v10097_v4  ;;  %v8905_v52 = vld [vmem:[%s9397_s5 + $0xd44] sm:$0xf0]  ;;  %v7744_v37 = vor.u32 %v8891_v30, %v7743_v20  ;;  %v7863_v4 = vld [vmem:[%s9397_s5 + $0xdc0] sm:$0xf]  ;;  %v7663_v20 = vld [vmem:[%s9397_s5 + $0xc30] sm:$0xf] }
 0x118   : > { %11575 = vst [vmem:[#allocation21_spill] sm:$0xff] %v10208_v15  ;;  %4644 = vmatpush.bf16.msra.mxu0 %v7688_v38  ;;  %v7671_v38 = vld [vmem:[%s9397_s5 + $0xc40] sm:$0xf]  ;;  %4613 = vmatmul.bf16.vlgmr.msrb.gmra.mxu2 %v10215_v34  ;;  %v7800_v10 = vor.u32 %v8905_v52, %v7799_v41  ;;  %v7855_v19 = vld [vmem:[%s9397_s5 + $0xdb0] sm:$0xf]  ;;  %v7792_v52 = vor.u32 %v8903_v3, %v7791_v2 }
 0x119   : > { %11576 = vst [vmem:[#allocation22_spill] sm:$0xff] %v10210_v27  ;;  %4663 = vmatpush.bf16.msra.mxu1 %v7752_v49  ;;  %v4292_v47 = vadd.f32 %v4291_v33, %v4273_v36  ;;  %4575 = vmatmul.bf16.vlgmr.msrb.gmra.mxu0 %v10208_v15  ;;  %v8889_v49 = vld [vmem:[%s9397_s5 + $0xcc4] sm:$0xf0]  ;;  %v7672_v60 = vor.u32 %v8873_v42, %v7671_v38  ;;  %v8919_v33 = vld [vmem:[%s9397_s5 + $0xdb4] sm:$0xf0] }
 0x11a   : > { %4682 = vmatpush.bf16.msra.mxu2 %v7816_v59  ;;  %v7872_v59 = vor.u32 %v8923_v16, %v7871_v31  ;;  %4594 = vmatmul.bf16.vlgmr.msrb.gmra.mxu1 %v10210_v27  ;;  %v7736_v11 = vor.u32 %v8889_v49, %v7735_v43  ;;  %v4310_v30 = vpop.f32.mrf.mxu2  ;;  %v4329_v31 = vpop.f32.mrf.mxu3  ;;  %v8887_v16 = vld [vmem:[%s9397_s5 + $0xcb4] sm:$0xf0]  ;;  %v8901_v38 = vld [vmem:[%s9397_s5 + $0xd24] sm:$0xf0]  ;;  %v8472_v43 = vld [vmem:[%s11511_s0 + $0x1fc] sm:$0xf0] }
 0x11b   : > { %4701 = vmatpush.bf16.msra.mxu3 %v7880_v61  ;;  %v8921_v61 = vld [vmem:[%s9397_s5 + $0xdc4] sm:$0xf0]  ;;  %v4311_v36 = vadd.f32 %v4310_v30, %v4292_v47  ;;  %v8454_v47 = vld [vmem:[%s11511_s0 + $0x174] sm:$0xf]  ;;  %v6041_v49 = vld [vmem:[%s11511_s0 + $0x200] sm:$0xf0] }
 0x11c   : > { %4632 = vmatmul.bf16.vlgmr.msrb.gmra.mxu3 %v10217_v35  ;;  %4645 = vmatpush.bf16.msra.mxu0 %v7680_v63  ;;  %v7864_v26 = vor.u32 %v8921_v61, %v7863_v4  ;;  %v7728_v4 = vor.u32 %v8887_v16, %v7727_v7  ;;  %v7856_v61 = vor.u32 %v8919_v33, %v7855_v19  ;;  %v7719_v2 = vld [vmem:[%s9397_s5 + $0xca0] sm:$0xf]  ;;  %v8473_v7 = vld [vmem:[%s11511_s0 + $0x204] sm:$0xf0]  ;;  %v8455_v30 = vld [vmem:[%s11511_s0 + $0x17c] sm:$0xf] }
 0x11d   : > { %4664 = vmatpush.bf16.msra.mxu1 %v7744_v37  ;;  %v7664_v37 = vor.u32 %v8871_v21, %v7663_v20  ;;  %v10245_v42 = vadd.f32 %v4329_v31, %v4311_v36  ;;  %v8917_v20 = vld [vmem:[%s9397_s5 + $0xda4] sm:$0xf0]  ;;  %v6047_v21 = vld [vmem:[%s11511_s0 + $0x178] sm:$0xf]  ;;  %v6049_v31 = vld [vmem:[%s11511_s0 + $0x208] sm:$0xf0] }
 0x11e   : > { %4683 = vmatpush.bf16.msra.mxu2 %v7808_v62  ;;  %v4274_v62 = vpop.f32.mrf.mxu0  ;;  %v7775_v33 = vld [vmem:[%s9397_s5 + $0xd10] sm:$0xf]  ;;  %v8899_v36 = vld [vmem:[%s9397_s5 + $0xd14] sm:$0xf0] }
 0x11f   : > { %4702 = vmatpush.bf16.msra.mxu3 %v7872_v59  ;;  %v4293_v63 = vpop.f32.mrf.mxu1  ;;  %v4275_v41 = vadd.f32 %v4274_v62, %v10148_v32  ;;  %v7783_v59 = vld [vmem:[%s9397_s5 + $0xd20] sm:$0xf]  ;;  %v6039_v32 = vld [vmem:[%s11511_s0 + $0x170] sm:$0xf]  ;;  %v8867_v35 = vld [vmem:[%s9397_s5 + $0xc14] sm:$0xf0] }
 0x120   : > { %4646 = vmatpush.bf16.msra.mxu0 %v7672_v60  ;;  %v8869_v60 = vld [vmem:[%s9397_s5 + $0xc24] sm:$0xf0]  ;;  %v7784_v16 = vor.u32 %v8901_v38, %v7783_v59  ;;  %v7711_v34 = vld [vmem:[%s9397_s5 + $0xc90] sm:$0xf]  ;;  %v10282_v55 = vor.u32 %v8472_v43, %v6039_v32  ;;  %v8915_v38 = vld [vmem:[%s9397_s5 + $0xd94] sm:$0xf0]  ;;  %v7776_v43 = vor.u32 %v8899_v36, %v7775_v33 }
 0x121   : > { %4665 = vmatpush.bf16.msra.mxu1 %v7736_v11  ;;  %v4294_v3 = vadd.f32 %v4293_v63, %v4275_v41  ;;  %v8885_v11 = vld [vmem:[%s9397_s5 + $0xca4] sm:$0xf0]  ;;  %v7647_v41 = vld [vmem:[%s9397_s5 + $0xc10] sm:$0xf] }
 0x122   : > { %4684 = vmatpush.bf16.msra.mxu2 %v7800_v10  ;;  %v7655_v10 = vld [vmem:[%s9397_s5 + $0xc20] sm:$0xf]  ;;  %v7720_v62 = vor.u32 %v8885_v11, %v7719_v2  ;;  %v4312_v27 = vpop.f32.mrf.mxu2  ;;  %v4331_v15 = vpop.f32.mrf.mxu3  ;;  %11579 = vst [vmem:[#allocation25_spill] sm:$0xff] %v10282_v55  ;;  %v7839_v59 = vld [vmem:[%s9397_s5 + $0xd90] sm:$0xf]  ;;  %v10291_v2 = vor.u32 %v8455_v30, %v6049_v31 }
 0x123   : > { %4703 = vmatpush.bf16.msra.mxu3 %v7864_v26  ;;  %v7847_v26 = vld [vmem:[%s9397_s5 + $0xda0] sm:$0xf]  ;;  %v7656_v19 = vor.u32 %v8869_v60, %v7655_v10  ;;  %v10289_v60 = vor.u32 %v8473_v7, %v6047_v21  ;;  %v7840_v21 = vor.u32 %v8915_v38, %v7839_v59  ;;  %v8881_v7 = vld [vmem:[%s9397_s5 + $0xc84] sm:$0xf0]  ;;  %v8015_v33 = vld [vmem:[%s9397_s5 + $0xef0] sm:$0xf] }
 0x124   : > { %4647 = vmatpush.bf16.msra.mxu0 %v7664_v37  ;;  %v7848_v63 = vor.u32 %v8917_v20, %v7847_v26  ;;  %v8883_v37 = vld [vmem:[%s9397_s5 + $0xc94] sm:$0xf0]  ;;  %11582 = vst [vmem:[#allocation28_spill] sm:$0xff] %v10291_v2  ;;  %v7767_v11 = vld [vmem:[%s9397_s5 + $0xd00] sm:$0xf] }
 0x125   : > { %4666 = vmatpush.bf16.msra.mxu1 %v7728_v4  ;;  %v4313_v4 = vadd.f32 %v4312_v27, %v4294_v3  ;;  %11581 = vst [vmem:[#allocation27_spill] sm:$0xff] %v10289_v60  ;;  %v7639_v27 = vld [vmem:[%s9397_s5 + $0xc00] sm:$0xf]  ;;  %v8865_v3 = vld [vmem:[%s9397_s5 + $0xc04] sm:$0xf0]  ;;  %v7712_v20 = vor.u32 %v8883_v37, %v7711_v34 }
 0x126   : > { %4685 = vmatpush.bf16.msra.mxu2 %v7792_v52  ;;  %v10284_v52 = vor.u32 %v8454_v47, %v6041_v49  ;;  %v7648_v47 = vor.u32 %v8867_v35, %v7647_v41  ;;  %v8897_v49 = vld [vmem:[%s9397_s5 + $0xd04] sm:$0xf0]  ;;  %v7831_v30 = vld [vmem:[%s9397_s5 + $0xd80] sm:$0xf]  ;;  %v8079_v35 = vld [vmem:[%s9397_s5 + $0xf70] sm:$0xf] }
 0x127   : > { %4704 = vmatpush.bf16.msra.mxu3 %v7856_v61  ;;  %v4277_v61 = vpop.f32.mrf.mxu0  ;;  %v4296_v10 = vpop.f32.mrf.mxu1  ;;  %v10298_v26 = vadd.f32 %v4331_v15, %v4313_v4  ;;  %v8913_v15 = vld [vmem:[%s9397_s5 + $0xd84] sm:$0xf0]  ;;  %v7951_v34 = vld [vmem:[%s9397_s5 + $0xe70] sm:$0xf]  ;;  %v7768_v36 = vor.u32 %v8897_v49, %v7767_v11  ;;  %v8991_v37 = vld [vmem:[%s9397_s5 + $0xff4] sm:$0xf0] }
 0x128   : > { %11580 = vst [vmem:[#allocation26_spill] sm:$0xff] %v10284_v52  ;;  %v4278_v32 = vadd.f32 %v4277_v61, %v10174_v58  ;;  %4648 = vmatpush.bf16.msra.mxu0 %v7656_v19  ;;  %v7703_v58 = vld [vmem:[%s9397_s5 + $0xc80] sm:$0xf]  ;;  %4618 = vmatmul.bf16.gmra.mxu2 %v10289_v60  ;;  %v8943_v19 = vld [vmem:[%s9397_s5 + $0xe74] sm:$0xf0]  ;;  %v7832_v38 = vor.u32 %v8913_v15, %v7831_v30 }
 0x129   : > { %4667 = vmatpush.bf16.msra.mxu1 %v7720_v62  ;;  %4580 = vmatmul.bf16.gmra.mxu0 %v10282_v55  ;;  %v7640_v62 = vor.u32 %v8865_v3, %v7639_v27  ;;  %v8143_v41 = vld [vmem:[%s9397_s5 + $0xff0] sm:$0xf]  ;;  %v7704_v59 = vor.u32 %v8881_v7, %v7703_v58  ;;  %v8973_v11 = vld [vmem:[%s9397_s5 + $0xf64] sm:$0xf0]  ;;  %v8135_v30 = vld [vmem:[%s9397_s5 + $0xfe0] sm:$0xf] }
 0x12a   : > { %4686 = vmatpush.bf16.msra.mxu2 %v7784_v16  ;;  %v4297_v31 = vadd.f32 %v4296_v10, %v4278_v32  ;;  %4599 = vmatmul.bf16.gmra.mxu1 %v10284_v52  ;;  %v8975_v16 = vld [vmem:[%s9397_s5 + $0xf74] sm:$0xf0]  ;;  %v4315_v4 = vpop.f32.mrf.mxu2  ;;  %v4334_v61 = vpop.f32.mrf.mxu3  ;;  %v7952_v32 = vor.u32 %v8943_v19, %v7951_v34  ;;  %v8941_v60 = vld [vmem:[%s9397_s5 + $0xe64] sm:$0xf0]  ;;  %v8438_v34 = vld [vmem:[%s11511_s0 + $0xec] sm:$0xf0] }
 0x12b   : > { %4705 = vmatpush.bf16.msra.mxu3 %v7848_v63  ;;  %v8959_v63 = vld [vmem:[%s9397_s5 + $0xef4] sm:$0xf0]  ;;  %v8080_v10 = vor.u32 %v8975_v16, %v8079_v35  ;;  %v8957_v7 = vld [vmem:[%s9397_s5 + $0xee4] sm:$0xf0]  ;;  %v5913_v19 = vld [vmem:[%s11511_s0 + $0xf0] sm:$0xf0] }
 0x12c   : > { %4637 = vmatmul.bf16.gmra.mxu3 %v10291_v2  ;;  %4649 = vmatpush.bf16.msra.mxu0 %v7648_v47  ;;  %v4316_v47 = vadd.f32 %v4315_v4, %v4297_v31  ;;  %v8016_v3 = vor.u32 %v8959_v63, %v8015_v33  ;;  %v8144_v2 = vor.u32 %v8991_v37, %v8143_v41  ;;  %v8989_v15 = vld [vmem:[%s9397_s5 + $0xfe4] sm:$0xf0]  ;;  %v5911_v31 = vld [vmem:[%s11511_s0 + $0x60] sm:$0xf]  ;;  %v8439_v63 = vld [vmem:[%s11511_s0 + $0xf4] sm:$0xf0] }
 0x12d   : > { %4668 = vmatpush.bf16.msra.mxu1 %v7712_v20  ;;  %v7943_v20 = vld [vmem:[%s9397_s5 + $0xe60] sm:$0xf]  ;;  %v8421_v41 = vld [vmem:[%s11511_s0 + $0x6c] sm:$0xf]  ;;  %v8971_v4 = vld [vmem:[%s9397_s5 + $0xf54] sm:$0xf0] }
 0x12e   : > { %4687 = vmatpush.bf16.msra.mxu2 %v7776_v43  ;;  %v8071_v43 = vld [vmem:[%s9397_s5 + $0xf60] sm:$0xf]  ;;  %v10325_v35 = vadd.f32 %v4334_v61, %v4316_v47  ;;  %v7935_v61 = vld [vmem:[%s9397_s5 + $0xe50] sm:$0xf]  ;;  %v10356_v47 = vor.u32 %v8438_v34, %v5911_v31 }
 0x12f   : > { %4706 = vmatpush.bf16.msra.mxu3 %v7840_v21  ;;  %v4279_v49 = vpop.f32.mrf.mxu0  ;;  %v4298_v27 = vpop.f32.mrf.mxu1  ;;  %v8007_v21 = vld [vmem:[%s9397_s5 + $0xee0] sm:$0xf]  ;;  %v8072_v33 = vor.u32 %v8973_v11, %v8071_v43 }
 0x130   : > { %v4280_v58 = vadd.f32 %v4279_v49, %v10219_v12  ;;  %4650 = vmatpush.bf16.msra.mxu0 %v7640_v62  ;;  %v8420_v12 = vld [vmem:[%s11511_s0 + $0x64] sm:$0xf]  ;;  %v5919_v62 = vld [vmem:[%s11511_s0 + $0x68] sm:$0xf]  ;;  %v8008_v37 = vor.u32 %v8957_v7, %v8007_v21  ;;  %11583 = vst [vmem:[#allocation29_spill] sm:$0xff] %v10356_v47 }
 0x131   : > { %4669 = vmatpush.bf16.msra.mxu1 %v7704_v59  ;;  %v8136_v59 = vor.u32 %v8989_v15, %v8135_v30  ;;  %v10358_v49 = vor.u32 %v8420_v12, %v5913_v19  ;;  %v10363_v7 = vor.u32 %v8439_v63, %v5919_v62  ;;  %v8055_v12 = vld [vmem:[%s9397_s5 + $0xf40] sm:$0xf]  ;;  %v8969_v19 = vld [vmem:[%s9397_s5 + $0xf44] sm:$0xf0] }
 0x132   : > { %4688 = vmatpush.bf16.msra.mxu2 %v7768_v36  ;;  %v4299_v16 = vadd.f32 %v4298_v27, %v4280_v58  ;;  %v7944_v36 = vor.u32 %v8941_v60, %v7943_v20  ;;  %v5921_v60 = vld [vmem:[%s11511_s0 + $0xf8] sm:$0xf0]  ;;  %v4317_v43 = vpop.f32.mrf.mxu2  ;;  %v4336_v11 = vpop.f32.mrf.mxu3  ;;  %v8127_v27 = vld [vmem:[%s9397_s5 + $0xfd0] sm:$0xf]  ;;  %v7927_v62 = vld [vmem:[%s9397_s5 + $0xe40] sm:$0xf] }
 0x133   : > { %4707 = vmatpush.bf16.msra.mxu3 %v7832_v38  ;;  %v8063_v38 = vld [vmem:[%s9397_s5 + $0xf50] sm:$0xf]  ;;  %11584 = vst [vmem:[#allocation30_spill] sm:$0xff] %v10358_v49  ;;  %v10365_v30 = vor.u32 %v8421_v41, %v5921_v60  ;;  %v8937_v63 = vld [vmem:[%s9397_s5 + $0xe44] sm:$0xf0] }
 0x134   : > { %4719 = vmatpush.bf16.msrb.mxu0 %v7952_v32  ;;  %v7999_v32 = vld [vmem:[%s9397_s5 + $0xed0] sm:$0xf]  ;;  %v4318_v20 = vadd.f32 %v4317_v43, %v4299_v16  ;;  %11585 = vst [vmem:[#allocation31_spill] sm:$0xff] %v10363_v7  ;;  %v8064_v31 = vor.u32 %v8971_v4, %v8063_v38  ;;  %v7991_v41 = vld [vmem:[%s9397_s5 + $0xec0] sm:$0xf]  ;;  %v8056_v38 = vor.u32 %v8969_v19, %v8055_v12 }
 0x135   : > { %4738 = vmatpush.bf16.msrb.mxu1 %v8016_v3  ;;  %v8987_v3 = vld [vmem:[%s9397_s5 + $0xfd4] sm:$0xf0]  ;;  %11586 = vst [vmem:[#allocation32_spill] sm:$0xff] %v10365_v30  ;;  %v8985_v60 = vld [vmem:[%s9397_s5 + $0xfc4] sm:$0xf0]  ;;  %v7928_v4 = vor.u32 %v8937_v63, %v7927_v62 }
 0x136   : > { %4757 = vmatpush.bf16.msrb.mxu2 %v8080_v10  ;;  %v8939_v10 = vld [vmem:[%s9397_s5 + $0xe54] sm:$0xf0]  ;;  %v10370_v16 = vadd.f32 %v4336_v11, %v4318_v20  ;;  %v7919_v11 = vld [vmem:[%s9397_s5 + $0xe30] sm:$0xf]  ;;  %v8039_v62 = vld [vmem:[%s9397_s5 + $0xf20] sm:$0xf] }
 0x137   : > { %4776 = vmatpush.bf16.msrb.mxu3 %v8144_v2  ;;  %v8955_v2 = vld [vmem:[%s9397_s5 + $0xed4] sm:$0xf0]  ;;  %v4348_v21 = vpop.f32.mrf.mxu0  ;;  %v4367_v58 = vpop.f32.mrf.mxu1  ;;  %v7936_v34 = vor.u32 %v8939_v10, %v7935_v61  ;;  %v8047_v61 = vld [vmem:[%s9397_s5 + $0xf30] sm:$0xf]  ;;  %v8965_v63 = vld [vmem:[%s9397_s5 + $0xf24] sm:$0xf0] }
 0x138   : > { %4720 = vmatpush.bf16.msrb.mxu0 %v7944_v36  ;;  %v4349_v15 = vadd.f32 %v4348_v21, %v10245_v42  ;;  %v8128_v36 = vor.u32 %v8987_v3, %v8127_v27  ;;  %v8953_v42 = vld [vmem:[%s9397_s5 + $0xec4] sm:$0xf0]  ;;  %4689 = vmatmul.bf16.vlgmr.msra.gmra.mxu2 %v10363_v7  ;;  %v8967_v10 = vld [vmem:[%s9397_s5 + $0xf34] sm:$0xf0]  ;;  %v7983_v27 = vld [vmem:[%s9397_s5 + $0xeb0] sm:$0xf] }
 0x139   : > { %4739 = vmatpush.bf16.msrb.mxu1 %v8008_v37  ;;  %4651 = vmatmul.bf16.vlgmr.msra.gmra.mxu0 %v10356_v47  ;;  %v8951_v21 = vld [vmem:[%s9397_s5 + $0xeb4] sm:$0xf0] }
 0x13a   : > { %4758 = vmatpush.bf16.msrb.mxu2 %v8072_v33  ;;  %v8000_v33 = vor.u32 %v8955_v2, %v7999_v32  ;;  %v4368_v37 = vadd.f32 %v4367_v58, %v4349_v15  ;;  %4670 = vmatmul.bf16.vlgmr.msra.gmra.mxu1 %v10358_v49  ;;  %v7992_v32 = vor.u32 %v8953_v42, %v7991_v41  ;;  %v8935_v2 = vld [vmem:[%s9397_s5 + $0xe34] sm:$0xf0]  ;;  %v4386_v3 = vpop.f32.mrf.mxu2  ;;  %v4405_v20 = vpop.f32.mrf.mxu3  ;;  %v8111_v58 = vld [vmem:[%s9397_s5 + $0xfb0] sm:$0xf]  ;;  %v8456_v42 = vld [vmem:[%s11511_s0 + $0x184] sm:$0xf] }
 0x13b   : > { %4777 = vmatpush.bf16.msrb.mxu3 %v8136_v59  ;;  %v8119_v59 = vld [vmem:[%s9397_s5 + $0xfc0] sm:$0xf]  ;;  %v8983_v15 = vld [vmem:[%s9397_s5 + $0xfb4] sm:$0xf0]  ;;  %v7967_v49 = vld [vmem:[%s9397_s5 + $0xe90] sm:$0xf] }
 0x13c   : > { %4708 = vmatmul.bf16.vlgmr.msra.gmra.mxu3 %v10365_v30  ;;  %4721 = vmatpush.bf16.msrb.mxu0 %v7936_v34  ;;  %v8120_v43 = vor.u32 %v8985_v60, %v8119_v59  ;;  %v6057_v59 = vld [vmem:[%s11511_s0 + $0x210] sm:$0xf0]  ;;  %v7984_v60 = vor.u32 %v8951_v21, %v7983_v27  ;;  %v8475_v27 = vld [vmem:[%s11511_s0 + $0x214] sm:$0xf0]  ;;  %v6065_v21 = vld [vmem:[%s11511_s0 + $0x218] sm:$0xf0] }
 0x13d   : > { %4740 = vmatpush.bf16.msrb.mxu1 %v8000_v33  ;;  %v8048_v33 = vor.u32 %v8967_v10, %v8047_v61  ;;  %v8933_v61 = vld [vmem:[%s9397_s5 + $0xe24] sm:$0xf0]  ;;  %v7975_v10 = vld [vmem:[%s9397_s5 + $0xea0] sm:$0xf]  ;;  %v7903_v30 = vld [vmem:[%s9397_s5 + $0xe10] sm:$0xf] }
 0x13e   : > { %4759 = vmatpush.bf16.msrb.mxu2 %v8064_v31  ;;  %v4387_v31 = vadd.f32 %v4386_v3, %v4368_v37  ;;  %v8474_v37 = vld [vmem:[%s11511_s0 + $0x20c] sm:$0xf0]  ;;  %v6063_v3 = vld [vmem:[%s11511_s0 + $0x188] sm:$0xf]  ;;  %v8931_v7 = vld [vmem:[%s9397_s5 + $0xe14] sm:$0xf0] }
 0x13f   : > { %4778 = vmatpush.bf16.msrb.mxu3 %v8128_v36  ;;  %v4350_v34 = vpop.f32.mrf.mxu0  ;;  %v4369_v12 = vpop.f32.mrf.mxu1  ;;  %v7920_v36 = vor.u32 %v8935_v2, %v7919_v11  ;;  %v8103_v11 = vld [vmem:[%s9397_s5 + $0xfa0] sm:$0xf]  ;;  %v8981_v2 = vld [vmem:[%s9397_s5 + $0xfa4] sm:$0xf0] }
 0x140   : > { %v4351_v19 = vadd.f32 %v4350_v34, %v10298_v26  ;;  %4722 = vmatpush.bf16.msrb.mxu0 %v7928_v4  ;;  %v10393_v41 = vadd.f32 %v4405_v20, %v4387_v31  ;;  %v6055_v26 = vld [vmem:[%s11511_s0 + $0x180] sm:$0xf]  ;;  %v8457_v20 = vld [vmem:[%s11511_s0 + $0x18c] sm:$0xf]  ;;  %v8031_v31 = vld [vmem:[%s9397_s5 + $0xf10] sm:$0xf] }
 0x141   : > { %4741 = vmatpush.bf16.msrb.mxu1 %v7992_v32  ;;  %v7911_v4 = vld [vmem:[%s9397_s5 + $0xe20] sm:$0xf]  ;;  %v8963_v34 = vld [vmem:[%s9397_s5 + $0xf14] sm:$0xf0]  ;;  %v10430_v55 = vor.u32 %v8474_v37, %v6055_v26 }
 0x142   : > { %4760 = vmatpush.bf16.msrb.mxu2 %v8056_v38  ;;  %v8112_v38 = vor.u32 %v8983_v15, %v8111_v58  ;;  %v4370_v32 = vadd.f32 %v4369_v12, %v4351_v19  ;;  %v8040_v58 = vor.u32 %v8965_v63, %v8039_v62  ;;  %v7912_v15 = vor.u32 %v8933_v61, %v7911_v4  ;;  %v4388_v47 = vpop.f32.mrf.mxu2  ;;  %v4407_v52 = vpop.f32.mrf.mxu3  ;;  %v8095_v62 = vld [vmem:[%s9397_s5 + $0xf90] sm:$0xf]  ;;  %v8979_v63 = vld [vmem:[%s9397_s5 + $0xf94] sm:$0xf0] }
 0x143   : > { %4779 = vmatpush.bf16.msrb.mxu3 %v8120_v43  ;;  %v8949_v43 = vld [vmem:[%s9397_s5 + $0xea4] sm:$0xf0]  ;;  %v8104_v19 = vor.u32 %v8981_v2, %v8103_v11  ;;  %11587 = vst [vmem:[#allocation33_spill] sm:$0xff] %v10430_v55  ;;  %v10437_v61 = vor.u32 %v8475_v27, %v6063_v3  ;;  %v8032_v37 = vor.u32 %v8963_v34, %v8031_v31 }
 0x144   : > { %4723 = vmatpush.bf16.msrb.mxu0 %v7920_v36  ;;  %v7976_v12 = vor.u32 %v8949_v43, %v7975_v10  ;;  %v8947_v36 = vld [vmem:[%s9397_s5 + $0xe94] sm:$0xf0]  ;;  %v10439_v10 = vor.u32 %v8457_v20, %v6065_v21  ;;  %v8023_v43 = vld [vmem:[%s9397_s5 + $0xf00] sm:$0xf]  ;;  %v8096_v3 = vor.u32 %v8979_v63, %v8095_v62  ;;  %v8945_v27 = vld [vmem:[%s9397_s5 + $0xe84] sm:$0xf0] }
 0x145   : > { %4742 = vmatpush.bf16.msrb.mxu1 %v7984_v60  ;;  %v4389_v60 = vadd.f32 %v4388_v47, %v4370_v32  ;;  %11589 = vst [vmem:[#allocation35_spill] sm:$0xff] %v10437_v61  ;;  %v7895_v47 = vld [vmem:[%s9397_s5 + $0xe00] sm:$0xf]  ;;  %v8929_v32 = vld [vmem:[%s9397_s5 + $0xe04] sm:$0xf0]  ;;  %v7968_v2 = vor.u32 %v8947_v36, %v7967_v49 }
 0x146   : > { %4761 = vmatpush.bf16.msrb.mxu2 %v8048_v33  ;;  %v10432_v33 = vor.u32 %v8456_v42, %v6057_v59  ;;  %11590 = vst [vmem:[#allocation36_spill] sm:$0xff] %v10439_v10  ;;  %v7904_v42 = vor.u32 %v8931_v7, %v7903_v30  ;;  %v8961_v59 = vld [vmem:[%s9397_s5 + $0xf04] sm:$0xf0]  ;;  %v8087_v20 = vld [vmem:[%s9397_s5 + $0xf80] sm:$0xf]  ;;  %v7896_v34 = vor.u32 %v8929_v32, %v7895_v47 }
 0x147   : > { %4780 = vmatpush.bf16.msrb.mxu3 %v8112_v38  ;;  %v4353_v38 = vpop.f32.mrf.mxu0  ;;  %v4372_v4 = vpop.f32.mrf.mxu1  ;;  %v10446_v11 = vadd.f32 %v4407_v52, %v4389_v60  ;;  %v8977_v52 = vld [vmem:[%s9397_s5 + $0xf84] sm:$0xf0]  ;;  %v8335_v7 = vld [vmem:[%s9397_s5 + $0x1170] sm:$0xf]  ;;  %v9039_v30 = vld [vmem:[%s9397_s5 + $0x1174] sm:$0xf0]  ;;  %v8024_v31 = vor.u32 %v8961_v59, %v8023_v43 }
 0x148   : > { %11588 = vst [vmem:[#allocation34_spill] sm:$0xff] %v10432_v33  ;;  %v4354_v26 = vadd.f32 %v4353_v38, %v10325_v35  ;;  %4724 = vmatpush.bf16.msrb.mxu0 %v7912_v15  ;;  %v7959_v35 = vld [vmem:[%s9397_s5 + $0xe80] sm:$0xf]  ;;  %4694 = vmatmul.bf16.gmra.mxu2 %v10437_v61  ;;  %v8207_v49 = vld [vmem:[%s9397_s5 + $0x1070] sm:$0xf]  ;;  %v8088_v63 = vor.u32 %v8977_v52, %v8087_v20 }
 0x149   : > { %4743 = vmatpush.bf16.msrb.mxu1 %v7976_v12  ;;  %4656 = vmatmul.bf16.gmra.mxu0 %v10430_v55  ;;  %v8271_v15 = vld [vmem:[%s9397_s5 + $0x10f0] sm:$0xf]  ;;  %v9023_v12 = vld [vmem:[%s9397_s5 + $0x10f4] sm:$0xf0]  ;;  %v7960_v62 = vor.u32 %v8945_v27, %v7959_v35  ;;  %v9037_v43 = vld [vmem:[%s9397_s5 + $0x1164] sm:$0xf0] }
 0x14a   : > { %4762 = vmatpush.bf16.msrb.mxu2 %v8040_v58  ;;  %v4373_v21 = vadd.f32 %v4372_v4, %v4354_v26  ;;  %4675 = vmatmul.bf16.gmra.mxu1 %v10432_v33  ;;  %v9007_v58 = vld [vmem:[%s9397_s5 + $0x1074] sm:$0xf0]  ;;  %v4391_v60 = vpop.f32.mrf.mxu2  ;;  %v4410_v38 = vpop.f32.mrf.mxu3  ;;  %v8336_v4 = vor.u32 %v9039_v30, %v8335_v7  ;;  %v8272_v32 = vor.u32 %v9023_v12, %v8271_v15  ;;  %v9005_v61 = vld [vmem:[%s9397_s5 + $0x1064] sm:$0xf0]  ;;  %v8391_v20 = vld [vmem:[%s9397_s5 + $0x11e0] sm:$0xf] }
 0x14b   : > { %4781 = vmatpush.bf16.msrb.mxu3 %v8104_v19  ;;  %v8399_v19 = vld [vmem:[%s9397_s5 + $0x11f0] sm:$0xf]  ;;  %v9055_v36 = vld [vmem:[%s9397_s5 + $0x11f4] sm:$0xf0]  ;;  %v8208_v26 = vor.u32 %v9007_v58, %v8207_v49  ;;  %v9021_v27 = vld [vmem:[%s9397_s5 + $0x10e4] sm:$0xf0] }
 0x14c   : > { %4713 = vmatmul.bf16.gmra.mxu3 %v10439_v10  ;;  %4725 = vmatpush.bf16.msrb.mxu0 %v7904_v42  ;;  %v4392_v42 = vadd.f32 %v4391_v60, %v4373_v21  ;;  %v8400_v10 = vor.u32 %v9055_v36, %v8399_v19  ;;  %v9053_v52 = vld [vmem:[%s9397_s5 + $0x11e4] sm:$0xf0]  ;;  %v5927_v21 = vld [vmem:[%s11511_s0 + $0x70] sm:$0xf]  ;;  %v8440_v49 = vld [vmem:[%s11511_s0 + $0xfc] sm:$0xf0] }
 0x14d   : > { %4744 = vmatpush.bf16.msrb.mxu1 %v7968_v2  ;;  %v8199_v2 = vld [vmem:[%s9397_s5 + $0x1060] sm:$0xf]  ;;  %v5929_v58 = vld [vmem:[%s11511_s0 + $0x100] sm:$0xf0]  ;;  %v8441_v12 = vld [vmem:[%s11511_s0 + $0x104] sm:$0xf0] }
 0x14e   : > { %4763 = vmatpush.bf16.msrb.mxu2 %v8032_v37  ;;  %v8327_v37 = vld [vmem:[%s9397_s5 + $0x1160] sm:$0xf]  ;;  %v10473_v7 = vadd.f32 %v4410_v38, %v4392_v42  ;;  %v8423_v19 = vld [vmem:[%s11511_s0 + $0x7c] sm:$0xf]  ;;  %v9035_v60 = vld [vmem:[%s9397_s5 + $0x1154] sm:$0xf0]  ;;  %v10504_v42 = vor.u32 %v8440_v49, %v5927_v21 }
 0x14f   : > { %4782 = vmatpush.bf16.msrb.mxu3 %v8096_v3  ;;  %v4355_v59 = vpop.f32.mrf.mxu0  ;;  %v4374_v47 = vpop.f32.mrf.mxu1  ;;  %v8263_v3 = vld [vmem:[%s9397_s5 + $0x10e0] sm:$0xf]  ;;  %v8328_v15 = vor.u32 %v9037_v43, %v8327_v37  ;;  %v8191_v38 = vld [vmem:[%s9397_s5 + $0x1050] sm:$0xf] }
 0x150   : > { %v4356_v35 = vadd.f32 %v4355_v59, %v10370_v16  ;;  %4726 = vmatpush.bf16.msrb.mxu0 %v7896_v34  ;;  %v8422_v16 = vld [vmem:[%s11511_s0 + $0x74] sm:$0xf]  ;;  %v5935_v34 = vld [vmem:[%s11511_s0 + $0x78] sm:$0xf]  ;;  %v8264_v36 = vor.u32 %v9021_v27, %v8263_v3  ;;  %11591 = vst [vmem:[#allocation37_spill] sm:$0xff] %v10504_v42 }
 0x151   : > { %4745 = vmatpush.bf16.msrb.mxu1 %v7960_v62  ;;  %v8392_v62 = vor.u32 %v9053_v52, %v8391_v20  ;;  %v10506_v59 = vor.u32 %v8422_v16, %v5929_v58  ;;  %v10511_v27 = vor.u32 %v8441_v12, %v5935_v34  ;;  %v8311_v16 = vld [vmem:[%s9397_s5 + $0x1140] sm:$0xf]  ;;  %v9033_v58 = vld [vmem:[%s9397_s5 + $0x1144] sm:$0xf0] }
 0x152   : > { %4764 = vmatpush.bf16.msrb.mxu2 %v8024_v31  ;;  %v4375_v30 = vadd.f32 %v4374_v47, %v4356_v35  ;;  %v8200_v31 = vor.u32 %v9005_v61, %v8199_v2  ;;  %v5937_v61 = vld [vmem:[%s11511_s0 + $0x108] sm:$0xf0]  ;;  %v4393_v37 = vpop.f32.mrf.mxu2  ;;  %v4412_v43 = vpop.f32.mrf.mxu3  ;;  %v8383_v47 = vld [vmem:[%s9397_s5 + $0x11d0] sm:$0xf]  ;;  %v8183_v34 = vld [vmem:[%s9397_s5 + $0x1040] sm:$0xf] }
 0x153   : > { %4783 = vmatpush.bf16.msrb.mxu3 %v8088_v63  ;;  %v8319_v63 = vld [vmem:[%s9397_s5 + $0x1150] sm:$0xf]  ;;  %11592 = vst [vmem:[#allocation38_spill] sm:$0xff] %v10506_v59  ;;  %v10513_v20 = vor.u32 %v8423_v19, %v5937_v61  ;;  %v9001_v12 = vld [vmem:[%s9397_s5 + $0x1044] sm:$0xf0] }
 0x154   : > { %4795 = vmatpush.bf16.msra.mxu0 %v8208_v26  ;;  %v8255_v26 = vld [vmem:[%s9397_s5 + $0x10d0] sm:$0xf]  ;;  %v4394_v2 = vadd.f32 %v4393_v37, %v4375_v30  ;;  %11593 = vst [vmem:[#allocation39_spill] sm:$0xff] %v10511_v27  ;;  %v8320_v21 = vor.u32 %v9035_v60, %v8319_v63  ;;  %v8247_v19 = vld [vmem:[%s9397_s5 + $0x10c0] sm:$0xf]  ;;  %v8312_v63 = vor.u32 %v9033_v58, %v8311_v16 }
 0x155   : > { %4814 = vmatpush.bf16.msra.mxu1 %v8272_v32  ;;  %v9051_v32 = vld [vmem:[%s9397_s5 + $0x11d4] sm:$0xf0]  ;;  %11594 = vst [vmem:[#allocation40_spill] sm:$0xff] %v10513_v20  ;;  %v9049_v61 = vld [vmem:[%s9397_s5 + $0x11c4] sm:$0xf0]  ;;  %v8184_v60 = vor.u32 %v9001_v12, %v8183_v34 }
 0x156   : > { %4833 = vmatpush.bf16.msra.mxu2 %v8336_v4  ;;  %v9003_v4 = vld [vmem:[%s9397_s5 + $0x1054] sm:$0xf0]  ;;  %v10518_v30 = vadd.f32 %v4412_v43, %v4394_v2  ;;  %v8175_v43 = vld [vmem:[%s9397_s5 + $0x1030] sm:$0xf]  ;;  %v8295_v34 = vld [vmem:[%s9397_s5 + $0x1120] sm:$0xf] }
 0x157   : > { %4852 = vmatpush.bf16.msra.mxu3 %v8400_v10  ;;  %v9019_v10 = vld [vmem:[%s9397_s5 + $0x10d4] sm:$0xf0]  ;;  %v4424_v3 = vpop.f32.mrf.mxu0  ;;  %v4443_v35 = vpop.f32.mrf.mxu1  ;;  %v8192_v49 = vor.u32 %v9003_v4, %v8191_v38  ;;  %v8303_v38 = vld [vmem:[%s9397_s5 + $0x1130] sm:$0xf]  ;;  %v9029_v12 = vld [vmem:[%s9397_s5 + $0x1124] sm:$0xf0] }
 0x158   : > { %4796 = vmatpush.bf16.msra.mxu0 %v8200_v31  ;;  %v4425_v52 = vadd.f32 %v4424_v3, %v10393_v41  ;;  %v8384_v31 = vor.u32 %v9051_v32, %v8383_v47  ;;  %v9017_v41 = vld [vmem:[%s9397_s5 + $0x10c4] sm:$0xf0]  ;;  %4765 = vmatmul.bf16.vlgmr.msrb.gmra.mxu2 %v10511_v27  ;;  %v9031_v4 = vld [vmem:[%s9397_s5 + $0x1134] sm:$0xf0]  ;;  %v8239_v47 = vld [vmem:[%s9397_s5 + $0x10b0] sm:$0xf] }
 0x159   : > { %4815 = vmatpush.bf16.msra.mxu1 %v8264_v36  ;;  %4727 = vmatmul.bf16.vlgmr.msrb.gmra.mxu0 %v10504_v42  ;;  %v9015_v3 = vld [vmem:[%s9397_s5 + $0x10b4] sm:$0xf0] }
 0x15a   : > { %4834 = vmatpush.bf16.msra.mxu2 %v8328_v15  ;;  %v8256_v15 = vor.u32 %v9019_v10, %v8255_v26  ;;  %v4444_v36 = vadd.f32 %v4443_v35, %v4425_v52  ;;  %4746 = vmatmul.bf16.vlgmr.msrb.gmra.mxu1 %v10506_v59  ;;  %v8248_v26 = vor.u32 %v9017_v41, %v8247_v19  ;;  %v8999_v10 = vld [vmem:[%s9397_s5 + $0x1034] sm:$0xf0]  ;;  %v4462_v32 = vpop.f32.mrf.mxu2  ;;  %v4481_v2 = vpop.f32.mrf.mxu3  ;;  %v8367_v35 = vld [vmem:[%s9397_s5 + $0x11b0] sm:$0xf]  ;;  %v8458_v41 = vld [vmem:[%s11511_s0 + $0x194] sm:$0xf] }
 0x15b   : > { %4853 = vmatpush.bf16.msra.mxu3 %v8392_v62  ;;  %v8375_v62 = vld [vmem:[%s9397_s5 + $0x11c0] sm:$0xf]  ;;  %v9047_v52 = vld [vmem:[%s9397_s5 + $0x11b4] sm:$0xf0]  ;;  %v8223_v59 = vld [vmem:[%s9397_s5 + $0x1090] sm:$0xf] }
 0x15c   : > { %4784 = vmatmul.bf16.vlgmr.msrb.gmra.mxu3 %v10513_v20  ;;  %4797 = vmatpush.bf16.msra.mxu0 %v8192_v49  ;;  %v8376_v37 = vor.u32 %v9049_v61, %v8375_v62  ;;  %v6073_v62 = vld [vmem:[%s11511_s0 + $0x220] sm:$0xf0]  ;;  %v8240_v61 = vor.u32 %v9015_v3, %v8239_v47  ;;  %v8477_v47 = vld [vmem:[%s11511_s0 + $0x224] sm:$0xf0]  ;;  %v6081_v3 = vld [vmem:[%s11511_s0 + $0x228] sm:$0xf0] }
 0x15d   : > { %4816 = vmatpush.bf16.msra.mxu1 %v8256_v15  ;;  %v8304_v15 = vor.u32 %v9031_v4, %v8303_v38  ;;  %v8997_v38 = vld [vmem:[%s9397_s5 + $0x1024] sm:$0xf0]  ;;  %v8231_v4 = vld [vmem:[%s9397_s5 + $0x10a0] sm:$0xf]  ;;  %v8159_v20 = vld [vmem:[%s9397_s5 + $0x1010] sm:$0xf] }
 0x15e   : > { %4835 = vmatpush.bf16.msra.mxu2 %v8320_v21  ;;  %v4463_v21 = vadd.f32 %v4462_v32, %v4444_v36  ;;  %v8476_v36 = vld [vmem:[%s11511_s0 + $0x21c] sm:$0xf0]  ;;  %v6079_v32 = vld [vmem:[%s11511_s0 + $0x198] sm:$0xf] }
 0x15f   : > { %4854 = vmatpush.bf16.msra.mxu3 %v8384_v31  ;;  %v4426_v49 = vpop.f32.mrf.mxu0  ;;  %v4445_v16 = vpop.f32.mrf.mxu1  ;;  %v8176_v31 = vor.u32 %v8999_v10, %v8175_v43  ;;  %v8359_v43 = vld [vmem:[%s9397_s5 + $0x11a0] sm:$0xf]  ;;  %v9045_v10 = vld [vmem:[%s9397_s5 + $0x11a4] sm:$0xf0]  ;;  %v8995_v27 = vld [vmem:[%s9397_s5 + $0x1014] sm:$0xf0] }
 0x160   : > { %v4427_v58 = vadd.f32 %v4426_v49, %v10446_v11  ;;  %4798 = vmatpush.bf16.msra.mxu0 %v8184_v60  ;;  %v10541_v19 = vadd.f32 %v4481_v2, %v4463_v21  ;;  %v6071_v11 = vld [vmem:[%s11511_s0 + $0x190] sm:$0xf]  ;;  %v8167_v60 = vld [vmem:[%s9397_s5 + $0x1020] sm:$0xf]  ;;  %v8459_v2 = vld [vmem:[%s11511_s0 + $0x19c] sm:$0xf] }
 0x161   : > { %4817 = vmatpush.bf16.msra.mxu1 %v8248_v26  ;;  %v8287_v21 = vld [vmem:[%s9397_s5 + $0x1110] sm:$0xf]  ;;  %v9027_v49 = vld [vmem:[%s9397_s5 + $0x1114] sm:$0xf0]  ;;  %v10578_v55 = vor.u32 %v8476_v36, %v6071_v11 }
 0x162   : > { %4836 = vmatpush.bf16.msra.mxu2 %v8312_v63  ;;  %v8368_v63 = vor.u32 %v9047_v52, %v8367_v35  ;;  %v4446_v26 = vadd.f32 %v4445_v16, %v4427_v58  ;;  %v8296_v35 = vor.u32 %v9029_v12, %v8295_v34  ;;  %v8168_v52 = vor.u32 %v8997_v38, %v8167_v60  ;;  %v4464_v42 = vpop.f32.mrf.mxu2  ;;  %v4483_v33 = vpop.f32.mrf.mxu3  ;;  %v8351_v34 = vld [vmem:[%s9397_s5 + $0x1190] sm:$0xf]  ;;  %v9043_v12 = vld [vmem:[%s9397_s5 + $0x1194] sm:$0xf0] }
 0x163   : > { %4855 = vmatpush.bf16.msra.mxu3 %v8376_v37  ;;  %v9013_v37 = vld [vmem:[%s9397_s5 + $0x10a4] sm:$0xf0]  ;;  %v8360_v58 = vor.u32 %v9045_v10, %v8359_v43  ;;  %11595 = vst [vmem:[#allocation41_spill] sm:$0xff] %v10578_v55  ;;  %v10585_v38 = vor.u32 %v8477_v47, %v6079_v32  ;;  %v8288_v36 = vor.u32 %v9027_v49, %v8287_v21 }
 0x164   : > { %4799 = vmatpush.bf16.msra.mxu0 %v8176_v31  ;;  %v8232_v16 = vor.u32 %v9013_v37, %v8231_v4  ;;  %v9011_v31 = vld [vmem:[%s9397_s5 + $0x1094] sm:$0xf0]  ;;  %v10587_v4 = vor.u32 %v8459_v2, %v6081_v3  ;;  %v8279_v37 = vld [vmem:[%s9397_s5 + $0x1100] sm:$0xf]  ;;  %v8352_v32 = vor.u32 %v9043_v12, %v8351_v34  ;;  %v9009_v47 = vld [vmem:[%s9397_s5 + $0x1084] sm:$0xf0] }
 0x165   : > { %4818 = vmatpush.bf16.msra.mxu1 %v8240_v61  ;;  %v4465_v61 = vadd.f32 %v4464_v42, %v4446_v26  ;;  %11597 = vst [vmem:[#allocation43_spill] sm:$0xff] %v10585_v38  ;;  %v8151_v42 = vld [vmem:[%s9397_s5 + $0x1000] sm:$0xf]  ;;  %v8993_v26 = vld [vmem:[%s9397_s5 + $0x1004] sm:$0xf0]  ;;  %v8224_v10 = vor.u32 %v9011_v31, %v8223_v59 }
 0x166   : > { %4837 = vmatpush.bf16.msra.mxu2 %v8304_v15  ;;  %v10580_v15 = vor.u32 %v8458_v41, %v6073_v62  ;;  %11598 = vst [vmem:[#allocation44_spill] sm:$0xff] %v10587_v4  ;;  %v8160_v41 = vor.u32 %v8995_v27, %v8159_v20  ;;  %v9025_v62 = vld [vmem:[%s9397_s5 + $0x1104] sm:$0xf0]  ;;  %v8343_v2 = vld [vmem:[%s9397_s5 + $0x1180] sm:$0xf]  ;;  %v8152_v49 = vor.u32 %v8993_v26, %v8151_v42 }
 0x167   : > { %4856 = vmatpush.bf16.msra.mxu3 %v8368_v63  ;;  %v4429_v63 = vpop.f32.mrf.mxu0  ;;  %v4448_v60 = vpop.f32.mrf.mxu1  ;;  %v10594_v43 = vadd.f32 %v4483_v33, %v4465_v61  ;;  %v9041_v33 = vld [vmem:[%s9397_s5 + $0x1184] sm:$0xf0]  ;;  %v8526_v27 = vld [vmem:[%s9397_s5 + $0x174] sm:$0xf]  ;;  %v6289_v20 = vld [vmem:[%s9397_s5 + $0x178] sm:$0xf0]  ;;  %v8280_v21 = vor.u32 %v9025_v62, %v8279_v37 }
 0x168   : > { %11596 = vst [vmem:[#allocation42_spill] sm:$0xff] %v10580_v15  ;;  %v4430_v11 = vadd.f32 %v4429_v63, %v10473_v7  ;;  %4800 = vmatpush.bf16.msra.mxu0 %v8168_v52  ;;  %v8215_v7 = vld [vmem:[%s9397_s5 + $0x1080] sm:$0xf]  ;;  %4770 = vmatmul.bf16.gmra.mxu2 %v10585_v38  ;;  %v8494_v59 = vld [vmem:[%s9397_s5 + $0x74] sm:$0xf]  ;;  %v8344_v12 = vor.u32 %v9041_v33, %v8343_v2 }
 0x169   : > { %4819 = vmatpush.bf16.msra.mxu1 %v8232_v16  ;;  %4732 = vmatmul.bf16.gmra.mxu0 %v10578_v55  ;;  %v8510_v52 = vld [vmem:[%s9397_s5 + $0xf4] sm:$0xf]  ;;  %v6225_v16 = vld [vmem:[%s9397_s5 + $0xf8] sm:$0xf0]  ;;  %v8216_v34 = vor.u32 %v9009_v47, %v8215_v7  ;;  %v6281_v37 = vld [vmem:[%s9397_s5 + $0x168] sm:$0xf0] }
 0x16a   : > { %4838 = vmatpush.bf16.msra.mxu2 %v8296_v35  ;;  %v4449_v3 = vadd.f32 %v4448_v60, %v4430_v11  ;;  %4751 = vmatmul.bf16.gmra.mxu1 %v10580_v15  ;;  %v6161_v35 = vld [vmem:[%s9397_s5 + $0x78] sm:$0xf0]  ;;  %v4467_v61 = vpop.f32.mrf.mxu2  ;;  %v4486_v63 = vpop.f32.mrf.mxu3  ;;  %v6292_v60 = vor.u32 %v8526_v27, %v6289_v20  ;;  %v6228_v26 = vor.u32 %v8510_v52, %v6225_v16  ;;  %v6153_v38 = vld [vmem:[%s9397_s5 + $0x68] sm:$0xf0]  ;;  %v8540_v2 = vld [vmem:[%s9397_s5 + $0x1e4] sm:$0xf] }
 0x16b   : > { %4857 = vmatpush.bf16.msra.mxu3 %v8360_v58  ;;  %v8542_v58 = vld [vmem:[%s9397_s5 + $0x1f4] sm:$0xf]  ;;  %v6353_v31 = vld [vmem:[%s9397_s5 + $0x1f8] sm:$0xf0]  ;;  %v6164_v11 = vor.u32 %v8494_v59, %v6161_v35  ;;  %v6217_v47 = vld [vmem:[%s9397_s5 + $0xe8] sm:$0xf0] }
 0x16c   : > { %4789 = vmatmul.bf16.gmra.mxu3 %v10587_v4  ;;  %4801 = vmatpush.bf16.msra.mxu0 %v8160_v41  ;;  %v4468_v41 = vadd.f32 %v4467_v61, %v4449_v3  ;;  %v6356_v4 = vor.u32 %v8542_v58, %v6353_v31  ;;  %v6345_v33 = vld [vmem:[%s9397_s5 + $0x1e8] sm:$0xf0]  ;;  %v5943_v3 = vld [vmem:[%s11511_s0 + $0x80] sm:$0xf]  ;;  %v8442_v59 = vld [vmem:[%s11511_s0 + $0x10c] sm:$0xf0] }
 0x16d   : > { %4820 = vmatpush.bf16.msra.mxu1 %v8224_v10  ;;  %v8492_v10 = vld [vmem:[%s9397_s5 + $0x64] sm:$0xf]  ;;  %v5945_v35 = vld [vmem:[%s11511_s0 + $0x110] sm:$0xf0]  ;;  %v8443_v16 = vld [vmem:[%s11511_s0 + $0x114] sm:$0xf0] }
 0x16e   : > { %4839 = vmatpush.bf16.msra.mxu2 %v8288_v36  ;;  %v8524_v36 = vld [vmem:[%s9397_s5 + $0x164] sm:$0xf]  ;;  %v10621_v27 = vadd.f32 %v4486_v63, %v4468_v41  ;;  %v8425_v58 = vld [vmem:[%s11511_s0 + $0x8c] sm:$0xf]  ;;  %v6273_v61 = vld [vmem:[%s9397_s5 + $0x158] sm:$0xf0]  ;;  %v10652_v41 = vor.u32 %v8442_v59, %v5943_v3 }
 0x16f   : > { %4858 = vmatpush.bf16.msra.mxu3 %v8352_v32  ;;  %v4431_v62 = vpop.f32.mrf.mxu0  ;;  %v4450_v42 = vpop.f32.mrf.mxu1  ;;  %v8508_v32 = vld [vmem:[%s9397_s5 + $0xe4] sm:$0xf]  ;;  %v6284_v52 = vor.u32 %v8524_v36, %v6281_v37  ;;  %v8490_v63 = vld [vmem:[%s9397_s5 + $0x54] sm:$0xf] }
 0x170   : > { %v4432_v7 = vadd.f32 %v4431_v62, %v10518_v30  ;;  %4802 = vmatpush.bf16.msra.mxu0 %v8152_v49  ;;  %v8424_v30 = vld [vmem:[%s11511_s0 + $0x84] sm:$0xf]  ;;  %v5951_v49 = vld [vmem:[%s11511_s0 + $0x88] sm:$0xf]  ;;  %v6220_v31 = vor.u32 %v8508_v32, %v6217_v47  ;;  %11599 = vst [vmem:[#allocation45_spill] sm:$0xff] %v10652_v41 }
 0x171   : > { %4821 = vmatpush.bf16.msra.mxu1 %v8216_v34  ;;  %v6348_v34 = vor.u32 %v8540_v2, %v6345_v33  ;;  %v10654_v62 = vor.u32 %v8424_v30, %v5945_v35  ;;  %v10659_v47 = vor.u32 %v8443_v16, %v5951_v49  ;;  %v8520_v30 = vld [vmem:[%s9397_s5 + $0x144] sm:$0xf]  ;;  %v6265_v35 = vld [vmem:[%s9397_s5 + $0x148] sm:$0xf0] }
 0x172   : > { %4840 = vmatpush.bf16.msra.mxu2 %v8280_v21  ;;  %v4451_v20 = vadd.f32 %v4450_v42, %v4432_v7  ;;  %v6156_v21 = vor.u32 %v8492_v10, %v6153_v38  ;;  %v5953_v38 = vld [vmem:[%s11511_s0 + $0x118] sm:$0xf0]  ;;  %v4469_v36 = vpop.f32.mrf.mxu2  ;;  %v4488_v37 = vpop.f32.mrf.mxu3  ;;  %v8538_v42 = vld [vmem:[%s9397_s5 + $0x1d4] sm:$0xf]  ;;  %v8488_v49 = vld [vmem:[%s9397_s5 + $0x44] sm:$0xf] }
 0x173   : > { %4859 = vmatpush.bf16.msra.mxu3 %v8344_v12  ;;  %v8522_v12 = vld [vmem:[%s9397_s5 + $0x154] sm:$0xf]  ;;  %11600 = vst [vmem:[#allocation46_spill] sm:$0xff] %v10654_v62  ;;  %v10661_v2 = vor.u32 %v8425_v58, %v5953_v38  ;;  %v6137_v16 = vld [vmem:[%s9397_s5 + $0x48] sm:$0xf0] }
 0x174   : > { %4871 = vmatpush.bf16.msrb.mxu0 %v6164_v11  ;;  %v8506_v11 = vld [vmem:[%s9397_s5 + $0xd4] sm:$0xf]  ;;  %v4470_v10 = vadd.f32 %v4469_v36, %v4451_v20  ;;  %11601 = vst [vmem:[#allocation47_spill] sm:$0xff] %v10659_v47  ;;  %v6276_v3 = vor.u32 %v8522_v12, %v6273_v61  ;;  %v8504_v58 = vld [vmem:[%s9397_s5 + $0xc4] sm:$0xf]  ;;  %v6268_v12 = vor.u32 %v8520_v30, %v6265_v35 }
 0x175   : > { %4890 = vmatpush.bf16.msrb.mxu1 %v6228_v26  ;;  %v6337_v26 = vld [vmem:[%s9397_s5 + $0x1d8] sm:$0xf0]  ;;  %11602 = vst [vmem:[#allocation48_spill] sm:$0xff] %v10661_v2  ;;  %v6329_v38 = vld [vmem:[%s9397_s5 + $0x1c8] sm:$0xf0]  ;;  %v6140_v61 = vor.u32 %v8488_v49, %v6137_v16 }
 0x176   : > { %4909 = vmatpush.bf16.msrb.mxu2 %v6292_v60  ;;  %v6145_v60 = vld [vmem:[%s9397_s5 + $0x58] sm:$0xf0]  ;;  %v10666_v20 = vadd.f32 %v4488_v37, %v4470_v10  ;;  %v8486_v37 = vld [vmem:[%s9397_s5 + $0x34] sm:$0xf]  ;;  %v8516_v49 = vld [vmem:[%s9397_s5 + $0x124] sm:$0xf] }
 0x177   : > { %4928 = vmatpush.bf16.msrb.mxu3 %v6356_v4  ;;  %v6209_v4 = vld [vmem:[%s9397_s5 + $0xd8] sm:$0xf0]  ;;  %v4500_v32 = vpop.f32.mrf.mxu0  ;;  %v4519_v7 = vpop.f32.mrf.mxu1  ;;  %v6148_v59 = vor.u32 %v8490_v63, %v6145_v60  ;;  %v8518_v63 = vld [vmem:[%s9397_s5 + $0x134] sm:$0xf]  ;;  %v6249_v16 = vld [vmem:[%s9397_s5 + $0x128] sm:$0xf0] }
 0x178   : > { %4872 = vmatpush.bf16.msrb.mxu0 %v6156_v21  ;;  %v4501_v33 = vadd.f32 %v4500_v32, %v10541_v19  ;;  %v6340_v21 = vor.u32 %v8538_v42, %v6337_v26  ;;  %v6201_v19 = vld [vmem:[%s9397_s5 + $0xc8] sm:$0xf0]  ;;  %4841 = vmatmul.bf16.vlgmr.msra.gmra.mxu2 %v10659_v47  ;;  %v6257_v60 = vld [vmem:[%s9397_s5 + $0x138] sm:$0xf0]  ;;  %v8502_v42 = vld [vmem:[%s9397_s5 + $0xb4] sm:$0xf] }
 0x179   : > { %4891 = vmatpush.bf16.msrb.mxu1 %v6220_v31  ;;  %4803 = vmatmul.bf16.vlgmr.msra.gmra.mxu0 %v10652_v41  ;;  %v6193_v32 = vld [vmem:[%s9397_s5 + $0xb8] sm:$0xf0] }
 0x17a   : > { %4910 = vmatpush.bf16.msrb.mxu2 %v6284_v52  ;;  %v6212_v52 = vor.u32 %v8506_v11, %v6209_v4  ;;  %v4520_v31 = vadd.f32 %v4519_v7, %v4501_v33  ;;  %4822 = vmatmul.bf16.vlgmr.msra.gmra.mxu1 %v10654_v62  ;;  %v6204_v11 = vor.u32 %v8504_v58, %v6201_v19  ;;  %v6129_v4 = vld [vmem:[%s9397_s5 + $0x38] sm:$0xf0]  ;;  %v4538_v26 = vpop.f32.mrf.mxu2  ;;  %v8534_v7 = vld [vmem:[%s9397_s5 + $0x1b4] sm:$0xf]  ;;  %v8460_v19 = vld [vmem:[%s11511_s0 + $0x1a4] sm:$0xf] }
 0x17b   : > { %4929 = vmatpush.bf16.msrb.mxu3 %v6348_v34  ;;  %v8536_v34 = vld [vmem:[%s9397_s5 + $0x1c4] sm:$0xf]  ;;  %v6321_v33 = vld [vmem:[%s9397_s5 + $0x1b8] sm:$0xf0]  ;;  %v8498_v62 = vld [vmem:[%s9397_s5 + $0x94] sm:$0xf] }
 0x17c   : > { %4860 = vmatmul.bf16.vlgmr.msra.gmra.mxu3 %v10661_v2  ;;  %4873 = vmatpush.bf16.msrb.mxu0 %v6148_v59  ;;  %v6332_v36 = vor.u32 %v8536_v34, %v6329_v38  ;;  %v4557_v10 = vpop.f32.mrf.mxu3  ;;  %v6089_v34 = vld [vmem:[%s11511_s0 + $0x230] sm:$0xf0]  ;;  %v6196_v38 = vor.u32 %v8502_v42, %v6193_v32  ;;  %v8479_v42 = vld [vmem:[%s11511_s0 + $0x234] sm:$0xf0]  ;;  %v6097_v32 = vld [vmem:[%s11511_s0 + $0x238] sm:$0xf0] }
 0x17d   : > { %4892 = vmatpush.bf16.msrb.mxu1 %v6212_v52  ;;  %v6260_v52 = vor.u32 %v8518_v63, %v6257_v60  ;;  %v6121_v63 = vld [vmem:[%s9397_s5 + $0x28] sm:$0xf0]  ;;  %v8500_v60 = vld [vmem:[%s9397_s5 + $0xa4] sm:$0xf]  ;;  %v8482_v2 = vld [vmem:[%s9397_s5 + $0x14] sm:$0xf] }
 0x17e   : > { %4911 = vmatpush.bf16.msrb.mxu2 %v6276_v3  ;;  %v4539_v3 = vadd.f32 %v4538_v26, %v4520_v31  ;;  %v8478_v31 = vld [vmem:[%s11511_s0 + $0x22c] sm:$0xf0]  ;;  %v6095_v26 = vld [vmem:[%s11511_s0 + $0x1a8] sm:$0xf]  ;;  %v6113_v47 = vld [vmem:[%s9397_s5 + $0x18] sm:$0xf0] }
 0x17f   : > { %4930 = vmatpush.bf16.msrb.mxu3 %v6340_v21  ;;  %v4502_v59 = vpop.f32.mrf.mxu0  ;;  %v4521_v30 = vpop.f32.mrf.mxu1  ;;  %v6132_v21 = vor.u32 %v8486_v37, %v6129_v4  ;;  %v8532_v37 = vld [vmem:[%s9397_s5 + $0x1a4] sm:$0xf]  ;;  %v6313_v4 = vld [vmem:[%s9397_s5 + $0x1a8] sm:$0xf0] }
 0x180   : > { %v4503_v35 = vadd.f32 %v4502_v59, %v10594_v43  ;;  %4874 = vmatpush.bf16.msrb.mxu0 %v6140_v61  ;;  %v10689_v58 = vadd.f32 %v4557_v10, %v4539_v3  ;;  %v6087_v43 = vld [vmem:[%s11511_s0 + $0x1a0] sm:$0xf]  ;;  %v8484_v61 = vld [vmem:[%s9397_s5 + $0x24] sm:$0xf]  ;;  %v8461_v10 = vld [vmem:[%s11511_s0 + $0x1ac] sm:$0xf] }
 0x181   : > { %4893 = vmatpush.bf16.msrb.mxu1 %v6204_v11  ;;  %v8514_v3 = vld [vmem:[%s9397_s5 + $0x114] sm:$0xf]  ;;  %v6241_v59 = vld [vmem:[%s9397_s5 + $0x118] sm:$0xf0]  ;;  %v10726_v55 = vor.u32 %v8478_v31, %v6087_v43 }
 0x182   : > { %4912 = vmatpush.bf16.msrb.mxu2 %v6268_v12  ;;  %v6324_v12 = vor.u32 %v8534_v7, %v6321_v33  ;;  %v4522_v11 = vadd.f32 %v4521_v30, %v4503_v35  ;;  %v6252_v7 = vor.u32 %v8516_v49, %v6249_v16  ;;  %v6124_v33 = vor.u32 %v8484_v61, %v6121_v63  ;;  %v4540_v41 = vpop.f32.mrf.mxu2  ;;  %v8530_v49 = vld [vmem:[%s9397_s5 + $0x194] sm:$0xf]  ;;  %v6305_v16 = vld [vmem:[%s9397_s5 + $0x198] sm:$0xf0] }
 0x183   : > { %4931 = vmatpush.bf16.msrb.mxu3 %v6332_v36  ;;  %v6185_v36 = vld [vmem:[%s9397_s5 + $0xa8] sm:$0xf0]  ;;  %v6316_v35 = vor.u32 %v8532_v37, %v6313_v4  ;;  %v10733_v63 = vor.u32 %v8479_v42, %v6095_v26  ;;  %v6244_v31 = vor.u32 %v8514_v3, %v6241_v59  ;;  %v6308_v26 = vor.u32 %v8530_v49, %v6305_v16 }
 0x184   : > { %4875 = vmatpush.bf16.msrb.mxu0 %v6132_v21  ;;  %v6188_v30 = vor.u32 %v8500_v60, %v6185_v36  ;;  %v4559_v15 = vpop.f32.mrf.mxu3  ;;  %v6177_v21 = vld [vmem:[%s9397_s5 + $0x98] sm:$0xf0]  ;;  %v10735_v60 = vor.u32 %v8461_v10, %v6097_v32  ;;  %v8512_v36 = vld [vmem:[%s9397_s5 + $0x104] sm:$0xf]  ;;  %v6169_v42 = vld [vmem:[%s9397_s5 + $0x88] sm:$0xf0] }
 0x185   : > { %4894 = vmatpush.bf16.msrb.mxu1 %v6196_v38  ;;  %v4541_v38 = vadd.f32 %v4540_v41, %v4522_v11  ;;  %11603 = vst [vmem:[#allocation49_spill] sm:$0xff] %v10733_v63  ;;  %v8480_v41 = vld [vmem:[%s9397_s5 + $0x4] sm:$0xf]  ;;  %v6105_v11 = vld [vmem:[%s9397_s5 + $0x8] sm:$0xf0]  ;;  %v6180_v4 = vor.u32 %v8498_v62, %v6177_v21 }
 0x186   : > { %4913 = vmatpush.bf16.msrb.mxu2 %v6260_v52  ;;  %v10728_v52 = vor.u32 %v8460_v19, %v6089_v34  ;;  %11604 = vst [vmem:[#allocation50_spill] sm:$0xff] %v10735_v60  ;;  %v6116_v19 = vor.u32 %v8482_v2, %v6113_v47  ;;  %v6233_v34 = vld [vmem:[%s9397_s5 + $0x108] sm:$0xf0]  ;;  %v8528_v10 = vld [vmem:[%s9397_s5 + $0x184] sm:$0xf]  ;;  %v6108_v59 = vor.u32 %v8480_v41, %v6105_v11 }
 0x187   : > { %4932 = vmatpush.bf16.msrb.mxu3 %v6324_v12  ;;  %v4505_v12 = vpop.f32.mrf.mxu0  ;;  %v4524_v61 = vpop.f32.mrf.mxu1  ;;  %v10742_v37 = vadd.f32 %v4559_v15, %v4541_v38  ;;  %v6297_v15 = vld [vmem:[%s9397_s5 + $0x188] sm:$0xf0]  ;;  %v8590_v47 = vld [vmem:[%s9397_s5 + $0x374] sm:$0xf]  ;;  %v6545_v2 = vld [vmem:[%s9397_s5 + $0x378] sm:$0xf0]  ;;  %v6236_v3 = vor.u32 %v8512_v36, %v6233_v34 }
 0x188   : > { %v4506_v43 = vadd.f32 %v4505_v12, %v10621_v27  ;;  %4876 = vmatpush.bf16.msrb.mxu0 %v6124_v33  ;;  %v8496_v27 = vld [vmem:[%s9397_s5 + $0x84] sm:$0xf]  ;;  %4846 = vmatmul.bf16.gmra.mxu2 %v10733_v63  ;;  %v8558_v62 = vld [vmem:[%s9397_s5 + $0x274] sm:$0xf]  ;;  %v6609_v21 = vld [vmem:[%s9397_s5 + $0x3f8] sm:$0xf0]  ;;  %v6300_v16 = vor.u32 %v8528_v10, %v6297_v15 }
 0x189   : > { %4895 = vmatpush.bf16.msrb.mxu1 %v6188_v30  ;;  %4808 = vmatmul.bf16.gmra.mxu0 %v10726_v55  ;;  %v8574_v33 = vld [vmem:[%s9397_s5 + $0x2f4] sm:$0xf]  ;;  %v6481_v30 = vld [vmem:[%s9397_s5 + $0x2f8] sm:$0xf0]  ;;  %v6172_v49 = vor.u32 %v8496_v27, %v6169_v42  ;;  %v6537_v36 = vld [vmem:[%s9397_s5 + $0x368] sm:$0xf0] }
 0x18a   : > { %4914 = vmatpush.bf16.msrb.mxu2 %v6252_v7  ;;  %v4525_v32 = vadd.f32 %v4524_v61, %v4506_v43  ;;  %4827 = vmatmul.bf16.gmra.mxu1 %v10728_v52  ;;  %v6417_v7 = vld [vmem:[%s9397_s5 + $0x278] sm:$0xf0]  ;;  %v6548_v61 = vor.u32 %v8590_v47, %v6545_v2  ;;  %v6484_v11 = vor.u32 %v8574_v33, %v6481_v30  ;;  %v6409_v63 = vld [vmem:[%s9397_s5 + $0x268] sm:$0xf0]  ;;  %v8604_v10 = vld [vmem:[%s9397_s5 + $0x3e4] sm:$0xf] }
 0x18b   : > { %4933 = vmatpush.bf16.msrb.mxu3 %v6316_v35  ;;  %v8606_v35 = vld [vmem:[%s9397_s5 + $0x3f4] sm:$0xf]  ;;  %v4543_v38 = vpop.f32.mrf.mxu2  ;;  %v6420_v43 = vor.u32 %v8558_v62, %v6417_v7  ;;  %v6473_v42 = vld [vmem:[%s9397_s5 + $0x2e8] sm:$0xf0]  ;;  %v6401_v30 = vld [vmem:[%s9397_s5 + $0x258] sm:$0xf0] }
 0x18c   : > { %4865 = vmatmul.bf16.gmra.mxu3 %v10735_v60  ;;  %4877 = vmatpush.bf16.msrb.mxu0 %v6116_v19  ;;  %v4562_v12 = vpop.f32.mrf.mxu3  ;;  %v4544_v19 = vadd.f32 %v4543_v38, %v4525_v32  ;;  %v6612_v60 = vor.u32 %v8606_v35, %v6609_v21  ;;  %v6601_v15 = vld [vmem:[%s9397_s5 + $0x3e8] sm:$0xf0]  ;;  %v8586_v33 = vld [vmem:[%s9397_s5 + $0x354] sm:$0xf] }
 0x18d   : > { %4896 = vmatpush.bf16.msrb.mxu1 %v6180_v4  ;;  %v8556_v4 = vld [vmem:[%s9397_s5 + $0x264] sm:$0xf]  ;;  %v6604_v7 = vor.u32 %v8604_v10, %v6601_v15  ;;  %v8570_v35 = vld [vmem:[%s9397_s5 + $0x2d4] sm:$0xf] }
 0x18e   : > { %4915 = vmatpush.bf16.msrb.mxu2 %v6244_v31  ;;  %v8588_v31 = vld [vmem:[%s9397_s5 + $0x364] sm:$0xf]  ;;  %v10769_v47 = vadd.f32 %v4562_v12, %v4544_v19  ;;  %v8602_v38 = vld [vmem:[%s9397_s5 + $0x3d4] sm:$0xf] }
 0x18f   : > { %4934 = vmatpush.bf16.msrb.mxu3 %v6308_v26  ;;  %v4507_v34 = vpop.f32.mrf.mxu0  ;;  %v4526_v41 = vpop.f32.mrf.mxu1  ;;  %v8572_v26 = vld [vmem:[%s9397_s5 + $0x2e4] sm:$0xf]  ;;  %v6540_v2 = vor.u32 %v8588_v31, %v6537_v36 }
 0x190   : > { %v4508_v27 = vadd.f32 %v4507_v34, %v10666_v20  ;;  %4878 = vmatpush.bf16.msrb.mxu0 %v6108_v59  ;;  %v6412_v20 = vor.u32 %v8556_v4, %v6409_v63  ;;  %v6476_v62 = vor.u32 %v8572_v26, %v6473_v42  ;;  %v8554_v59 = vld [vmem:[%s9397_s5 + $0x254] sm:$0xf]  ;;  %v6593_v63 = vld [vmem:[%s9397_s5 + $0x3d8] sm:$0xf0]  ;;  %v8584_v19 = vld [vmem:[%s9397_s5 + $0x344] sm:$0xf] }
 0x191   : > { %4897 = vmatpush.bf16.msrb.mxu1 %v6172_v49  ;;  %v6404_v36 = vor.u32 %v8554_v59, %v6401_v30  ;;  %v6521_v34 = vld [vmem:[%s9397_s5 + $0x348] sm:$0xf0]  ;;  %v6596_v4 = vor.u32 %v8602_v38, %v6593_v63  ;;  %v8552_v26 = vld [vmem:[%s9397_s5 + $0x244] sm:$0xf]  ;;  %v6449_v30 = vld [vmem:[%s9397_s5 + $0x2b8] sm:$0xf0] }
 0x192   : > { %4916 = vmatpush.bf16.msrb.mxu2 %v6236_v3  ;;  %v4527_v32 = vadd.f32 %v4526_v41, %v4508_v27  ;;  %v6529_v3 = vld [vmem:[%s9397_s5 + $0x358] sm:$0xf0]  ;;  %v6393_v27 = vld [vmem:[%s9397_s5 + $0x248] sm:$0xf0]  ;;  %v8568_v42 = vld [vmem:[%s9397_s5 + $0x2c4] sm:$0xf] }
 0x193   : > { %4935 = vmatpush.bf16.msrb.mxu3 %v6300_v16  ;;  %v4545_v21 = vpop.f32.mrf.mxu2  ;;  %v6465_v16 = vld [vmem:[%s9397_s5 + $0x2d8] sm:$0xf0]  ;;  %v6532_v31 = vor.u32 %v8586_v33, %v6529_v3  ;;  %v8600_v15 = vld [vmem:[%s9397_s5 + $0x3c4] sm:$0xf]  ;;  %v8550_v33 = vld [vmem:[%s9397_s5 + $0x234] sm:$0xf] }
 0x194   : > { %4947 = vmatpush.bf16.msra.mxu0 %v6420_v43  ;;  %v4564_v49 = vpop.f32.mrf.mxu3  ;;  %v6385_v3 = vld [vmem:[%s9397_s5 + $0x238] sm:$0xf0] }
 0x195   : > { %4966 = vmatpush.bf16.msra.mxu1 %v6484_v11  ;;  %v6468_v11 = vor.u32 %v8570_v35, %v6465_v16  ;;  %v8598_v35 = vld [vmem:[%s9397_s5 + $0x3b4] sm:$0xf] }
 0x196   : > { %4985 = vmatpush.bf16.msra.mxu2 %v6548_v61 }
 0x197   : > { %5004 = vmatpush.bf16.msra.mxu3 %v6612_v60  ;;  %v4546_v60 = vadd.f32 %v4545_v21, %v4527_v32  ;;  %v4576_v12 = vpop.f32.mrf.mxu0  ;;  %v4595_v61 = vpop.f32.mrf.mxu1  ;;  %v6585_v32 = vld [vmem:[%s9397_s5 + $0x3c8] sm:$0xf0]  ;;  %v6577_v21 = vld [vmem:[%s9397_s5 + $0x3b8] sm:$0xf0] }
 0x198   : > { %4948 = vmatpush.bf16.msra.mxu0 %v6412_v20  ;;  %v4577_v43 = vadd.f32 %v4576_v12, %v10689_v58  ;;  %v6457_v58 = vld [vmem:[%s9397_s5 + $0x2c8] sm:$0xf0]  ;;  %4917 = vmatmul.bf16.vlgmr.msrb.gmra.mxu2 %v9515_v54  ;;  %v6396_v20 = vor.u32 %v8552_v26, %v6393_v27  ;;  %v8566_v54 = vld [vmem:[%s9397_s5 + $0x2b4] sm:$0xf]  ;;  %v6388_v12 = vor.u32 %v8550_v33, %v6385_v3  ;;  %v8596_v27 = vld [vmem:[%s9397_s5 + $0x3a4] sm:$0xf] }
 0x199   : > { %4967 = vmatpush.bf16.msra.mxu1 %v6476_v62  ;;  %v10782_v41 = vadd.f32 %v4564_v49, %v4546_v60  ;;  %4879 = vmatmul.bf16.vlgmr.msrb.gmra.mxu0 %v9508_v48  ;;  %v8582_v48 = vld [vmem:[%s9397_s5 + $0x334] sm:$0xf]  ;;  %v6513_v62 = vld [vmem:[%s9397_s5 + $0x338] sm:$0xf0]  ;;  %v6441_v26 = vld [vmem:[%s9397_s5 + $0x2a8] sm:$0xf0] }
 0x19a   : > { %4986 = vmatpush.bf16.msra.mxu2 %v6540_v2  ;;  %v4596_v10 = vadd.f32 %v4595_v61, %v4577_v43  ;;  %4898 = vmatmul.bf16.vlgmr.msrb.gmra.mxu1 %v9513_v53  ;;  %v6524_v2 = vor.u32 %v8584_v19, %v6521_v34  ;;  %v6460_v53 = vor.u32 %v8568_v42, %v6457_v58  ;;  %v8580_v61 = vld [vmem:[%s9397_s5 + $0x324] sm:$0xf]  ;;  %v6505_v43 = vld [vmem:[%s9397_s5 + $0x328] sm:$0xf0]  ;;  %v6433_v3 = vld [vmem:[%s9397_s5 + $0x298] sm:$0xf0] }
 0x19b   : > { %5005 = vmatpush.bf16.msra.mxu3 %v6604_v7  ;;  %v6588_v7 = vor.u32 %v8600_v15, %v6585_v32  ;;  %v4614_v59 = vpop.f32.mrf.mxu2  ;;  %v6516_v60 = vor.u32 %v8582_v48, %v6513_v62  ;;  %v6580_v19 = vor.u32 %v8598_v35, %v6577_v21  ;;  %v8548_v34 = vld [vmem:[%s9397_s5 + $0x224] sm:$0xf]  ;;  %v6569_v42 = vld [vmem:[%s9397_s5 + $0x3a8] sm:$0xf0]  ;;  %v8578_v15 = vld [vmem:[%s9397_s5 + $0x314] sm:$0xf] }
 0x19c   : > { %4936 = vmatmul.bf16.vlgmr.msrb.gmra.mxu3 %v9519_v57  ;;  %4949 = vmatpush.bf16.msra.mxu0 %v6404_v36  ;;  %v4615_v49 = vadd.f32 %v4614_v59, %v4596_v10  ;;  %v6452_v36 = vor.u32 %v8566_v54, %v6449_v30  ;;  %v6508_v10 = vor.u32 %v8580_v61, %v6505_v43  ;;  %v6497_v32 = vld [vmem:[%s9397_s5 + $0x318] sm:$0xf0]  ;;  %v8546_v48 = vld [vmem:[%s9397_s5 + $0x214] sm:$0xf]  ;;  %v8576_v21 = vld [vmem:[%s9397_s5 + $0x304] sm:$0xf] }
 0x19d   : > { %4968 = vmatpush.bf16.msra.mxu1 %v6468_v11  ;;  %v6377_v11 = vld [vmem:[%s9397_s5 + $0x228] sm:$0xf0]  ;;  %v6369_v62 = vld [vmem:[%s9397_s5 + $0x218] sm:$0xf0]  ;;  %v8594_v54 = vld [vmem:[%s9397_s5 + $0x394] sm:$0xf] }
 0x19e   : > { %4987 = vmatpush.bf16.msra.mxu2 %v6532_v31  ;;  %v6380_v58 = vor.u32 %v8548_v34, %v6377_v11  ;;  %v6561_v59 = vld [vmem:[%s9397_s5 + $0x398] sm:$0xf0]  ;;  %v8592_v34 = vld [vmem:[%s9397_s5 + $0x384] sm:$0xf] }
 0x19f   : > { %5006 = vmatpush.bf16.msra.mxu3 %v6596_v4  ;;  %v4633_v57 = vpop.f32.mrf.mxu3  ;;  %v4578_v16 = vpop.f32.mrf.mxu0 }
 0x1a0   : > { %v4597_v38 = vpop.f32.mrf.mxu1  ;;  %v4579_v63 = vadd.f32 %v4578_v16, %v10742_v37  ;;  %4950 = vmatpush.bf16.msra.mxu0 %v6396_v20  ;;  %v10805_v31 = vadd.f32 %v4633_v57, %v4615_v49  ;;  %v8564_v37 = vld [vmem:[%s9397_s5 + $0x2a4] sm:$0xf]  ;;  %v6572_v20 = vor.u32 %v8596_v27, %v6569_v42  ;;  %v6500_v16 = vor.u32 %v8578_v15, %v6497_v32  ;;  %v8622_v27 = vld [vmem:[%s9397_s5 + $0x474] sm:$0xf]  ;;  %v6673_v42 = vld [vmem:[%s9397_s5 + $0x478] sm:$0xf0] }
 0x1a1   : > { %4969 = vmatpush.bf16.msra.mxu1 %v6460_v53  ;;  %v8562_v53 = vld [vmem:[%s9397_s5 + $0x294] sm:$0xf] }
 0x1a2   : > { %4988 = vmatpush.bf16.msra.mxu2 %v6524_v2  ;;  %v4598_v4 = vadd.f32 %v4597_v38, %v4579_v63  ;;  %v6444_v2 = vor.u32 %v8564_v37, %v6441_v26  ;;  %v6372_v38 = vor.u32 %v8546_v48, %v6369_v62  ;;  %v6489_v63 = vld [vmem:[%s9397_s5 + $0x308] sm:$0xf0]  ;;  %v6436_v43 = vor.u32 %v8562_v53, %v6433_v3  ;;  %v6801_v26 = vld [vmem:[%s9397_s5 + $0x578] sm:$0xf0]  ;;  %v8670_v32 = vld [vmem:[%s9397_s5 + $0x5f4] sm:$0xf] }
 0x1a3   : > { %5007 = vmatpush.bf16.msra.mxu3 %v6588_v7  ;;  %v4616_v7 = vpop.f32.mrf.mxu2  ;;  %v6553_v37 = vld [vmem:[%s9397_s5 + $0x388] sm:$0xf0]  ;;  %v6676_v62 = vor.u32 %v8622_v27, %v6673_v42  ;;  %v8652_v53 = vld [vmem:[%s9397_s5 + $0x564] sm:$0xf]  ;;  %v6721_v42 = vld [vmem:[%s9397_s5 + $0x4d8] sm:$0xf0] }
 0x1a4   : > { %4951 = vmatpush.bf16.msra.mxu0 %v6388_v12  ;;  %v4617_v57 = vadd.f32 %v4616_v7, %v4598_v4  ;;  %v6361_v12 = vld [vmem:[%s9397_s5 + $0x208] sm:$0xf0]  ;;  %v8654_v4 = vld [vmem:[%s9397_s5 + $0x574] sm:$0xf] }
 0x1a5   : > { %4970 = vmatpush.bf16.msra.mxu1 %v6452_v36  ;;  %v6564_v36 = vor.u32 %v8594_v54, %v6561_v59  ;;  %v6804_v48 = vor.u32 %v8654_v4, %v6801_v26  ;;  %v6793_v7 = vld [vmem:[%s9397_s5 + $0x568] sm:$0xf0]  ;;  %v8634_v4 = vld [vmem:[%s9397_s5 + $0x4d4] sm:$0xf] }
 0x1a6   : > { %4989 = vmatpush.bf16.msra.mxu2 %v6516_v60  ;;  %v8544_v60 = vld [vmem:[%s9397_s5 + $0x204] sm:$0xf] }
 0x1a7   : > { %5008 = vmatpush.bf16.msra.mxu3 %v6580_v19  ;;  %v4635_v33 = vpop.f32.mrf.mxu3  ;;  %v4581_v30 = vpop.f32.mrf.mxu0  ;;  %v6425_v19 = vld [vmem:[%s9397_s5 + $0x288] sm:$0xf0]  ;;  %v6364_v15 = vor.u32 %v8544_v60, %v6361_v12 }
 0x1a8   : > { %v4600_v35 = vpop.f32.mrf.mxu1  ;;  %v4582_v49 = vadd.f32 %v4581_v30, %v10769_v47  ;;  %4952 = vmatpush.bf16.msra.mxu0 %v6380_v58  ;;  %v10826_v61 = vadd.f32 %v4635_v33, %v4617_v57  ;;  %v8560_v47 = vld [vmem:[%s9397_s5 + $0x284] sm:$0xf]  ;;  %4922 = vmatmul.bf16.gmra.mxu2 %v9583_v51  ;;  %v6492_v58 = vor.u32 %v8576_v21, %v6489_v63  ;;  %v6857_v63 = vld [vmem:[%s9397_s5 + $0x5e8] sm:$0xf0] }
 0x1a9   : > { %4971 = vmatpush.bf16.msra.mxu1 %v6444_v2  ;;  %4884 = vmatmul.bf16.gmra.mxu0 %v9576_v44  ;;  %v6737_v44 = vld [vmem:[%s9397_s5 + $0x4f8] sm:$0xf0]  ;;  %v6556_v51 = vor.u32 %v8592_v34, %v6553_v37  ;;  %v8620_v30 = vld [vmem:[%s9397_s5 + $0x464] sm:$0xf] }
 0x1aa   : > { %4990 = vmatpush.bf16.msra.mxu2 %v6508_v10  ;;  %v4601_v11 = vadd.f32 %v4600_v35, %v4582_v49  ;;  %4903 = vmatmul.bf16.gmra.mxu1 %v9581_v50  ;;  %v8638_v10 = vld [vmem:[%s9397_s5 + $0x4f4] sm:$0xf]  ;;  %v6865_v2 = vld [vmem:[%s9397_s5 + $0x5f8] sm:$0xf0]  ;;  %v6428_v50 = vor.u32 %v8560_v47, %v6425_v19  ;;  %v6665_v35 = vld [vmem:[%s9397_s5 + $0x468] sm:$0xf0] }
 0x1ab   : > { %5009 = vmatpush.bf16.msra.mxu3 %v6572_v20  ;;  %v6740_v59 = vor.u32 %v8638_v10, %v6737_v44  ;;  %v6868_v57 = vor.u32 %v8670_v32, %v6865_v2  ;;  %v8636_v21 = vld [vmem:[%s9397_s5 + $0x4e4] sm:$0xf]  ;;  %v8650_v19 = vld [vmem:[%s9397_s5 + $0x554] sm:$0xf]  ;;  %v6785_v34 = vld [vmem:[%s9397_s5 + $0x558] sm:$0xf0] }
 0x1ac   : > { %4941 = vmatmul.bf16.gmra.mxu3 %v9587_v56  ;;  %4953 = vmatpush.bf16.msra.mxu0 %v6372_v38  ;;  %v4619_v56 = vpop.f32.mrf.mxu2  ;;  %v8668_v38 = vld [vmem:[%s9397_s5 + $0x5e4] sm:$0xf]  ;;  %v6657_v37 = vld [vmem:[%s9397_s5 + $0x458] sm:$0xf0]  ;;  %v8666_v10 = vld [vmem:[%s9397_s5 + $0x5d4] sm:$0xf] }
 0x1ad   : > { %4972 = vmatpush.bf16.msra.mxu1 %v6436_v43  ;;  %v4620_v33 = vadd.f32 %v4619_v56, %v4601_v11  ;;  %v6796_v43 = vor.u32 %v8652_v53, %v6793_v7  ;;  %v6860_v47 = vor.u32 %v8668_v38, %v6857_v63  ;;  %v8618_v11 = vld [vmem:[%s9397_s5 + $0x454] sm:$0xf]  ;;  %v8648_v56 = vld [vmem:[%s9397_s5 + $0x544] sm:$0xf]  ;;  %v6641_v38 = vld [vmem:[%s9397_s5 + $0x438] sm:$0xf0] }
 0x1ae   : > { %4991 = vmatpush.bf16.msra.mxu2 %v6500_v16  ;;  %v6729_v16 = vld [vmem:[%s9397_s5 + $0x4e8] sm:$0xf0]  ;;  %v8616_v7 = vld [vmem:[%s9397_s5 + $0x444] sm:$0xf] }
 0x1af   : > { %5010 = vmatpush.bf16.msra.mxu3 %v6564_v36  ;;  %v4638_v20 = vpop.f32.mrf.mxu3  ;;  %v4583_v3 = vpop.f32.mrf.mxu0  ;;  %v6732_v36 = vor.u32 %v8636_v21, %v6729_v16  ;;  %v6769_v21 = vld [vmem:[%s9397_s5 + $0x538] sm:$0xf0]  ;;  %v8614_v16 = vld [vmem:[%s9397_s5 + $0x434] sm:$0xf] }
 0x1b0   : > { %v4602_v54 = vpop.f32.mrf.mxu1  ;;  %v4584_v49 = vadd.f32 %v4583_v3, %v10782_v41  ;;  %4954 = vmatpush.bf16.msra.mxu0 %v6364_v15  ;;  %v10853_v60 = vadd.f32 %v4638_v20, %v4620_v33  ;;  %v6668_v41 = vor.u32 %v8620_v30, %v6665_v35  ;;  %v6777_v20 = vld [vmem:[%s9397_s5 + $0x548] sm:$0xf0]  ;;  %v8632_v3 = vld [vmem:[%s9397_s5 + $0x4c4] sm:$0xf] }
 0x1b1   : > { %4973 = vmatpush.bf16.msra.mxu1 %v6428_v50  ;;  %v6788_v50 = vor.u32 %v8650_v19, %v6785_v34  ;;  %v6649_v33 = vld [vmem:[%s9397_s5 + $0x448] sm:$0xf0]  ;;  %v6780_v30 = vor.u32 %v8648_v56, %v6777_v20  ;;  %v8642_v20 = vld [vmem:[%s9397_s5 + $0x514] sm:$0xf] }
 0x1b2   : > { %4992 = vmatpush.bf16.msra.mxu2 %v6492_v58  ;;  %v4603_v12 = vadd.f32 %v4602_v54, %v4584_v49  ;;  %v6849_v58 = vld [vmem:[%s9397_s5 + $0x5d8] sm:$0xf0]  ;;  %v6652_v35 = vor.u32 %v8616_v7, %v6649_v33  ;;  %v8610_v33 = vld [vmem:[%s9397_s5 + $0x414] sm:$0xf] }
 0x1b3   : > { %5011 = vmatpush.bf16.msra.mxu3 %v6556_v51  ;;  %v6660_v51 = vor.u32 %v8618_v11, %v6657_v37  ;;  %v6852_v53 = vor.u32 %v8666_v10, %v6849_v58  ;;  %v6644_v37 = vor.u32 %v8614_v16, %v6641_v38  ;;  %v8612_v58 = vld [vmem:[%s9397_s5 + $0x424] sm:$0xf] }
 0x1b4   : > { %5023 = vmatpush.bf16.msrb.mxu0 %v6676_v62  ;;  %v4621_v26 = vpop.f32.mrf.mxu2  ;;  %v6724_v62 = vor.u32 %v8634_v4, %v6721_v42  ;;  %v8644_v4 = vld [vmem:[%s9397_s5 + $0x524] sm:$0xf] }
 0x1b5   : > { %5042 = vmatpush.bf16.msrb.mxu1 %v6740_v59  ;;  %v4622_v15 = vadd.f32 %v4621_v26, %v4603_v12  ;;  %v8664_v59 = vld [vmem:[%s9397_s5 + $0x5c4] sm:$0xf]  ;;  %v6705_v12 = vld [vmem:[%s9397_s5 + $0x4b8] sm:$0xf0]  ;;  %v6761_v26 = vld [vmem:[%s9397_s5 + $0x528] sm:$0xf0] }
 0x1b6   : > { %5061 = vmatpush.bf16.msrb.mxu2 %v6804_v48 }
 0x1b7   : > { %5080 = vmatpush.bf16.msrb.mxu3 %v6868_v57  ;;  %v4640_v27 = vpop.f32.mrf.mxu3  ;;  %v4652_v44 = vpop.f32.mrf.mxu0  ;;  %v6841_v57 = vld [vmem:[%s9397_s5 + $0x5c8] sm:$0xf0] }
 0x1b8   : > { %5024 = vmatpush.bf16.msrb.mxu0 %v6668_v41  ;;  %v4671_v32 = vpop.f32.mrf.mxu1  ;;  %v4653_v2 = vadd.f32 %v4652_v44, %v10805_v31  ;;  %v10866_v48 = vadd.f32 %v4640_v27, %v4622_v15  ;;  %v6713_v31 = vld [vmem:[%s9397_s5 + $0x4c8] sm:$0xf0]  ;;  %4993 = vmatmul.bf16.vlgmr.msra.gmra.mxu2 %v9659_v5  ;;  %v6844_v49 = vor.u32 %v8664_v59, %v6841_v57  ;;  %v8630_v5 = vld [vmem:[%s9397_s5 + $0x4b4] sm:$0xf]  ;;  %v6833_v41 = vld [vmem:[%s9397_s5 + $0x5b8] sm:$0xf0] }
 0x1b9   : > { %5043 = vmatpush.bf16.msrb.mxu1 %v6732_v36  ;;  %4955 = vmatmul.bf16.vlgmr.msra.gmra.mxu0 %v9652_v0  ;;  %v8646_v0 = vld [vmem:[%s9397_s5 + $0x534] sm:$0xf]  ;;  %v6708_v42 = vor.u32 %v8630_v5, %v6705_v12  ;;  %v6633_v15 = vld [vmem:[%s9397_s5 + $0x428] sm:$0xf0]  ;;  %v6689_v57 = vld [vmem:[%s9397_s5 + $0x498] sm:$0xf0] }
 0x1ba   : > { %5062 = vmatpush.bf16.msrb.mxu2 %v6796_v43  ;;  %v4672_v54 = vadd.f32 %v4671_v32, %v4653_v2  ;;  %4974 = vmatmul.bf16.vlgmr.msra.gmra.mxu1 %v9654_v1  ;;  %v6716_v1 = vor.u32 %v8632_v3, %v6713_v31  ;;  %v8662_v43 = vld [vmem:[%s9397_s5 + $0x5b4] sm:$0xf]  ;;  %v6772_v11 = vor.u32 %v8646_v0, %v6769_v21  ;;  %v6697_v32 = vld [vmem:[%s9397_s5 + $0x4a8] sm:$0xf0]  ;;  %v8660_v2 = vld [vmem:[%s9397_s5 + $0x5a4] sm:$0xf] }
 0x1bb   : > { %5081 = vmatpush.bf16.msrb.mxu3 %v6860_v47  ;;  %v6836_v10 = vor.u32 %v8662_v43, %v6833_v41  ;;  %v6636_v56 = vor.u32 %v8612_v58, %v6633_v15  ;;  %v6625_v3 = vld [vmem:[%s9397_s5 + $0x418] sm:$0xf0]  ;;  %v6617_v12 = vld [vmem:[%s9397_s5 + $0x408] sm:$0xf0] }
 0x1bc   : > { %5012 = vmatmul.bf16.vlgmr.msra.gmra.mxu3 %v9661_v6  ;;  %5025 = vmatpush.bf16.msrb.mxu0 %v6660_v51  ;;  %v4690_v63 = vpop.f32.mrf.mxu2  ;;  %v6764_v51 = vor.u32 %v8644_v4, %v6761_v26  ;;  %v6628_v5 = vor.u32 %v8610_v33, %v6625_v3  ;;  %v7057_v4 = vld [vmem:[%s9397_s5 + $0x778] sm:$0xf0]  ;;  %v8686_v26 = vld [vmem:[%s9397_s5 + $0x674] sm:$0xf]  ;;  %v8684_v3 = vld [vmem:[%s9397_s5 + $0x664] sm:$0xf] }
 0x1bd   : > { %5044 = vmatpush.bf16.msrb.mxu1 %v6724_v62  ;;  %v4691_v36 = vadd.f32 %v4690_v63, %v4672_v54  ;;  %v6753_v62 = vld [vmem:[%s9397_s5 + $0x518] sm:$0xf0]  ;;  %v8626_v54 = vld [vmem:[%s9397_s5 + $0x494] sm:$0xf]  ;;  %v6745_v63 = vld [vmem:[%s9397_s5 + $0x508] sm:$0xf0] }
 0x1be   : > { %5063 = vmatpush.bf16.msrb.mxu2 %v6788_v50  ;;  %v6825_v50 = vld [vmem:[%s9397_s5 + $0x5a8] sm:$0xf0]  ;;  %v6756_v38 = vor.u32 %v8642_v20, %v6753_v62  ;;  %v6692_v41 = vor.u32 %v8626_v54, %v6689_v57 }
 0x1bf   : > { %5082 = vmatpush.bf16.msrb.mxu3 %v6852_v53  ;;  %v4709_v6 = vpop.f32.mrf.mxu3  ;;  %v4654_v47 = vpop.f32.mrf.mxu0  ;;  %v6828_v7 = vor.u32 %v8660_v2, %v6825_v50  ;;  %v6921_v54 = vld [vmem:[%s9397_s5 + $0x668] sm:$0xf0] }
 0x1c0   : > { %v4673_v19 = vpop.f32.mrf.mxu1  ;;  %v4655_v34 = vadd.f32 %v4654_v47, %v10826_v61  ;;  %5026 = vmatpush.bf16.msrb.mxu0 %v6652_v35  ;;  %v10889_v27 = vadd.f32 %v4709_v6, %v4691_v36  ;;  %v8628_v61 = vld [vmem:[%s9397_s5 + $0x4a4] sm:$0xf]  ;;  %v6817_v35 = vld [vmem:[%s9397_s5 + $0x598] sm:$0xf0]  ;;  %v6681_v47 = vld [vmem:[%s9397_s5 + $0x488] sm:$0xf0] }
 0x1c1   : > { %5045 = vmatpush.bf16.msrb.mxu1 %v6716_v1  ;;  %v6700_v53 = vor.u32 %v8628_v61, %v6697_v32  ;;  %v8608_v6 = vld [vmem:[%s9397_s5 + $0x404] sm:$0xf]  ;;  %v8734_v61 = vld [vmem:[%s9397_s5 + $0x7f4] sm:$0xf]  ;;  %v6985_v57 = vld [vmem:[%s9397_s5 + $0x6e8] sm:$0xf0] }
 0x1c2   : > { %5064 = vmatpush.bf16.msrb.mxu2 %v6780_v30  ;;  %v4674_v44 = vadd.f32 %v4673_v19, %v4655_v34  ;;  %v8658_v30 = vld [vmem:[%s9397_s5 + $0x594] sm:$0xf]  ;;  %v8656_v19 = vld [vmem:[%s9397_s5 + $0x584] sm:$0xf]  ;;  %v6620_v15 = vor.u32 %v8608_v6, %v6617_v12  ;;  %v6913_v6 = vld [vmem:[%s9397_s5 + $0x658] sm:$0xf0] }
 0x1c3   : > { %5083 = vmatpush.bf16.msrb.mxu3 %v6844_v49  ;;  %v8640_v49 = vld [vmem:[%s9397_s5 + $0x504] sm:$0xf]  ;;  %v6820_v36 = vor.u32 %v8658_v30, %v6817_v35  ;;  %v7113_v35 = vld [vmem:[%s9397_s5 + $0x7e8] sm:$0xf0]  ;;  %v8698_v12 = vld [vmem:[%s9397_s5 + $0x6d4] sm:$0xf] }
 0x1c4   : > { %5027 = vmatpush.bf16.msrb.mxu0 %v6644_v37  ;;  %v4692_v31 = vpop.f32.mrf.mxu2  ;;  %v8718_v37 = vld [vmem:[%s9397_s5 + $0x774] sm:$0xf]  ;;  %v6748_v58 = vor.u32 %v8640_v49, %v6745_v63  ;;  %v8732_v30 = vld [vmem:[%s9397_s5 + $0x7e4] sm:$0xf] }
 0x1c5   : > { %5046 = vmatpush.bf16.msrb.mxu1 %v6708_v42  ;;  %v4693_v0 = vadd.f32 %v4692_v31, %v4674_v44  ;;  %v6929_v42 = vld [vmem:[%s9397_s5 + $0x678] sm:$0xf0]  ;;  %v7060_v2 = vor.u32 %v8718_v37, %v7057_v4  ;;  %v8700_v31 = vld [vmem:[%s9397_s5 + $0x6e4] sm:$0xf]  ;;  %v8682_v63 = vld [vmem:[%s9397_s5 + $0x654] sm:$0xf] }
 0x1c6   : > { %5065 = vmatpush.bf16.msrb.mxu2 %v6772_v11  ;;  %v6809_v11 = vld [vmem:[%s9397_s5 + $0x588] sm:$0xf0]  ;;  %v7121_v44 = vld [vmem:[%s9397_s5 + $0x7f8] sm:$0xf0]  ;;  %v6932_v50 = vor.u32 %v8686_v26, %v6929_v42  ;;  %v6988_v49 = vor.u32 %v8700_v31, %v6985_v57  ;;  %v6916_v42 = vor.u32 %v8682_v63, %v6913_v6 }
 0x1c7   : > { %5084 = vmatpush.bf16.msrb.mxu3 %v6836_v10  ;;  %v4711_v59 = vpop.f32.mrf.mxu3  ;;  %v4657_v21 = vpop.f32.mrf.mxu0  ;;  %v8702_v10 = vld [vmem:[%s9397_s5 + $0x6f4] sm:$0xf]  ;;  %v7124_v33 = vor.u32 %v8734_v61, %v7121_v44  ;;  %v8680_v44 = vld [vmem:[%s9397_s5 + $0x644] sm:$0xf]  ;;  %v6889_v63 = vld [vmem:[%s9397_s5 + $0x628] sm:$0xf0] }
 0x1c8   : > { %v4676_v1 = vpop.f32.mrf.mxu1  ;;  %v4658_v16 = vadd.f32 %v4657_v21, %v10853_v60  ;;  %5028 = vmatpush.bf16.msrb.mxu0 %v6636_v56  ;;  %v10910_v43 = vadd.f32 %v4711_v59, %v4693_v0  ;;  %v8624_v60 = vld [vmem:[%s9397_s5 + $0x484] sm:$0xf]  ;;  %4998 = vmatmul.bf16.gmra.mxu2 %v9727_v13  ;;  %v6812_v13 = vor.u32 %v8656_v19, %v6809_v11  ;;  %v7049_v56 = vld [vmem:[%s9397_s5 + $0x768] sm:$0xf0]  ;;  %v7105_v19 = vld [vmem:[%s9397_s5 + $0x7d8] sm:$0xf0] }
 0x1c9   : > { %5047 = vmatpush.bf16.msrb.mxu1 %v6700_v53  ;;  %4960 = vmatmul.bf16.gmra.mxu0 %v9720_v8  ;;  %v6993_v8 = vld [vmem:[%s9397_s5 + $0x6f8] sm:$0xf0] }
 0x1ca   : > { %5066 = vmatpush.bf16.msrb.mxu2 %v6764_v51  ;;  %v4677_v34 = vadd.f32 %v4676_v1, %v4658_v16  ;;  %4979 = vmatmul.bf16.gmra.mxu1 %v9722_v9  ;;  %v6684_v9 = vor.u32 %v8624_v60, %v6681_v47  ;;  %v8716_v51 = vld [vmem:[%s9397_s5 + $0x764] sm:$0xf]  ;;  %v7116_v16 = vor.u32 %v8732_v30, %v7113_v35  ;;  %v6977_v60 = vld [vmem:[%s9397_s5 + $0x6d8] sm:$0xf0]  ;;  %v8730_v47 = vld [vmem:[%s9397_s5 + $0x7d4] sm:$0xf] }
 0x1cb   : > { %5085 = vmatpush.bf16.msrb.mxu3 %v6828_v7  ;;  %v6996_v7 = vor.u32 %v8702_v10, %v6993_v8  ;;  %v7052_v1 = vor.u32 %v8716_v51, %v7049_v56  ;;  %v8712_v10 = vld [vmem:[%s9397_s5 + $0x744] sm:$0xf]  ;;  %v6980_v8 = vor.u32 %v8698_v12, %v6977_v60  ;;  %v7108_v61 = vor.u32 %v8730_v47, %v7105_v19  ;;  %v7025_v56 = vld [vmem:[%s9397_s5 + $0x738] sm:$0xf0]  ;;  %v6953_v12 = vld [vmem:[%s9397_s5 + $0x6a8] sm:$0xf0] }
 0x1cc   : > { %5017 = vmatmul.bf16.gmra.mxu3 %v9729_v14  ;;  %5029 = vmatpush.bf16.msrb.mxu0 %v6628_v5  ;;  %v4695_v14 = vpop.f32.mrf.mxu2  ;;  %v7041_v5 = vld [vmem:[%s9397_s5 + $0x758] sm:$0xf0]  ;;  %v8706_v19 = vld [vmem:[%s9397_s5 + $0x714] sm:$0xf] }
 0x1cd   : > { %5048 = vmatpush.bf16.msrb.mxu1 %v6692_v41  ;;  %v4696_v20 = vadd.f32 %v4695_v14, %v4677_v34 }
 0x1ce   : > { %5067 = vmatpush.bf16.msrb.mxu2 %v6756_v38  ;;  %v8714_v38 = vld [vmem:[%s9397_s5 + $0x754] sm:$0xf] }
 0x1cf   : > { %5086 = vmatpush.bf16.msrb.mxu3 %v6820_v36  ;;  %v4714_v32 = vpop.f32.mrf.mxu3  ;;  %v4659_v62 = vpop.f32.mrf.mxu0  ;;  %v7044_v26 = vor.u32 %v8714_v38, %v7041_v5  ;;  %v8676_v5 = vld [vmem:[%s9397_s5 + $0x624] sm:$0xf] }
 0x1d0   : > { %v4678_v53 = vpop.f32.mrf.mxu1  ;;  %v4660_v59 = vadd.f32 %v4659_v62, %v10866_v48  ;;  %5030 = vmatpush.bf16.msrb.mxu0 %v6620_v15  ;;  %v10937_v0 = vadd.f32 %v4714_v32, %v4696_v20  ;;  %v6924_v48 = vor.u32 %v8684_v3, %v6921_v54  ;;  %v8728_v32 = vld [vmem:[%s9397_s5 + $0x7c4] sm:$0xf]  ;;  %v8678_v62 = vld [vmem:[%s9397_s5 + $0x634] sm:$0xf]  ;;  %v7089_v54 = vld [vmem:[%s9397_s5 + $0x7b8] sm:$0xf0]  ;;  %v6892_v47 = vor.u32 %v8676_v5, %v6889_v63 }
 0x1d1   : > { %5049 = vmatpush.bf16.msrb.mxu1 %v6684_v9  ;;  %v6905_v9 = vld [vmem:[%s9397_s5 + $0x648] sm:$0xf0]  ;;  %v8726_v3 = vld [vmem:[%s9397_s5 + $0x7b4] sm:$0xf] }
 0x1d2   : > { %5068 = vmatpush.bf16.msrb.mxu2 %v6748_v58  ;;  %v4679_v21 = vadd.f32 %v4678_v53, %v4660_v59  ;;  %v7033_v58 = vld [vmem:[%s9397_s5 + $0x748] sm:$0xf0]  ;;  %v6908_v51 = vor.u32 %v8680_v44, %v6905_v9  ;;  %v6897_v53 = vld [vmem:[%s9397_s5 + $0x638] sm:$0xf0]  ;;  %v7092_v38 = vor.u32 %v8726_v3, %v7089_v54  ;;  %v8750_v54 = vld [vmem:[%s9397_s5 + $0x874] sm:$0xf] }
 0x1d3   : > { %5087 = vmatpush.bf16.msrb.mxu3 %v6812_v13  ;;  %v8696_v13 = vld [vmem:[%s9397_s5 + $0x6c4] sm:$0xf]  ;;  %v7073_v44 = vld [vmem:[%s9397_s5 + $0x798] sm:$0xf0]  ;;  %v7305_v5 = vld [vmem:[%s9397_s5 + $0x968] sm:$0xf0] }
 0x1d4   : > { %5099 = vmatpush.bf16.msra.mxu0 %v6932_v50  ;;  %v4697_v41 = vpop.f32.mrf.mxu2  ;;  %v7036_v50 = vor.u32 %v8712_v10, %v7033_v58  ;;  %v7313_v3 = vld [vmem:[%s9397_s5 + $0x978] sm:$0xf0] }
 0x1d5   : > { %5118 = vmatpush.bf16.msra.mxu1 %v6996_v7  ;;  %v4698_v34 = vadd.f32 %v4697_v41, %v4679_v21  ;;  %v6900_v21 = vor.u32 %v8678_v62, %v6897_v53  ;;  %v8724_v41 = vld [vmem:[%s9397_s5 + $0x7a4] sm:$0xf]  ;;  %v6937_v53 = vld [vmem:[%s9397_s5 + $0x688] sm:$0xf0] }
 0x1d6   : > { %5137 = vmatpush.bf16.msra.mxu2 %v7060_v2  ;;  %v7097_v2 = vld [vmem:[%s9397_s5 + $0x7c8] sm:$0xf0] }
 0x1d7   : > { %5156 = vmatpush.bf16.msra.mxu3 %v7124_v33  ;;  %v4716_v36 = vpop.f32.mrf.mxu3  ;;  %v4728_v11 = vpop.f32.mrf.mxu0  ;;  %v7100_v20 = vor.u32 %v8728_v32, %v7097_v2  ;;  %v6961_v33 = vld [vmem:[%s9397_s5 + $0x6b8] sm:$0xf0] }
 0x1d8   : > { %5100 = vmatpush.bf16.msra.mxu0 %v6924_v48  ;;  %v4747_v37 = vpop.f32.mrf.mxu1  ;;  %v4729_v4 = vadd.f32 %v4728_v11, %v10889_v27  ;;  %v10950_v15 = vadd.f32 %v4716_v36, %v4698_v34  ;;  %v6969_v27 = vld [vmem:[%s9397_s5 + $0x6c8] sm:$0xf0]  ;;  %5069 = vmatmul.bf16.vlgmr.msrb.gmra.mxu2 %v9797_v28  ;;  %v8694_v28 = vld [vmem:[%s9397_s5 + $0x6b4] sm:$0xf]  ;;  %v7009_v34 = vld [vmem:[%s9397_s5 + $0x718] sm:$0xf0] }
 0x1d9   : > { %5119 = vmatpush.bf16.msra.mxu1 %v6988_v49  ;;  %5031 = vmatmul.bf16.vlgmr.msrb.gmra.mxu0 %v9790_v23  ;;  %v8710_v23 = vld [vmem:[%s9397_s5 + $0x734] sm:$0xf]  ;;  %v7017_v48 = vld [vmem:[%s9397_s5 + $0x728] sm:$0xf0]  ;;  %v7012_v2 = vor.u32 %v8706_v19, %v7009_v34 }
 0x1da   : > { %5138 = vmatpush.bf16.msra.mxu2 %v7052_v1  ;;  %v4748_v14 = vadd.f32 %v4747_v37, %v4729_v4  ;;  %5050 = vmatmul.bf16.vlgmr.msrb.gmra.mxu1 %v9792_v24  ;;  %v6972_v24 = vor.u32 %v8696_v13, %v6969_v27  ;;  %v7028_v35 = vor.u32 %v8710_v23, %v7025_v56  ;;  %v8708_v1 = vld [vmem:[%s9397_s5 + $0x724] sm:$0xf]  ;;  %v7081_v36 = vld [vmem:[%s9397_s5 + $0x7a8] sm:$0xf0]  ;;  %v8674_v4 = vld [vmem:[%s9397_s5 + $0x614] sm:$0xf] }
 0x1db   : > { %5157 = vmatpush.bf16.msra.mxu3 %v7116_v16  ;;  %v6964_v16 = vor.u32 %v8694_v28, %v6961_v33  ;;  %v7020_v60 = vor.u32 %v8708_v1, %v7017_v48  ;;  %v7084_v37 = vor.u32 %v8724_v41, %v7081_v36  ;;  %v8704_v27 = vld [vmem:[%s9397_s5 + $0x704] sm:$0xf]  ;;  %v6873_v56 = vld [vmem:[%s9397_s5 + $0x608] sm:$0xf0]  ;;  %v8782_v33 = vld [vmem:[%s9397_s5 + $0x974] sm:$0xf] }
 0x1dc   : > { %5088 = vmatmul.bf16.vlgmr.msrb.gmra.mxu3 %v9799_v29  ;;  %5101 = vmatpush.bf16.msra.mxu0 %v6916_v42  ;;  %v4766_v7 = vpop.f32.mrf.mxu2  ;;  %v8690_v42 = vld [vmem:[%s9397_s5 + $0x694] sm:$0xf]  ;;  %v8672_v23 = vld [vmem:[%s9397_s5 + $0x604] sm:$0xf]  ;;  %v7316_v48 = vor.u32 %v8782_v33, %v7313_v3  ;;  %v7241_v34 = vld [vmem:[%s9397_s5 + $0x8e8] sm:$0xf0] }
 0x1dd   : > { %5120 = vmatpush.bf16.msra.mxu1 %v6980_v8  ;;  %v4767_v31 = vadd.f32 %v4766_v7, %v4748_v14  ;;  %v6945_v8 = vld [vmem:[%s9397_s5 + $0x698] sm:$0xf0]  ;;  %v8720_v28 = vld [vmem:[%s9397_s5 + $0x784] sm:$0xf] }
 0x1de   : > { %5139 = vmatpush.bf16.msra.mxu2 %v7044_v26  ;;  %v6881_v26 = vld [vmem:[%s9397_s5 + $0x618] sm:$0xf0]  ;;  %v8748_v36 = vld [vmem:[%s9397_s5 + $0x864] sm:$0xf] }
 0x1df   : > { %5158 = vmatpush.bf16.msra.mxu3 %v7108_v61  ;;  %v4785_v29 = vpop.f32.mrf.mxu3  ;;  %v4730_v59 = vpop.f32.mrf.mxu0  ;;  %v8722_v61 = vld [vmem:[%s9397_s5 + $0x794] sm:$0xf]  ;;  %v8744_v3 = vld [vmem:[%s9397_s5 + $0x844] sm:$0xf] }
 0x1e0   : > { %v4749_v57 = vpop.f32.mrf.mxu1  ;;  %v4731_v30 = vadd.f32 %v4730_v59, %v10910_v43  ;;  %5102 = vmatpush.bf16.msra.mxu0 %v6908_v51  ;;  %v10973_v49 = vadd.f32 %v4785_v29, %v4767_v31  ;;  %v8692_v43 = vld [vmem:[%s9397_s5 + $0x6a4] sm:$0xf]  ;;  %v7001_v51 = vld [vmem:[%s9397_s5 + $0x708] sm:$0xf0]  ;;  %v7076_v62 = vor.u32 %v8722_v61, %v7073_v44  ;;  %v7185_v31 = vld [vmem:[%s9397_s5 + $0x878] sm:$0xf0] }
 0x1e1   : > { %5121 = vmatpush.bf16.msra.mxu1 %v6972_v24  ;;  %v6956_v11 = vor.u32 %v8692_v43, %v6953_v12  ;;  %v7065_v29 = vld [vmem:[%s9397_s5 + $0x788] sm:$0xf0]  ;;  %v8766_v59 = vld [vmem:[%s9397_s5 + $0x8f4] sm:$0xf]  ;;  %v7297_v61 = vld [vmem:[%s9397_s5 + $0x958] sm:$0xf0] }
 0x1e2   : > { %5140 = vmatpush.bf16.msra.mxu2 %v7036_v50  ;;  %v4750_v6 = vadd.f32 %v4749_v57, %v4731_v30  ;;  %v6884_v50 = vor.u32 %v8674_v4, %v6881_v26  ;;  %v7004_v57 = vor.u32 %v8704_v27, %v7001_v51  ;;  %v6876_v30 = vor.u32 %v8672_v23, %v6873_v56  ;;  %v8746_v44 = vld [vmem:[%s9397_s5 + $0x854] sm:$0xf] }
 0x1e3   : > { %5159 = vmatpush.bf16.msra.mxu3 %v7100_v20  ;;  %v6948_v20 = vor.u32 %v8690_v42, %v6945_v8  ;;  %v8778_v8 = vld [vmem:[%s9397_s5 + $0x954] sm:$0xf] }
 0x1e4   : > { %5103 = vmatpush.bf16.msra.mxu0 %v6900_v21  ;;  %v4768_v10 = vpop.f32.mrf.mxu2  ;;  %v7377_v21 = vld [vmem:[%s9397_s5 + $0x9f8] sm:$0xf0] }
 0x1e5   : > { %5122 = vmatpush.bf16.msra.mxu1 %v6964_v16  ;;  %v4769_v9 = vadd.f32 %v4768_v10, %v4750_v6  ;;  %v7188_v16 = vor.u32 %v8750_v54, %v7185_v31  ;;  %v7161_v54 = vld [vmem:[%s9397_s5 + $0x848] sm:$0xf0]  ;;  %v8760_v31 = vld [vmem:[%s9397_s5 + $0x8c4] sm:$0xf] }
 0x1e6   : > { %5141 = vmatpush.bf16.msra.mxu2 %v7028_v35  ;;  %v8798_v35 = vld [vmem:[%s9397_s5 + $0x9f4] sm:$0xf] }
 0x1e7   : > { %5160 = vmatpush.bf16.msra.mxu3 %v7092_v38  ;;  %v4787_v58 = vpop.f32.mrf.mxu3  ;;  %v4733_v13 = vpop.f32.mrf.mxu0  ;;  %v8780_v38 = vld [vmem:[%s9397_s5 + $0x964] sm:$0xf]  ;;  %v7380_v41 = vor.u32 %v8798_v35, %v7377_v21  ;;  %v7164_v35 = vor.u32 %v8744_v3, %v7161_v54  ;;  %v7281_v21 = vld [vmem:[%s9397_s5 + $0x938] sm:$0xf0]  ;;  %v7257_v3 = vld [vmem:[%s9397_s5 + $0x908] sm:$0xf0] }
 0x1e8   : > { %v4752_v14 = vpop.f32.mrf.mxu1  ;;  %v4734_v32 = vadd.f32 %v4733_v13, %v10937_v0  ;;  %5104 = vmatpush.bf16.msra.mxu0 %v6892_v47  ;;  %v10994_v24 = vadd.f32 %v4787_v58, %v4769_v9  ;;  %v8688_v0 = vld [vmem:[%s9397_s5 + $0x684] sm:$0xf]  ;;  %5074 = vmatmul.bf16.gmra.mxu2 %v9865_v45  ;;  %v7068_v45 = vor.u32 %v8720_v28, %v7065_v29  ;;  %v7169_v9 = vld [vmem:[%s9397_s5 + $0x858] sm:$0xf0]  ;;  %v8762_v13 = vld [vmem:[%s9397_s5 + $0x8d4] sm:$0xf] }
 0x1e9   : > { %5123 = vmatpush.bf16.msra.mxu1 %v6956_v11  ;;  %5036 = vmatmul.bf16.gmra.mxu0 %v9858_v39  ;;  %v7249_v39 = vld [vmem:[%s9397_s5 + $0x8f8] sm:$0xf0]  ;;  %v8764_v47 = vld [vmem:[%s9397_s5 + $0x8e4] sm:$0xf]  ;;  %v7308_v42 = vor.u32 %v8780_v38, %v7305_v5  ;;  %v7289_v28 = vld [vmem:[%s9397_s5 + $0x948] sm:$0xf0] }
 0x1ea   : > { %5142 = vmatpush.bf16.msra.mxu2 %v7020_v60  ;;  %v4753_v7 = vadd.f32 %v4752_v14, %v4734_v32  ;;  %5055 = vmatmul.bf16.gmra.mxu1 %v9860_v40  ;;  %v6940_v40 = vor.u32 %v8688_v0, %v6937_v53  ;;  %v7252_v12 = vor.u32 %v8766_v59, %v7249_v39  ;;  %v7177_v60 = vld [vmem:[%s9397_s5 + $0x868] sm:$0xf0]  ;;  %v8796_v11 = vld [vmem:[%s9397_s5 + $0x9e4] sm:$0xf]  ;;  %v7233_v32 = vld [vmem:[%s9397_s5 + $0x8d8] sm:$0xf0] }
 0x1eb   : > { %5161 = vmatpush.bf16.msra.mxu3 %v7084_v37  ;;  %v7369_v37 = vld [vmem:[%s9397_s5 + $0x9e8] sm:$0xf0]  ;;  %v7244_v10 = vor.u32 %v8764_v47, %v7241_v34  ;;  %v7172_v0 = vor.u32 %v8746_v44, %v7169_v9  ;;  %v8776_v53 = vld [vmem:[%s9397_s5 + $0x944] sm:$0xf]  ;;  %v7236_v29 = vor.u32 %v8762_v13, %v7233_v32  ;;  %v7345_v38 = vld [vmem:[%s9397_s5 + $0x9b8] sm:$0xf0] }
 0x1ec   : > { %5093 = vmatmul.bf16.gmra.mxu3 %v9867_v46  ;;  %5105 = vmatpush.bf16.msra.mxu0 %v6884_v50  ;;  %v4771_v46 = vpop.f32.mrf.mxu2  ;;  %v7372_v58 = vor.u32 %v8796_v11, %v7369_v37  ;;  %v7361_v50 = vld [vmem:[%s9397_s5 + $0x9d8] sm:$0xf0]  ;;  %v7292_v39 = vor.u32 %v8776_v53, %v7289_v28  ;;  %v8740_v11 = vld [vmem:[%s9397_s5 + $0x824] sm:$0xf]  ;;  %v7145_v37 = vld [vmem:[%s9397_s5 + $0x828] sm:$0xf0] }
 0x1ed   : > { %5124 = vmatpush.bf16.msra.mxu1 %v6948_v20  ;;  %v4772_v63 = vadd.f32 %v4771_v46, %v4753_v7  ;;  %v7153_v46 = vld [vmem:[%s9397_s5 + $0x838] sm:$0xf0]  ;;  %v8754_v32 = vld [vmem:[%s9397_s5 + $0x894] sm:$0xf]  ;;  %v8768_v53 = vld [vmem:[%s9397_s5 + $0x904] sm:$0xf] }
 0x1ee   : > { %5143 = vmatpush.bf16.msra.mxu2 %v7012_v2  ;;  %v8794_v2 = vld [vmem:[%s9397_s5 + $0x9d4] sm:$0xf]  ;;  %v7265_v44 = vld [vmem:[%s9397_s5 + $0x918] sm:$0xf0]  ;;  %v8736_v54 = vld [vmem:[%s9397_s5 + $0x804] sm:$0xf] }
 0x1ef   : > { %5162 = vmatpush.bf16.msra.mxu3 %v7076_v62  ;;  %v4790_v1 = vpop.f32.mrf.mxu3  ;;  %v4735_v43 = vpop.f32.mrf.mxu0  ;;  %v7300_v62 = vor.u32 %v8778_v8, %v7297_v61  ;;  %v7364_v33 = vor.u32 %v8794_v2, %v7361_v50  ;;  %v7148_v8 = vor.u32 %v8740_v11, %v7145_v37  ;;  %v8770_v61 = vld [vmem:[%s9397_s5 + $0x914] sm:$0xf] }
 0x1f0   : > { %v4754_v6 = vpop.f32.mrf.mxu1  ;;  %v4736_v19 = vadd.f32 %v4735_v43, %v10950_v15  ;;  %5106 = vmatpush.bf16.msra.mxu0 %v6876_v30  ;;  %v11021_v4 = vadd.f32 %v4790_v1, %v4772_v63  ;;  %v7180_v15 = vor.u32 %v8748_v36, %v7177_v60  ;;  %v7353_v30 = vld [vmem:[%s9397_s5 + $0x9c8] sm:$0xf0]  ;;  %v8772_v36 = vld [vmem:[%s9397_s5 + $0x924] sm:$0xf] }
 0x1f1   : > { %5125 = vmatpush.bf16.msra.mxu1 %v6940_v40  ;;  %v7273_v60 = vld [vmem:[%s9397_s5 + $0x928] sm:$0xf0] }
 0x1f2   : > { %5144 = vmatpush.bf16.msra.mxu2 %v7004_v57  ;;  %v4755_v26 = vadd.f32 %v4754_v6, %v4736_v19  ;;  %v8792_v57 = vld [vmem:[%s9397_s5 + $0x9c4] sm:$0xf] }
 0x1f3   : > { %5163 = vmatpush.bf16.msra.mxu3 %v7068_v45  ;;  %v7356_v40 = vor.u32 %v8792_v57, %v7353_v30  ;;  %v8742_v45 = vld [vmem:[%s9397_s5 + $0x834] sm:$0xf]  ;;  %v8752_v30 = vld [vmem:[%s9397_s5 + $0x884] sm:$0xf] }
 0x1f4   : > { %5175 = vmatpush.bf16.msrb.mxu0 %v7188_v16  ;;  %v4773_v14 = vpop.f32.mrf.mxu2  ;;  %v8790_v16 = vld [vmem:[%s9397_s5 + $0x9b4] sm:$0xf] }
 0x1f5   : > { %5194 = vmatpush.bf16.msrb.mxu1 %v7252_v12  ;;  %v4774_v51 = vadd.f32 %v4773_v14, %v4755_v26  ;;  %v7348_v34 = vor.u32 %v8790_v16, %v7345_v38  ;;  %v8738_v14 = vld [vmem:[%s9397_s5 + $0x814] sm:$0xf]  ;;  %v7441_v38 = vld [vmem:[%s9397_s5 + $0xa78] sm:$0xf0] }
 0x1f6   : > { %5213 = vmatpush.bf16.msrb.mxu2 %v7316_v48  ;;  %v7217_v48 = vld [vmem:[%s9397_s5 + $0x8b8] sm:$0xf0]  ;;  %v8814_v16 = vld [vmem:[%s9397_s5 + $0xa74] sm:$0xf] }
 0x1f7   : > { %5232 = vmatpush.bf16.msrb.mxu3 %v7380_v41  ;;  %v4792_v27 = vpop.f32.mrf.mxu3  ;;  %v4804_v23 = vpop.f32.mrf.mxu0  ;;  %v7156_v41 = vor.u32 %v8742_v45, %v7153_v46  ;;  %v7569_v45 = vld [vmem:[%s9397_s5 + $0xb78] sm:$0xf0] }
 0x1f8   : > { %5176 = vmatpush.bf16.msrb.mxu0 %v7180_v15  ;;  %v4823_v56 = vpop.f32.mrf.mxu1  ;;  %v4805_v20 = vadd.f32 %v4804_v23, %v10973_v49  ;;  %v11034_v7 = vadd.f32 %v4792_v27, %v4774_v51  ;;  %v7225_v49 = vld [vmem:[%s9397_s5 + $0x8c8] sm:$0xf0]  ;;  %5145 = vmatmul.bf16.vlgmr.msra.gmra.mxu2 %v9937_v22  ;;  %v8758_v22 = vld [vmem:[%s9397_s5 + $0x8b4] sm:$0xf]  ;;  %v8788_v15 = vld [vmem:[%s9397_s5 + $0x9a4] sm:$0xf] }
 0x1f9   : > { %5195 = vmatpush.bf16.msrb.mxu1 %v7244_v10  ;;  %5107 = vmatmul.bf16.vlgmr.msra.gmra.mxu0 %v9930_v17  ;;  %v8774_v17 = vld [vmem:[%s9397_s5 + $0x934] sm:$0xf]  ;;  %v7220_v19 = vor.u32 %v8758_v22, %v7217_v48  ;;  %v7337_v10 = vld [vmem:[%s9397_s5 + $0x9a8] sm:$0xf0]  ;;  %v7137_v27 = vld [vmem:[%s9397_s5 + $0x818] sm:$0xf0] }
 0x1fa   : > { %5214 = vmatpush.bf16.msrb.mxu2 %v7308_v42  ;;  %v4824_v59 = vadd.f32 %v4823_v56, %v4805_v20  ;;  %5126 = vmatmul.bf16.vlgmr.msra.gmra.mxu1 %v9932_v18  ;;  %v7228_v18 = vor.u32 %v8760_v31, %v7225_v49  ;;  %v7284_v12 = vor.u32 %v8774_v17, %v7281_v21  ;;  %v7209_v42 = vld [vmem:[%s9397_s5 + $0x8a8] sm:$0xf0]  ;;  %v7201_v51 = vld [vmem:[%s9397_s5 + $0x898] sm:$0xf0]  ;;  %v8786_v23 = vld [vmem:[%s9397_s5 + $0x994] sm:$0xf] }
 0x1fb   : > { %5233 = vmatpush.bf16.msrb.mxu3 %v7372_v58  ;;  %v7276_v58 = vor.u32 %v8772_v36, %v7273_v60  ;;  %v7340_v13 = vor.u32 %v8788_v15, %v7337_v10  ;;  %v7329_v56 = vld [vmem:[%s9397_s5 + $0x998] sm:$0xf0]  ;;  %v7129_v31 = vld [vmem:[%s9397_s5 + $0x808] sm:$0xf0]  ;;  %v7204_v49 = vor.u32 %v8754_v32, %v7201_v51  ;;  %v11606_v21 = vld [vmem:[#allocation10_spill] sm:$0xff] }
 0x1fc   : > { %5164 = vmatmul.bf16.vlgmr.msra.gmra.mxu3 %v9939_v25  ;;  %5177 = vmatpush.bf16.msrb.mxu0 %v7172_v0  ;;  %v4842_v1 = vpop.f32.mrf.mxu2  ;;  %v7332_v57 = vor.u32 %v8786_v23, %v7329_v56  ;;  %v11605_v17 = vld [vmem:[#allocation9_spill] sm:$0xff]  ;;  %v11608_v48 = vld [vmem:[#allocation12_spill] sm:$0xff] }
 0x1fd   : > { %5196 = vmatpush.bf16.msrb.mxu1 %v7236_v29  ;;  %v4843_v5 = vadd.f32 %v4842_v1, %v4824_v59  ;;  %v7268_v29 = vor.u32 %v8770_v61, %v7265_v44  ;;  %v8812_v15 = vld [vmem:[%s9397_s5 + $0xa64] sm:$0xf] }
 0x1fe   : > { %5215 = vmatpush.bf16.msrb.mxu2 %v7300_v62  ;;  %v8860_v32 = vld [vmem:[%s9397_s5 + $0xbe4] sm:$0xf] }
 0x1ff   : > { %5234 = vmatpush.bf16.msrb.mxu3 %v7364_v33  ;;  %v4861_v25 = vpop.f32.mrf.mxu3  ;;  %v4806_v63 = vpop.f32.mrf.mxu0  ;;  %v7140_v33 = vor.u32 %v8738_v14, %v7137_v27  ;;  %v7497_v14 = vld [vmem:[%s9397_s5 + $0xae8] sm:$0xf0] }
 0x200   : > { %v4825_v43 = vpop.f32.mrf.mxu1  ;;  %v4807_v6 = vadd.f32 %v4806_v63, %v10994_v24  ;;  %5178 = vmatpush.bf16.msrb.mxu0 %v7164_v35  ;;  %v11057_v47 = vadd.f32 %v4861_v25, %v4843_v5  ;;  %v8756_v24 = vld [vmem:[%s9397_s5 + $0x8a4] sm:$0xf]  ;;  %v11607_v25 = vld [vmem:[#allocation11_spill] sm:$0xff]  ;;  %v8830_v5 = vld [vmem:[%s9397_s5 + $0xaf4] sm:$0xf]  ;;  %v7260_v63 = vor.u32 %v8768_v53, %v7257_v3 }
 0x201   : > { %5197 = vmatpush.bf16.msrb.mxu1 %v7228_v18  ;;  %v7212_v9 = vor.u32 %v8756_v24, %v7209_v42  ;;  %v7321_v18 = vld [vmem:[%s9397_s5 + $0x988] sm:$0xf0]  ;;  %v7444_v24 = vor.u32 %v8814_v16, %v7441_v38  ;;  %v8842_v53 = vld [vmem:[%s9397_s5 + $0xb54] sm:$0xf]  ;;  %v7425_v3 = vld [vmem:[%s9397_s5 + $0xa58] sm:$0xf0] }
 0x202   : > { %5216 = vmatpush.bf16.msrb.mxu2 %v7292_v39  ;;  %v4826_v26 = vadd.f32 %v4825_v43, %v4807_v6  ;;  %v8784_v39 = vld [vmem:[%s9397_s5 + $0x984] sm:$0xf]  ;;  %v5573_v46 = vmul.f32 %v11057_v47, %v11057_v47  ;;  %v7132_v43 = vor.u32 %v8736_v54, %v7129_v31  ;;  %v7505_v6 = vld [vmem:[%s9397_s5 + $0xaf8] sm:$0xf0]  ;;  %v7561_v42 = vld [vmem:[%s9397_s5 + $0xb68] sm:$0xf0] }
 0x203   : > { %5235 = vmatpush.bf16.msrb.mxu3 %v7356_v40  ;;  %v8846_v40 = vld [vmem:[%s9397_s5 + $0xb74] sm:$0xf]  ;;  %v7508_v61 = vor.u32 %v8830_v5, %v7505_v6  ;;  %v7417_v16 = vld [vmem:[%s9397_s5 + $0xa48] sm:$0xf0]  ;;  %v8824_v38 = vld [vmem:[%s9397_s5 + $0xac4] sm:$0xf] }
 0x204   : > { %5179 = vmatpush.bf16.msrb.mxu0 %v7156_v41  ;;  %v4844_v2 = vpop.f32.mrf.mxu2  ;;  %v7633_v41 = vld [vmem:[%s9397_s5 + $0xbf8] sm:$0xf0]  ;;  %v7572_v37 = vor.u32 %v8846_v40, %v7569_v45  ;;  %v8826_v54 = vld [vmem:[%s9397_s5 + $0xad4] sm:$0xf]  ;;  %v8840_v45 = vld [vmem:[%s9397_s5 + $0xb44] sm:$0xf] }
 0x205   : > { %5198 = vmatpush.bf16.msrb.mxu1 %v7220_v19  ;;  %v4845_v20 = vadd.f32 %v4844_v2, %v4826_v26  ;;  %v7324_v19 = vor.u32 %v8784_v39, %v7321_v18  ;;  %v8844_v26 = vld [vmem:[%s9397_s5 + $0xb64] sm:$0xf]  ;;  %v7625_v2 = vld [vmem:[%s9397_s5 + $0xbe8] sm:$0xf0] }
 0x206   : > { %5217 = vmatpush.bf16.msrb.mxu2 %v7284_v12  ;;  %v8862_v12 = vld [vmem:[%s9397_s5 + $0xbf4] sm:$0xf]  ;;  %v7564_v51 = vor.u32 %v8844_v26, %v7561_v42  ;;  %v11609_v5 = vld [vmem:[#allocation13_spill] sm:$0xff]  ;;  %v8856_v6 = vld [vmem:[%s9397_s5 + $0xbc4] sm:$0xf] }
 0x207   : > { %5236 = vmatpush.bf16.msrb.mxu3 %v7348_v34  ;;  %v4863_v50 = vpop.f32.mrf.mxu3  ;;  %v4809_v62 = vpop.f32.mrf.mxu0  ;;  %v7636_v44 = vor.u32 %v8862_v12, %v7633_v41  ;;  %v7609_v12 = vld [vmem:[%s9397_s5 + $0xbc8] sm:$0xf0]  ;;  %v8806_v26 = vld [vmem:[%s9397_s5 + $0xa34] sm:$0xf]  ;;  %v7409_v42 = vld [vmem:[%s9397_s5 + $0xa38] sm:$0xf0] }
 0x208   : > { %v4828_v0 = vpop.f32.mrf.mxu1  ;;  %v4810_v28 = vadd.f32 %v4809_v62, %v11021_v4  ;;  %5180 = vmatpush.bf16.msrb.mxu0 %v7148_v8  ;;  %v11078_v59 = vadd.f32 %v4863_v50, %v4845_v20  ;;  %v7193_v4 = vld [vmem:[%s9397_s5 + $0x888] sm:$0xf0]  ;;  %5150 = vmatmul.bf16.gmra.mxu2 %v11607_v25 }
 0x209   : > { %5199 = vmatpush.bf16.msrb.mxu1 %v7212_v9  ;;  %5112 = vmatmul.bf16.gmra.mxu0 %v11605_v17  ;;  %v7196_v60 = vor.u32 %v8752_v30, %v7193_v4  ;;  %v7433_v9 = vld [vmem:[%s9397_s5 + $0xa68] sm:$0xf0]  ;;  %v8858_v30 = vld [vmem:[%s9397_s5 + $0xbd4] sm:$0xf]  ;;  %v7617_v4 = vld [vmem:[%s9397_s5 + $0xbd8] sm:$0xf0] }
 0x20a   : > { %5218 = vmatpush.bf16.msrb.mxu2 %v7276_v58  ;;  %v4829_v35 = vadd.f32 %v4828_v0, %v4810_v28  ;;  %5131 = vmatmul.bf16.gmra.mxu1 %v11606_v21  ;;  %v5555_v22 = vadd.f32 %v11078_v59, %v11057_v47  ;;  %v5575_v1 = vmul.f32 %v11078_v59, %v11078_v59  ;;  %v7553_v28 = vld [vmem:[%s9397_s5 + $0xb58] sm:$0xf0] }
 0x20b   : > { %5237 = vmatpush.bf16.msrb.mxu3 %v7340_v13  ;;  %v8828_v13 = vld [vmem:[%s9397_s5 + $0xae4] sm:$0xf]  ;;  %v7436_v56 = vor.u32 %v8812_v15, %v7433_v9  ;;  %v7628_v0 = vor.u32 %v8860_v32, %v7625_v2  ;;  %v7556_v18 = vor.u32 %v8842_v53, %v7553_v28  ;;  %v7620_v25 = vor.u32 %v8858_v30, %v7617_v4  ;;  %v7529_v28 = vld [vmem:[%s9397_s5 + $0xb28] sm:$0xf0] }
 0x20c   : > { %5169 = vmatmul.bf16.gmra.mxu3 %v11608_v48  ;;  %5181 = vmatpush.bf16.msrb.mxu0 %v7140_v33  ;;  %v5581_v36 = vadd.f32 %v5575_v1, %v5573_v46  ;;  %v4847_v34 = vpop.f32.mrf.mxu2  ;;  %v7500_v20 = vor.u32 %v8828_v13, %v7497_v14  ;;  %v8810_v33 = vld [vmem:[%s9397_s5 + $0xa54] sm:$0xf]  ;;  %v7545_v46 = vld [vmem:[%s9397_s5 + $0xb48] sm:$0xf0]  ;;  %v8808_v48 = vld [vmem:[%s9397_s5 + $0xa44] sm:$0xf] }
 0x20d   : > { %5200 = vmatpush.bf16.msrb.mxu1 %v7204_v49  ;;  %v4848_v10 = vadd.f32 %v4847_v34, %v4829_v35  ;;  %v7428_v40 = vor.u32 %v8810_v33, %v7425_v3  ;;  %v8838_v34 = vld [vmem:[%s9397_s5 + $0xb34] sm:$0xf]  ;;  %v8836_v53 = vld [vmem:[%s9397_s5 + $0xb24] sm:$0xf]  ;;  %v7465_v30 = vld [vmem:[%s9397_s5 + $0xaa8] sm:$0xf0] }
 0x20e   : > { %5219 = vmatpush.bf16.msrb.mxu2 %v7268_v29  ;;  %v8854_v14 = vld [vmem:[%s9397_s5 + $0xbb4] sm:$0xf]  ;;  %v8852_v4 = vld [vmem:[%s9397_s5 + $0xba4] sm:$0xf] }
 0x20f   : > { %5238 = vmatpush.bf16.msrb.mxu3 %v7332_v57  ;;  %v4866_v11 = vpop.f32.mrf.mxu3  ;;  %v4811_v58 = vpop.f32.mrf.mxu0  ;;  %v7489_v57 = vld [vmem:[%s9397_s5 + $0xad8] sm:$0xf0] }
 0x210   : > { %v4830_v8 = vpop.f32.mrf.mxu1  ;;  %v4812_v27 = vadd.f32 %v4811_v58, %v11034_v7  ;;  %5182 = vmatpush.bf16.msrb.mxu0 %v7132_v43  ;;  %v11111_v50 = vadd.f32 %v4866_v11, %v4848_v10  ;;  %v7492_v1 = vor.u32 %v8826_v54, %v7489_v57  ;;  %v7481_v43 = vld [vmem:[%s9397_s5 + $0xac8] sm:$0xf0]  ;;  %v7548_v11 = vor.u32 %v8840_v45, %v7545_v46  ;;  %v8820_v57 = vld [vmem:[%s9397_s5 + $0xaa4] sm:$0xf]  ;;  %v7521_v45 = vld [vmem:[%s9397_s5 + $0xb18] sm:$0xf0] }
 0x211   : > { %5201 = vmatpush.bf16.msrb.mxu1 %v7196_v60  ;;  %v11611_v60 = vld [vmem:[#allocation15_spill] sm:$0xff]  ;;  %v7484_v58 = vor.u32 %v8824_v38, %v7481_v43  ;;  %v8802_v46 = vld [vmem:[%s9397_s5 + $0xa14] sm:$0xf] }
 0x212   : > { %5220 = vmatpush.bf16.msrb.mxu2 %v7260_v63  ;;  %v4831_v23 = vadd.f32 %v4830_v8, %v4812_v27  ;;  %v5556_v7 = vadd.f32 %v5555_v22, %v11111_v50  ;;  %v5577_v62 = vmul.f32 %v11111_v50, %v11111_v50  ;;  %v11610_v63 = vld [vmem:[#allocation14_spill] sm:$0xff]  ;;  %v7612_v8 = vor.u32 %v8856_v6, %v7609_v12  ;;  %v7601_v27 = vld [vmem:[%s9397_s5 + $0xbb8] sm:$0xf0] }
 0x213   : > { %5239 = vmatpush.bf16.msrb.mxu3 %v7324_v19  ;;  %v11612_v19 = vld [vmem:[#allocation16_spill] sm:$0xff]  ;;  %v8850_v12 = vld [vmem:[%s9397_s5 + $0xb94] sm:$0xf] }
 0x214   : > { %5251 = vmatpush.bf16.msra.mxu0 %v7444_v24  ;;  %v5582_v29 = vadd.f32 %v5581_v36, %v5577_v62  ;;  %v4849_v31 = vpop.f32.mrf.mxu2  ;;  %v7537_v24 = vld [vmem:[%s9397_s5 + $0xb38] sm:$0xf0]  ;;  %v7412_v62 = vor.u32 %v8806_v26, %v7409_v42  ;;  %v7513_v26 = vld [vmem:[%s9397_s5 + $0xb08] sm:$0xf0]  ;;  %v8800_v42 = vld [vmem:[%s9397_s5 + $0xa04] sm:$0xf] }
 0x215   : > { %5270 = vmatpush.bf16.msra.mxu1 %v7508_v61  ;;  %v4850_v39 = vadd.f32 %v4849_v31, %v4831_v23  ;;  %v8822_v61 = vld [vmem:[%s9397_s5 + $0xab4] sm:$0xf]  ;;  %v7604_v31 = vor.u32 %v8854_v14, %v7601_v27 }
 0x216   : > { %5289 = vmatpush.bf16.msra.mxu2 %v7572_v37  ;;  %v7420_v37 = vor.u32 %v8808_v48, %v7417_v16  ;;  %v7468_v16 = vor.u32 %v8820_v57, %v7465_v30  ;;  %v8926_v57 = vld [vmem:[%s9397_s5 + $0xdf4] sm:$0xf]  ;;  %v7889_v30 = vld [vmem:[%s9397_s5 + $0xdf8] sm:$0xf0] }
 0x217   : > { %5308 = vmatpush.bf16.msra.mxu3 %v7636_v44  ;;  %v4868_v49 = vpop.f32.mrf.mxu3  ;;  %v4880_v35 = vpop.f32.mrf.mxu0  ;;  %v7473_v44 = vld [vmem:[%s9397_s5 + $0xab8] sm:$0xf0] }
 0x218   : > { %5252 = vmatpush.bf16.msra.mxu0 %v7436_v56  ;;  %v4899_v17 = vpop.f32.mrf.mxu1  ;;  %v11126_v22 = vadd.f32 %v4868_v49, %v4850_v39  ;;  %5221 = vmatmul.bf16.vlgmr.msrb.gmra.mxu2 %v11611_v60  ;;  %v7401_v49 = vld [vmem:[%s9397_s5 + $0xa28] sm:$0xf0] }
 0x219   : > { %5271 = vmatpush.bf16.msra.mxu1 %v7500_v20  ;;  %v4900_v21 = vadd.f32 %v4899_v17, %v4880_v35  ;;  %5183 = vmatmul.bf16.vlgmr.msrb.gmra.mxu0 %v11609_v5  ;;  %v7540_v20 = vor.u32 %v8838_v34, %v7537_v24  ;;  %v7593_v39 = vld [vmem:[%s9397_s5 + $0xba8] sm:$0xf0]  ;;  %v8818_v5 = vld [vmem:[%s9397_s5 + $0xa94] sm:$0xf]  ;;  %v8832_v24 = vld [vmem:[%s9397_s5 + $0xb04] sm:$0xf] }
 0x21a   : > { %5290 = vmatpush.bf16.msra.mxu2 %v7564_v51  ;;  %5202 = vmatmul.bf16.vlgmr.msrb.gmra.mxu1 %v11610_v63  ;;  %v5557_v41 = vadd.f32 %v5556_v7, %v11126_v22  ;;  %v5579_v36 = vmul.f32 %v11126_v22, %v11126_v22  ;;  %v7596_v38 = vor.u32 %v8852_v4, %v7593_v39  ;;  %v7457_v63 = vld [vmem:[%s9397_s5 + $0xa98] sm:$0xf0] }
 0x21b   : > { %5309 = vmatpush.bf16.msra.mxu3 %v7628_v0  ;;  %v7476_v0 = vor.u32 %v8822_v61, %v7473_v44  ;;  %v8816_v61 = vld [vmem:[%s9397_s5 + $0xa84] sm:$0xf]  ;;  %v7449_v44 = vld [vmem:[%s9397_s5 + $0xa88] sm:$0xf0] }
 0x21c   : > { %5240 = vmatmul.bf16.vlgmr.msrb.gmra.mxu3 %v11612_v19  ;;  %5253 = vmatpush.bf16.msra.mxu0 %v7428_v40  ;;  %v5558_v15 = vrot.slane %v5557_v41, 4  ;;  %v5583_v10 = vadd.f32 %v5582_v29, %v5579_v36  ;;  %v4918_v9 = vpop.f32.mrf.mxu2  ;;  %v8804_v29 = vld [vmem:[%s9397_s5 + $0xa24] sm:$0xf]  ;;  %v7452_v39 = vor.u32 %v8816_v61, %v7449_v44 }
 0x21d   : > { %5272 = vmatpush.bf16.msra.mxu1 %v7492_v1  ;;  %v4919_v51 = vadd.f32 %v4918_v9, %v4900_v21  ;;  %v8834_v21 = vld [vmem:[%s9397_s5 + $0xb14] sm:$0xf]  ;;  %v7404_v40 = vor.u32 %v8804_v29, %v7401_v49  ;;  %v7393_v1 = vld [vmem:[%s9397_s5 + $0xa18] sm:$0xf0] }
 0x21e   : > { %5291 = vmatpush.bf16.msra.mxu2 %v7556_v18  ;;  %v5559_v32 = vadd.f32 %v5558_v15, %v5557_v41  ;;  %v5584_v2 = vrot.slane %v5583_v10, 4  ;;  %v7532_v18 = vor.u32 %v8836_v53, %v7529_v28  ;;  %v7585_v41 = vld [vmem:[%s9397_s5 + $0xb98] sm:$0xf0]  ;;  %v11616_v28 = vld [vmem:[#allocation20_spill] sm:$0xff] }
 0x21f   : > { %5310 = vmatpush.bf16.msra.mxu3 %v7620_v25  ;;  %v4937_v13 = vpop.f32.mrf.mxu3  ;;  %v4882_v23 = vpop.f32.mrf.mxu0  ;;  %v7588_v27 = vor.u32 %v8850_v12, %v7585_v41  ;;  %v11615_v53 = vld [vmem:[#allocation19_spill] sm:$0xff]  ;;  %v7753_v41 = vld [vmem:[%s9397_s5 + $0xce8] sm:$0xf0] }
 0x220   : > { %v4901_v56 = vpop.f32.mrf.mxu1  ;;  %5254 = vmatpush.bf16.msra.mxu0 %v7420_v37  ;;  %v5560_v33 = vrot.slane %v5559_v32, 2  ;;  %v5585_v3 = vadd.f32 %v5584_v2, %v5583_v10  ;;  %v11152_v54 = vadd.f32 %v4937_v13, %v4919_v51  ;;  %v7524_v37 = vor.u32 %v8834_v21, %v7521_v45  ;;  %v7577_v2 = vld [vmem:[%s9397_s5 + $0xb88] sm:$0xf0]  ;;  %v7697_v29 = vld [vmem:[%s9397_s5 + $0xc78] sm:$0xf0] }
 0x221   : > { %v4902_v7 = vadd.f32 %v4901_v56, %v4882_v23  ;;  %5273 = vmatpush.bf16.msra.mxu1 %v7484_v58  ;;  %v7396_v10 = vor.u32 %v8802_v46, %v7393_v1  ;;  %v7460_v58 = vor.u32 %v8818_v5, %v7457_v63  ;;  %v11613_v51 = vld [vmem:[#allocation17_spill] sm:$0xff]  ;;  %v11614_v23 = vld [vmem:[#allocation18_spill] sm:$0xff]  ;;  %v7761_v49 = vld [vmem:[%s9397_s5 + $0xcf8] sm:$0xf0]  ;;  %v7892_v63 = vor.u32 %v8926_v57, %v7889_v30 }
 0x222   : > { %5292 = vmatpush.bf16.msra.mxu2 %v7548_v11  ;;  %v5561_v35 = vadd.f32 %v5560_v33, %v5559_v32  ;;  %v5586_v17 = vrot.slane %v5585_v3, 2  ;;  %v8848_v32 = vld [vmem:[%s9397_s5 + $0xb84] sm:$0xf]  ;;  %v8910_v56 = vld [vmem:[%s9397_s5 + $0xd74] sm:$0xf]  ;;  %v11617_v30 = vld [vmem:[#allocation21_spill] sm:$0xff] }
 0x223   : > { %5311 = vmatpush.bf16.msra.mxu3 %v7612_v8  ;;  %v7385_v8 = vld [vmem:[%s9397_s5 + $0xa08] sm:$0xf0]  ;;  %v8894_v33 = vld [vmem:[%s9397_s5 + $0xcf4] sm:$0xf]  ;;  %v8908_v45 = vld [vmem:[%s9397_s5 + $0xd64] sm:$0xf] }
 0x224   : > { %5255 = vmatpush.bf16.msra.mxu0 %v7412_v62  ;;  %v5562_v25 = vrot.slane %v5561_v35, 1  ;;  %v5587_v48 = vadd.f32 %v5586_v17, %v5585_v3  ;;  %v4920_v43 = vpop.f32.mrf.mxu2  ;;  %v7516_v3 = vor.u32 %v8832_v24, %v7513_v26  ;;  %v7817_v46 = vld [vmem:[%s9397_s5 + $0xd68] sm:$0xf0]  ;;  %v8876_v1 = vld [vmem:[%s9397_s5 + $0xc64] sm:$0xf]  ;;  %v7764_v5 = vor.u32 %v8894_v33, %v7761_v49 }
 0x225   : > { %5274 = vmatpush.bf16.msra.mxu1 %v7476_v0  ;;  %v4921_v19 = vadd.f32 %v4920_v43, %v4902_v7  ;;  %v8878_v7 = vld [vmem:[%s9397_s5 + $0xc74] sm:$0xf]  ;;  %v7689_v43 = vld [vmem:[%s9397_s5 + $0xc68] sm:$0xf0]  ;;  %v8888_v49 = vld [vmem:[%s9397_s5 + $0xcc4] sm:$0xf] }
 0x226   : > { %5293 = vmatpush.bf16.msra.mxu2 %v7540_v20  ;;  %v5563_v36 = vadd.f32 %v5562_v25, %v5561_v35  ;;  %v5588_v60 = vrot.slane %v5587_v48, 1  ;;  %v7825_v20 = vld [vmem:[%s9397_s5 + $0xd78] sm:$0xf0]  ;;  %v7580_v35 = vor.u32 %v8848_v32, %v7577_v2 }
 0x227   : > { %5312 = vmatpush.bf16.msra.mxu3 %v7604_v31  ;;  %v4939_v6 = vpop.f32.mrf.mxu3  ;;  %v4885_v34 = vpop.f32.mrf.mxu0  ;;  %v7388_v31 = vor.u32 %v8800_v42, %v7385_v8  ;;  %v8906_v42 = vld [vmem:[%s9397_s5 + $0xd54] sm:$0xf]  ;;  %v7873_v32 = vld [vmem:[%s9397_s5 + $0xdd8] sm:$0xf0] }
 0x228   : > { %v4904_v11 = vpop.f32.mrf.mxu1  ;;  %5256 = vmatpush.bf16.msra.mxu0 %v7404_v40  ;;  %v5589_v9 = vadd.f32 %v5588_v60, %v5587_v48  ;;  %v11173_v13 = vmul.f32 0.03125, %v5563_v36  ;;  %v11175_v14 = vadd.f32 %v4939_v6, %v4921_v19  ;;  %5226 = vmatmul.bf16.gmra.mxu2 %v11615_v53  ;;  %v7700_v40 = vor.u32 %v8878_v7, %v7697_v29  ;;  %v8892_v6 = vld [vmem:[%s9397_s5 + $0xce4] sm:$0xf]  ;;  %v7881_v60 = vld [vmem:[%s9397_s5 + $0xde8] sm:$0xf0] }
 0x229   : > { %v4905_v15 = vadd.f32 %v4904_v11, %v4885_v34  ;;  %5275 = vmatpush.bf16.msra.mxu1 %v7468_v16  ;;  %5188 = vmatmul.bf16.gmra.mxu0 %v11613_v51  ;;  %v8924_v36 = vld [vmem:[%s9397_s5 + $0xde4] sm:$0xf]  ;;  %v7820_v11 = vor.u32 %v8908_v45, %v7817_v46  ;;  %v7756_v24 = vor.u32 %v8892_v6, %v7753_v41  ;;  %v8890_v8 = vld [vmem:[%s9397_s5 + $0xcd4] sm:$0xf]  ;;  %v7729_v6 = vld [vmem:[%s9397_s5 + $0xcb8] sm:$0xf0] }
 0x22a   : > { %5294 = vmatpush.bf16.msra.mxu2 %v7532_v18  ;;  %5207 = vmatmul.bf16.gmra.mxu1 %v11614_v23  ;;  %v5601_v62 = vmul.f32 0.03125, %v5589_v9  ;;  %v5603_v0 = vmul.f32 %v11173_v13, %v11173_v13  ;;  %v7828_v18 = vor.u32 %v8910_v56, %v7825_v20  ;;  %v7884_v26 = vor.u32 %v8924_v36, %v7881_v60  ;;  %v7745_v9 = vld [vmem:[%s9397_s5 + $0xcd8] sm:$0xf0]  ;;  %v8918_v60 = vld [vmem:[%s9397_s5 + $0xdb4] sm:$0xf] }
 0x22b   : > { %5313 = vmatpush.bf16.msra.mxu3 %v7596_v38  ;;  %v7748_v29 = vor.u32 %v8890_v8, %v7745_v9 }
 0x22c   : > { %5245 = vmatmul.bf16.gmra.mxu3 %v11616_v28  ;;  %5257 = vmatpush.bf16.msra.mxu0 %v7396_v10  ;;  %v5605_v4 = vsub.f32 %v5601_v62, %v5603_v0  ;;  %v4923_v17 = vpop.f32.mrf.mxu2  ;;  %v8874_v10 = vld [vmem:[%s9397_s5 + $0xc54] sm:$0xf]  ;;  %v8904_v62 = vld [vmem:[%s9397_s5 + $0xd44] sm:$0xf]  ;;  %v7801_v0 = vld [vmem:[%s9397_s5 + $0xd48] sm:$0xf0] }
 0x22d   : > { %5276 = vmatpush.bf16.msra.mxu1 %v7460_v58  ;;  %v4924_v48 = vadd.f32 %v4923_v17, %v4905_v15  ;;  %v7809_v15 = vld [vmem:[%s9397_s5 + $0xd58] sm:$0xf0]  ;;  %v7865_v17 = vld [vmem:[%s9397_s5 + $0xdc8] sm:$0xf0]  ;;  %v7804_v46 = vor.u32 %v8904_v62, %v7801_v0  ;;  %v8898_v0 = vld [vmem:[%s9397_s5 + $0xd14] sm:$0xf] }
 0x22e   : > { %5295 = vmatpush.bf16.msra.mxu2 %v7524_v37  ;;  %v5607_v25 = vmax.f32 %v5605_v4, 0.0  ;;  %v7692_v37 = vor.u32 %v8876_v1, %v7689_v43  ;;  %v7681_v58 = vld [vmem:[%s9397_s5 + $0xc58] sm:$0xf0]  ;;  %v7812_v20 = vor.u32 %v8906_v42, %v7809_v15  ;;  %v11618_v4 = vld [vmem:[#allocation22_spill] sm:$0xff]  ;;  %v7849_v62 = vld [vmem:[%s9397_s5 + $0xda8] sm:$0xf0] }
 0x22f   : > { %5314 = vmatpush.bf16.msra.mxu3 %v7588_v27  ;;  %v4942_v21 = vpop.f32.mrf.mxu3  ;;  %v4887_v16 = vpop.f32.mrf.mxu0  ;;  %v8922_v27 = vld [vmem:[%s9397_s5 + $0xdd4] sm:$0xf]  ;;  %v7684_v7 = vor.u32 %v8874_v10, %v7681_v58 }
 0x230   : > { %v4906_v38 = vpop.f32.mrf.mxu1  ;;  %5258 = vmatpush.bf16.msra.mxu0 %v7388_v31  ;;  %v11201_v19 = vadd.f32 1e-05, %v5607_v25  ;;  %v11203_v34 = vadd.f32 %v4942_v21, %v4924_v48  ;;  %v7876_v33 = vor.u32 %v8922_v27, %v7873_v32  ;;  %v7673_v31 = vld [vmem:[%s9397_s5 + $0xc48] sm:$0xf0]  ;;  %v5631_v21 = vld [vmem:[%s9407_s26] sm:$0x3] }
 0x231   : > { %v4907_v12 = vadd.f32 %v4906_v38, %v4887_v16  ;;  %5277 = vmatpush.bf16.msra.mxu1 %v7452_v39  ;;  %v7737_v39 = vld [vmem:[%s9397_s5 + $0xcc8] sm:$0xf0]  ;;  %v8902_v25 = vld [vmem:[%s9397_s5 + $0xd34] sm:$0xf]  ;;  %v7793_v48 = vld [vmem:[%s9397_s5 + $0xd38] sm:$0xf0] }
 0x232   : > { %5296 = vmatpush.bf16.msra.mxu2 %v7516_v3  ;;  %9110 = vrsqrt.f32 %v11201_v19  ;;  %v8872_v3 = vld [vmem:[%s9397_s5 + $0xc44] sm:$0xf]  ;;  %v8870_v16 = vld [vmem:[%s9397_s5 + $0xc34] sm:$0xf]  ;;  %v7740_v38 = vor.u32 %v8888_v49, %v7737_v39  ;;  %v7796_v15 = vor.u32 %v8902_v25, %v7793_v48  ;;  %vm5617_vm1 = vweird.f32 %v11201_v19  ;;  %v7713_v39 = vld [vmem:[%s9397_s5 + $0xc98] sm:$0xf0] }
 0x233   : > { %5315 = vmatpush.bf16.msra.mxu3 %v7580_v35  ;;  %v8920_v35 = vld [vmem:[%s9397_s5 + $0xdc4] sm:$0xf]  ;;  %v7676_v1 = vor.u32 %v8872_v3, %v7673_v31  ;;  %v8886_v43 = vld [vmem:[%s9397_s5 + $0xcb4] sm:$0xf] }
 0x234   : > { %5327 = vmatpush.bf16.msrb.mxu0 %v7700_v40  ;;  %v4925_v61 = vpop.f32.mrf.mxu2  ;;  %v11620_v40 = vld [vmem:[#allocation24_spill] sm:$0xff]  ;;  %v7732_v27 = vor.u32 %v8886_v43, %v7729_v6  ;;  %v8866_v49 = vld [vmem:[%s9397_s5 + $0xc14] sm:$0xf]  ;;  %v7769_v43 = vld [vmem:[%s9397_s5 + $0xd08] sm:$0xf0] }
 0x235   : > { %5346 = vmatpush.bf16.msrb.mxu1 %v7764_v5  ;;  %v4926_v2 = vadd.f32 %v4925_v61, %v4907_v12  ;;  %v7868_v5 = vor.u32 %v8920_v35, %v7865_v17  ;;  %v8900_v61 = vld [vmem:[%s9397_s5 + $0xd24] sm:$0xf]  ;;  %v8914_v35 = vld [vmem:[%s9397_s5 + $0xd94] sm:$0xf]  ;;  %v7841_v17 = vld [vmem:[%s9397_s5 + $0xd98] sm:$0xf0] }
 0x236   : > { %5365 = vmatpush.bf16.msrb.mxu2 %v7828_v18  ;;  %v11619_v18 = vld [vmem:[#allocation23_spill] sm:$0xff]  ;;  %v7641_v6 = vld [vmem:[%s9397_s5 + $0xc08] sm:$0xf0] }
 0x237   : > { %5384 = vmatpush.bf16.msrb.mxu3 %v7892_v63  ;;  %v4944_v44 = vpop.f32.mrf.mxu3  ;;  %v4956_v51 = vpop.f32.mrf.mxu0  ;;  %v7665_v63 = vld [vmem:[%s9397_s5 + $0xc38] sm:$0xf0] }
 0x238   : > { %5328 = vmatpush.bf16.msrb.mxu0 %v7692_v37  ;;  %v4975_v23 = vpop.f32.mrf.mxu1  ;;  %v4957_v56 = vadd.f32 %v4956_v51, %v11152_v54  ;;  %v11217_v53 = vpop.eup %9110  ;;  %v11219_v28 = vadd.f32 %v4944_v44, %v4926_v2  ;;  %5297 = vmatmul.bf16.vlgmr.msra.gmra.mxu2 %v11619_v18  ;;  %v5633_v37 = vperm.slane %v5631_v21, 0  ;;  %v7668_v8 = vor.u32 %v8870_v16, %v7665_v63  ;;  %v7785_v44 = vld [vmem:[%s9397_s5 + $0xd28] sm:$0xf0]  ;;  %v8868_v2 = vld [vmem:[%s9397_s5 + $0xc24] sm:$0xf] }
 0x239   : > { %5347 = vmatpush.bf16.msrb.mxu1 %v7756_v24  ;;  %v5612_v54 = vmul.f32 %v11217_v53, %v11201_v19  ;;  %5259 = vmatmul.bf16.vlgmr.msra.gmra.mxu0 %v11617_v30  ;;  %vm5618_vm0 = vweird.f32 %v11217_v53  ;;  %v7657_v51 = vld [vmem:[%s9397_s5 + $0xc28] sm:$0xf0]  ;;  %v7788_v3 = vor.u32 %v8900_v61, %v7785_v44  ;;  %v7649_v19 = vld [vmem:[%s9397_s5 + $0xc18] sm:$0xf0]  ;;  %v8896_v16 = vld [vmem:[%s9397_s5 + $0xd04] sm:$0xf]  ;;  %v7844_v63 = vor.u32 %v8914_v35, %v7841_v17 }
 0x23a   : > { %5366 = vmatpush.bf16.msrb.mxu2 %v7820_v11  ;;  %v4976_v57 = vadd.f32 %v4975_v23, %v4957_v56  ;;  %5278 = vmatmul.bf16.vlgmr.msra.gmra.mxu1 %v11618_v4  ;;  %v7857_v11 = vld [vmem:[%s9397_s5 + $0xdb8] sm:$0xf0]  ;;  %vm5619_vm2 = vmor %vm5617_vm1, %vm5618_vm0  ;;  %v7660_v31 = vor.u32 %v8868_v2, %v7657_v51  ;;  %v7652_v48 = vor.u32 %v8866_v49, %v7649_v19  ;;  %v8958_v44 = vld [vmem:[%s9397_s5 + $0xef4] sm:$0xf] }
 0x23b   : > { %5385 = vmatpush.bf16.msrb.mxu3 %v7884_v26  ;;  %v5613_v45 = vmul.f32 %v11217_v53, %v5612_v54  ;;  %v7860_v32 = vor.u32 %v8918_v60, %v7857_v11  ;;  %v8882_v54 = vld [vmem:[%s9397_s5 + $0xc94] sm:$0xf]  ;;  %v8912_v60 = vld [vmem:[%s9397_s5 + $0xd84] sm:$0xf]  ;;  %v7953_v61 = vld [vmem:[%s9397_s5 + $0xe78] sm:$0xf0] }
 0x23c   : > { %5316 = vmatmul.bf16.vlgmr.msra.gmra.mxu3 %v11620_v40  ;;  %5329 = vmatpush.bf16.msrb.mxu0 %v7684_v7  ;;  %v4994_v41 = vpop.f32.mrf.mxu2  ;;  %v8916_v7 = vld [vmem:[%s9397_s5 + $0xda4] sm:$0xf]  ;;  %v8017_v51 = vld [vmem:[%s9397_s5 + $0xef8] sm:$0xf0]  ;;  %v8137_v17 = vld [vmem:[%s9397_s5 + $0xfe8] sm:$0xf0] }
 0x23d   : > { %5348 = vmatpush.bf16.msrb.mxu1 %v7748_v29  ;;  %v5614_v12 = vmul.f32 0.5, %v5613_v45  ;;  %v4995_v24 = vadd.f32 %v4994_v41, %v4976_v57  ;;  %v7777_v29 = vld [vmem:[%s9397_s5 + $0xd18] sm:$0xf0]  ;;  %v7852_v4 = vor.u32 %v8916_v7, %v7849_v62  ;;  %v8020_v49 = vor.u32 %v8958_v44, %v8017_v51  ;;  %v8988_v35 = vld [vmem:[%s9397_s5 + $0xfe4] sm:$0xf]  ;;  %v11626_v51 = vld [vmem:[#allocation30_spill] sm:$0xff] }
 0x23e   : > { %5367 = vmatpush.bf16.msrb.mxu2 %v7812_v20  ;;  %v7721_v20 = vld [vmem:[%s9397_s5 + $0xca8] sm:$0xf0]  ;;  %v7780_v18 = vor.u32 %v8898_v0, %v7777_v29  ;;  %v8972_v0 = vld [vmem:[%s9397_s5 + $0xf64] sm:$0xf] }
 0x23f   : > { %5386 = vmatpush.bf16.msrb.mxu3 %v7876_v33  ;;  %v5013_v36 = vpop.f32.mrf.mxu3  ;;  %v4958_v26 = vpop.f32.mrf.mxu0  ;;  %v5615_v10 = vsub.f32 1.5, %v5614_v12  ;;  %v8073_v29 = vld [vmem:[%s9397_s5 + $0xf68] sm:$0xf0]  ;;  %v8952_v44 = vld [vmem:[%s9397_s5 + $0xec4] sm:$0xf] }
 0x240   : > { %v4977_v42 = vpop.f32.mrf.mxu1  ;;  %v4959_v58 = vadd.f32 %v4958_v26, %v11175_v14  ;;  %5330 = vmatpush.bf16.msrb.mxu0 %v7676_v1  ;;  %v11247_v9 = vadd.f32 %v5013_v36, %v4995_v24  ;;  %v8884_v14 = vld [vmem:[%s9397_s5 + $0xca4] sm:$0xf]  ;;  %v7705_v36 = vld [vmem:[%s9397_s5 + $0xc88] sm:$0xf0]  ;;  %v11622_v26 = vld [vmem:[#allocation26_spill] sm:$0xff] }
 0x241   : > { %5349 = vmatpush.bf16.msrb.mxu1 %v7740_v38  ;;  %v5616_v23 = vmul.f32 %v11217_v53, %v5615_v10  ;;  %v7724_v30 = vor.u32 %v8884_v14, %v7721_v20  ;;  %v11621_v24 = vld [vmem:[#allocation25_spill] sm:$0xff]  ;;  %v8990_v14 = vld [vmem:[%s9397_s5 + $0xff4] sm:$0xf] }
 0x242   : > { %5368 = vmatpush.bf16.msrb.mxu2 %v7804_v46  ;;  %v4978_v56 = vadd.f32 %v4977_v42, %v4959_v58  ;;  %v8974_v42 = vld [vmem:[%s9397_s5 + $0xf74] sm:$0xf]  ;;  %v11623_v58 = vld [vmem:[#allocation27_spill] sm:$0xff] }
 0x243   : > { %5387 = vmatpush.bf16.msrb.mxu3 %v7868_v5  ;;  %v5620_v33 = vsel %vm5619_vm2, %v11217_v53, %v5616_v23  ;;  %v7716_v5 = vor.u32 %v8882_v54, %v7713_v39  ;;  %v8940_v54 = vld [vmem:[%s9397_s5 + $0xe64] sm:$0xf]  ;;  %v8009_v39 = vld [vmem:[%s9397_s5 + $0xee8] sm:$0xf0] }
 0x244   : > { %5331 = vmatpush.bf16.msrb.mxu0 %v7668_v8  ;;  %v5637_v57 = vmul.f32 %v5633_v37, %v5620_v33  ;;  %v4996_v21 = vpop.f32.mrf.mxu2  ;;  %v11624_v8 = vld [vmem:[#allocation28_spill] sm:$0xff] }
 0x245   : > { %5350 = vmatpush.bf16.msrb.mxu1 %v7732_v27  ;;  %v4997_v46 = vadd.f32 %v4996_v21, %v4978_v56 }
 0x246   : > { %5369 = vmatpush.bf16.msrb.mxu2 %v7796_v15  ;;  %v11269_v40 = vmul.f32 %v5637_v57, %v11173_v13  ;;  %v5649_v45 = vperm.slane %v5637_v57, 0  ;;  %v8864_v13 = vld [vmem:[%s9397_s5 + $0xc04] sm:$0xf]  ;;  %v8081_v15 = vld [vmem:[%s9397_s5 + $0xf78] sm:$0xf0] }
 0x247   : > { %5388 = vmatpush.bf16.msrb.mxu3 %v7860_v32  ;;  %v5015_v53 = vpop.f32.mrf.mxu3  ;;  %v4961_v1 = vpop.f32.mrf.mxu0  ;;  %v7772_v32 = vor.u32 %v8896_v16, %v7769_v43  ;;  %v7644_v2 = vor.u32 %v8864_v13, %v7641_v6  ;;  %v7945_v57 = vld [vmem:[%s9397_s5 + $0xe68] sm:$0xf0]  ;;  %v7937_v16 = vld [vmem:[%s9397_s5 + $0xe58] sm:$0xf0]  ;;  %v8986_v13 = vld [vmem:[%s9397_s5 + $0xfd4] sm:$0xf] }
 0x248   : > { %v4980_v25 = vpop.f32.mrf.mxu1  ;;  %v4962_v38 = vadd.f32 %v4961_v1, %v11203_v34  ;;  %5332 = vmatpush.bf16.msrb.mxu0 %v7660_v31  ;;  %v11277_v12 = vmul.f32 %v5649_v45, %v11126_v22  ;;  %v11279_v41 = vadd.f32 %v5015_v53, %v4997_v46  ;;  %v8880_v34 = vld [vmem:[%s9397_s5 + $0xc84] sm:$0xf]  ;;  %v11285_v11 = vmul.f32 %v5649_v45, %v11057_v47  ;;  %v7833_v22 = vld [vmem:[%s9397_s5 + $0xd88] sm:$0xf0]  ;;  %v8942_v47 = vld [vmem:[%s9397_s5 + $0xe74] sm:$0xf] }
 0x249   : > { %5351 = vmatpush.bf16.msrb.mxu1 %v7724_v30  ;;  %5264 = vmatmul.bf16.gmra.mxu0 %v11621_v24  ;;  %v11293_v10 = vmul.f32 %v5649_v45, %v11078_v59  ;;  %v11301_v27 = vmul.f32 %v5649_v45, %v11111_v50  ;;  %v8145_v59 = vld [vmem:[%s9397_s5 + $0xff8] sm:$0xf0]  ;;  %v7708_v23 = vor.u32 %v8880_v34, %v7705_v36  ;;  %v8956_v30 = vld [vmem:[%s9397_s5 + $0xee4] sm:$0xf]  ;;  %v8970_v1 = vld [vmem:[%s9397_s5 + $0xf54] sm:$0xf] }
 0x24a   : > { %5370 = vmatpush.bf16.msrb.mxu2 %v7788_v3  ;;  %v4981_v37 = vadd.f32 %v4980_v25, %v4962_v38  ;;  %5283 = vmatmul.bf16.gmra.mxu1 %v11622_v26  ;;  %v7836_v56 = vor.u32 %v8912_v60, %v7833_v22  ;;  %v8084_v50 = vor.u32 %v8974_v42, %v8081_v15  ;;  %v8065_v25 = vld [vmem:[%s9397_s5 + $0xf58] sm:$0xf0]  ;;  %v8954_v38 = vld [vmem:[%s9397_s5 + $0xed4] sm:$0xf]  ;;  %v8968_v22 = vld [vmem:[%s9397_s5 + $0xf44] sm:$0xf] }
 0x24b   : > { %5389 = vmatpush.bf16.msrb.mxu3 %v7852_v4  ;;  %5302 = vmatmul.bf16.gmra.mxu2 %v11623_v58  ;;  %v7956_v62 = vor.u32 %v8942_v47, %v7953_v61  ;;  %v8148_v19 = vor.u32 %v8990_v14, %v8145_v59  ;;  %v8012_v45 = vor.u32 %v8956_v30, %v8009_v39  ;;  %v8001_v43 = vld [vmem:[%s9397_s5 + $0xed8] sm:$0xf0]  ;;  %v8057_v42 = vld [vmem:[%s9397_s5 + $0xf48] sm:$0xf0]  ;;  %v8936_v47 = vld [vmem:[%s9397_s5 + $0xe44] sm:$0xf] }
 0x24c   : > { %5321 = vmatmul.bf16.gmra.mxu3 %v11624_v8  ;;  %5333 = vmatpush.bf16.msrb.mxu0 %v7652_v48  ;;  %v4999_v20 = vpop.f32.mrf.mxu2  ;;  %v8140_v46 = vor.u32 %v8988_v35, %v8137_v17  ;;  %v8938_v48 = vld [vmem:[%s9397_s5 + $0xe54] sm:$0xf]  ;;  %v8129_v6 = vld [vmem:[%s9397_s5 + $0xfd8] sm:$0xf0]  ;;  %v8068_v24 = vor.u32 %v8970_v1, %v8065_v25  ;;  %v8004_v58 = vor.u32 %v8954_v38, %v8001_v43  ;;  %v7929_v61 = vld [vmem:[%s9397_s5 + $0xe48] sm:$0xf0] }
 0x24d   : > { %5352 = vmatpush.bf16.msrb.mxu1 %v7716_v5  ;;  %v5000_v33 = vadd.f32 %v4999_v20, %v4981_v37  ;;  %v7940_v26 = vor.u32 %v8938_v48, %v7937_v16  ;;  %v8132_v8 = vor.u32 %v8986_v13, %v8129_v6  ;;  %v8984_v14 = vld [vmem:[%s9397_s5 + $0xfc4] sm:$0xf]  ;;  %v8121_v59 = vld [vmem:[%s9397_s5 + $0xfc8] sm:$0xf0]  ;;  %v8060_v20 = vor.u32 %v8968_v22, %v8057_v42  ;;  %v8113_v30 = vld [vmem:[%s9397_s5 + $0xfb8] sm:$0xf0] }
 0x24e   : > { %5371 = vmatpush.bf16.msrb.mxu2 %v7780_v18  ;;  %v8076_v18 = vor.u32 %v8972_v0, %v8073_v29  ;;  %v8124_v29 = vor.u32 %v8984_v14, %v8121_v59  ;;  %v8932_v48 = vld [vmem:[%s9397_s5 + $0xe24] sm:$0xf]  ;;  %v7913_v16 = vld [vmem:[%s9397_s5 + $0xe28] sm:$0xf0]  ;;  %v8946_v22 = vld [vmem:[%s9397_s5 + $0xe94] sm:$0xf] }
 0x24f   : > { %5390 = vmatpush.bf16.msrb.mxu3 %v7844_v63  ;;  %v5018_v7 = vpop.f32.mrf.mxu3  ;;  %v4963_v3 = vpop.f32.mrf.mxu0  ;;  %v8105_v43 = vld [vmem:[%s9397_s5 + $0xfa8] sm:$0xf0]  ;;  %v7916_v6 = vor.u32 %v8932_v48, %v7913_v16 }
 0x250   : > { %v4982_v31 = vpop.f32.mrf.mxu1  ;;  %v4964_v4 = vadd.f32 %v4963_v3, %v11219_v28  ;;  %5334 = vmatpush.bf16.msrb.mxu0 %v7644_v2  ;;  %v11315_v21 = vadd.f32 %v5018_v7, %v5000_v33  ;;  %v7948_v28 = vor.u32 %v8940_v54, %v7945_v57  ;;  %v11625_v2 = vld [vmem:[#allocation29_spill] sm:$0xff]  ;;  %v7932_v7 = vor.u32 %v8936_v47, %v7929_v61  ;;  %v8934_v33 = vld [vmem:[%s9397_s5 + $0xe34] sm:$0xf]  ;;  %v7921_v3 = vld [vmem:[%s9397_s5 + $0xe38] sm:$0xf0] }
 0x251   : > { %5353 = vmatpush.bf16.msrb.mxu1 %v7708_v23  ;;  %v11627_v23 = vld [vmem:[#allocation31_spill] sm:$0xff]  ;;  %v8982_v57 = vld [vmem:[%s9397_s5 + $0xfb4] sm:$0xf] }
 0x252   : > { %5372 = vmatpush.bf16.msrb.mxu2 %v7772_v32  ;;  %v4983_v53 = vadd.f32 %v4982_v31, %v4964_v4  ;;  %v8950_v31 = vld [vmem:[%s9397_s5 + $0xeb4] sm:$0xf]  ;;  %v7985_v54 = vld [vmem:[%s9397_s5 + $0xeb8] sm:$0xf0]  ;;  %v8116_v25 = vor.u32 %v8982_v57, %v8113_v30  ;;  %v11632_v30 = vld [vmem:[#allocation36_spill] sm:$0xff] }
 0x253   : > { %5391 = vmatpush.bf16.msrb.mxu3 %v7836_v56  ;;  %v11628_v56 = vld [vmem:[#allocation32_spill] sm:$0xff]  ;;  %v7988_v1 = vor.u32 %v8950_v31, %v7985_v54  ;;  %v8978_v47 = vld [vmem:[%s9397_s5 + $0xf94] sm:$0xf]  ;;  %v8097_v61 = vld [vmem:[%s9397_s5 + $0xf98] sm:$0xf0] }
 0x254   : > { %5403 = vmatpush.bf16.msra.mxu0 %v7956_v62  ;;  %v5001_v5 = vpop.f32.mrf.mxu2  ;;  %v8049_v62 = vld [vmem:[%s9397_s5 + $0xf38] sm:$0xf0]  ;;  %v11630_v31 = vld [vmem:[#allocation34_spill] sm:$0xff] }
 0x255   : > { %5422 = vmatpush.bf16.msra.mxu1 %v8020_v49  ;;  %v5002_v34 = vadd.f32 %v5001_v5, %v4983_v53  ;;  %v7977_v5 = vld [vmem:[%s9397_s5 + $0xea8] sm:$0xf0]  ;;  %v8337_v54 = vld [vmem:[%s9397_s5 + $0x1178] sm:$0xf0] }
 0x256   : > { %5441 = vmatpush.bf16.msra.mxu2 %v8084_v50  ;;  %v8966_v50 = vld [vmem:[%s9397_s5 + $0xf34] sm:$0xf]  ;;  %v11631_v57 = vld [vmem:[#allocation35_spill] sm:$0xff] }
 0x257   : > { %5460 = vmatpush.bf16.msra.mxu3 %v8148_v19  ;;  %v5020_v63 = vpop.f32.mrf.mxu3  ;;  %v5032_v36 = vpop.f32.mrf.mxu0  ;;  %v8052_v53 = vor.u32 %v8966_v50, %v8049_v62  ;;  %v8100_v62 = vor.u32 %v8978_v47, %v8097_v61 }
 0x258   : > { %5404 = vmatpush.bf16.msra.mxu0 %v7948_v28  ;;  %v5051_v60 = vpop.f32.mrf.mxu1  ;;  %v5033_v37 = vadd.f32 %v5032_v36, %v11247_v9  ;;  %v11328_v15 = vadd.f32 %v5020_v63, %v5002_v34  ;;  %v7993_v9 = vld [vmem:[%s9397_s5 + $0xec8] sm:$0xf0]  ;;  %v8964_v28 = vld [vmem:[%s9397_s5 + $0xf24] sm:$0xf]  ;;  %v8962_v34 = vld [vmem:[%s9397_s5 + $0xf14] sm:$0xf] }
 0x259   : > { %5423 = vmatpush.bf16.msra.mxu1 %v8012_v45  ;;  %5335 = vmatmul.bf16.vlgmr.msrb.gmra.mxu0 %v11625_v2  ;;  %v7996_v0 = vor.u32 %v8952_v44, %v7993_v9  ;;  %v8041_v45 = vld [vmem:[%s9397_s5 + $0xf28] sm:$0xf0]  ;;  %v8980_v63 = vld [vmem:[%s9397_s5 + $0xfa4] sm:$0xf]  ;;  %v8033_v36 = vld [vmem:[%s9397_s5 + $0xf18] sm:$0xf0] }
 0x25a   : > { %5442 = vmatpush.bf16.msra.mxu2 %v8076_v18  ;;  %v5052_v32 = vadd.f32 %v5051_v60, %v5033_v37  ;;  %5354 = vmatmul.bf16.vlgmr.msrb.gmra.mxu1 %v11626_v51  ;;  %v7924_v18 = vor.u32 %v8934_v33, %v7921_v3  ;;  %v8044_v13 = vor.u32 %v8964_v28, %v8041_v45  ;;  %v8960_v51 = vld [vmem:[%s9397_s5 + $0xf04] sm:$0xf]  ;;  %v11629_v3 = vld [vmem:[#allocation33_spill] sm:$0xff]  ;;  %v9054_v28 = vld [vmem:[%s9397_s5 + $0x11f4] sm:$0xf] }
 0x25b   : > { %5461 = vmatpush.bf16.msra.mxu3 %v8140_v46  ;;  %5373 = vmatmul.bf16.vlgmr.msrb.gmra.mxu2 %v11627_v23  ;;  %v8108_v37 = vor.u32 %v8980_v63, %v8105_v43  ;;  %v8036_v14 = vor.u32 %v8962_v34, %v8033_v36  ;;  %v8025_v23 = vld [vmem:[%s9397_s5 + $0xf08] sm:$0xf0]  ;;  %v8401_v45 = vld [vmem:[%s9397_s5 + $0x11f8] sm:$0xf0] }
 0x25c   : > { %5392 = vmatmul.bf16.vlgmr.msrb.gmra.mxu3 %v11628_v56  ;;  %5405 = vmatpush.bf16.msra.mxu0 %v7940_v26  ;;  %v5070_v49 = vpop.f32.mrf.mxu2  ;;  %v7905_v26 = vld [vmem:[%s9397_s5 + $0xe18] sm:$0xf0]  ;;  %v8928_v56 = vld [vmem:[%s9397_s5 + $0xe04] sm:$0xf]  ;;  %v8329_v63 = vld [vmem:[%s9397_s5 + $0x1168] sm:$0xf0]  ;;  %v8404_v36 = vor.u32 %v9054_v28, %v8401_v45 }
 0x25d   : > { %5424 = vmatpush.bf16.msra.mxu1 %v8004_v58  ;;  %v5071_v4 = vadd.f32 %v5070_v49, %v5052_v32  ;;  %v8089_v49 = vld [vmem:[%s9397_s5 + $0xf88] sm:$0xf0]  ;;  %v9048_v28 = vld [vmem:[%s9397_s5 + $0x11c4] sm:$0xf] }
 0x25e   : > { %5443 = vmatpush.bf16.msra.mxu2 %v8068_v24  ;;  %v8930_v24 = vld [vmem:[%s9397_s5 + $0xe14] sm:$0xf]  ;;  %v8377_v45 = vld [vmem:[%s9397_s5 + $0x11c8] sm:$0xf0] }
 0x25f   : > { %5462 = vmatpush.bf16.msra.mxu3 %v8132_v8  ;;  %v5089_v19 = vpop.f32.mrf.mxu3  ;;  %v5034_v39 = vpop.f32.mrf.mxu0  ;;  %v7969_v8 = vld [vmem:[%s9397_s5 + $0xe98] sm:$0xf0]  ;;  %v7908_v59 = vor.u32 %v8930_v24, %v7905_v26  ;;  %v9020_v24 = vld [vmem:[%s9397_s5 + $0x10e4] sm:$0xf] }
 0x260   : > { %v5053_v35 = vpop.f32.mrf.mxu1  ;;  %v5035_v17 = vadd.f32 %v5034_v39, %v11279_v41  ;;  %5406 = vmatpush.bf16.msra.mxu0 %v7932_v7  ;;  %v11351_v46 = vadd.f32 %v5089_v19, %v5071_v4  ;;  %v8948_v41 = vld [vmem:[%s9397_s5 + $0xea4] sm:$0xf]  ;;  %v7972_v50 = vor.u32 %v8946_v22, %v7969_v8  ;;  %v9038_v19 = vld [vmem:[%s9397_s5 + $0x1174] sm:$0xf]  ;;  %v8209_v39 = vld [vmem:[%s9397_s5 + $0x1078] sm:$0xf0] }
 0x261   : > { %5425 = vmatpush.bf16.msra.mxu1 %v7996_v0  ;;  %v7980_v60 = vor.u32 %v8948_v41, %v7977_v5  ;;  %v7961_v0 = vld [vmem:[%s9397_s5 + $0xe88] sm:$0xf0]  ;;  %v9006_v4 = vld [vmem:[%s9397_s5 + $0x1074] sm:$0xf]  ;;  %v8340_v41 = vor.u32 %v9038_v19, %v8337_v54  ;;  %v9036_v5 = vld [vmem:[%s9397_s5 + $0x1164] sm:$0xf] }
 0x262   : > { %5444 = vmatpush.bf16.msra.mxu2 %v8060_v20  ;;  %v5054_v38 = vadd.f32 %v5053_v35, %v5035_v17  ;;  %v7897_v20 = vld [vmem:[%s9397_s5 + $0xe08] sm:$0xf0]  ;;  %v9022_v35 = vld [vmem:[%s9397_s5 + $0x10f4] sm:$0xf]  ;;  %v8028_v17 = vor.u32 %v8960_v51, %v8025_v23  ;;  %v8332_v61 = vor.u32 %v9036_v5, %v8329_v63  ;;  %v8321_v51 = vld [vmem:[%s9397_s5 + $0x1158] sm:$0xf0]  ;;  %v8380_v63 = vor.u32 %v9048_v28, %v8377_v45 }
 0x263   : > { %5463 = vmatpush.bf16.msra.mxu3 %v8124_v29  ;;  %v8976_v29 = vld [vmem:[%s9397_s5 + $0xf84] sm:$0xf]  ;;  %v8265_v22 = vld [vmem:[%s9397_s5 + $0x10e8] sm:$0xf0] }
 0x264   : > { %5407 = vmatpush.bf16.msra.mxu0 %v7924_v18  ;;  %v5072_v42 = vpop.f32.mrf.mxu2  ;;  %v8273_v18 = vld [vmem:[%s9397_s5 + $0x10f8] sm:$0xf0]  ;;  %v8313_v19 = vld [vmem:[%s9397_s5 + $0x1148] sm:$0xf0]  ;;  %v9024_v45 = vld [vmem:[%s9397_s5 + $0x1104] sm:$0xf] }
 0x265   : > { %5426 = vmatpush.bf16.msra.mxu1 %v7988_v1  ;;  %v5073_v44 = vadd.f32 %v5072_v42, %v5054_v38  ;;  %v8212_v38 = vor.u32 %v9006_v4, %v8209_v39  ;;  %v8276_v34 = vor.u32 %v9022_v35, %v8273_v18  ;;  %v9052_v42 = vld [vmem:[%s9397_s5 + $0x11e4] sm:$0xf]  ;;  %v8185_v39 = vld [vmem:[%s9397_s5 + $0x1048] sm:$0xf0]  ;;  %v11634_v18 = vld [vmem:[#allocation38_spill] sm:$0xff] }
 0x266   : > { %5445 = vmatpush.bf16.msra.mxu2 %v8052_v53  ;;  %v7900_v53 = vor.u32 %v8928_v56, %v7897_v20  ;;  %v8257_v20 = vld [vmem:[%s9397_s5 + $0x10d8] sm:$0xf0]  ;;  %v9000_v4 = vld [vmem:[%s9397_s5 + $0x1044] sm:$0xf] }
 0x267   : > { %5464 = vmatpush.bf16.msra.mxu3 %v8116_v25  ;;  %v5091_v58 = vpop.f32.mrf.mxu3  ;;  %v5037_v32 = vpop.f32.mrf.mxu0  ;;  %v8092_v25 = vor.u32 %v8976_v29, %v8089_v49  ;;  %v9032_v49 = vld [vmem:[%s9397_s5 + $0x1144] sm:$0xf] }
 0x268   : > { %v5056_v2 = vpop.f32.mrf.mxu1  ;;  %v5038_v9 = vadd.f32 %v5037_v32, %v11315_v21  ;;  %5408 = vmatpush.bf16.msra.mxu0 %v7916_v6  ;;  %v11372_v7 = vadd.f32 %v5091_v58, %v5073_v44  ;;  %v8944_v21 = vld [vmem:[%s9397_s5 + $0xe84] sm:$0xf]  ;;  %v8393_v58 = vld [vmem:[%s9397_s5 + $0x11e8] sm:$0xf0]  ;;  %v8268_v44 = vor.u32 %v9020_v24, %v8265_v22  ;;  %v8369_v24 = vld [vmem:[%s9397_s5 + $0x11b8] sm:$0xf0] }
 0x269   : > { %5427 = vmatpush.bf16.msra.mxu1 %v7980_v60  ;;  %5340 = vmatmul.bf16.gmra.mxu0 %v11629_v3  ;;  %v7964_v1 = vor.u32 %v8944_v21, %v7961_v0  ;;  %v9004_v60 = vld [vmem:[%s9397_s5 + $0x1064] sm:$0xf]  ;;  %v8396_v32 = vor.u32 %v9052_v42, %v8393_v58 }
 0x26a   : > { %5446 = vmatpush.bf16.msra.mxu2 %v8044_v13  ;;  %v5057_v33 = vadd.f32 %v5056_v2, %v5038_v9  ;;  %5359 = vmatmul.bf16.gmra.mxu1 %v11630_v31  ;;  %v9034_v2 = vld [vmem:[%s9397_s5 + $0x1154] sm:$0xf]  ;;  %v9016_v35 = vld [vmem:[%s9397_s5 + $0x10c4] sm:$0xf] }
 0x26b   : > { %5465 = vmatpush.bf16.msra.mxu3 %v8108_v37  ;;  %5378 = vmatmul.bf16.gmra.mxu2 %v11631_v57  ;;  %v8201_v37 = vld [vmem:[%s9397_s5 + $0x1068] sm:$0xf0]  ;;  %v9002_v9 = vld [vmem:[%s9397_s5 + $0x1054] sm:$0xf]  ;;  %v8324_v3 = vor.u32 %v9034_v2, %v8321_v51 }
 0x26c   : > { %5397 = vmatmul.bf16.gmra.mxu3 %v11632_v30  ;;  %5409 = vmatpush.bf16.msra.mxu0 %v7908_v59  ;;  %v5075_v48 = vpop.f32.mrf.mxu2  ;;  %v9018_v59 = vld [vmem:[%s9397_s5 + $0x10d4] sm:$0xf] }
 0x26d   : > { %5428 = vmatpush.bf16.msra.mxu1 %v7972_v50  ;;  %v5076_v43 = vadd.f32 %v5075_v48, %v5057_v33  ;;  %v9050_v50 = vld [vmem:[%s9397_s5 + $0x11d4] sm:$0xf]  ;;  %v8260_v57 = vor.u32 %v9018_v59, %v8257_v20  ;;  %v8316_v48 = vor.u32 %v9032_v49, %v8313_v19  ;;  %v8361_v20 = vld [vmem:[%s9397_s5 + $0x11a8] sm:$0xf0] }
 0x26e   : > { %5447 = vmatpush.bf16.msra.mxu2 %v8036_v14  ;;  %v8193_v14 = vld [vmem:[%s9397_s5 + $0x1058] sm:$0xf0]  ;;  %v9010_v49 = vld [vmem:[%s9397_s5 + $0x1094] sm:$0xf] }
 0x26f   : > { %5466 = vmatpush.bf16.msra.mxu3 %v8100_v62  ;;  %v5094_v16 = vpop.f32.mrf.mxu3  ;;  %v5039_v13 = vpop.f32.mrf.mxu0  ;;  %v8385_v62 = vld [vmem:[%s9397_s5 + $0x11d8] sm:$0xf0]  ;;  %v8196_v31 = vor.u32 %v9002_v9, %v8193_v14  ;;  %v8996_v9 = vld [vmem:[%s9397_s5 + $0x1024] sm:$0xf]  ;;  %v8169_v14 = vld [vmem:[%s9397_s5 + $0x1028] sm:$0xf0] }
 0x270   : > { %v5058_v6 = vpop.f32.mrf.mxu1  ;;  %v5040_v26 = vadd.f32 %v5039_v13, %v11328_v15  ;;  %5410 = vmatpush.bf16.msra.mxu0 %v7900_v53  ;;  %v11399_v8 = vadd.f32 %v5094_v16, %v5076_v43  ;;  %v8204_v15 = vor.u32 %v9004_v60, %v8201_v37  ;;  %v8388_v30 = vor.u32 %v9050_v50, %v8385_v62  ;;  %v11633_v53 = vld [vmem:[#allocation37_spill] sm:$0xff]  ;;  %v8998_v43 = vld [vmem:[%s9397_s5 + $0x1034] sm:$0xf]  ;;  %v8177_v13 = vld [vmem:[%s9397_s5 + $0x1038] sm:$0xf0] }
 0x271   : > { %5429 = vmatpush.bf16.msra.mxu1 %v7964_v1  ;;  %v11635_v1 = vld [vmem:[#allocation39_spill] sm:$0xff]  ;;  %v8188_v16 = vor.u32 %v9000_v4, %v8185_v39  ;;  %v9046_v37 = vld [vmem:[%s9397_s5 + $0x11b4] sm:$0xf]  ;;  %v8172_v62 = vor.u32 %v8996_v9, %v8169_v14 }
 0x272   : > { %5448 = vmatpush.bf16.msra.mxu2 %v8028_v17  ;;  %v5059_v47 = vadd.f32 %v5058_v6, %v5040_v26  ;;  %v9014_v6 = vld [vmem:[%s9397_s5 + $0x10b4] sm:$0xf]  ;;  %v8241_v60 = vld [vmem:[%s9397_s5 + $0x10b8] sm:$0xf0]  ;;  %v8372_v51 = vor.u32 %v9046_v37, %v8369_v24 }
 0x273   : > { %5467 = vmatpush.bf16.msra.mxu3 %v8092_v25  ;;  %v11636_v25 = vld [vmem:[#allocation40_spill] sm:$0xff]  ;;  %v8244_v2 = vor.u32 %v9014_v6, %v8241_v60  ;;  %v9042_v4 = vld [vmem:[%s9397_s5 + $0x1194] sm:$0xf]  ;;  %v8353_v39 = vld [vmem:[%s9397_s5 + $0x1198] sm:$0xf0] }
 0x274   : > { %5479 = vmatpush.bf16.msrb.mxu0 %v8212_v38  ;;  %v5077_v23 = vpop.f32.mrf.mxu2  ;;  %v8305_v38 = vld [vmem:[%s9397_s5 + $0x1138] sm:$0xf0]  ;;  %v9040_v6 = vld [vmem:[%s9397_s5 + $0x1184] sm:$0xf] }
 0x275   : > { %5498 = vmatpush.bf16.msrb.mxu1 %v8276_v34  ;;  %v5078_v21 = vadd.f32 %v5077_v23, %v5059_v47  ;;  %v8233_v23 = vld [vmem:[%s9397_s5 + $0x10a8] sm:$0xf0]  ;;  %v11640_v60 = vld [vmem:[#allocation44_spill] sm:$0xff] }
 0x276   : > { %5517 = vmatpush.bf16.msrb.mxu2 %v8340_v41  ;;  %v9030_v41 = vld [vmem:[%s9397_s5 + $0x1134] sm:$0xf] }
 0x277   : > { %5536 = vmatpush.bf16.msrb.mxu3 %v8404_v36  ;;  %v5096_v56 = vpop.f32.mrf.mxu3  ;;  %v5108_v0 = vpop.f32.mrf.mxu0  ;;  %v8308_v47 = vor.u32 %v9030_v41, %v8305_v38  ;;  %v8992_v41 = vld [vmem:[%s9397_s5 + $0x1004] sm:$0xf]  ;;  %v8153_v38 = vld [vmem:[%s9397_s5 + $0x1008] sm:$0xf0] }
 0x278   : > { %5480 = vmatpush.bf16.msrb.mxu0 %v8204_v15  ;;  %v5127_v29 = vpop.f32.mrf.mxu1  ;;  %v5109_v33 = vadd.f32 %v5108_v0, %v11351_v46  ;;  %v11412_v54 = vadd.f32 %v5096_v56, %v5078_v21  ;;  %v8249_v46 = vld [vmem:[%s9397_s5 + $0x10c8] sm:$0xf0]  ;;  %v9028_v15 = vld [vmem:[%s9397_s5 + $0x1124] sm:$0xf]  ;;  %v9026_v21 = vld [vmem:[%s9397_s5 + $0x1114] sm:$0xf]  ;;  %v8156_v24 = vor.u32 %v8992_v41, %v8153_v38 }
 0x279   : > { %5499 = vmatpush.bf16.msrb.mxu1 %v8268_v44  ;;  %5411 = vmatmul.bf16.vlgmr.msra.gmra.mxu0 %v11633_v53  ;;  %v8252_v5 = vor.u32 %v9016_v35, %v8249_v46  ;;  %v8297_v44 = vld [vmem:[%s9397_s5 + $0x1128] sm:$0xf0]  ;;  %v9044_v56 = vld [vmem:[%s9397_s5 + $0x11a4] sm:$0xf]  ;;  %v8289_v0 = vld [vmem:[%s9397_s5 + $0x1118] sm:$0xf0] }
 0x27a   : > { %5518 = vmatpush.bf16.msrb.mxu2 %v8332_v61  ;;  %v5128_v17 = vadd.f32 %v5127_v29, %v5109_v33  ;;  %5430 = vmatmul.bf16.vlgmr.msra.gmra.mxu1 %v11634_v18  ;;  %v8180_v61 = vor.u32 %v8998_v43, %v8177_v13  ;;  %v8300_v50 = vor.u32 %v9028_v15, %v8297_v44  ;;  %v11637_v43 = vld [vmem:[#allocation41_spill] sm:$0xff] }
 0x27b   : > { %5537 = vmatpush.bf16.msrb.mxu3 %v8396_v32  ;;  %5449 = vmatmul.bf16.vlgmr.msra.gmra.mxu2 %v11635_v1  ;;  %v8364_v33 = vor.u32 %v9044_v56, %v8361_v20  ;;  %v8292_v46 = vor.u32 %v9026_v21, %v8289_v0  ;;  %v8281_v1 = vld [vmem:[%s9397_s5 + $0x1108] sm:$0xf0]  ;;  %v11642_v21 = vld [vmem:[#allocation46_spill] sm:$0xff]  ;;  %v11644_v0 = vld [vmem:[#allocation48_spill] sm:$0xff] }
 0x27c   : > { %5468 = vmatmul.bf16.vlgmr.msra.gmra.mxu3 %v11636_v25  ;;  %5481 = vmatpush.bf16.msrb.mxu0 %v8196_v31  ;;  %v5146_v34 = vpop.f32.mrf.mxu2  ;;  %v8161_v31 = vld [vmem:[%s9397_s5 + $0x1018] sm:$0xf0]  ;;  %v8217_v13 = vld [vmem:[%s9397_s5 + $0x1088] sm:$0xf0]  ;;  %v8284_v37 = vor.u32 %v9024_v45, %v8281_v1  ;;  %v11646_v45 = vld [vmem:[#allocation50_spill] sm:$0xff] }
 0x27d   : > { %5500 = vmatpush.bf16.msrb.mxu1 %v8260_v57  ;;  %v5147_v26 = vadd.f32 %v5146_v34, %v5128_v17  ;;  %v8345_v34 = vld [vmem:[%s9397_s5 + $0x1188] sm:$0xf0] }
 0x27e   : > { %5519 = vmatpush.bf16.msrb.mxu2 %v8324_v3  ;;  %v8994_v3 = vld [vmem:[%s9397_s5 + $0x1014] sm:$0xf] }
 0x27f   : > { %5538 = vmatpush.bf16.msrb.mxu3 %v8388_v30  ;;  %v5165_v36 = vpop.f32.mrf.mxu3  ;;  %v5110_v22 = vpop.f32.mrf.mxu0  ;;  %v8225_v30 = vld [vmem:[%s9397_s5 + $0x1098] sm:$0xf0]  ;;  %v8164_v28 = vor.u32 %v8994_v3, %v8161_v31 }
 0x280   : > { %v5129_v42 = vpop.f32.mrf.mxu1  ;;  %v5111_v58 = vadd.f32 %v5110_v22, %v11372_v7  ;;  %5482 = vmatpush.bf16.msrb.mxu0 %v8188_v16  ;;  %v11435_v32 = vadd.f32 %v5165_v36, %v5147_v26  ;;  %v9012_v7 = vld [vmem:[%s9397_s5 + $0x10a4] sm:$0xf]  ;;  %v8356_v16 = vor.u32 %v9042_v4, %v8353_v39  ;;  %v11639_v36 = vld [vmem:[#allocation43_spill] sm:$0xff]  ;;  %v8348_v22 = vor.u32 %v9040_v6, %v8345_v34 }
 0x281   : > { %5501 = vmatpush.bf16.msrb.mxu1 %v8252_v5  ;;  %v8236_v29 = vor.u32 %v9012_v7, %v8233_v23  ;;  %v9008_v5 = vld [vmem:[%s9397_s5 + $0x1084] sm:$0xf]  ;;  %s254_s5 = scalar_lea.vmem [#allocation6], %s5809_s13 }
 0x282   : > { %5520 = vmatpush.bf16.msrb.mxu2 %v8316_v48  ;;  %v5130_v59 = vadd.f32 %v5129_v42, %v5111_v58  ;;  %v8228_v48 = vor.u32 %v9010_v49, %v8225_v30  ;;  %v8220_v26 = vor.u32 %v9008_v5, %v8217_v13 }
 0x283   : > { %5539 = vmatpush.bf16.msrb.mxu3 %v8380_v63 }
 0x284   : > { %5483 = vmatpush.bf16.msrb.mxu0 %v8180_v61  ;;  %v5148_v19 = vpop.f32.mrf.mxu2 }
 0x285   : > { %5502 = vmatpush.bf16.msrb.mxu1 %v8244_v2  ;;  %v5149_v35 = vadd.f32 %v5148_v19, %v5130_v59 }
 0x286   : > { %5521 = vmatpush.bf16.msrb.mxu2 %v8308_v47 }
 0x287   : > { %5540 = vmatpush.bf16.msrb.mxu3 %v8372_v51  ;;  %v5167_v57 = vpop.f32.mrf.mxu3  ;;  %v5113_v17 = vpop.f32.mrf.mxu0 }
 0x288   : > { %v5132_v53 = vpop.f32.mrf.mxu1  ;;  %v5114_v18 = vadd.f32 %v5113_v17, %v11399_v8  ;;  %5484 = vmatpush.bf16.msrb.mxu0 %v8172_v62  ;;  %v5168_v25 = vadd.f32 %v5167_v57, %v5149_v35  ;;  %v11638_v8 = vld [vmem:[#allocation42_spill] sm:$0xff]  ;;  %v11641_v62 = vld [vmem:[#allocation45_spill] sm:$0xff] }
 0x289   : > { %5503 = vmatpush.bf16.msrb.mxu1 %v8236_v29  ;;  %5416 = vmatmul.bf16.gmra.mxu0 %v11637_v43 }
 0x28a   : > { %5522 = vmatpush.bf16.msrb.mxu2 %v8300_v50  ;;  %v5133_v63 = vadd.f32 %v5132_v53, %v5114_v18  ;;  %5435 = vmatmul.bf16.gmra.mxu1 %v11638_v8 }
 0x28b   : > { %5541 = vmatpush.bf16.msrb.mxu3 %v8364_v33  ;;  %5454 = vmatmul.bf16.gmra.mxu2 %v11639_v36 }
 0x28c   : > { %5473 = vmatmul.bf16.gmra.mxu3 %v11640_v60  ;;  %5485 = vmatpush.bf16.msrb.mxu0 %v8164_v28  ;;  %v5151_v42 = vpop.f32.mrf.mxu2  ;;  %v11645_v28 = vld [vmem:[#allocation49_spill] sm:$0xff] }
 0x28d   : > { %5504 = vmatpush.bf16.msrb.mxu1 %v8228_v48  ;;  %v5152_v47 = vadd.f32 %v5151_v42, %v5133_v63 }
 0x28e   : > { %5523 = vmatpush.bf16.msrb.mxu2 %v8292_v46 }
 0x28f   : > { %5542 = vmatpush.bf16.msrb.mxu3 %v8356_v16  ;;  %v5170_v58 = vpop.f32.mrf.mxu3  ;;  %v5115_v61 = vpop.f32.mrf.mxu0 }
 0x290   : > { %v5134_v15 = vpop.f32.mrf.mxu1  ;;  %v5116_v44 = vadd.f32 %v5115_v61, %v11412_v54  ;;  %5486 = vmatpush.bf16.msrb.mxu0 %v8156_v24  ;;  %v5171_v2 = vadd.f32 %v5170_v58, %v5152_v47  ;;  %v11643_v54 = vld [vmem:[#allocation47_spill] sm:$0xff] }
 0x291   : > { %5505 = vmatpush.bf16.msrb.mxu1 %v8220_v26 }
 0x292   : > { %5524 = vmatpush.bf16.msrb.mxu2 %v8284_v37  ;;  %v5135_v51 = vadd.f32 %v5134_v15, %v5116_v44 }
 0x293   : > { %5543 = vmatpush.bf16.msrb.mxu3 %v8348_v22 }
 0x294   : > { %v5153_v9 = vpop.f32.mrf.mxu2 }
 0x295   : > { %v5154_v7 = vadd.f32 %v5153_v9, %v5135_v51 }
 0x297   : > { %v5172_v14 = vpop.f32.mrf.mxu3  ;;  %v5184_v59 = vpop.f32.mrf.mxu0 }
 0x298   : > { %v5203_v23 = vpop.f32.mrf.mxu1  ;;  %v5185_v56 = vadd.f32 %v5184_v59, %v11435_v32  ;;  %v5173_v20 = vadd.f32 %v5172_v14, %v5154_v7 }
 0x299   : > { %5487 = vmatmul.bf16.vlgmr.msrb.gmra.mxu0 %v11641_v62 }
 0x29a   : > { %v5204_v50 = vadd.f32 %v5203_v23, %v5185_v56  ;;  %5506 = vmatmul.bf16.vlgmr.msrb.gmra.mxu1 %v11642_v21 }
 0x29b   : > { %5525 = vmatmul.bf16.vlgmr.msrb.gmra.mxu2 %v11643_v54 }
 0x29c   : > { %5544 = vmatmul.bf16.vlgmr.msrb.gmra.mxu3 %v11644_v0  ;;  %v5222_v29 = vpop.f32.mrf.mxu2 }
 0x29d   : > { %v5223_v3 = vadd.f32 %v5222_v29, %v5204_v50 }
 0x29f   : > { %v5241_v33 = vpop.f32.mrf.mxu3  ;;  %v5186_v31 = vpop.f32.mrf.mxu0 }
 0x2a0   : > { %v5205_v49 = vpop.f32.mrf.mxu1  ;;  %v5187_v19 = vadd.f32 %v5186_v31, %v5168_v25  ;;  %v5242_v57 = vadd.f32 %v5241_v33, %v5223_v3 }
 0x2a2   : > { %v5206_v30 = vadd.f32 %v5205_v49, %v5187_v19 }
 0x2a4   : > { %v5224_v4 = vpop.f32.mrf.mxu2 }
 0x2a5   : > { %v5225_v39 = vadd.f32 %v5224_v4, %v5206_v30 }
 0x2a7   : > { %v5243_v32 = vpop.f32.mrf.mxu3  ;;  %v5189_v35 = vpop.f32.mrf.mxu0 }
 0x2a8   : > { %v5208_v17 = vpop.f32.mrf.mxu1  ;;  %v5190_v53 = vadd.f32 %v5189_v35, %v5171_v2  ;;  %v5244_v18 = vadd.f32 %v5243_v32, %v5225_v39 }
 0x2a9   : > { %5492 = vmatmul.bf16.gmra.mxu0 %v10726_v55 }
 0x2aa   : > { %v5209_v46 = vadd.f32 %v5208_v17, %v5190_v53  ;;  %5511 = vmatmul.bf16.gmra.mxu1 %v10728_v52 }
 0x2ab   : > { %5530 = vmatmul.bf16.gmra.mxu2 %v11645_v28 }
 0x2ac   : > { %5549 = vmatmul.bf16.gmra.mxu3 %v11646_v45  ;;  %v5227_v1 = vpop.f32.mrf.mxu2 }
 0x2ad   : > { %v5228_v48 = vadd.f32 %v5227_v1, %v5209_v46 }
 0x2af   : > { %v5246_v25 = vpop.f32.mrf.mxu3  ;;  %v5191_v16 = vpop.f32.mrf.mxu0 }
 0x2b0   : > { %v5210_v41 = vpop.f32.mrf.mxu1  ;;  %v5192_v38 = vadd.f32 %v5191_v16, %v5173_v20  ;;  %v5247_v5 = vadd.f32 %v5246_v25, %v5228_v48 }
 0x2b2   : > { %v5211_v63 = vadd.f32 %v5210_v41, %v5192_v38 }
 0x2b4   : > { %v5229_v43 = vpop.f32.mrf.mxu2 }
 0x2b5   : > { %v5230_v13 = vadd.f32 %v5229_v43, %v5211_v63 }
 0x2b7   : > { %v5248_v8 = vpop.f32.mrf.mxu3  ;;  %v5260_v6 = vpop.f32.mrf.mxu0 }
 0x2b8   : > { %v5279_v34 = vpop.f32.mrf.mxu1  ;;  %v5261_v55 = vadd.f32 %v5260_v6, %v5242_v57  ;;  %v5249_v36 = vadd.f32 %v5248_v8, %v5230_v13 }
 0x2ba   : > { %v5280_v52 = vadd.f32 %v5279_v34, %v5261_v55 }
 0x2bc   : > { %v5298_v60 = vpop.f32.mrf.mxu2 }
 0x2bd   : > { %v5299_v24 = vadd.f32 %v5298_v60, %v5280_v52 }
 0x2bf   : > { %v5317_v37 = vpop.f32.mrf.mxu3  ;;  %v5262_v26 = vpop.f32.mrf.mxu0 }
 0x2c0   : > { %v5281_v22 = vpop.f32.mrf.mxu1  ;;  %v5263_v42 = vadd.f32 %v5262_v26, %v5244_v18  ;;  %v5318_v58 = vadd.f32 %v5317_v37, %v5299_v24 }
 0x2c2   : > { %v5282_v47 = vadd.f32 %v5281_v22, %v5263_v42 }
 0x2c4   : > { %v5300_v61 = vpop.f32.mrf.mxu2 }
 0x2c5   : > { %v5301_v44 = vadd.f32 %v5300_v61, %v5282_v47 }
 0x2c7   : > { %v5319_v15 = vpop.f32.mrf.mxu3  ;;  %v5265_v2 = vpop.f32.mrf.mxu0 }
 0x2c8   : > { %v5284_v51 = vpop.f32.mrf.mxu1  ;;  %v5266_v9 = vadd.f32 %v5265_v2, %v5247_v5  ;;  %v5320_v14 = vadd.f32 %v5319_v15, %v5301_v44 }
 0x2ca   : > { %v5285_v7 = vadd.f32 %v5284_v51, %v5266_v9 }
 0x2ce   : > { %v5303_v59 = vpop.f32.mrf.mxu2 }
 0x2cf   : > { %v5322_v23 = vpop.f32.mrf.mxu3  ;;  %v5304_v56 = vadd.f32 %v5303_v59, %v5285_v7  ;;  %v5267_v20 = vpop.f32.mrf.mxu0 }
 0x2d0   : > { %v5286_v50 = vpop.f32.mrf.mxu1  ;;  %v5268_v62 = vadd.f32 %v5267_v20, %v5249_v36 }
 0x2d1   : > { %v5323_v21 = vadd.f32 %v5322_v23, %v5304_v56 }
 0x2d2   : > { %v5287_v54 = vadd.f32 %v5286_v50, %v5268_v62 }
 0x2d6   : > { %v5305_v0 = vpop.f32.mrf.mxu2 }
 0x2d7   : > { %v5324_v29 = vpop.f32.mrf.mxu3  ;;  %v5306_v33 = vadd.f32 %v5305_v0, %v5287_v54  ;;  %v5336_v3 = vpop.f32.mrf.mxu0 }
 0x2d8   : > { %v5355_v31 = vpop.f32.mrf.mxu1  ;;  %v5337_v49 = vadd.f32 %v5336_v3, %v5318_v58 }
 0x2d9   : > { %v5325_v19 = vadd.f32 %v5324_v29, %v5306_v33 }
 0x2da   : > { %v5356_v57 = vadd.f32 %v5355_v31, %v5337_v49 }
 0x2de   : > { %v5374_v30 = vpop.f32.mrf.mxu2 }
 0x2df   : > { %v5393_v4 = vpop.f32.mrf.mxu3  ;;  %v5375_v32 = vadd.f32 %v5374_v30, %v5356_v57  ;;  %v5338_v39 = vpop.f32.mrf.mxu0 }
 0x2e0   : > { %v5357_v35 = vpop.f32.mrf.mxu1  ;;  %v5339_v52 = vadd.f32 %v5338_v39, %v5320_v14 }
 0x2e1   : > { %v5394_v17 = vadd.f32 %v5393_v4, %v5375_v32 }
 0x2e2   : > { %v5358_v60 = vadd.f32 %v5357_v35, %v5339_v52 }
 0x2e6   : > { %v5376_v53 = vpop.f32.mrf.mxu2 }
 0x2e7   : > { %v5395_v18 = vpop.f32.mrf.mxu3  ;;  %v5341_v46 = vpop.f32.mrf.mxu0  ;;  %v5377_v26 = vadd.f32 %v5376_v53, %v5358_v60 }
 0x2e8   : > { %v5360_v28 = vpop.f32.mrf.mxu1  ;;  %v5342_v58 = vadd.f32 %v5341_v46, %v5323_v21 }
 0x2e9   : > { %v5396_v61 = vadd.f32 %v5395_v18, %v5377_v26 }
 0x2ea   : > { %v5361_v15 = vadd.f32 %v5360_v28, %v5342_v58 }
 0x2ee   : > { %v5379_v45 = vpop.f32.mrf.mxu2 }
 0x2ef   : > { %v5398_v1 = vpop.f32.mrf.mxu3  ;;  %v5343_v25 = vpop.f32.mrf.mxu0  ;;  %v5380_v7 = vadd.f32 %v5379_v45, %v5361_v15 }
 0x2f0   : > { %v5362_v48 = vpop.f32.mrf.mxu1  ;;  %v5344_v20 = vadd.f32 %v5343_v25, %v5325_v19 }
 0x2f1   : > { %v5399_v50 = vadd.f32 %v5398_v1, %v5380_v7 }
 0x2f2   : > { %v5363_v0 = vadd.f32 %v5362_v48, %v5344_v20 }
 0x2f6   : > { %v5381_v16 = vpop.f32.mrf.mxu2 }
 0x2f7   : > { %v5400_v41 = vpop.f32.mrf.mxu3  ;;  %v5412_v38 = vpop.f32.mrf.mxu0  ;;  %v5382_v31 = vadd.f32 %v5381_v16, %v5363_v0 }
 0x2f8   : > { %v5431_v5 = vpop.f32.mrf.mxu1  ;;  %v5413_v47 = vadd.f32 %v5412_v38, %v5394_v17 }
 0x2f9   : > { %v5401_v35 = vadd.f32 %v5400_v41, %v5382_v31 }
 0x2fa   : > { %v5432_v44 = vadd.f32 %v5431_v5, %v5413_v47 }
 0x2fe   : > { %v5450_v63 = vpop.f32.mrf.mxu2 }
 0x2ff   : > { %v5469_v43 = vpop.f32.mrf.mxu3  ;;  %v5414_v8 = vpop.f32.mrf.mxu0  ;;  %v5451_v59 = vadd.f32 %v5450_v63, %v5432_v44 }
 0x300   : > { %v5433_v13 = vpop.f32.mrf.mxu1  ;;  %v5415_v2 = vadd.f32 %v5414_v8, %v5396_v61 }
 0x301   : > { %v5470_v62 = vadd.f32 %v5469_v43, %v5451_v59 }
 0x302   : > { %v5434_v14 = vadd.f32 %v5433_v13, %v5415_v2 }
 0x306   : > { %v5452_v6 = vpop.f32.mrf.mxu2 }
 0x307   : > { %v5471_v34 = vpop.f32.mrf.mxu3  ;;  %v5417_v55 = vpop.f32.mrf.mxu0  ;;  %v5453_v54 = vadd.f32 %v5452_v6, %v5434_v14 }
 0x308   : > { %v5436_v36 = vpop.f32.mrf.mxu1  ;;  %v5418_v29 = vadd.f32 %v5417_v55, %v5399_v50 }
 0x309   : > { %v5472_v49 = vadd.f32 %v5471_v34, %v5453_v54 }
 0x30a   : > { %v5437_v4 = vadd.f32 %v5436_v36, %v5418_v29 }
 0x30e   : > { %v5455_v37 = vpop.f32.mrf.mxu2 }
 0x30f   : > { %v5474_v24 = vpop.f32.mrf.mxu3  ;;  %v5419_v22 = vpop.f32.mrf.mxu0  ;;  %v5456_v17 = vadd.f32 %v5455_v37, %v5437_v4 }
 0x310   : > { %v5438_v42 = vpop.f32.mrf.mxu1  ;;  %v5420_v19 = vadd.f32 %v5419_v22, %v5401_v35 }
 0x311   : > { %v5475_v45 = vadd.f32 %v5474_v24, %v5456_v17 }
 0x312   : > { %v5439_v38 = vadd.f32 %v5438_v42, %v5420_v19 }
 0x316   : > { %v5457_v51 = vpop.f32.mrf.mxu2 }
 0x317   : > { %v5476_v9 = vpop.f32.mrf.mxu3  ;;  %v5488_v23 = vpop.f32.mrf.mxu0  ;;  %v5458_v43 = vadd.f32 %v5457_v51, %v5439_v38 }
 0x318   : > { %v5507_v56 = vpop.f32.mrf.mxu1  ;;  %v5489_v33 = vadd.f32 %v5488_v23, %v5470_v62 }
 0x319   : > { %v5477_v52 = vadd.f32 %v5476_v9, %v5458_v43 }
 0x31a   : > { %v5508_v32 = vadd.f32 %v5507_v56, %v5489_v33 }
 0x31e   : > { %v5526_v21 = vpop.f32.mrf.mxu2 }
 0x31f   : > { %v5545_v3 = vpop.f32.mrf.mxu3  ;;  %v5490_v57 = vpop.f32.mrf.mxu0  ;;  %v5527_v53 = vadd.f32 %v5526_v21, %v5508_v32 }
 0x320   : > { %v5509_v30 = vpop.f32.mrf.mxu1  ;;  %v5491_v39 = vadd.f32 %v5490_v57, %v5472_v49 }
 0x321   : > { %v11474_v1 = vadd.f32 %v5545_v3, %v5527_v53 }
 0x322   : > { %v5510_v18 = vadd.f32 %v5509_v30, %v5491_v39 }
 0x323   : > { %v5574_v41 = vmul.f32 %v11474_v1, %v11474_v1 }
 0x326   : > { %v5528_v46 = vpop.f32.mrf.mxu2 }
 0x327   : > { %v5547_v28 = vpop.f32.mrf.mxu3  ;;  %v5529_v25 = vadd.f32 %v5528_v46, %v5510_v18  ;;  %v5493_v48 = vpop.f32.mrf.mxu0  ;;  %v9114_v18 = vld [vmem:[%s9407_s26] sm:$0x3]  ;;  %s5811_s26 = sshll.u32 %s9292_s19, 1 }
 0x328   : > { %v5494_v5 = vadd.f32 %v5493_v48, %v5475_v45  ;;  %v5512_v63 = vpop.f32.mrf.mxu1  ;;  %v5634_v46 = vperm.slane %v9114_v18, 1  ;;  %p294_p7 = scmp.lt.s32.totalorder %s5811_s26, 3 }
 0x329   : > { %v11476_v16 = vadd.f32 %v5547_v28, %v5529_v25 }
 0x32a   : > { %v5513_v34 = vadd.f32 %v5512_v63, %v5494_v5  ;;  %v5639_v5 = vld [vmem:[%s254_s5] sm:$0x3]  ;;  %s11652_s26 = smov (!%p294_p7, %s5811_s26), 3 }
 0x32b   : > { %v5564_v8 = vadd.f32 %v11476_v16, %v11474_v1  ;;  %v5576_v13 = vmul.f32 %v11476_v16, %v11476_v16  ;;  %s5812_s19 = sshll.u32 %s11652_s26, 2 }
 0x32c   : > { %s297_s24 = scalar_lea.vmem %s11515_s4, %s5812_s19 }
 0x32d   : > { %v5590_v6 = vadd.f32 %v5576_v13, %v5574_v41 }
 0x32e   : > { %v5531_v55 = vpop.f32.mrf.mxu2 }
 0x32f   : > { %v5550_v36 = vpop.f32.mrf.mxu3  ;;  %v5532_v60 = vadd.f32 %v5531_v55, %v5513_v34  ;;  %v5495_v37 = vpop.f32.mrf.mxu0 }
 0x330   : > { %v5496_v26 = vadd.f32 %v5495_v37, %v5477_v52  ;;  %v5514_v58 = vpop.f32.mrf.mxu1 }
 0x331   : > { %v5551_v24 = vadd.f32 %v5550_v36, %v5532_v60 }
 0x332   : > { %v5515_v61 = vadd.f32 %v5514_v58, %v5496_v26 }
 0x333   : > { %v5565_v22 = vadd.f32 %v5564_v8, %v5551_v24  ;;  %v5578_v42 = vmul.f32 %v5551_v24, %v5551_v24 }
 0x335   : > { %v5591_v47 = vadd.f32 %v5590_v6, %v5578_v42 }
 0x336   : > { %v5533_v15 = vpop.f32.mrf.mxu2 }
 0x337   : > { %v5534_v44 = vadd.f32 %v5533_v15, %v5515_v61  ;;  %v5552_v2 = vpop.f32.mrf.mxu3 }
 0x339   : > { %v5553_v51 = vadd.f32 %v5552_v2, %v5534_v44 }
 0x33b   : > { %v5566_v7 = vadd.f32 %v5565_v22, %v5553_v51  ;;  %v5580_v59 = vmul.f32 %v5553_v51, %v5553_v51 }
 0x33d   : > { %v5567_v23 = vrot.slane %v5566_v7, 4  ;;  %v5592_v56 = vadd.f32 %v5591_v47, %v5580_v59 }
 0x33f   : > { %v5568_v20 = vadd.f32 %v5567_v23, %v5566_v7  ;;  %v5593_v14 = vrot.slane %v5592_v56, 4 }
 0x341   : > { %v5569_v9 = vrot.slane %v5568_v20, 2  ;;  %v5594_v50 = vadd.f32 %v5593_v14, %v5592_v56 }
 0x343   : > { %v5570_v62 = vadd.f32 %v5569_v9, %v5568_v20  ;;  %v5595_v54 = vrot.slane %v5594_v50, 2 }
 0x345   : > { %v5571_v0 = vrot.slane %v5570_v62, 1  ;;  %v5596_v29 = vadd.f32 %v5595_v54, %v5594_v50 }
 0x347   : > { %v5572_v33 = vadd.f32 %v5571_v0, %v5570_v62  ;;  %v5597_v21 = vrot.slane %v5596_v29, 1 }
 0x349   : > { %v5598_v3 = vadd.f32 %v5597_v21, %v5596_v29  ;;  %v5600_v31 = vmul.f32 0.03125, %v5572_v33 }
 0x34b   : > { %v5602_v49 = vmul.f32 0.03125, %v5598_v3  ;;  %v5604_v57 = vmul.f32 %v5600_v31, %v5600_v31 }
 0x34d   : > { %v5606_v30 = vsub.f32 %v5602_v49, %v5604_v57 }
 0x34f   : > { %v5608_v4 = vmax.f32 %v5606_v30, 0.0 }
 0x351   : > { %v5610_v32 = vadd.f32 1e-05, %v5608_v4 }
 0x353   : > { %9112 = vrsqrt.f32 %v5610_v32  ;;  %vm5627_vm4 = vweird.f32 %v5610_v32 }
 0x359   : > { %v9113_v39 = vpop.eup %9112 }
 0x35a   : > { %v5622_v35 = vmul.f32 %v9113_v39, %v5610_v32  ;;  %vm5628_vm3 = vweird.f32 %v9113_v39 }
 0x35b   : > { %vm5629_vm5 = vmor %vm5627_vm4, %vm5628_vm3 }
 0x35c   : > { %v5623_v17 = vmul.f32 %v9113_v39, %v5622_v35 }
 0x35e   : > { %v5624_v53 = vmul.f32 0.5, %v5623_v17 }
 0x360   : > { %v5625_v19 = vsub.f32 1.5, %v5624_v53 }
 0x362   : > { %v5626_v28 = vmul.f32 %v9113_v39, %v5625_v19 }
 0x364   : > { %v5630_v45 = vsel %vm5629_vm5, %v9113_v39, %v5626_v28 }
 0x365   : > { %v5638_v25 = vmul.f32 %v5634_v46, %v5630_v45 }
 0x367   : > { %v5641_v48 = vmul.f32 %v5638_v25, %v5600_v31  ;;  %v5650_v38 = vperm.slane %v5638_v25, 0 }
 0x369   : > { %v5644_v63 = vrot.slane %v5641_v48, 7  ;;  %v5652_v43 = vmul.f32 %v5650_v38, %v11474_v1  ;;  %v5654_v41 = vmul.f32 %v5650_v38, %v11476_v16  ;;  %v5656_v8 = vmul.f32 %v5650_v38, %v5551_v24 }
 0x36a   : > { %v5658_v13 = vmul.f32 %v5650_v38, %v5553_v51 }
 0x36b   : > { %v5646_v6 = vsel %vm5645_vm6, %v11269_v40, %v5644_v63 }
 0x36c   : > { %v5648_v34 = vsub.f32 %v5639_v5, %v5646_v6 }
 0x36e   : > { %v5660_v55 = vperm.slane %v5648_v34, 0  ;;  %v5661_v36 = vperm.slane %v5648_v34, 1 }
 0x370   : > { %v5664_v52 = vadd.f32 %v5660_v55, %v11285_v11  ;;  %v5665_v60 = vadd.f32 %v5661_v36, %v5652_v43  ;;  %v5666_v37 = vadd.f32 %v5660_v55, %v11293_v10  ;;  %v5667_v26 = vadd.f32 %v5661_v36, %v5654_v41 }
 0x371   : > { %v5668_v1 = vadd.f32 %v5660_v55, %v11301_v27  ;;  %v5669_v22 = vadd.f32 %v5661_v36, %v5656_v8  ;;  %v5670_v16 = vadd.f32 %v5660_v55, %v11277_v12  ;;  %v5671_v24 = vadd.f32 %v5661_v36, %v5658_v13 }
 0x372   : > { %v5672_v42 = vmax.f32 %v5664_v52, 0.0  ;;  %v5673_v58 = vmax.f32 %v5665_v60, 0.0  ;;  %v5674_v40 = vmax.f32 %v5666_v37, 0.0  ;;  %v5675_v47 = vmax.f32 %v5667_v26, 0.0 }
 0x373   : > { %v5676_v61 = vmax.f32 %v5668_v1, 0.0  ;;  %v5677_v15 = vmax.f32 %v5669_v22, 0.0  ;;  %v5678_v44 = vmax.f32 %v5670_v16, 0.0  ;;  %v5679_v2 = vmax.f32 %v5671_v24, 0.0 }
 0x374   : > { %v5680_v11 = vmax.f32 %v5672_v42, %v5674_v40  ;;  %v5681_v51 = vmax.f32 %v5673_v58, %v5675_v47 }
 0x375   : > { %v5682_v10 = vmax.f32 %v5676_v61, %v5678_v44  ;;  %v5683_v7 = vmax.f32 %v5677_v15, %v5679_v2 }
 0x377   : > { %v5684_v59 = vmax.f32 %v5680_v11, %v5682_v10  ;;  %v5685_v23 = vmax.f32 %v5681_v51, %v5683_v7 }
 0x379   : > { %v5686_v12 = vpack.c.bf16 %v5685_v23, %v5684_v59 }
 0x37b   : > { %5687 = vst [vmem:[%s297_s24] sm:$0xff] %v5686_v12 }
 0x37c PF: > { %p17_p8 = scmp.ge.s32.totalorder %s9295_s20, 4   ;;  %s11647_s15 = smov %s9235_s16 }
 0x37d   : > { %s11648_s16 = smov %s9239_s17  ;;  %s11649_s17 = smov %s9305_s23 }
 0x37e   : > { %s11650_s18 = smov %s9295_s20  ;;  %19 = sbr.rel (!%p17_p8) target bundleno = 7 (0x7), region = 100 }
 0x383   :  { %5710 = vsyncpa [#allocation3], 1 }
 0x384   :  { %5712 = vsyncpa [#allocation3 + $0x1], 1 }
 0x385   :  { %5713 = vsyncpa [#allocation5], 1 }
 0x386   :  { %5715 = vsyncpa [#allocation5 + $0x1], 1 }

// kernel: relation_network_forward.3
= control target key start
LH: loop header
LB: loop body
LE: loop exit
PB: predicated region body
PF: predicated region fallthrough
CT: control target
= control target key end

     0   :  { %s9720_s0 = inlined_call_operand.vmem [shape: bf16[8,4608], index: 0, kind: input, shape index: {}]   ;;  %s9721_s1 = inlined_call_operand.hbm [shape: bf16[4608,512], index: 1, kind: input, shape index: {}]   ;;  %s9722_s2 = inlined_call_operand.hbm [shape: f32[1,512], index: 2, kind: input, shape index: {}]   ;;  %s9723_s3 = inlined_call_operand.hbm [shape: f32[1,512], index: 3, kind: input, shape index: {}]   ;;  %s9724_s4 = inlined_call_operand.vmem [shape: bf16[2,512], index: 4, kind: output, shape index: {}]  }
   0x1   :  { %9726 = sst [smem:[#allocation10_spill]] %s9721_s1 }
   0x2   :  { %9 = vsyncpa [#allocation3], 0 }
   0x3   :  { %11 = vsyncpa [#allocation3 + $0x1], 0 }
   0x4   :  { %12 = vsyncpa [#allocation5], 0 }
   0x5   :  { %14 = vsyncpa [#allocation5 + $0x1], 0  ;;  %s8163_s15 = smov 0   ;;  %s8165_s16 = smov 0  }
   0x6   :  { %s8167_s17 = smov 0   ;;  %s8169_s18 = smov 0  }
   0x7 LB: > { %s8182_s19 = sadd.s32 4294967295, %s8133_s18   ;;  %s8185_s20 = sadd.s32 1, %s8133_s18   ;;  %s8133_s18 = sphi %s8169_s18, %s9736_s18   ;;  %s8129_s17 = sphi %s8167_s17, %s9735_s17   ;;  %s8125_s16 = sphi %s8165_s16, %s9734_s16   ;;  %s8121_s15 = sphi %s8163_s15, %s9733_s15  }
   0x8   : > { %s45_s21 = ssub.s32 %s8133_s18, %s8185_s20  ;;  %s48_s22 = sadd.s32 1, %s8129_s17 }
   0x9   : > { %p46_p0 = scmp.eq.s32.totalorder %s45_s21, 0  ;;  %p55_p1 = scmp.ne.s32.totalorder %s8129_s17, %s8125_s16 }
   0xa   : > { %p56_p2 = scmp.eq.s32.totalorder %s8133_s18, 0  ;;  %p61_p3 = scmp.ne.s32.totalorder %s8125_s16, %s8121_s15 }
   0xb   : > { %s8195_s23 = scalar_select %p46_p0, %s8129_s17, %s48_s22  }
   0xc   : > { %p57_p4 = por %p56_p2, %p55_p1  ;;  %p62_p5 = scmp.eq.s32.totalorder %s8182_s19, 0 }
   0xd   : > { %p7965_p6 = scmp.lt.s32.totalorder %s8133_s18, 2  ;;  %s8204_s25 = sand.u32 1, %s8129_s17  }
   0xe   : > { %p8199_p7 = por %p62_p5, %p61_p3  ;;  %s7947_s26 = smul.u32 4608, %s8204_s25 }
   0xf   : > { %p8207_p8 = pnand %p7965_p6, %p57_p4  ;;  %s188_s28 = sand.u32 1, %s8133_s18  }
  0x10   : > { %s170_s29 = scalar_lea.vmem [#allocation2], %s7947_s26  ;;  %s5056_s5 = sshll.u32 %s8204_s25, 1 }
  0x11   : > { %s178_s30 = sshll.u32 %s170_s29, 4  ;;  %s5057_s6 = sshll.u32 %s8133_s18, 1  ;;  %s8212_s30 = int_to_ptr.vmem [resolvable:$true] %s178_s30 }
  0x12   : > { %s196_s9 = scalar_lea.hbm %s9722_s2, %s5057_s6  ;;  %s192_s10 = scalar_lea.vmem [#allocation4], %s5056_s5 }
  0x13   : > { %s200_s11 = sshll.u32 %s192_s10, 4  ;;  %s198_s12 = sshll.u32 %s196_s9, 4  ;;  %s201_s11 = int_to_ptr.vmem [resolvable:$true] %s200_s11  ;;  %s199_s12 = int_to_ptr.hbm [resolvable:$true] %s198_s12 }
  0x14   : > { %s8221_s13 = scalar_lea.sflag [#allocation5], %s188_s28  ;;  %s8005_s14 = sshra.s32 %s199_s12, 4  ;;  %s8006_s14 = int_to_ptr.hbm [resolvable:$true] %s8005_s14 }
  0x15   : > { %s8007_s15 = scalar_lea.hbm %s8006_s14, 2  ;;  %p8009_p10 = pneg %p8207_p8 }
  0x16   : > { %p8008_p9 = scmp.ne.s32.totalorder %s8006_s14, %s8007_s15  ;;  %s8012_s26 = scalar_lea.hbm %s9722_s2, 4 }
  0x17   : > { %p8013_p13 = scmp.lt.s32.totalorder %s8006_s14, %s9722_s2  ;;  %p8014_p0 = scmp.lt.s32.totalorder %s8012_s26, %s8007_s15 }
  0x18   : > { %p8010_p11 = pnand %p8009_p10, %p8008_p9 }
  0x19   : > { %p8015_p1 = por %p8014_p0, %p8013_p13 }
  0x1a   : > { %p8011_p12 = pneg %p8010_p11 }
  0x1c   : > { %p8016_p2 = pnand %p8015_p1, %p8011_p12 }
  0x1e   : > { %8019 = shalt.err (!%p8016_p2)
}
  0x1f   : > { %7961 = dma.hbm_to_vmem [thread:$0]  (!%p8207_p8), %s199_s12, 32, %s201_s11, %s8221_s13  }
  0x20   : > { %s8240_s9 = scalar_lea.hbm %s9723_s3, %s5057_s6  ;;  %p5060_p3 = scmp.ge.s32.totalorder %s8133_s18, 1 }
  0x21   : > { %p224_p4 = scmp.lt.s32.totalorder %s8133_s18, 3  ;;  %s7370_s10 = sshll.u32 %s8133_s18, 3 }
  0x22   : > { %s9729_s1 = sld [smem:[#allocation10_spill]]  ;;  %s217_s11 = sshll.u32 %s8240_s9, 4  ;;  %s218_s11 = int_to_ptr.hbm [resolvable:$true] %s217_s11 }
  0x23   : > { %p8248_p5 = pnand %p5060_p3, %p224_p4  ;;  %s167_s12 = scalar_lea.sflag [#allocation3], %s8204_s25 }
  0x28   : > { %s175_s21 = scalar_lea.hbm %s9729_s1, %s7370_s10  ;;  %s8042_s28 = scalar_lea.hbm %s9729_s1, 9216 }
  0x29   : > { %s176_s26 = sshll.u32 %s175_s21, 4  ;;  %s177_s26 = int_to_ptr.hbm [resolvable:$true] %s176_s26 }
  0x2a   : > { %s8035_s29 = sshra.s32 %s177_s26, 4  ;;  %s8036_s29 = int_to_ptr.hbm [resolvable:$true] %s8035_s29 }
  0x2b   : > { %s8037_s6 = scalar_lea.hbm %s8036_s29, 4608  ;;  %p8043_p12 = scmp.lt.s32.totalorder %s8036_s29, %s9729_s1 }
  0x2c   : > { %p8038_p6 = scmp.ne.s32.totalorder %s8036_s29, %s8037_s6  ;;  %p8044_p13 = scmp.lt.s32.totalorder %s8042_s28, %s8037_s6 }
  0x2e   : > { %p8040_p9 = pnand %p8038_p6, %p8009_p10  ;;  %p8045_p0 = por %p8044_p13, %p8043_p12 }
  0x30   : > { %p8041_p11 = pneg %p8040_p9 }
  0x32   : > { %p8046_p1 = pnand %p8045_p0, %p8041_p11 }
  0x34   : > { %8049 = shalt.err (!%p8046_p1)
}
  0x35   : > { %s8135_s9 = smov 256   ;;  %s8136_s14 = smov 128  }
  0x36   : > { %s8137_s15 = smov 8   ;;  %s211_s21 = scalar_lea.vmem [#allocation6], %s5056_s5 }
  0x37   : > { %7958 = dma.hbm_to_vmem [thread:$0]  (!%p8207_p8), %s177_s26, 73728, %s8212_s30, %s167_s12, %s8135_s9, %s8136_s14, %s8137_s15  }
  0x38   : > { %s219_s18 = sshll.u32 %s211_s21, 4  ;;  %s8065_s7 = sshra.s32 %s218_s11, 4  ;;  %s220_s18 = int_to_ptr.vmem [resolvable:$true] %s219_s18  ;;  %s8066_s7 = int_to_ptr.hbm [resolvable:$true] %s8065_s7 }
  0x39   : > { %s8067_s29 = scalar_lea.hbm %s8066_s7, 2  ;;  %s8072_s8 = scalar_lea.hbm %s9723_s3, 4 }
  0x3a   : > { %p8068_p2 = scmp.ne.s32.totalorder %s8066_s7, %s8067_s29  ;;  %p8073_p6 = scmp.lt.s32.totalorder %s8066_s7, %s9723_s3 }
  0x3b   : > { %p8074_p9 = scmp.lt.s32.totalorder %s8072_s8, %s8067_s29 }
  0x3c   : > { %p8070_p3 = pnand %p8068_p2, %p8009_p10 }
  0x3d   : > { %p8075_p11 = por %p8074_p9, %p8073_p6 }
  0x3e   : > { %p8071_p4 = pneg %p8070_p3 }
  0x40   : > { %p8076_p12 = pnand %p8075_p11, %p8071_p4 }
  0x42   : > { %8079 = shalt.err (!%p8076_p12)
}
  0x43   : > { %7964 = dma.hbm_to_vmem [thread:$0]  (!%p8207_p8), %s218_s11, 32, %s220_s18, %s8221_s13  }
  0x44   : > { %228 = sbr.rel (%p8248_p5) target bundleno = 866 (0x362), region = 36 }
  0x49   : > { %s8283_s25 = sand.u32 1, %s8125_s16  }
  0x4a   : > { %s7948_s30 = smul.u32 4608, %s8283_s25  ;;  %s231_s1 = scalar_lea.sflag [#allocation3], %s8283_s25 }
  0x4c   : > { %s8287_s5 = scalar_lea.vmem [#allocation2], %s7948_s30 }
  0x4d   : > { %8112 = dma.done.wait (%p8199_p7), %s231_s1, 73728  }
  0x4e   : > { %8114 = vsyncadd (%p8199_p7), %s231_s1, 4294893568  ;;  %s240_s27 = sand.u32 1, %s8182_s19   ;;  %s5061_s13 = sshll.u32 %s8283_s25, 1 }
  0x4f   : > { %s241_s22 = scalar_lea.sflag [#allocation5], %s240_s27  ;;  %s8297_s26 = scalar_lea.vmem [#allocation4], %s5061_s13 }
  0x50   : > { %8116 = dma.done.wait (%p8199_p7), %s241_s22, 64  }
  0x51   : > { %8118 = vsyncadd (%p8199_p7), %s241_s22, 4294967232  ;;  %v5122_v0 = vld [vmem:[%s8287_s5 + $0x70] sm:$0xf]  ;;  %v7386_v1 = vld [vmem:[%s8287_s5 + $0x74] sm:$0xf0]  ;;  %vm4905_vm6 = vcmask 1040384  }
  0x52   : > { %v5186_v2 = vld [vmem:[%s8287_s5 + $0xf0] sm:$0xf]  ;;  %v5123_v3 = vor.u32 %v7386_v1, %v5122_v0  ;;  %v7402_v4 = vld [vmem:[%s8287_s5 + $0xf4] sm:$0xf0]  ;;  %v5114_v11 = vld [vmem:[%s8287_s5 + $0x60] sm:$0xf] }
  0x53   : > { %v5250_v5 = vld [vmem:[%s8287_s5 + $0x170] sm:$0xf]  ;;  %v7418_v6 = vld [vmem:[%s8287_s5 + $0x174] sm:$0xf0]  ;;  %v5187_v7 = vor.u32 %v7402_v4, %v5186_v2  ;;  %v7384_v13 = vld [vmem:[%s8287_s5 + $0x64] sm:$0xf0] }
  0x54   : > { %v5251_v8 = vor.u32 %v7418_v6, %v5250_v5  ;;  %v5314_v9 = vld [vmem:[%s8287_s5 + $0x1f0] sm:$0xf]  ;;  %v7434_v10 = vld [vmem:[%s8287_s5 + $0x1f4] sm:$0xf0]  ;;  %3897 = vmatpush.bf16.msra.mxu0 %v5123_v3  ;;  %v5178_v14 = vld [vmem:[%s8287_s5 + $0xe0] sm:$0xf]  ;;  %v5115_v16 = vor.u32 %v7384_v13, %v5114_v11 }
  0x55   : > { %v5315_v12 = vor.u32 %v7434_v10, %v5314_v9  ;;  %v7400_v15 = vld [vmem:[%s8287_s5 + $0xe4] sm:$0xf0]  ;;  %3910 = vmatpush.bf16.msra.mxu1 %v5187_v7  ;;  %v5242_v18 = vld [vmem:[%s8287_s5 + $0x160] sm:$0xf]  ;;  %v5106_v23 = vld [vmem:[%s8287_s5 + $0x50] sm:$0xf] }
  0x56   : > { %3923 = vmatpush.bf16.msra.mxu2 %v5251_v8  ;;  %v5179_v17 = vor.u32 %v7400_v15, %v5178_v14  ;;  %v7416_v19 = vld [vmem:[%s8287_s5 + $0x164] sm:$0xf0]  ;;  %v5306_v20 = vld [vmem:[%s8287_s5 + $0x1e0] sm:$0xf]  ;;  %v7382_v24 = vld [vmem:[%s8287_s5 + $0x54] sm:$0xf0] }
  0x57   : > { %3936 = vmatpush.bf16.msra.mxu3 %v5315_v12  ;;  %v5243_v21 = vor.u32 %v7416_v19, %v5242_v18  ;;  %v7432_v22 = vld [vmem:[%s8287_s5 + $0x1e4] sm:$0xf0]  ;;  %v5170_v26 = vld [vmem:[%s8287_s5 + $0xd0] sm:$0xf]  ;;  %v7398_v27 = vld [vmem:[%s8287_s5 + $0xd4] sm:$0xf0]  ;;  %v5107_v29 = vor.u32 %v7382_v24, %v5106_v23 }
  0x58   : > { %v5307_v25 = vor.u32 %v7432_v22, %v5306_v20  ;;  %v5234_v28 = vld [vmem:[%s8287_s5 + $0x150] sm:$0xf]  ;;  %3898 = vmatpush.bf16.msra.mxu0 %v5115_v16  ;;  %v7414_v30 = vld [vmem:[%s8287_s5 + $0x154] sm:$0xf0]  ;;  %v5171_v33 = vor.u32 %v7398_v27, %v5170_v26  ;;  %v5098_v35 = vld [vmem:[%s8287_s5 + $0x40] sm:$0xf] }
  0x59   : > { %v5298_v31 = vld [vmem:[%s8287_s5 + $0x1d0] sm:$0xf]  ;;  %v7430_v32 = vld [vmem:[%s8287_s5 + $0x1d4] sm:$0xf0]  ;;  %3911 = vmatpush.bf16.msra.mxu1 %v5179_v17  ;;  %v5235_v34 = vor.u32 %v7414_v30, %v5234_v28  ;;  %v7380_v36 = vld [vmem:[%s8287_s5 + $0x44] sm:$0xf0] }
  0x5a   : > { %3924 = vmatpush.bf16.msra.mxu2 %v5243_v21  ;;  %v5162_v37 = vld [vmem:[%s8287_s5 + $0xc0] sm:$0xf]  ;;  %v5299_v38 = vor.u32 %v7430_v32, %v5298_v31  ;;  %v7396_v39 = vld [vmem:[%s8287_s5 + $0xc4] sm:$0xf0]  ;;  %v5099_v44 = vor.u32 %v7380_v36, %v5098_v35  ;;  %v5090_v47 = vld [vmem:[%s8287_s5 + $0x30] sm:$0xf] }
  0x5b   : > { %3937 = vmatpush.bf16.msra.mxu3 %v5307_v25  ;;  %v5226_v40 = vld [vmem:[%s8287_s5 + $0x140] sm:$0xf]  ;;  %v7412_v41 = vld [vmem:[%s8287_s5 + $0x144] sm:$0xf0]  ;;  %v5163_v45 = vor.u32 %v7396_v39, %v5162_v37  ;;  %v7378_v48 = vld [vmem:[%s8287_s5 + $0x34] sm:$0xf0] }
  0x5c   : > { %v5290_v42 = vld [vmem:[%s8287_s5 + $0x1c0] sm:$0xf]  ;;  %v7428_v43 = vld [vmem:[%s8287_s5 + $0x1c4] sm:$0xf0]  ;;  %3899 = vmatpush.bf16.msra.mxu0 %v5107_v29  ;;  %v5227_v46 = vor.u32 %v7412_v41, %v5226_v40  ;;  %v5154_v49 = vld [vmem:[%s8287_s5 + $0xb0] sm:$0xf]  ;;  %v5091_v56 = vor.u32 %v7378_v48, %v5090_v47 }
  0x5d   : > { %3912 = vmatpush.bf16.msra.mxu1 %v5171_v33  ;;  %v5291_v50 = vor.u32 %v7428_v43, %v5290_v42  ;;  %v7394_v51 = vld [vmem:[%s8287_s5 + $0xb4] sm:$0xf0]  ;;  %v5218_v52 = vld [vmem:[%s8287_s5 + $0x130] sm:$0xf]  ;;  %v5082_v59 = vld [vmem:[%s8287_s5 + $0x20] sm:$0xf] }
  0x5e   : > { %3925 = vmatpush.bf16.msra.mxu2 %v5235_v34  ;;  %v7410_v53 = vld [vmem:[%s8287_s5 + $0x134] sm:$0xf0]  ;;  %v5282_v54 = vld [vmem:[%s8287_s5 + $0x1b0] sm:$0xf]  ;;  %v5155_v57 = vor.u32 %v7394_v51, %v5154_v49  ;;  %v7376_v60 = vld [vmem:[%s8287_s5 + $0x24] sm:$0xf0] }
  0x5f   : > { %3938 = vmatpush.bf16.msra.mxu3 %v5299_v38  ;;  %v7426_v55 = vld [vmem:[%s8287_s5 + $0x1b4] sm:$0xf0]  ;;  %v5219_v58 = vor.u32 %v7410_v53, %v5218_v52  ;;  %v5146_v61 = vld [vmem:[%s8287_s5 + $0xa0] sm:$0xf]  ;;  %v7392_v63 = vld [vmem:[%s8287_s5 + $0xa4] sm:$0xf0]  ;;  %v5083_v4 = vor.u32 %v7376_v60, %v5082_v59 }
  0x60   : > { %3900 = vmatpush.bf16.msra.mxu0 %v5099_v44  ;;  %v5283_v62 = vor.u32 %v7426_v55, %v5282_v54  ;;  %v5210_v0 = vld [vmem:[%s8287_s5 + $0x120] sm:$0xf]  ;;  %v7408_v1 = vld [vmem:[%s8287_s5 + $0x124] sm:$0xf0]  ;;  %v5147_v5 = vor.u32 %v7392_v63, %v5146_v61  ;;  %v5074_v7 = vld [vmem:[%s8287_s5 + $0x10] sm:$0xf] }
  0x61   : > { %3913 = vmatpush.bf16.msra.mxu1 %v5163_v45  ;;  %v5274_v2 = vld [vmem:[%s8287_s5 + $0x1a0] sm:$0xf]  ;;  %v7424_v3 = vld [vmem:[%s8287_s5 + $0x1a4] sm:$0xf0]  ;;  %v5211_v6 = vor.u32 %v7408_v1, %v5210_v0  ;;  %v7374_v8 = vld [vmem:[%s8287_s5 + $0x14] sm:$0xf0] }
  0x62   : > { %3926 = vmatpush.bf16.msra.mxu2 %v5227_v46  ;;  %v5138_v9 = vld [vmem:[%s8287_s5 + $0x90] sm:$0xf]  ;;  %v5275_v10 = vor.u32 %v7424_v3, %v5274_v2  ;;  %v7390_v11 = vld [vmem:[%s8287_s5 + $0x94] sm:$0xf0]  ;;  %v5075_v16 = vor.u32 %v7374_v8, %v5074_v7  ;;  %v5066_v17 = vld [vmem:[%s8287_s5] sm:$0xf] }
  0x63   : > { %3939 = vmatpush.bf16.msra.mxu3 %v5291_v50  ;;  %v5202_v12 = vld [vmem:[%s8287_s5 + $0x110] sm:$0xf]  ;;  %v7406_v13 = vld [vmem:[%s8287_s5 + $0x114] sm:$0xf0]  ;;  %v7372_v18 = vld [vmem:[%s8287_s5 + $0x4] sm:$0xf0]  ;;  %v5139_v19 = vor.u32 %v7390_v11, %v5138_v9 }
  0x64   : > { %3901 = vmatpush.bf16.msra.mxu0 %v5091_v56  ;;  %v5266_v14 = vld [vmem:[%s8287_s5 + $0x190] sm:$0xf]  ;;  %v7422_v15 = vld [vmem:[%s8287_s5 + $0x194] sm:$0xf0]  ;;  %v5203_v20 = vor.u32 %v7406_v13, %v5202_v12  ;;  %v5130_v21 = vld [vmem:[%s8287_s5 + $0x80] sm:$0xf]  ;;  %v5067_v31 = vor.u32 %v7372_v18, %v5066_v17 }
  0x65   : > { %3914 = vmatpush.bf16.msra.mxu1 %v5155_v57  ;;  %v7388_v22 = vld [vmem:[%s8287_s5 + $0x84] sm:$0xf0]  ;;  %v5194_v23 = vld [vmem:[%s8287_s5 + $0x100] sm:$0xf]  ;;  %v5267_v24 = vor.u32 %v7422_v15, %v5266_v14  ;;  %v5378_v28 = vld [vmem:[%s8287_s5 + $0x270] sm:$0xf] }
  0x66   : > { %3927 = vmatpush.bf16.msra.mxu2 %v5219_v58  ;;  %v7404_v25 = vld [vmem:[%s8287_s5 + $0x104] sm:$0xf0]  ;;  %v5258_v26 = vld [vmem:[%s8287_s5 + $0x180] sm:$0xf]  ;;  %v7450_v29 = vld [vmem:[%s8287_s5 + $0x274] sm:$0xf0]  ;;  %v5131_v35 = vor.u32 %v7388_v22, %v5130_v21 }
  0x67   : > { %3940 = vmatpush.bf16.msra.mxu3 %v5283_v62  ;;  %v7420_v27 = vld [vmem:[%s8287_s5 + $0x184] sm:$0xf0]  ;;  %v5442_v30 = vld [vmem:[%s8287_s5 + $0x2f0] sm:$0xf]  ;;  %v7466_v32 = vld [vmem:[%s8287_s5 + $0x2f4] sm:$0xf0]  ;;  %v5195_v36 = vor.u32 %v7404_v25, %v5194_v23  ;;  %v5379_v40 = vor.u32 %v7450_v29, %v5378_v28 }
  0x68   : > { %3902 = vmatpush.bf16.msra.mxu0 %v5083_v4  ;;  %v5506_v33 = vld [vmem:[%s8287_s5 + $0x370] sm:$0xf]  ;;  %v7482_v34 = vld [vmem:[%s8287_s5 + $0x374] sm:$0xf0]  ;;  %v5259_v39 = vor.u32 %v7420_v27, %v5258_v26  ;;  %v5443_v41 = vor.u32 %v7466_v32, %v5442_v30  ;;  %v5370_v43 = vld [vmem:[%s8287_s5 + $0x260] sm:$0xf] }
  0x69   : > { %3915 = vmatpush.bf16.msra.mxu1 %v5147_v5  ;;  %v5570_v37 = vld [vmem:[%s8287_s5 + $0x3f0] sm:$0xf]  ;;  %v7498_v38 = vld [vmem:[%s8287_s5 + $0x3f4] sm:$0xf0]  ;;  %v5507_v42 = vor.u32 %v7482_v34, %v5506_v33  ;;  %v7448_v44 = vld [vmem:[%s8287_s5 + $0x264] sm:$0xf0] }
  0x6a   : > { %3928 = vmatpush.bf16.msra.mxu2 %v5211_v6  ;;  %v5434_v45 = vld [vmem:[%s8287_s5 + $0x2e0] sm:$0xf]  ;;  %v5571_v46 = vor.u32 %v7498_v38, %v5570_v37  ;;  %v7464_v47 = vld [vmem:[%s8287_s5 + $0x2e4] sm:$0xf0]  ;;  %v5371_v52 = vor.u32 %v7448_v44, %v5370_v43  ;;  %v5362_v53 = vld [vmem:[%s8287_s5 + $0x250] sm:$0xf] }
  0x6b   : > { %3941 = vmatpush.bf16.msra.mxu3 %v5275_v10  ;;  %v5498_v48 = vld [vmem:[%s8287_s5 + $0x360] sm:$0xf]  ;;  %v7480_v49 = vld [vmem:[%s8287_s5 + $0x364] sm:$0xf0]  ;;  %v5435_v54 = vor.u32 %v7464_v47, %v5434_v45  ;;  %v7446_v56 = vld [vmem:[%s8287_s5 + $0x254] sm:$0xf0] }
  0x6c   : > { %3903 = vmatpush.bf16.msra.mxu0 %v5075_v16  ;;  %v5562_v50 = vld [vmem:[%s8287_s5 + $0x3e0] sm:$0xf]  ;;  %v7496_v51 = vld [vmem:[%s8287_s5 + $0x3e4] sm:$0xf0]  ;;  %v5499_v55 = vor.u32 %v7480_v49, %v5498_v48  ;;  %v5426_v57 = vld [vmem:[%s8287_s5 + $0x2d0] sm:$0xf]  ;;  %v5363_v3 = vor.u32 %v7446_v56, %v5362_v53 }
  0x6d   : > { %3916 = vmatpush.bf16.msra.mxu1 %v5139_v19  ;;  %v298_v58 = vld [vmem:[%s9720_s0 + $0x8] sm:$0xff]  ;;  %v5563_v59 = vor.u32 %v7496_v51, %v5562_v50  ;;  %v7462_v60 = vld [vmem:[%s8287_s5 + $0x2d4] sm:$0xf0]  ;;  %v5490_v61 = vld [vmem:[%s8287_s5 + $0x350] sm:$0xf] }
  0x6e   : > { %3929 = vmatpush.bf16.msra.mxu2 %v5203_v20  ;;  %v7478_v62 = vld [vmem:[%s8287_s5 + $0x354] sm:$0xf0]  ;;  %v911_v63 = vunpack.c.l.b16 %v298_v58  ;;  %v912_v0 = vunpack.c.h.b16 %v298_v58  ;;  %v5554_v1 = vld [vmem:[%s8287_s5 + $0x3d0] sm:$0xf]  ;;  %v297_v5 = vld [vmem:[%s9720_s0] sm:$0xff]  ;;  %v5427_v7 = vor.u32 %v7462_v60, %v5426_v57 }
  0x6f   : > { %3942 = vmatpush.bf16.msra.mxu3 %v5267_v24  ;;  %v7494_v2 = vld [vmem:[%s8287_s5 + $0x3d4] sm:$0xf0]  ;;  %v5491_v8 = vor.u32 %v7478_v62, %v5490_v61  ;;  %v5354_v9 = vld [vmem:[%s8287_s5 + $0x240] sm:$0xf]  ;;  %v7444_v10 = vld [vmem:[%s8287_s5 + $0x244] sm:$0xf0]  ;;  %v909_v12 = vunpack.c.l.b16 %v297_v5  ;;  %v910_v13 = vunpack.c.h.b16 %v297_v5 }
  0x70   : > { %3904 = vmatpush.bf16.msra.mxu0 %v5067_v31  ;;  %v8394_v4 = vpack.c.b16 %v911_v63, %v911_v63  ;;  %v8399_v6 = vpack.c.b16 %v912_v0, %v912_v0  ;;  %v5418_v11 = vld [vmem:[%s8287_s5 + $0x2c0] sm:$0xf]  ;;  %v5555_v14 = vor.u32 %v7494_v2, %v5554_v1  ;;  %v7460_v15 = vld [vmem:[%s8287_s5 + $0x2c4] sm:$0xf0]  ;;  %v5355_v22 = vor.u32 %v7444_v10, %v5354_v9  ;;  %v5346_v25 = vld [vmem:[%s8287_s5 + $0x230] sm:$0xf] }
  0x71   : > { %3917 = vmatpush.bf16.msra.mxu1 %v5131_v35  ;;  %v5482_v16 = vld [vmem:[%s8287_s5 + $0x340] sm:$0xf]  ;;  %v7476_v17 = vld [vmem:[%s8287_s5 + $0x344] sm:$0xf0]  ;;  %v8410_v20 = vpack.c.b16 %v909_v12, %v909_v12  ;;  %v8413_v21 = vpack.c.b16 %v910_v13, %v910_v13  ;;  %v5419_v23 = vor.u32 %v7460_v15, %v5418_v11  ;;  %v7442_v26 = vld [vmem:[%s8287_s5 + $0x234] sm:$0xf0] }
  0x72   : > { %3930 = vmatpush.bf16.msra.mxu2 %v5195_v36  ;;  %v5546_v18 = vld [vmem:[%s8287_s5 + $0x3c0] sm:$0xf]  ;;  %v7492_v19 = vld [vmem:[%s8287_s5 + $0x3c4] sm:$0xf0]  ;;  %v5483_v24 = vor.u32 %v7476_v17, %v5482_v16  ;;  %v5410_v27 = vld [vmem:[%s8287_s5 + $0x2b0] sm:$0xf]  ;;  %v5347_v34 = vor.u32 %v7442_v26, %v5346_v25 }
  0x73   : > { %3943 = vmatpush.bf16.msra.mxu3 %v5259_v39  ;;  %v5547_v28 = vor.u32 %v7492_v19, %v5546_v18  ;;  %v7458_v29 = vld [vmem:[%s8287_s5 + $0x2b4] sm:$0xf0]  ;;  %v5474_v30 = vld [vmem:[%s8287_s5 + $0x330] sm:$0xf]  ;;  %3905 = vmatmul.bf16.vlgmr.msra.gmra.mxu0 %v8410_v20  ;;  %v5338_v37 = vld [vmem:[%s8287_s5 + $0x220] sm:$0xf] }
  0x74   : > { %3949 = vmatpush.bf16.msrb.mxu0 %v5379_v40  ;;  %v7474_v31 = vld [vmem:[%s8287_s5 + $0x334] sm:$0xf0]  ;;  %v5538_v32 = vld [vmem:[%s8287_s5 + $0x3b0] sm:$0xf]  ;;  %3918 = vmatmul.bf16.vlgmr.msra.gmra.mxu1 %v8413_v21  ;;  %v5411_v35 = vor.u32 %v7458_v29, %v5410_v27  ;;  %v7440_v38 = vld [vmem:[%s8287_s5 + $0x224] sm:$0xf0] }
  0x75   : > { %3962 = vmatpush.bf16.msrb.mxu1 %v5443_v41  ;;  %3931 = vmatmul.bf16.vlgmr.msra.gmra.mxu2 %v8394_v4  ;;  %v7490_v33 = vld [vmem:[%s8287_s5 + $0x3b4] sm:$0xf0]  ;;  %v5475_v36 = vor.u32 %v7474_v31, %v5474_v30  ;;  %v5402_v39 = vld [vmem:[%s8287_s5 + $0x2a0] sm:$0xf]  ;;  %v7456_v41 = vld [vmem:[%s8287_s5 + $0x2a4] sm:$0xf0] }
  0x76   : > { %3975 = vmatpush.bf16.msrb.mxu2 %v5507_v42  ;;  %3944 = vmatmul.bf16.vlgmr.msra.gmra.mxu3 %v8399_v6  ;;  %v5539_v40 = vor.u32 %v7490_v33, %v5538_v32  ;;  %v5466_v42 = vld [vmem:[%s8287_s5 + $0x320] sm:$0xf]  ;;  %v7472_v43 = vld [vmem:[%s8287_s5 + $0x324] sm:$0xf0]  ;;  %v5403_v47 = vor.u32 %v7456_v41, %v5402_v39  ;;  %v5330_v49 = vld [vmem:[%s8287_s5 + $0x210] sm:$0xf] }
  0x77   : > { %3988 = vmatpush.bf16.msrb.mxu3 %v5571_v46  ;;  %v5530_v44 = vld [vmem:[%s8287_s5 + $0x3a0] sm:$0xf]  ;;  %v7488_v45 = vld [vmem:[%s8287_s5 + $0x3a4] sm:$0xf0]  ;;  %v5339_v46 = vor.u32 %v7440_v38, %v5338_v37  ;;  %v5467_v48 = vor.u32 %v7472_v43, %v5466_v42  ;;  %v7438_v50 = vld [vmem:[%s8287_s5 + $0x214] sm:$0xf0] }
  0x78   : > { %3950 = vmatpush.bf16.msrb.mxu0 %v5371_v52  ;;  %v5394_v51 = vld [vmem:[%s8287_s5 + $0x290] sm:$0xf]  ;;  %v5531_v52 = vor.u32 %v7488_v45, %v5530_v44  ;;  %v7454_v53 = vld [vmem:[%s8287_s5 + $0x294] sm:$0xf0]  ;;  %v5322_v58 = vld [vmem:[%s8287_s5 + $0x200] sm:$0xf] }
  0x79   : > { %3963 = vmatpush.bf16.msrb.mxu1 %v5435_v54  ;;  %v5458_v54 = vld [vmem:[%s8287_s5 + $0x310] sm:$0xf]  ;;  %v7486_v57 = vld [vmem:[%s8287_s5 + $0x394] sm:$0xf0]  ;;  %v7436_v60 = vld [vmem:[%s8287_s5 + $0x204] sm:$0xf0]  ;;  %v5395_v63 = vor.u32 %v7454_v53, %v5394_v51 }
  0x7a   : > { %3976 = vmatpush.bf16.msrb.mxu2 %v5499_v55  ;;  %v7470_v55 = vld [vmem:[%s8287_s5 + $0x314] sm:$0xf0]  ;;  %v5522_v56 = vld [vmem:[%s8287_s5 + $0x390] sm:$0xf]  ;;  %v5386_v61 = vld [vmem:[%s8287_s5 + $0x280] sm:$0xf]  ;;  %v5323_v13 = vor.u32 %v7436_v60, %v5322_v58 }
  0x7b   : > { %3989 = vmatpush.bf16.msrb.mxu3 %v5563_v59  ;;  %v5331_v59 = vor.u32 %v7438_v50, %v5330_v49  ;;  %v7452_v62 = vld [vmem:[%s8287_s5 + $0x284] sm:$0xf0]  ;;  %v5459_v0 = vor.u32 %v7470_v55, %v5458_v54  ;;  %v5450_v1 = vld [vmem:[%s8287_s5 + $0x300] sm:$0xf]  ;;  %v5523_v5 = vor.u32 %v7486_v57, %v5522_v56  ;;  %v299_v9 = vld [vmem:[%s9720_s0 + $0x10] sm:$0xff] }
  0x7c   : > { %3951 = vmatpush.bf16.msrb.mxu0 %v5363_v3  ;;  %v7468_v2 = vld [vmem:[%s8287_s5 + $0x304] sm:$0xf0]  ;;  %v300_v3 = vld [vmem:[%s9720_s0 + $0x18] sm:$0xff]  ;;  %v5634_v10 = vld [vmem:[%s8287_s5 + $0x470] sm:$0xf]  ;;  %v5387_v18 = vor.u32 %v7452_v62, %v5386_v61 }
  0x7d   : > { %3964 = vmatpush.bf16.msrb.mxu1 %v5427_v7  ;;  %v5514_v7 = vld [vmem:[%s8287_s5 + $0x380] sm:$0xf]  ;;  %v7514_v11 = vld [vmem:[%s8287_s5 + $0x474] sm:$0xf0]  ;;  %v5698_v12 = vld [vmem:[%s8287_s5 + $0x4f0] sm:$0xf]  ;;  %v915_v17 = vunpack.c.l.b16 %v300_v3  ;;  %v5451_v19 = vor.u32 %v7468_v2, %v5450_v1  ;;  %v916_v25 = vunpack.c.h.b16 %v300_v3 }
  0x7e   : > { %3977 = vmatpush.bf16.msrb.mxu2 %v5491_v8  ;;  %v7484_v8 = vld [vmem:[%s8287_s5 + $0x384] sm:$0xf0]  ;;  %v5762_v15 = vld [vmem:[%s8287_s5 + $0x570] sm:$0xf]  ;;  %v7546_v16 = vld [vmem:[%s8287_s5 + $0x574] sm:$0xf0]  ;;  %v5635_v27 = vor.u32 %v7514_v11, %v5634_v10 }
  0x7f   : > { %3990 = vmatpush.bf16.msrb.mxu3 %v5555_v14  ;;  %v7530_v14 = vld [vmem:[%s8287_s5 + $0x4f4] sm:$0xf0]  ;;  %v5515_v26 = vor.u32 %v7484_v8, %v5514_v7  ;;  %v5763_v30 = vor.u32 %v7546_v16, %v5762_v15  ;;  %v5626_v31 = vld [vmem:[%s8287_s5 + $0x460] sm:$0xf]  ;;  %v7512_v32 = vld [vmem:[%s8287_s5 + $0x464] sm:$0xf0]  ;;  %v8469_v38 = vpack.c.b16 %v915_v17, %v915_v17  ;;  %v8475_v42 = vpack.c.b16 %v916_v25, %v916_v25 }
  0x80   : > { %3952 = vmatpush.bf16.msrb.mxu0 %v5355_v22  ;;  %v5826_v22 = vld [vmem:[%s8287_s5 + $0x5f0] sm:$0xf]  ;;  %v5699_v29 = vor.u32 %v7530_v14, %v5698_v12  ;;  %v5690_v33 = vld [vmem:[%s8287_s5 + $0x4e0] sm:$0xf]  ;;  %v7544_v37 = vld [vmem:[%s8287_s5 + $0x564] sm:$0xf0]  ;;  %v5627_v43 = vor.u32 %v7512_v32, %v5626_v31 }
  0x81   : > { %3965 = vmatpush.bf16.msrb.mxu1 %v5419_v23  ;;  %v7562_v23 = vld [vmem:[%s8287_s5 + $0x5f4] sm:$0xf0]  ;;  %v5818_v39 = vld [vmem:[%s8287_s5 + $0x5e0] sm:$0xf]  ;;  %v5682_v49 = vld [vmem:[%s8287_s5 + $0x4d0] sm:$0xf] }
  0x82   : > { %3978 = vmatpush.bf16.msrb.mxu2 %v5483_v24  ;;  %v913_v24 = vunpack.c.l.b16 %v299_v9  ;;  %v7526_v51 = vld [vmem:[%s8287_s5 + $0x4d4] sm:$0xf0]  ;;  %v5810_v54 = vld [vmem:[%s8287_s5 + $0x5d0] sm:$0xf]  ;;  %v7508_v60 = vld [vmem:[%s8287_s5 + $0x444] sm:$0xf0] }
  0x83   : > { %3991 = vmatpush.bf16.msrb.mxu3 %v5547_v28  ;;  %v914_v28 = vunpack.c.h.b16 %v299_v9  ;;  %v7542_v53 = vld [vmem:[%s8287_s5 + $0x554] sm:$0xf0]  ;;  %v5683_v57 = vor.u32 %v7526_v51, %v5682_v49  ;;  %v5674_v61 = vld [vmem:[%s8287_s5 + $0x4c0] sm:$0xf]  ;;  %v7540_v1 = vld [vmem:[%s8287_s5 + $0x544] sm:$0xf0] }
  0x84   : > { %3953 = vmatpush.bf16.msrb.mxu0 %v5347_v34  ;;  %v5827_v34 = vor.u32 %v7562_v23, %v5826_v22  ;;  %v8473_v41 = vpack.c.b16 %v913_v24, %v913_v24  ;;  %v7558_v55 = vld [vmem:[%s8287_s5 + $0x5d4] sm:$0xf0]  ;;  %v5802_v2 = vld [vmem:[%s8287_s5 + $0x5c0] sm:$0xf]  ;;  %v7556_v3 = vld [vmem:[%s8287_s5 + $0x5c4] sm:$0xf0] }
  0x85   : > { %3966 = vmatpush.bf16.msrb.mxu1 %v5411_v35  ;;  %v7528_v35 = vld [vmem:[%s8287_s5 + $0x4e4] sm:$0xf0]  ;;  %v8477_v44 = vpack.c.b16 %v914_v28, %v914_v28  ;;  %v5811_v62 = vor.u32 %v7558_v55, %v5810_v54  ;;  %v5602_v9 = vld [vmem:[%s8287_s5 + $0x430] sm:$0xf]  ;;  %v7506_v10 = vld [vmem:[%s8287_s5 + $0x434] sm:$0xf0]  ;;  %v5803_v12 = vor.u32 %v7556_v3, %v5802_v2 }
  0x86   : > { %3979 = vmatpush.bf16.msrb.mxu2 %v5475_v36  ;;  %v5754_v36 = vld [vmem:[%s8287_s5 + $0x560] sm:$0xf]  ;;  %v5691_v45 = vor.u32 %v7528_v35, %v5690_v33  ;;  %v5666_v11 = vld [vmem:[%s8287_s5 + $0x4b0] sm:$0xf]  ;;  %v7538_v15 = vld [vmem:[%s8287_s5 + $0x534] sm:$0xf0] }
  0x87   : > { %3992 = vmatpush.bf16.msrb.mxu3 %v5539_v40  ;;  %v7560_v40 = vld [vmem:[%s8287_s5 + $0x5e4] sm:$0xf0]  ;;  %v5730_v14 = vld [vmem:[%s8287_s5 + $0x530] sm:$0xf]  ;;  %v7554_v17 = vld [vmem:[%s8287_s5 + $0x5b4] sm:$0xf0] }
  0x88   : > { %3954 = vmatpush.bf16.msrb.mxu0 %v5339_v46  ;;  %v5755_v46 = vor.u32 %v7544_v37, %v5754_v36  ;;  %v5819_v50 = vor.u32 %v7560_v40, %v5818_v39  ;;  %v5794_v16 = vld [vmem:[%s8287_s5 + $0x5b0] sm:$0xf]  ;;  %v5731_v22 = vor.u32 %v7538_v15, %v5730_v14  ;;  %v5594_v23 = vld [vmem:[%s8287_s5 + $0x420] sm:$0xf]  ;;  %v7504_v24 = vld [vmem:[%s8287_s5 + $0x424] sm:$0xf0] }
  0x89   : > { %3967 = vmatpush.bf16.msrb.mxu1 %v5403_v47  ;;  %v5618_v47 = vld [vmem:[%s8287_s5 + $0x450] sm:$0xf]  ;;  %v5658_v25 = vld [vmem:[%s8287_s5 + $0x4a0] sm:$0xf]  ;;  %v7552_v31 = vld [vmem:[%s8287_s5 + $0x5a4] sm:$0xf0]  ;;  %v5595_v32 = vor.u32 %v7504_v24, %v5594_v23 }
  0x8a   : > { %3980 = vmatpush.bf16.msrb.mxu2 %v5467_v48  ;;  %v7510_v48 = vld [vmem:[%s8287_s5 + $0x454] sm:$0xf0]  ;;  %v5722_v28 = vld [vmem:[%s8287_s5 + $0x520] sm:$0xf]  ;;  %v5586_v35 = vld [vmem:[%s8287_s5 + $0x410] sm:$0xf] }
  0x8b   : > { %3993 = vmatpush.bf16.msrb.mxu3 %v5531_v52  ;;  %v5746_v52 = vld [vmem:[%s8287_s5 + $0x550] sm:$0xf]  ;;  %v5619_v56 = vor.u32 %v7510_v48, %v5618_v47  ;;  %v7502_v36 = vld [vmem:[%s8287_s5 + $0x414] sm:$0xf0]  ;;  %v5578_v48 = vld [vmem:[%s8287_s5 + $0x400] sm:$0xf] }
  0x8c   : > { %3955 = vmatpush.bf16.msrb.mxu0 %v5331_v59  ;;  %v5747_v58 = vor.u32 %v7542_v53, %v5746_v52  ;;  %v5610_v59 = vld [vmem:[%s8287_s5 + $0x440] sm:$0xf]  ;;  %v5650_v37 = vld [vmem:[%s8287_s5 + $0x490] sm:$0xf]  ;;  %v7518_v40 = vld [vmem:[%s8287_s5 + $0x494] sm:$0xf0]  ;;  %v5587_v49 = vor.u32 %v7502_v36, %v5586_v35 }
  0x8d   : > { %3968 = vmatpush.bf16.msrb.mxu1 %v5395_v63  ;;  %v7524_v63 = vld [vmem:[%s8287_s5 + $0x4c4] sm:$0xf0]  ;;  %v7550_v47 = vld [vmem:[%s8287_s5 + $0x594] sm:$0xf0]  ;;  %v5642_v51 = vld [vmem:[%s8287_s5 + $0x480] sm:$0xf]  ;;  %v5651_v53 = vor.u32 %v7518_v40, %v5650_v37 }
  0x8e   : > { %3981 = vmatpush.bf16.msrb.mxu2 %v5459_v0  ;;  %v5738_v0 = vld [vmem:[%s8287_s5 + $0x540] sm:$0xf]  ;;  %v5675_v7 = vor.u32 %v7524_v63, %v5674_v61  ;;  %v7516_v52 = vld [vmem:[%s8287_s5 + $0x484] sm:$0xf0]  ;;  %v7578_v63 = vld [vmem:[%s8287_s5 + $0x674] sm:$0xf0] }
  0x8f   : > { %3994 = vmatpush.bf16.msrb.mxu3 %v5523_v5  ;;  %v5611_v5 = vor.u32 %v7508_v60, %v5610_v59  ;;  %v5739_v8 = vor.u32 %v7540_v1, %v5738_v0  ;;  %v5706_v55 = vld [vmem:[%s8287_s5 + $0x500] sm:$0xf]  ;;  %v7548_v60 = vld [vmem:[%s8287_s5 + $0x584] sm:$0xf0]  ;;  %v5954_v0 = vld [vmem:[%s8287_s5 + $0x6f0] sm:$0xf] }
  0x90   : > { %3956 = vmatpush.bf16.msrb.mxu0 %v5323_v13  ;;  %v7522_v13 = vld [vmem:[%s8287_s5 + $0x4b4] sm:$0xf0]  ;;  %v5770_v59 = vld [vmem:[%s8287_s5 + $0x580] sm:$0xf]  ;;  %v302_v61 = vld [vmem:[%s9720_s0 + $0x28] sm:$0xff] }
  0x91   : > { %3969 = vmatpush.bf16.msrb.mxu1 %v5387_v18  ;;  %v5603_v18 = vor.u32 %v7506_v10, %v5602_v9  ;;  %v7594_v2 = vld [vmem:[%s8287_s5 + $0x6f4] sm:$0xf0]  ;;  %v6018_v3 = vld [vmem:[%s8287_s5 + $0x770] sm:$0xf]  ;;  %v5771_v14 = vor.u32 %v7548_v60, %v5770_v59  ;;  %v5946_v23 = vld [vmem:[%s8287_s5 + $0x6e0] sm:$0xf] }
  0x92   : > { %3982 = vmatpush.bf16.msrb.mxu2 %v5451_v19  ;;  %v5667_v19 = vor.u32 %v7522_v13, %v5666_v11  ;;  %v6082_v10 = vld [vmem:[%s8287_s5 + $0x7f0] sm:$0xf]  ;;  %v7626_v11 = vld [vmem:[%s8287_s5 + $0x7f4] sm:$0xf0]  ;;  %v7604_v59 = vld [vmem:[%s8287_s5 + $0x744] sm:$0xf0] }
  0x93   : > { %3995 = vmatpush.bf16.msrb.mxu3 %v5515_v26  ;;  %3957 = vmatmul.bf16.vlgmr.msrb.gmra.mxu0 %v8473_v41  ;;  %v5795_v26 = vor.u32 %v7554_v17, %v5794_v16  ;;  %v920_v16 = vunpack.c.h.b16 %v302_v61  ;;  %v5955_v17 = vor.u32 %v7594_v2, %v5954_v0  ;;  %v6083_v24 = vor.u32 %v7626_v11, %v6082_v10  ;;  %v5874_v37 = vld [vmem:[%s8287_s5 + $0x650] sm:$0xf]  ;;  %v6058_v60 = vld [vmem:[%s8287_s5 + $0x7c0] sm:$0xf]  ;;  %v7570_v2 = vld [vmem:[%s8287_s5 + $0x634] sm:$0xf0] }
  0x94   : > { %4001 = vmatpush.bf16.msra.mxu0 %v5635_v27  ;;  %3970 = vmatmul.bf16.vlgmr.msrb.gmra.mxu1 %v8477_v44  ;;  %v7520_v27 = vld [vmem:[%s8287_s5 + $0x4a4] sm:$0xf0]  ;;  %v5938_v40 = vld [vmem:[%s8287_s5 + $0x6d0] sm:$0xf]  ;;  %v7618_v11 = vld [vmem:[%s8287_s5 + $0x7b4] sm:$0xf0] }
  0x95   : > { %4014 = vmatpush.bf16.msra.mxu1 %v5699_v29  ;;  %3983 = vmatmul.bf16.vlgmr.msrb.gmra.mxu2 %v8469_v38  ;;  %v7536_v29 = vld [vmem:[%s8287_s5 + $0x524] sm:$0xf0]  ;;  %v5659_v33 = vor.u32 %v7520_v27, %v5658_v25  ;;  %v6010_v27 = vld [vmem:[%s8287_s5 + $0x760] sm:$0xf]  ;;  %v6050_v10 = vld [vmem:[%s8287_s5 + $0x7b0] sm:$0xf] }
  0x96   : > { %4027 = vmatpush.bf16.msra.mxu2 %v5763_v30  ;;  %3996 = vmatmul.bf16.vlgmr.msrb.gmra.mxu3 %v8475_v42  ;;  %v5786_v30 = vld [vmem:[%s8287_s5 + $0x5a0] sm:$0xf] }
  0x97   : > { %4040 = vmatpush.bf16.msra.mxu3 %v5827_v34  ;;  %v5723_v34 = vor.u32 %v7536_v29, %v5722_v28  ;;  %v5787_v39 = vor.u32 %v7552_v31, %v5786_v30  ;;  %v7608_v28 = vld [vmem:[%s8287_s5 + $0x764] sm:$0xf0]  ;;  %v6074_v31 = vld [vmem:[%s8287_s5 + $0x7e0] sm:$0xf] }
  0x98   : > { %4002 = vmatpush.bf16.msra.mxu0 %v5627_v43  ;;  %v5714_v43 = vld [vmem:[%s8287_s5 + $0x510] sm:$0xf]  ;;  %v6011_v36 = vor.u32 %v7608_v28, %v6010_v27 }
  0x99   : > { %4015 = vmatpush.bf16.msra.mxu1 %v5691_v45  ;;  %v7534_v45 = vld [vmem:[%s8287_s5 + $0x514] sm:$0xf0] }
  0x9a   : > { %4028 = vmatpush.bf16.msra.mxu2 %v5755_v46  ;;  %v5778_v46 = vld [vmem:[%s8287_s5 + $0x590] sm:$0xf]  ;;  %v5715_v54 = vor.u32 %v7534_v45, %v5714_v43  ;;  %v7590_v45 = vld [vmem:[%s8287_s5 + $0x6d4] sm:$0xf0] }
  0x9b   : > { %4041 = vmatpush.bf16.msra.mxu3 %v5819_v50  ;;  %v7500_v50 = vld [vmem:[%s8287_s5 + $0x404] sm:$0xf0] }
  0x9c   : > { %4003 = vmatpush.bf16.msra.mxu0 %v5619_v56  ;;  %v7532_v56 = vld [vmem:[%s8287_s5 + $0x504] sm:$0xf0]  ;;  %v5579_v1 = vor.u32 %v7500_v50, %v5578_v48  ;;  %v6066_v48 = vld [vmem:[%s8287_s5 + $0x7d0] sm:$0xf] }
  0x9d   : > { %4016 = vmatpush.bf16.msra.mxu1 %v5683_v57  ;;  %v301_v57 = vld [vmem:[%s9720_s0 + $0x20] sm:$0xff]  ;;  %v5707_v9 = vor.u32 %v7532_v56, %v5706_v55 }
  0x9e   : > { %4029 = vmatpush.bf16.msra.mxu2 %v5747_v58  ;;  %v5779_v58 = vor.u32 %v7550_v47, %v5778_v46  ;;  %v918_v13 = vunpack.c.h.b16 %v301_v57  ;;  %v6002_v46 = vld [vmem:[%s8287_s5 + $0x750] sm:$0xf]  ;;  %v7606_v47 = vld [vmem:[%s8287_s5 + $0x754] sm:$0xf0]  ;;  %v5930_v55 = vld [vmem:[%s8287_s5 + $0x6c0] sm:$0xf] }
  0x9f   : > { %4042 = vmatpush.bf16.msra.mxu3 %v5811_v62  ;;  %v5890_v62 = vld [vmem:[%s8287_s5 + $0x670] sm:$0xf] }
  0xa0   : > { %4004 = vmatpush.bf16.msra.mxu0 %v5611_v5  ;;  %v7610_v5 = vld [vmem:[%s8287_s5 + $0x774] sm:$0xf0]  ;;  %v5891_v15 = vor.u32 %v7578_v63, %v5890_v62  ;;  %v8555_v30 = vpack.c.b16 %v918_v13, %v918_v13 }
  0xa1   : > { %4017 = vmatpush.bf16.msra.mxu1 %v5675_v7  ;;  %v917_v7 = vunpack.c.l.b16 %v301_v57  ;;  %v7588_v57 = vld [vmem:[%s8287_s5 + $0x6c4] sm:$0xf0] }
  0xa2   : > { %4030 = vmatpush.bf16.msra.mxu2 %v5739_v8  ;;  %v5643_v8 = vor.u32 %v7516_v52, %v5642_v51  ;;  %v5939_v51 = vor.u32 %v7590_v45, %v5938_v40  ;;  %v6003_v52 = vor.u32 %v7606_v47, %v6002_v46  ;;  %v5931_v63 = vor.u32 %v7588_v57, %v5930_v55  ;;  %v7598_v40 = vld [vmem:[%s8287_s5 + $0x714] sm:$0xf0]  ;;  %v5834_v46 = vld [vmem:[%s8287_s5 + $0x600] sm:$0xf]  ;;  %v303_v55 = vld [vmem:[%s9720_s0 + $0x30] sm:$0xff] }
  0xa3   : > { %4043 = vmatpush.bf16.msra.mxu3 %v5803_v12  ;;  %v919_v12 = vunpack.c.l.b16 %v302_v61  ;;  %v8548_v25 = vpack.c.b16 %v917_v7, %v917_v7  ;;  %v7620_v61 = vld [vmem:[%s8287_s5 + $0x7c4] sm:$0xf0]  ;;  %v7586_v7 = vld [vmem:[%s8287_s5 + $0x6b4] sm:$0xf0]  ;;  %v6026_v57 = vld [vmem:[%s8287_s5 + $0x780] sm:$0xf] }
  0xa4   : > { %4005 = vmatpush.bf16.msra.mxu0 %v5603_v18  ;;  %v6019_v18 = vor.u32 %v7610_v5, %v6018_v3  ;;  %v5922_v3 = vld [vmem:[%s8287_s5 + $0x6b0] sm:$0xf]  ;;  %v6059_v5 = vor.u32 %v7620_v61, %v6058_v60  ;;  %v7614_v45 = vld [vmem:[%s8287_s5 + $0x794] sm:$0xf0] }
  0xa5   : > { %4018 = vmatpush.bf16.msra.mxu1 %v5667_v19  ;;  %v5882_v19 = vld [vmem:[%s8287_s5 + $0x660] sm:$0xf]  ;;  %v8553_v29 = vpack.c.b16 %v919_v12, %v919_v12  ;;  %v5923_v13 = vor.u32 %v7586_v7, %v5922_v3  ;;  %v6146_v60 = vld [vmem:[%s8287_s5 + $0x870] sm:$0xf]  ;;  %v7642_v61 = vld [vmem:[%s8287_s5 + $0x874] sm:$0xf0]  ;;  %v921_v3 = vunpack.c.l.b16 %v303_v55 }
  0xa6   : > { %4031 = vmatpush.bf16.msra.mxu2 %v5731_v22  ;;  %v7576_v22 = vld [vmem:[%s8287_s5 + $0x664] sm:$0xf0] }
  0xa7   : > { %4044 = vmatpush.bf16.msra.mxu3 %v5795_v26  ;;  %v7592_v26 = vld [vmem:[%s8287_s5 + $0x6e4] sm:$0xf0] }
  0xa8   : > { %4006 = vmatpush.bf16.msra.mxu0 %v5595_v32  ;;  %v7624_v32 = vld [vmem:[%s8287_s5 + $0x7e4] sm:$0xf0]  ;;  %v5947_v35 = vor.u32 %v7592_v26, %v5946_v23 }
  0xa9   : > { %4019 = vmatpush.bf16.msra.mxu1 %v5659_v33  ;;  %v8559_v33 = vpack.c.b16 %v920_v16, %v920_v16  ;;  %v6075_v43 = vor.u32 %v7624_v32, %v6074_v31  ;;  %v7568_v16 = vld [vmem:[%s8287_s5 + $0x624] sm:$0xf0]  ;;  %v5842_v32 = vld [vmem:[%s8287_s5 + $0x610] sm:$0xf] }
  0xaa   : > { %4032 = vmatpush.bf16.msra.mxu2 %v5723_v34  ;;  %v5883_v34 = vor.u32 %v7576_v22, %v5882_v19  ;;  %v7584_v19 = vld [vmem:[%s8287_s5 + $0x6a4] sm:$0xf0]  ;;  %v5978_v22 = vld [vmem:[%s8287_s5 + $0x720] sm:$0xf] }
  0xab   : > { %4045 = vmatpush.bf16.msra.mxu3 %v5787_v39  ;;  %v7574_v39 = vld [vmem:[%s8287_s5 + $0x654] sm:$0xf0]  ;;  %v7600_v23 = vld [vmem:[%s8287_s5 + $0x724] sm:$0xf0] }
  0xac   : > { %4007 = vmatpush.bf16.msra.mxu0 %v5587_v49  ;;  %v7622_v49 = vld [vmem:[%s8287_s5 + $0x7d4] sm:$0xf0]  ;;  %v5875_v50 = vor.u32 %v7574_v39, %v5874_v37  ;;  %v7616_v26 = vld [vmem:[%s8287_s5 + $0x7a4] sm:$0xf0]  ;;  %v5979_v31 = vor.u32 %v7600_v23, %v5978_v22  ;;  %v5970_v39 = vld [vmem:[%s8287_s5 + $0x710] sm:$0xf]  ;;  %v8630_v23 = vpack.c.b16 %v921_v3, %v921_v3 }
  0xad   : > { %4020 = vmatpush.bf16.msra.mxu1 %v5651_v53  ;;  %v5866_v53 = vld [vmem:[%s8287_s5 + $0x640] sm:$0xf]  ;;  %v6067_v56 = vor.u32 %v7622_v49, %v6066_v48  ;;  %v7582_v37 = vld [vmem:[%s8287_s5 + $0x694] sm:$0xf0]  ;;  %v7564_v48 = vld [vmem:[%s8287_s5 + $0x604] sm:$0xf0] }
  0xae   : > { %4033 = vmatpush.bf16.msra.mxu2 %v5715_v54  ;;  %v7572_v54 = vld [vmem:[%s8287_s5 + $0x644] sm:$0xf0]  ;;  %v5898_v49 = vld [vmem:[%s8287_s5 + $0x680] sm:$0xf]  ;;  %v6114_v3 = vld [vmem:[%s8287_s5 + $0x830] sm:$0xf] }
  0xaf   : > { %4046 = vmatpush.bf16.msra.mxu3 %v5779_v58  ;;  %v5994_v58 = vld [vmem:[%s8287_s5 + $0x740] sm:$0xf]  ;;  %v5867_v62 = vor.u32 %v7572_v54, %v5866_v53  ;;  %v7596_v54 = vld [vmem:[%s8287_s5 + $0x704] sm:$0xf0] }
  0xb0   : > { %4008 = vmatpush.bf16.msra.mxu0 %v5579_v1  ;;  %v5995_v0 = vor.u32 %v7604_v59, %v5994_v58  ;;  %v5858_v1 = vld [vmem:[%s8287_s5 + $0x630] sm:$0xf]  ;;  %v5962_v53 = vld [vmem:[%s8287_s5 + $0x700] sm:$0xf]  ;;  %v7612_v58 = vld [vmem:[%s8287_s5 + $0x784] sm:$0xf0] }
  0xb1   : > { %4021 = vmatpush.bf16.msra.mxu1 %v5643_v8  ;;  %v5986_v8 = vld [vmem:[%s8287_s5 + $0x730] sm:$0xf]  ;;  %v5859_v12 = vor.u32 %v7570_v2, %v5858_v1  ;;  %v304_v59 = vld [vmem:[%s9720_s0 + $0x38] sm:$0xff]  ;;  %v5963_v7 = vor.u32 %v7596_v54, %v5962_v53 }
  0xb2   : > { %4034 = vmatpush.bf16.msra.mxu2 %v5707_v9  ;;  %v7602_v9 = vld [vmem:[%s8287_s5 + $0x734] sm:$0xf0]  ;;  %v6274_v1 = vld [vmem:[%s8287_s5 + $0x970] sm:$0xf] }
  0xb3   : > { %4047 = vmatpush.bf16.msra.mxu3 %v5771_v14  ;;  %4009 = vmatmul.bf16.vlgmr.msra.gmra.mxu0 %v8548_v25  ;;  %v5987_v14 = vor.u32 %v7602_v9, %v5986_v8  ;;  %v7674_v2 = vld [vmem:[%s8287_s5 + $0x974] sm:$0xf0]  ;;  %v6338_v8 = vld [vmem:[%s8287_s5 + $0x9f0] sm:$0xf] }
  0xb4   : > { %4053 = vmatpush.bf16.msrb.mxu0 %v5891_v15  ;;  %4022 = vmatmul.bf16.vlgmr.msra.gmra.mxu1 %v8555_v30  ;;  %v5850_v15 = vld [vmem:[%s8287_s5 + $0x620] sm:$0xf]  ;;  %v7690_v9 = vld [vmem:[%s8287_s5 + $0x9f4] sm:$0xf0] }
  0xb5   : > { %4066 = vmatpush.bf16.msrb.mxu1 %v5955_v17  ;;  %4035 = vmatmul.bf16.vlgmr.msra.gmra.mxu2 %v8553_v29  ;;  %v5914_v17 = vld [vmem:[%s8287_s5 + $0x6a0] sm:$0xf]  ;;  %v5851_v27 = vor.u32 %v7568_v16, %v5850_v15  ;;  %v6275_v16 = vor.u32 %v7674_v2, %v6274_v1  ;;  %v6339_v22 = vor.u32 %v7690_v9, %v6338_v8  ;;  %v7650_v9 = vld [vmem:[%s8287_s5 + $0x8b4] sm:$0xf0] }
  0xb6   : > { %4079 = vmatpush.bf16.msrb.mxu2 %v6019_v18  ;;  %4048 = vmatmul.bf16.vlgmr.msra.gmra.mxu3 %v8559_v33  ;;  %v6051_v18 = vor.u32 %v7618_v11, %v6050_v10  ;;  %v5915_v28 = vor.u32 %v7584_v19, %v5914_v17  ;;  %v923_v10 = vunpack.c.l.b16 %v304_v59  ;;  %v922_v11 = vunpack.c.h.b16 %v303_v55  ;;  %v6138_v17 = vld [vmem:[%s8287_s5 + $0x860] sm:$0xf] }
  0xb7   : > { %4092 = vmatpush.bf16.msrb.mxu3 %v6083_v24  ;;  %v6042_v24 = vld [vmem:[%s8287_s5 + $0x7a0] sm:$0xf] }
  0xb8   : > { %4054 = vmatpush.bf16.msrb.mxu0 %v5883_v34  ;;  %v7566_v34 = vld [vmem:[%s8287_s5 + $0x614] sm:$0xf0]  ;;  %v6202_v19 = vld [vmem:[%s8287_s5 + $0x8e0] sm:$0xf] }
  0xb9   : > { %4067 = vmatpush.bf16.msrb.mxu1 %v5947_v35  ;;  %v5906_v35 = vld [vmem:[%s8287_s5 + $0x690] sm:$0xf]  ;;  %v5843_v47 = vor.u32 %v7566_v34, %v5842_v32  ;;  %v6330_v32 = vld [vmem:[%s8287_s5 + $0x9e0] sm:$0xf]  ;;  %v7688_v34 = vld [vmem:[%s8287_s5 + $0x9e4] sm:$0xf0] }
  0xba   : > { %4080 = vmatpush.bf16.msrb.mxu2 %v6011_v36  ;;  %v6043_v36 = vor.u32 %v7616_v26, %v6042_v24  ;;  %v7656_v24 = vld [vmem:[%s8287_s5 + $0x8e4] sm:$0xf0]  ;;  %v6266_v26 = vld [vmem:[%s8287_s5 + $0x960] sm:$0xf] }
  0xbb   : > { %4093 = vmatpush.bf16.msrb.mxu3 %v6075_v43  ;;  %v6034_v43 = vld [vmem:[%s8287_s5 + $0x790] sm:$0xf]  ;;  %v6122_v55 = vld [vmem:[%s8287_s5 + $0x840] sm:$0xf] }
  0xbc   : > { %4055 = vmatpush.bf16.msrb.mxu0 %v5875_v50  ;;  %v7580_v50 = vld [vmem:[%s8287_s5 + $0x684] sm:$0xf0] }
  0xbd   : > { %4068 = vmatpush.bf16.msrb.mxu1 %v5939_v51  ;;  %v5907_v51 = vor.u32 %v7582_v37, %v5906_v35  ;;  %v6203_v37 = vor.u32 %v7656_v24, %v6202_v19  ;;  %v6170_v19 = vld [vmem:[%s8287_s5 + $0x8a0] sm:$0xf]  ;;  %v7648_v24 = vld [vmem:[%s8287_s5 + $0x8a4] sm:$0xf0] }
  0xbe   : > { %4081 = vmatpush.bf16.msrb.mxu2 %v6003_v52  ;;  %v5971_v52 = vor.u32 %v7598_v40, %v5970_v39  ;;  %v6130_v40 = vld [vmem:[%s8287_s5 + $0x850] sm:$0xf] }
  0xbf   : > { %4094 = vmatpush.bf16.msrb.mxu3 %v6067_v56  ;;  %v6035_v56 = vor.u32 %v7614_v45, %v6034_v43  ;;  %v7638_v43 = vld [vmem:[%s8287_s5 + $0x854] sm:$0xf0]  ;;  %v6194_v45 = vld [vmem:[%s8287_s5 + $0x8d0] sm:$0xf] }
  0xc0   : > { %4056 = vmatpush.bf16.msrb.mxu0 %v5867_v62  ;;  %v6210_v62 = vld [vmem:[%s8287_s5 + $0x8f0] sm:$0xf] }
  0xc1   : > { %4069 = vmatpush.bf16.msrb.mxu1 %v5931_v63  ;;  %v5835_v63 = vor.u32 %v7564_v48, %v5834_v46  ;;  %v6331_v46 = vor.u32 %v7688_v34, %v6330_v32  ;;  %v6258_v48 = vld [vmem:[%s8287_s5 + $0x950] sm:$0xf]  ;;  %v6298_v32 = vld [vmem:[%s8287_s5 + $0x9a0] sm:$0xf]  ;;  %v7680_v34 = vld [vmem:[%s8287_s5 + $0x9a4] sm:$0xf0] }
  0xc2   : > { %4082 = vmatpush.bf16.msrb.mxu2 %v5995_v0  ;;  %v7658_v0 = vld [vmem:[%s8287_s5 + $0x8f4] sm:$0xf0] }
  0xc3   : > { %4095 = vmatpush.bf16.msrb.mxu3 %v6059_v5  ;;  %v5899_v5 = vor.u32 %v7580_v50, %v5898_v49  ;;  %v6211_v15 = vor.u32 %v7658_v0, %v6210_v62  ;;  %v7670_v49 = vld [vmem:[%s8287_s5 + $0x954] sm:$0xf0]  ;;  %v6322_v50 = vld [vmem:[%s8287_s5 + $0x9d0] sm:$0xf]  ;;  %v6314_v62 = vld [vmem:[%s8287_s5 + $0x9c0] sm:$0xf] }
  0xc4   : > { %4057 = vmatpush.bf16.msrb.mxu0 %v5859_v12  ;;  %v6027_v12 = vor.u32 %v7612_v58, %v6026_v57  ;;  %v6259_v54 = vor.u32 %v7670_v49, %v6258_v48  ;;  %v6186_v57 = vld [vmem:[%s8287_s5 + $0x8c0] sm:$0xf]  ;;  %v6226_v48 = vld [vmem:[%s8287_s5 + $0x910] sm:$0xf]  ;;  %v7662_v49 = vld [vmem:[%s8287_s5 + $0x914] sm:$0xf0] }
  0xc5   : > { %4070 = vmatpush.bf16.msrb.mxu1 %v5923_v13  ;;  %v6147_v13 = vor.u32 %v7642_v61, %v6146_v60  ;;  %v6250_v60 = vld [vmem:[%s8287_s5 + $0x940] sm:$0xf]  ;;  %v7668_v61 = vld [vmem:[%s8287_s5 + $0x944] sm:$0xf0] }
  0xc6   : > { %4083 = vmatpush.bf16.msrb.mxu2 %v5987_v14  ;;  %v924_v14 = vunpack.c.h.b16 %v304_v59  ;;  %v7652_v59 = vld [vmem:[%s8287_s5 + $0x8c4] sm:$0xf0]  ;;  %v6251_v2 = vor.u32 %v7668_v61, %v6250_v60  ;;  %v305_v61 = vld [vmem:[%s9720_s0 + $0x40] sm:$0xff] }
  0xc7   : > { %4096 = vmatpush.bf16.msrb.mxu3 %v6051_v18  ;;  %v7640_v18 = vld [vmem:[%s8287_s5 + $0x864] sm:$0xf0]  ;;  %v6187_v1 = vor.u32 %v7652_v59, %v6186_v57  ;;  %v6218_v59 = vld [vmem:[%s8287_s5 + $0x900] sm:$0xf] }
  0xc8   : > { %4058 = vmatpush.bf16.msrb.mxu0 %v5851_v27  ;;  %v7672_v27 = vld [vmem:[%s8287_s5 + $0x964] sm:$0xf0]  ;;  %v8641_v35 = vpack.c.b16 %v924_v14, %v924_v14 }
  0xc9   : > { %4071 = vmatpush.bf16.msrb.mxu1 %v5915_v28  ;;  %v8635_v28 = vpack.c.b16 %v923_v10, %v923_v10  ;;  %v6267_v39 = vor.u32 %v7672_v27, %v6266_v26  ;;  %v6242_v10 = vld [vmem:[%s8287_s5 + $0x930] sm:$0xf]  ;;  %v6234_v26 = vld [vmem:[%s8287_s5 + $0x920] sm:$0xf]  ;;  %v7664_v27 = vld [vmem:[%s8287_s5 + $0x924] sm:$0xf0] }
  0xca   : > { %4084 = vmatpush.bf16.msrb.mxu2 %v5979_v31  ;;  %v8637_v31 = vpack.c.b16 %v922_v11, %v922_v11  ;;  %v7666_v11 = vld [vmem:[%s8287_s5 + $0x934] sm:$0xf0]  ;;  %v7660_v60 = vld [vmem:[%s8287_s5 + $0x904] sm:$0xf0] }
  0xcb   : > { %4097 = vmatpush.bf16.msrb.mxu3 %v6043_v36  ;;  %v6139_v36 = vor.u32 %v7640_v18, %v6138_v17  ;;  %v6106_v17 = vld [vmem:[%s8287_s5 + $0x820] sm:$0xf]  ;;  %v7632_v18 = vld [vmem:[%s8287_s5 + $0x824] sm:$0xf0] }
  0xcc   : > { %4059 = vmatpush.bf16.msrb.mxu0 %v5843_v47  ;;  %v7654_v47 = vld [vmem:[%s8287_s5 + $0x8d4] sm:$0xf0] }
  0xcd   : > { %4072 = vmatpush.bf16.msrb.mxu1 %v5907_v51  ;;  %v7686_v51 = vld [vmem:[%s8287_s5 + $0x9d4] sm:$0xf0]  ;;  %v6195_v53 = vor.u32 %v7654_v47, %v6194_v45  ;;  %v6162_v45 = vld [vmem:[%s8287_s5 + $0x890] sm:$0xf] }
  0xce   : > { %4085 = vmatpush.bf16.msrb.mxu2 %v5971_v52  ;;  %v6131_v52 = vor.u32 %v7638_v43, %v6130_v40  ;;  %v6323_v58 = vor.u32 %v7686_v51, %v6322_v50  ;;  %v6098_v40 = vld [vmem:[%s8287_s5 + $0x810] sm:$0xf]  ;;  %v7630_v43 = vld [vmem:[%s8287_s5 + $0x814] sm:$0xf0] }
  0xcf   : > { %4098 = vmatpush.bf16.msrb.mxu3 %v6035_v56  ;;  %v7636_v56 = vld [vmem:[%s8287_s5 + $0x844] sm:$0xf0]  ;;  %v7646_v47 = vld [vmem:[%s8287_s5 + $0x894] sm:$0xf0]  ;;  %v6290_v50 = vld [vmem:[%s8287_s5 + $0x990] sm:$0xf] }
  0xd0   : > { %4060 = vmatpush.bf16.msrb.mxu0 %v5835_v63  ;;  %v7684_v63 = vld [vmem:[%s8287_s5 + $0x9c4] sm:$0xf0]  ;;  %v6123_v0 = vor.u32 %v7636_v56, %v6122_v55  ;;  %v7678_v51 = vld [vmem:[%s8287_s5 + $0x994] sm:$0xf0]  ;;  %v6154_v55 = vld [vmem:[%s8287_s5 + $0x880] sm:$0xf]  ;;  %v6163_v57 = vor.u32 %v7646_v47, %v6162_v45 }
  0xd1   : > { %4073 = vmatpush.bf16.msrb.mxu1 %v5899_v5  ;;  %v7634_v5 = vld [vmem:[%s8287_s5 + $0x834] sm:$0xf0]  ;;  %v6315_v8 = vor.u32 %v7684_v63, %v6314_v62  ;;  %v7644_v56 = vld [vmem:[%s8287_s5 + $0x884] sm:$0xf0]  ;;  %v6291_v62 = vor.u32 %v7678_v51, %v6290_v50  ;;  %v6282_v63 = vld [vmem:[%s8287_s5 + $0x980] sm:$0xf] }
  0xd2   : > { %4086 = vmatpush.bf16.msrb.mxu2 %v5963_v7  ;;  %v6178_v7 = vld [vmem:[%s8287_s5 + $0x8b0] sm:$0xf]  ;;  %v6115_v14 = vor.u32 %v7634_v5, %v6114_v3  ;;  %v7706_v3 = vld [vmem:[%s8287_s5 + $0xa74] sm:$0xf0]  ;;  %v6586_v47 = vld [vmem:[%s8287_s5 + $0xbe0] sm:$0xf] }
  0xd3   : > { %4099 = vmatpush.bf16.msrb.mxu3 %v6027_v12  ;;  %4061 = vmatmul.bf16.vlgmr.msrb.gmra.mxu0 %v8630_v23  ;;  %v6306_v12 = vld [vmem:[%s8287_s5 + $0x9b0] sm:$0xf] }
  0xd4   : > { %4105 = vmatpush.bf16.msra.mxu0 %v6147_v13  ;;  %4074 = vmatmul.bf16.vlgmr.msrb.gmra.mxu1 %v8637_v31  ;;  %v7682_v13 = vld [vmem:[%s8287_s5 + $0x9b4] sm:$0xf0]  ;;  %v6466_v5 = vld [vmem:[%s8287_s5 + $0xaf0] sm:$0xf] }
  0xd5   : > { %4118 = vmatpush.bf16.msra.mxu1 %v6211_v15  ;;  %4087 = vmatmul.bf16.vlgmr.msrb.gmra.mxu2 %v8635_v28  ;;  %v6179_v15 = vor.u32 %v7650_v9, %v6178_v7  ;;  %v6530_v9 = vld [vmem:[%s8287_s5 + $0xb70] sm:$0xf] }
  0xd6   : > { %4131 = vmatpush.bf16.msra.mxu2 %v6275_v16  ;;  %4100 = vmatmul.bf16.vlgmr.msrb.gmra.mxu3 %v8641_v35  ;;  %v6243_v16 = vor.u32 %v7666_v11, %v6242_v10  ;;  %v7738_v10 = vld [vmem:[%s8287_s5 + $0xb74] sm:$0xf0]  ;;  %v925_v11 = vunpack.c.l.b16 %v305_v61 }
  0xd7   : > { %4144 = vmatpush.bf16.msra.mxu3 %v6339_v22  ;;  %v6307_v22 = vor.u32 %v7682_v13, %v6306_v12  ;;  %v6155_v12 = vor.u32 %v7644_v56, %v6154_v55  ;;  %v6219_v13 = vor.u32 %v7660_v60, %v6218_v59  ;;  %v6450_v55 = vld [vmem:[%s8287_s5 + $0xad0] sm:$0xf]  ;;  %v7734_v59 = vld [vmem:[%s8287_s5 + $0xb54] sm:$0xf0] }
  0xd8   : > { %4106 = vmatpush.bf16.msra.mxu0 %v6139_v36  ;;  %v6107_v36 = vor.u32 %v7632_v18, %v6106_v17  ;;  %v926_v17 = vunpack.c.h.b16 %v305_v61  ;;  %v6578_v60 = vld [vmem:[%s8287_s5 + $0xbd0] sm:$0xf]  ;;  %v7750_v61 = vld [vmem:[%s8287_s5 + $0xbd4] sm:$0xf0] }
  0xd9   : > { %4119 = vmatpush.bf16.msra.mxu1 %v6203_v37  ;;  %v6171_v37 = vor.u32 %v7648_v24, %v6170_v19 }
  0xda   : > { %4132 = vmatpush.bf16.msra.mxu2 %v6267_v39  ;;  %v6235_v39 = vor.u32 %v7664_v27, %v6234_v26  ;;  %v6531_v26 = vor.u32 %v7738_v10, %v6530_v9  ;;  %v6394_v27 = vld [vmem:[%s8287_s5 + $0xa60] sm:$0xf]  ;;  %v7732_v9 = vld [vmem:[%s8287_s5 + $0xb44] sm:$0xf0] }
  0xdb   : > { %4145 = vmatpush.bf16.msra.mxu3 %v6331_v46  ;;  %v6299_v46 = vor.u32 %v7680_v34, %v6298_v32  ;;  %v7704_v32 = vld [vmem:[%s8287_s5 + $0xa64] sm:$0xf0]  ;;  %v6458_v34 = vld [vmem:[%s8287_s5 + $0xae0] sm:$0xf] }
  0xdc   : > { %4107 = vmatpush.bf16.msra.mxu0 %v6131_v52  ;;  %v6090_v52 = vld [vmem:[%s8287_s5 + $0x800] sm:$0xf]  ;;  %v6395_v50 = vor.u32 %v7704_v32, %v6394_v27  ;;  %v7746_v27 = vld [vmem:[%s8287_s5 + $0xbb4] sm:$0xf0] }
  0xdd   : > { %4120 = vmatpush.bf16.msra.mxu1 %v6195_v53  ;;  %v6099_v53 = vor.u32 %v7630_v43, %v6098_v40  ;;  %v6522_v40 = vld [vmem:[%s8287_s5 + $0xb60] sm:$0xf]  ;;  %v7736_v43 = vld [vmem:[%s8287_s5 + $0xb64] sm:$0xf0] }
  0xde   : > { %4133 = vmatpush.bf16.msra.mxu2 %v6259_v54  ;;  %v7628_v54 = vld [vmem:[%s8287_s5 + $0x804] sm:$0xf0]  ;;  %v6570_v10 = vld [vmem:[%s8287_s5 + $0xbc0] sm:$0xf] }
  0xdf   : > { %4146 = vmatpush.bf16.msra.mxu3 %v6323_v58  ;;  %v6227_v58 = vor.u32 %v7662_v49, %v6226_v48  ;;  %v6091_v7 = vor.u32 %v7628_v54, %v6090_v52  ;;  %v7752_v48 = vld [vmem:[%s8287_s5 + $0xbe4] sm:$0xf0]  ;;  %v6523_v52 = vor.u32 %v7736_v43, %v6522_v40  ;;  %v7702_v54 = vld [vmem:[%s8287_s5 + $0xa54] sm:$0xf0]  ;;  %v6426_v43 = vld [vmem:[%s8287_s5 + $0xaa0] sm:$0xf] }
  0xe0   : > { %4108 = vmatpush.bf16.msra.mxu0 %v6123_v0  ;;  %v7676_v0 = vld [vmem:[%s8287_s5 + $0x984] sm:$0xf0]  ;;  %v6587_v56 = vor.u32 %v7752_v48, %v6586_v47 }
  0xe1   : > { %4121 = vmatpush.bf16.msra.mxu1 %v6187_v1  ;;  %v306_v1 = vld [vmem:[%s9720_s0 + $0x48] sm:$0xff]  ;;  %v6283_v18 = vor.u32 %v7676_v0, %v6282_v63 }
  0xe2   : > { %4134 = vmatpush.bf16.msra.mxu2 %v6251_v2  ;;  %v6402_v2 = vld [vmem:[%s8287_s5 + $0xa70] sm:$0xf]  ;;  %v7696_v40 = vld [vmem:[%s8287_s5 + $0xa24] sm:$0xf0] }
  0xe3   : > { %4147 = vmatpush.bf16.msra.mxu3 %v6315_v8  ;;  %v7722_v8 = vld [vmem:[%s8287_s5 + $0xaf4] sm:$0xf0]  ;;  %v6403_v19 = vor.u32 %v7706_v3, %v6402_v2  ;;  %v7700_v2 = vld [vmem:[%s8287_s5 + $0xa44] sm:$0xf0]  ;;  %v6442_v3 = vld [vmem:[%s8287_s5 + $0xac0] sm:$0xf] }
  0xe4   : > { %4109 = vmatpush.bf16.msra.mxu0 %v6115_v14  ;;  %v6594_v14 = vld [vmem:[%s8287_s5 + $0xbf0] sm:$0xf]  ;;  %v6467_v24 = vor.u32 %v7722_v8, %v6466_v5  ;;  %v6579_v5 = vor.u32 %v7750_v61, %v6578_v60  ;;  %v6506_v8 = vld [vmem:[%s8287_s5 + $0xb40] sm:$0xf]  ;;  %v7712_v48 = vld [vmem:[%s8287_s5 + $0xaa4] sm:$0xf0] }
  0xe5   : > { %4122 = vmatpush.bf16.msra.mxu1 %v6179_v15  ;;  %v7754_v15 = vld [vmem:[%s8287_s5 + $0xbf4] sm:$0xf0]  ;;  %v6418_v61 = vld [vmem:[%s8287_s5 + $0xa90] sm:$0xf] }
  0xe6   : > { %4135 = vmatpush.bf16.msra.mxu2 %v6243_v16  ;;  %v927_v16 = vunpack.c.l.b16 %v306_v1  ;;  %v7694_v60 = vld [vmem:[%s8287_s5 + $0xa14] sm:$0xf0] }
  0xe7   : > { %4148 = vmatpush.bf16.msra.mxu3 %v6307_v22  ;;  %v928_v22 = vunpack.c.h.b16 %v306_v1  ;;  %v6378_v1 = vld [vmem:[%s8287_s5 + $0xa40] sm:$0xf] }
  0xe8   : > { %4110 = vmatpush.bf16.msra.mxu0 %v6107_v36  ;;  %v6595_v36 = vor.u32 %v7754_v15, %v6594_v14  ;;  %v8717_v45 = vpack.c.b16 %v927_v16, %v927_v16  ;;  %v6507_v14 = vor.u32 %v7732_v9, %v6506_v8  ;;  %v6370_v15 = vld [vmem:[%s8287_s5 + $0xa30] sm:$0xf]  ;;  %v7698_v16 = vld [vmem:[%s8287_s5 + $0xa34] sm:$0xf0]  ;;  %v6346_v9 = vld [vmem:[%s8287_s5 + $0xa00] sm:$0xf] }
  0xe9   : > { %4123 = vmatpush.bf16.msra.mxu1 %v6171_v37  ;;  %v8712_v37 = vpack.c.b16 %v925_v11, %v925_v11  ;;  %v8723_v49 = vpack.c.b16 %v928_v22, %v928_v22  ;;  %v7748_v11 = vld [vmem:[%s8287_s5 + $0xbc4] sm:$0xf0]  ;;  %v6498_v22 = vld [vmem:[%s8287_s5 + $0xb30] sm:$0xf]  ;;  %v6371_v32 = vor.u32 %v7698_v16, %v6370_v15  ;;  %v7742_v8 = vld [vmem:[%s8287_s5 + $0xb94] sm:$0xf0] }
  0xea   : > { %4136 = vmatpush.bf16.msra.mxu2 %v6235_v39  ;;  %v7720_v39 = vld [vmem:[%s8287_s5 + $0xae4] sm:$0xf0] }
  0xeb   : > { %4149 = vmatpush.bf16.msra.mxu3 %v6299_v46  ;;  %v8719_v46 = vpack.c.b16 %v926_v17, %v926_v17  ;;  %v6459_v51 = vor.u32 %v7720_v39, %v6458_v34  ;;  %v6434_v17 = vld [vmem:[%s8287_s5 + $0xab0] sm:$0xf]  ;;  %v6362_v39 = vld [vmem:[%s8287_s5 + $0xa20] sm:$0xf] }
  0xec   : > { %4111 = vmatpush.bf16.msra.mxu0 %v6099_v53  ;;  %v6386_v53 = vld [vmem:[%s8287_s5 + $0xa50] sm:$0xf] }
  0xed   : > { %4124 = vmatpush.bf16.msra.mxu1 %v6163_v57  ;;  %v7718_v57 = vld [vmem:[%s8287_s5 + $0xad4] sm:$0xf0] }
  0xee   : > { %4137 = vmatpush.bf16.msra.mxu2 %v6227_v58  ;;  %v6514_v58 = vld [vmem:[%s8287_s5 + $0xb50] sm:$0xf]  ;;  %v6451_v63 = vor.u32 %v7718_v57, %v6450_v55  ;;  %v6363_v55 = vor.u32 %v7696_v40, %v6362_v39  ;;  %v6427_v57 = vor.u32 %v7712_v48, %v6426_v43 }
  0xef   : > { %4150 = vmatpush.bf16.msra.mxu3 %v6291_v62  ;;  %v6387_v62 = vor.u32 %v7702_v54, %v6386_v53  ;;  %v6515_v0 = vor.u32 %v7734_v59, %v6514_v58  ;;  %v7744_v53 = vld [vmem:[%s8287_s5 + $0xba4] sm:$0xf0]  ;;  %v6354_v59 = vld [vmem:[%s8287_s5 + $0xa10] sm:$0xf] }
  0xf0   : > { %4112 = vmatpush.bf16.msra.mxu0 %v6091_v7  ;;  %v7716_v7 = vld [vmem:[%s8287_s5 + $0xac4] sm:$0xf0]  ;;  %v3906_v54 = vpop.f32.mrf.mxu0  ;;  %v6722_v39 = vld [vmem:[%s8287_s5 + $0xcf0] sm:$0xf] }
  0xf1   : > { %4125 = vmatpush.bf16.msra.mxu1 %v6155_v12  ;;  %v6379_v12 = vor.u32 %v7700_v2, %v6378_v1  ;;  %v7710_v1 = vld [vmem:[%s8287_s5 + $0xa94] sm:$0xf0]  ;;  %v6482_v2 = vld [vmem:[%s8287_s5 + $0xb10] sm:$0xf] }
  0xf2   : > { %4138 = vmatpush.bf16.msra.mxu2 %v6219_v13  ;;  %v6443_v13 = vor.u32 %v7716_v7, %v6442_v3  ;;  %v7726_v3 = vld [vmem:[%s8287_s5 + $0xb14] sm:$0xf0]  ;;  %v6546_v7 = vld [vmem:[%s8287_s5 + $0xb90] sm:$0xf]  ;;  %v6419_v15 = vor.u32 %v7710_v1, %v6418_v61 }
  0xf3   : > { %4151 = vmatpush.bf16.msra.mxu3 %v6283_v18  ;;  %4113 = vmatmul.bf16.vlgmr.msra.gmra.mxu0 %v8712_v37  ;;  %v6571_v18 = vor.u32 %v7748_v11, %v6570_v10  ;;  %v6355_v11 = vor.u32 %v7694_v60, %v6354_v59  ;;  %v6483_v16 = vor.u32 %v7726_v3, %v6482_v2  ;;  %v6786_v48 = vld [vmem:[%s8287_s5 + $0xd70] sm:$0xf]  ;;  %v6650_v2 = vld [vmem:[%s8287_s5 + $0xc60] sm:$0xf]  ;;  %v7768_v3 = vld [vmem:[%s8287_s5 + $0xc64] sm:$0xf0] }
  0xf4   : > { %4157 = vmatpush.bf16.msrb.mxu0 %v6403_v19  ;;  %4126 = vmatmul.bf16.vlgmr.msra.gmra.mxu1 %v8719_v46  ;;  %v7714_v19 = vld [vmem:[%s8287_s5 + $0xab4] sm:$0xf0] }
  0xf5   : > { %4170 = vmatpush.bf16.msrb.mxu1 %v6467_v24  ;;  %4139 = vmatmul.bf16.vlgmr.msra.gmra.mxu2 %v8717_v45  ;;  %v7730_v24 = vld [vmem:[%s8287_s5 + $0xb34] sm:$0xf0]  ;;  %v6435_v34 = vor.u32 %v7714_v19, %v6434_v17  ;;  %v6474_v17 = vld [vmem:[%s8287_s5 + $0xb00] sm:$0xf]  ;;  %v307_v19 = vld [vmem:[%s9720_s0 + $0x50] sm:$0xff] }
  0xf6   : > { %4183 = vmatpush.bf16.msrb.mxu2 %v6531_v26  ;;  %4152 = vmatmul.bf16.vlgmr.msra.gmra.mxu3 %v8723_v49  ;;  %v6562_v26 = vld [vmem:[%s8287_s5 + $0xbb0] sm:$0xf] }
  0xf7   : > { %4196 = vmatpush.bf16.msrb.mxu3 %v6595_v36  ;;  %v6499_v36 = vor.u32 %v7730_v24, %v6498_v22  ;;  %v6563_v47 = vor.u32 %v7746_v27, %v6562_v26  ;;  %v6547_v24 = vor.u32 %v7742_v8, %v6546_v7  ;;  %v6538_v26 = vld [vmem:[%s8287_s5 + $0xb80] sm:$0xf]  ;;  %v7740_v27 = vld [vmem:[%s8287_s5 + $0xb84] sm:$0xf0] }
  0xf8   : > { %4158 = vmatpush.bf16.msrb.mxu0 %v6395_v50  ;;  %v6490_v50 = vld [vmem:[%s8287_s5 + $0xb20] sm:$0xf]  ;;  %v3908_v40 = vpop.f32.mrf.mxu0  ;;  %v6539_v60 = vor.u32 %v7740_v27, %v6538_v26  ;;  %v7766_v26 = vld [vmem:[%s8287_s5 + $0xc54] sm:$0xf0]  ;;  %v6706_v27 = vld [vmem:[%s8287_s5 + $0xcd0] sm:$0xf] }
  0xf9   : > { %4171 = vmatpush.bf16.msrb.mxu1 %v6459_v51  ;;  %v7728_v51 = vld [vmem:[%s8287_s5 + $0xb24] sm:$0xf0]  ;;  %v6834_v40 = vld [vmem:[%s8287_s5 + $0xdd0] sm:$0xf] }
  0xfa   : > { %4184 = vmatpush.bf16.msrb.mxu2 %v6523_v52  ;;  %v6554_v52 = vld [vmem:[%s8287_s5 + $0xba0] sm:$0xf]  ;;  %v6491_v58 = vor.u32 %v7728_v51, %v6490_v50  ;;  %v7802_v50 = vld [vmem:[%s8287_s5 + $0xd74] sm:$0xf0]  ;;  %v929_v51 = vunpack.c.l.b16 %v307_v19 }
  0xfb   : > { %4197 = vmatpush.bf16.msrb.mxu3 %v6587_v56  ;;  %v3919_v56 = vpop.f32.mrf.mxu1  ;;  %v6787_v1 = vor.u32 %v7802_v50, %v6786_v48 }
  0xfc   : > { %4159 = vmatpush.bf16.msrb.mxu0 %v6387_v62  ;;  %v3920_v62 = vadd.f32 %v3919_v56, %v3906_v54  ;;  %v7818_v56 = vld [vmem:[%s8287_s5 + $0xdf4] sm:$0xf0]  ;;  %v8796_v8 = vpack.c.b16 %v929_v51, %v929_v51  ;;  %v6634_v51 = vld [vmem:[%s8287_s5 + $0xc40] sm:$0xf] }
  0xfd   : > { %4172 = vmatpush.bf16.msrb.mxu1 %v6451_v63  ;;  %v3932_v63 = vpop.f32.mrf.mxu2 }
  0xfe   : > { %4185 = vmatpush.bf16.msrb.mxu2 %v6515_v0  ;;  %v6555_v0 = vor.u32 %v7744_v53, %v6554_v52  ;;  %v3933_v10 = vadd.f32 %v3932_v63, %v3920_v62 }
  0xff   : > { %4198 = vmatpush.bf16.msrb.mxu3 %v6579_v5  ;;  %v3945_v5 = vpop.f32.mrf.mxu3 }
 0x100   : > { %4160 = vmatpush.bf16.msrb.mxu0 %v6379_v12  ;;  %v7692_v12 = vld [vmem:[%s8287_s5 + $0xa04] sm:$0xf0]  ;;  %v8778_v22 = vadd.f32 %v3945_v5, %v3933_v10  ;;  %v6714_v5 = vld [vmem:[%s8287_s5 + $0xce0] sm:$0xf] }
 0x101   : > { %4173 = vmatpush.bf16.msrb.mxu1 %v6443_v13  ;;  %v6410_v13 = vld [vmem:[%s8287_s5 + $0xa80] sm:$0xf]  ;;  %v6347_v43 = vor.u32 %v7692_v12, %v6346_v9  ;;  %v7784_v9 = vld [vmem:[%s8287_s5 + $0xce4] sm:$0xf0] }
 0x102   : > { %4186 = vmatpush.bf16.msrb.mxu2 %v6507_v14  ;;  %v7708_v14 = vld [vmem:[%s8287_s5 + $0xa84] sm:$0xf0]  ;;  %v6778_v10 = vld [vmem:[%s8287_s5 + $0xd60] sm:$0xf] }
 0x103   : > { %4199 = vmatpush.bf16.msrb.mxu3 %v6571_v18  ;;  %v7724_v18 = vld [vmem:[%s8287_s5 + $0xb04] sm:$0xf0]  ;;  %v3921_v52 = vpop.f32.mrf.mxu1  ;;  %v6411_v53 = vor.u32 %v7708_v14, %v6410_v13  ;;  %v6842_v14 = vld [vmem:[%s8287_s5 + $0xde0] sm:$0xf] }
 0x104   : > { %4161 = vmatpush.bf16.msrb.mxu0 %v6371_v32  ;;  %v308_v32 = vld [vmem:[%s9720_s0 + $0x58] sm:$0xff]  ;;  %v6475_v54 = vor.u32 %v7724_v18, %v6474_v17  ;;  %v6651_v17 = vor.u32 %v7768_v3, %v6650_v2  ;;  %v6715_v18 = vor.u32 %v7784_v9, %v6714_v5  ;;  %v7764_v52 = vld [vmem:[%s8287_s5 + $0xc44] sm:$0xf0]  ;;  %v6690_v2 = vld [vmem:[%s8287_s5 + $0xcb0] sm:$0xf] }
 0x105   : > { %4174 = vmatpush.bf16.msrb.mxu1 %v6435_v34  ;;  %v6658_v34 = vld [vmem:[%s8287_s5 + $0xc70] sm:$0xf]  ;;  %v3934_v59 = vpop.f32.mrf.mxu2  ;;  %v932_v62 = vunpack.c.h.b16 %v308_v32  ;;  %v7778_v9 = vld [vmem:[%s8287_s5 + $0xcb4] sm:$0xf0] }
 0x106   : > { %4187 = vmatpush.bf16.msrb.mxu2 %v6499_v36  ;;  %v7770_v36 = vld [vmem:[%s8287_s5 + $0xc74] sm:$0xf0]  ;;  %v7812_v59 = vld [vmem:[%s8287_s5 + $0xdc4] sm:$0xf0] }
 0x107   : > { %4200 = vmatpush.bf16.msrb.mxu3 %v6563_v47  ;;  %v7786_v47 = vld [vmem:[%s8287_s5 + $0xcf4] sm:$0xf0]  ;;  %v6659_v61 = vor.u32 %v7770_v36, %v6658_v34  ;;  %v3947_v63 = vpop.f32.mrf.mxu3  ;;  %v6770_v36 = vld [vmem:[%s8287_s5 + $0xd50] sm:$0xf] }
 0x108   : > { %4162 = vmatpush.bf16.msrb.mxu0 %v6363_v55  ;;  %v6850_v55 = vld [vmem:[%s8287_s5 + $0xdf0] sm:$0xf]  ;;  %v7782_v34 = vld [vmem:[%s8287_s5 + $0xcd4] sm:$0xf0] }
 0x109   : > { %4175 = vmatpush.bf16.msrb.mxu1 %v6427_v57  ;;  %v931_v57 = vunpack.c.l.b16 %v308_v32  ;;  %v6851_v7 = vor.u32 %v7818_v56, %v6850_v55  ;;  %v6707_v48 = vor.u32 %v7782_v34, %v6706_v27  ;;  %v7780_v55 = vld [vmem:[%s8287_s5 + $0xcc4] sm:$0xf0]  ;;  %v6762_v56 = vld [vmem:[%s8287_s5 + $0xd40] sm:$0xf] }
 0x10a   : > { %4188 = vmatpush.bf16.msrb.mxu2 %v6491_v58  ;;  %v930_v58 = vunpack.c.h.b16 %v307_v19  ;;  %v6682_v27 = vld [vmem:[%s8287_s5 + $0xca0] sm:$0xf] }
 0x10b   : > { %4201 = vmatpush.bf16.msrb.mxu3 %v6555_v0  ;;  %v6723_v0 = vor.u32 %v7786_v47, %v6722_v39  ;;  %v8801_v12 = vpack.c.b16 %v931_v57, %v931_v57  ;;  %v7798_v39 = vld [vmem:[%s8287_s5 + $0xd54] sm:$0xf0]  ;;  %v7796_v57 = vld [vmem:[%s8287_s5 + $0xd44] sm:$0xf0] }
 0x10c   : > { %4163 = vmatpush.bf16.msrb.mxu0 %v6355_v11  ;;  %v7800_v11 = vld [vmem:[%s8287_s5 + $0xd64] sm:$0xf0]  ;;  %v8803_v13 = vpack.c.b16 %v930_v58, %v930_v58  ;;  %v6771_v50 = vor.u32 %v7798_v39, %v6770_v36  ;;  %v6826_v58 = vld [vmem:[%s8287_s5 + $0xdc0] sm:$0xf]  ;;  %v6763_v63 = vor.u32 %v7796_v57, %v6762_v56  ;;  %v6610_v56 = vld [vmem:[%s8287_s5 + $0xc10] sm:$0xf] }
 0x10d   : > { %4176 = vmatpush.bf16.msrb.mxu1 %v6419_v15  ;;  %v7816_v15 = vld [vmem:[%s8287_s5 + $0xde4] sm:$0xf0]  ;;  %v6779_v19 = vor.u32 %v7800_v11, %v6778_v10  ;;  %v6754_v10 = vld [vmem:[%s8287_s5 + $0xd30] sm:$0xf]  ;;  %v7794_v11 = vld [vmem:[%s8287_s5 + $0xd34] sm:$0xf0] }
 0x10e   : > { %4189 = vmatpush.bf16.msrb.mxu2 %v6483_v16  ;;  %v8807_v16 = vpack.c.b16 %v932_v62, %v932_v62  ;;  %v6843_v32 = vor.u32 %v7816_v15, %v6842_v14  ;;  %v6818_v14 = vld [vmem:[%s8287_s5 + $0xdb0] sm:$0xf]  ;;  %v7810_v15 = vld [vmem:[%s8287_s5 + $0xdb4] sm:$0xf0]  ;;  %v7776_v36 = vld [vmem:[%s8287_s5 + $0xca4] sm:$0xf0] }
 0x10f   : > { %4202 = vmatpush.bf16.msrb.mxu3 %v6547_v24  ;;  %v6642_v24 = vld [vmem:[%s8287_s5 + $0xc50] sm:$0xf]  ;;  %v6819_v34 = vor.u32 %v7810_v15, %v6818_v14  ;;  %v6746_v39 = vld [vmem:[%s8287_s5 + $0xd20] sm:$0xf]  ;;  %v7758_v57 = vld [vmem:[%s8287_s5 + $0xc14] sm:$0xf0] }
 0x110   : > { %4164 = vmatpush.bf16.msrb.mxu0 %v6347_v43  ;;  %v7814_v43 = vld [vmem:[%s8287_s5 + $0xdd4] sm:$0xf0]  ;;  %v6643_v47 = vor.u32 %v7766_v26, %v6642_v24  ;;  %v6618_v24 = vld [vmem:[%s8287_s5 + $0xc20] sm:$0xf]  ;;  %v7760_v26 = vld [vmem:[%s8287_s5 + $0xc24] sm:$0xf0] }
 0x111   : > { %4177 = vmatpush.bf16.msrb.mxu1 %v6411_v53  ;;  %v6698_v53 = vld [vmem:[%s8287_s5 + $0xcc0] sm:$0xf]  ;;  %v3971_v5 = vpop.f32.mrf.mxu1  ;;  %v7788_v15 = vld [vmem:[%s8287_s5 + $0xd04] sm:$0xf0] }
 0x112   : > { %4190 = vmatpush.bf16.msrb.mxu2 %v6475_v54  ;;  %v6835_v54 = vor.u32 %v7814_v43, %v6834_v40  ;;  %v6699_v62 = vor.u32 %v7780_v55, %v6698_v53  ;;  %v7792_v40 = vld [vmem:[%s8287_s5 + $0xd24] sm:$0xf0]  ;;  %v6730_v14 = vld [vmem:[%s8287_s5 + $0xd00] sm:$0xf] }
 0x113   : > { %4203 = vmatpush.bf16.msrb.mxu3 %v6539_v60  ;;  %4165 = vmatmul.bf16.vlgmr.msrb.gmra.mxu0 %v8796_v8  ;;  %v6635_v60 = vor.u32 %v7764_v52, %v6634_v51  ;;  %v6619_v51 = vor.u32 %v7760_v26, %v6618_v24  ;;  %v6747_v55 = vor.u32 %v7792_v40, %v6746_v39  ;;  %v7804_v24 = vld [vmem:[%s8287_s5 + $0xd84] sm:$0xf0]  ;;  %v7850_v40 = vld [vmem:[%s8287_s5 + $0xef4] sm:$0xf0] }
 0x114   : > { %4209 = vmatpush.bf16.msra.mxu0 %v6659_v61  ;;  %4178 = vmatmul.bf16.vlgmr.msrb.gmra.mxu1 %v8803_v13  ;;  %v3958_v61 = vpop.f32.mrf.mxu0  ;;  %v310_v26 = vld [vmem:[%s9720_s0 + $0x68] sm:$0xff] }
 0x115   : > { %4222 = vmatpush.bf16.msra.mxu1 %v6723_v0  ;;  %4191 = vmatmul.bf16.vlgmr.msrb.gmra.mxu2 %v8801_v12  ;;  %v6626_v0 = vld [vmem:[%s8287_s5 + $0xc30] sm:$0xf]  ;;  %v3959_v3 = vadd.f32 %v3958_v61, %v8778_v22  ;;  %v6691_v22 = vor.u32 %v7778_v9, %v6690_v2  ;;  %v7774_v61 = vld [vmem:[%s8287_s5 + $0xc94] sm:$0xf0]  ;;  %v6602_v2 = vld [vmem:[%s8287_s5 + $0xc00] sm:$0xf] }
 0x116   : > { %4235 = vmatpush.bf16.msra.mxu2 %v6787_v1  ;;  %4204 = vmatmul.bf16.vlgmr.msrb.gmra.mxu3 %v8807_v16  ;;  %v7762_v1 = vld [vmem:[%s8287_s5 + $0xc34] sm:$0xf0]  ;;  %v7772_v9 = vld [vmem:[%s8287_s5 + $0xc84] sm:$0xf0] }
 0x117   : > { %4248 = vmatpush.bf16.msra.mxu3 %v6851_v7  ;;  %v6827_v7 = vor.u32 %v7812_v59, %v6826_v58  ;;  %v6674_v58 = vld [vmem:[%s8287_s5 + $0xc90] sm:$0xf] }
 0x118   : > { %4210 = vmatpush.bf16.msra.mxu0 %v6651_v17  ;;  %v3972_v17 = vadd.f32 %v3971_v5, %v3959_v3  ;;  %v6611_v3 = vor.u32 %v7758_v57, %v6610_v56  ;;  %v7756_v5 = vld [vmem:[%s8287_s5 + $0xc04] sm:$0xf0] }
 0x119   : > { %4223 = vmatpush.bf16.msra.mxu1 %v6715_v18  ;;  %v6627_v18 = vor.u32 %v7762_v1, %v6626_v0  ;;  %v3973_v59 = vpop.f32.mrf.mxu1  ;;  %v6802_v0 = vld [vmem:[%s8287_s5 + $0xd90] sm:$0xf]  ;;  %v7806_v1 = vld [vmem:[%s8287_s5 + $0xd94] sm:$0xf0]  ;;  %v6603_v39 = vor.u32 %v7756_v5, %v6602_v2  ;;  %v7034_v5 = vld [vmem:[%s8287_s5 + $0xf60] sm:$0xf] }
 0x11a   : > { %4236 = vmatpush.bf16.msra.mxu2 %v6779_v19  ;;  %v6755_v19 = vor.u32 %v7794_v11, %v6754_v10  ;;  %v6675_v10 = vor.u32 %v7774_v61, %v6674_v58  ;;  %v936_v59 = vunpack.c.h.b16 %v310_v26 }
 0x11b   : > { %4249 = vmatpush.bf16.msra.mxu3 %v6843_v32  ;;  %v3984_v32 = vpop.f32.mrf.mxu2 }
 0x11c   : > { %4211 = vmatpush.bf16.msra.mxu0 %v6643_v47  ;;  %v3985_v43 = vadd.f32 %v3984_v32, %v3972_v17  ;;  %v3997_v47 = vpop.f32.mrf.mxu3  ;;  %v3960_v53 = vpop.f32.mrf.mxu0  ;;  %v309_v17 = vld [vmem:[%s9720_s0 + $0x60] sm:$0xff]  ;;  %v6914_v32 = vld [vmem:[%s8287_s5 + $0xe70] sm:$0xf] }
 0x11d   : > { %4224 = vmatpush.bf16.msra.mxu1 %v6707_v48  ;;  %v6810_v48 = vld [vmem:[%s8287_s5 + $0xda0] sm:$0xf]  ;;  %v7106_v53 = vld [vmem:[%s8287_s5 + $0xff0] sm:$0xf]  ;;  %v934_v56 = vunpack.c.h.b16 %v309_v17 }
 0x11e   : > { %4237 = vmatpush.bf16.msra.mxu2 %v6771_v50  ;;  %v7808_v50 = vld [vmem:[%s8287_s5 + $0xda4] sm:$0xf0]  ;;  %v8846_v52 = vadd.f32 %v3997_v47, %v3985_v43  ;;  %v7042_v43 = vld [vmem:[%s8287_s5 + $0xf70] sm:$0xf]  ;;  %v7866_v47 = vld [vmem:[%s8287_s5 + $0xf74] sm:$0xf0] }
 0x11f   : > { %4250 = vmatpush.bf16.msra.mxu3 %v6835_v54  ;;  %v6683_v54 = vor.u32 %v7776_v36, %v6682_v27  ;;  %v6978_v36 = vld [vmem:[%s8287_s5 + $0xef0] sm:$0xf]  ;;  %v7043_v61 = vor.u32 %v7866_v47, %v7042_v43 }
 0x120   : > { %4212 = vmatpush.bf16.msra.mxu0 %v6635_v60  ;;  %v6811_v60 = vor.u32 %v7808_v50, %v6810_v48  ;;  %v933_v48 = vunpack.c.l.b16 %v309_v17 }
 0x121   : > { %4225 = vmatpush.bf16.msra.mxu1 %v6699_v62  ;;  %v6738_v62 = vld [vmem:[%s8287_s5 + $0xd10] sm:$0xf] }
 0x122   : > { %4238 = vmatpush.bf16.msra.mxu2 %v6763_v63  ;;  %v7790_v63 = vld [vmem:[%s8287_s5 + $0xd14] sm:$0xf0]  ;;  %v8881_v2 = vpack.c.b16 %v933_v48, %v933_v48 }
 0x123   : > { %4251 = vmatpush.bf16.msra.mxu3 %v6827_v7  ;;  %v6666_v7 = vld [vmem:[%s8287_s5 + $0xc80] sm:$0xf]  ;;  %v6739_v11 = vor.u32 %v7790_v63, %v6738_v62  ;;  %v7832_v63 = vld [vmem:[%s8287_s5 + $0xe64] sm:$0xf0] }
 0x124   : > { %4213 = vmatpush.bf16.msra.mxu0 %v6627_v18  ;;  %v3986_v18 = vpop.f32.mrf.mxu2  ;;  %v3999_v27 = vpop.f32.mrf.mxu3  ;;  %v6667_v50 = vor.u32 %v7772_v9, %v6666_v7  ;;  %v6906_v62 = vld [vmem:[%s8287_s5 + $0xe60] sm:$0xf]  ;;  %v7864_v7 = vld [vmem:[%s8287_s5 + $0xf64] sm:$0xf0] }
 0x125   : > { %4226 = vmatpush.bf16.msra.mxu1 %v6691_v22  ;;  %v6803_v22 = vor.u32 %v7806_v1, %v6802_v0  ;;  %v6970_v0 = vld [vmem:[%s8287_s5 + $0xee0] sm:$0xf]  ;;  %v6907_v17 = vor.u32 %v7832_v63, %v6906_v62 }
 0x126   : > { %4239 = vmatpush.bf16.msra.mxu2 %v6755_v19  ;;  %v6794_v19 = vld [vmem:[%s8287_s5 + $0xd80] sm:$0xf] }
 0x127   : > { %4252 = vmatpush.bf16.msra.mxu3 %v6819_v34  ;;  %v7834_v34 = vld [vmem:[%s8287_s5 + $0xe74] sm:$0xf0]  ;;  %v6795_v57 = vor.u32 %v7804_v24, %v6794_v19  ;;  %v6898_v19 = vld [vmem:[%s8287_s5 + $0xe50] sm:$0xf] }
 0x128   : > { %4214 = vmatpush.bf16.msra.mxu0 %v6619_v51  ;;  %v6731_v51 = vor.u32 %v7788_v15, %v6730_v14  ;;  %v6915_v58 = vor.u32 %v7834_v34, %v6914_v32  ;;  %v7880_v14 = vld [vmem:[%s8287_s5 + $0xfe4] sm:$0xf0]  ;;  %v8892_v15 = vpack.c.b16 %v936_v59, %v936_v59  ;;  %v7830_v24 = vld [vmem:[%s8287_s5 + $0xe54] sm:$0xf0]  ;;  %v7026_v34 = vld [vmem:[%s8287_s5 + $0xf50] sm:$0xf] }
 0x129   : > { %4227 = vmatpush.bf16.msra.mxu1 %v6683_v54  ;;  %v7882_v54 = vld [vmem:[%s8287_s5 + $0xff4] sm:$0xf0]  ;;  %v6899_v43 = vor.u32 %v7830_v24, %v6898_v19  ;;  %v7082_v59 = vld [vmem:[%s8287_s5 + $0xfc0] sm:$0xf] }
 0x12a   : > { %4240 = vmatpush.bf16.msra.mxu2 %v6747_v55  ;;  %v935_v55 = vunpack.c.l.b16 %v310_v26  ;;  %v7107_v1 = vor.u32 %v7882_v54, %v7106_v53  ;;  %v6962_v26 = vld [vmem:[%s8287_s5 + $0xed0] sm:$0xf]  ;;  %v7846_v32 = vld [vmem:[%s8287_s5 + $0xed4] sm:$0xf0]  ;;  %v6954_v53 = vld [vmem:[%s8287_s5 + $0xec0] sm:$0xf] }
 0x12b   : > { %4253 = vmatpush.bf16.msra.mxu3 %v6811_v60  ;;  %v6979_v60 = vor.u32 %v7850_v40, %v6978_v36  ;;  %v7862_v36 = vld [vmem:[%s8287_s5 + $0xf54] sm:$0xf0]  ;;  %v6963_v47 = vor.u32 %v7846_v32, %v6962_v26  ;;  %v6874_v32 = vld [vmem:[%s8287_s5 + $0xe20] sm:$0xf] }
 0x12c   : > { %4215 = vmatpush.bf16.msra.mxu0 %v6611_v3  ;;  %v7848_v3 = vld [vmem:[%s8287_s5 + $0xee4] sm:$0xf0]  ;;  %v8886_v9 = vpack.c.b16 %v935_v55, %v935_v55  ;;  %v7878_v40 = vld [vmem:[%s8287_s5 + $0xfd4] sm:$0xf0]  ;;  %v7027_v48 = vor.u32 %v7862_v36, %v7026_v34  ;;  %v6938_v36 = vld [vmem:[%s8287_s5 + $0xea0] sm:$0xf] }
 0x12d   : > { %4228 = vmatpush.bf16.msra.mxu1 %v6675_v10  ;;  %v8888_v10 = vpack.c.b16 %v934_v56, %v934_v56  ;;  %v6971_v18 = vor.u32 %v7848_v3, %v6970_v0  ;;  %v7844_v55 = vld [vmem:[%s8287_s5 + $0xec4] sm:$0xf0]  ;;  %v7018_v56 = vld [vmem:[%s8287_s5 + $0xf40] sm:$0xf]  ;;  %v6882_v3 = vld [vmem:[%s8287_s5 + $0xe30] sm:$0xf] }
 0x12e   : > { %4241 = vmatpush.bf16.msra.mxu2 %v6739_v11  ;;  %v7098_v11 = vld [vmem:[%s8287_s5 + $0xfe0] sm:$0xf]  ;;  %v6955_v0 = vor.u32 %v7844_v55, %v6954_v53  ;;  %v7874_v19 = vld [vmem:[%s8287_s5 + $0xfb4] sm:$0xf0]  ;;  %v7824_v34 = vld [vmem:[%s8287_s5 + $0xe24] sm:$0xf0] }
 0x12f   : > { %4254 = vmatpush.bf16.msra.mxu3 %v6803_v22  ;;  %v7035_v22 = vor.u32 %v7864_v7, %v7034_v5  ;;  %v7099_v27 = vor.u32 %v7880_v14, %v7098_v11  ;;  %v7826_v5 = vld [vmem:[%s8287_s5 + $0xe34] sm:$0xf0]  ;;  %v6946_v7 = vld [vmem:[%s8287_s5 + $0xeb0] sm:$0xf]  ;;  %v7066_v53 = vld [vmem:[%s8287_s5 + $0xfa0] sm:$0xf] }
 0x130   : > { %4216 = vmatpush.bf16.msra.mxu0 %v6603_v39  ;;  %v7090_v39 = vld [vmem:[%s8287_s5 + $0xfd0] sm:$0xf]  ;;  %v6883_v24 = vor.u32 %v7826_v5, %v6882_v3  ;;  %v7854_v5 = vld [vmem:[%s8287_s5 + $0xf14] sm:$0xf0] }
 0x131   : > { %4229 = vmatpush.bf16.msra.mxu1 %v6667_v50  ;;  %v6890_v50 = vld [vmem:[%s8287_s5 + $0xe40] sm:$0xf]  ;;  %v7091_v54 = vor.u32 %v7878_v40, %v7090_v39  ;;  %v4023_v63 = vpop.f32.mrf.mxu1  ;;  %v6994_v3 = vld [vmem:[%s8287_s5 + $0xf10] sm:$0xf] }
 0x132   : > { %4242 = vmatpush.bf16.msra.mxu2 %v6731_v51  ;;  %v7828_v51 = vld [vmem:[%s8287_s5 + $0xe44] sm:$0xf0] }
 0x133   : > { %4255 = vmatpush.bf16.msra.mxu3 %v6795_v57  ;;  %4217 = vmatmul.bf16.vlgmr.msra.gmra.mxu0 %v8881_v2  ;;  %v7860_v57 = vld [vmem:[%s8287_s5 + $0xf44] sm:$0xf0]  ;;  %v6891_v62 = vor.u32 %v7828_v51, %v6890_v50 }
 0x134   : > { %4261 = vmatpush.bf16.msrb.mxu0 %v6915_v58  ;;  %4230 = vmatmul.bf16.vlgmr.msra.gmra.mxu1 %v8888_v10  ;;  %v4010_v58 = vpop.f32.mrf.mxu0 }
 0x135   : > { %4274 = vmatpush.bf16.msrb.mxu1 %v6979_v60  ;;  %4243 = vmatmul.bf16.vlgmr.msra.gmra.mxu2 %v8886_v9  ;;  %v7876_v60 = vld [vmem:[%s8287_s5 + $0xfc4] sm:$0xf0] }
 0x136   : > { %4287 = vmatpush.bf16.msrb.mxu2 %v7043_v61  ;;  %4256 = vmatmul.bf16.vlgmr.msra.gmra.mxu3 %v8892_v15  ;;  %v4011_v61 = vadd.f32 %v4010_v58, %v8846_v52  ;;  %v7083_v11 = vor.u32 %v7876_v60, %v7082_v59  ;;  %v7858_v52 = vld [vmem:[%s8287_s5 + $0xf34] sm:$0xf0] }
 0x137   : > { %4300 = vmatpush.bf16.msrb.mxu3 %v7107_v1  ;;  %v7019_v1 = vor.u32 %v7860_v57, %v7018_v56  ;;  %v6875_v56 = vor.u32 %v7824_v34, %v6874_v32  ;;  %v311_v32 = vld [vmem:[%s9720_s0 + $0x70] sm:$0xff] }
 0x138   : > { %4262 = vmatpush.bf16.msrb.mxu0 %v6907_v17  ;;  %v4024_v14 = vadd.f32 %v4023_v63, %v4011_v61  ;;  %v7842_v17 = vld [vmem:[%s8287_s5 + $0xeb4] sm:$0xf0]  ;;  %v4036_v40 = vpop.f32.mrf.mxu2  ;;  %v6866_v61 = vld [vmem:[%s8287_s5 + $0xe10] sm:$0xf] }
 0x139   : > { %4275 = vmatpush.bf16.msrb.mxu1 %v6971_v18  ;;  %v7010_v18 = vld [vmem:[%s8287_s5 + $0xf30] sm:$0xf]  ;;  %v6947_v26 = vor.u32 %v7842_v17, %v6946_v7  ;;  %v4049_v51 = vpop.f32.mrf.mxu3  ;;  %v4025_v57 = vpop.f32.mrf.mxu1 }
 0x13a   : > { %4288 = vmatpush.bf16.msrb.mxu2 %v7035_v22  ;;  %v7074_v22 = vld [vmem:[%s8287_s5 + $0xfb0] sm:$0xf]  ;;  %v4037_v50 = vadd.f32 %v4036_v40, %v4024_v14  ;;  %v6858_v14 = vld [vmem:[%s8287_s5 + $0xe00] sm:$0xf]  ;;  %v312_v40 = vld [vmem:[%s9720_s0 + $0x78] sm:$0xff]  ;;  %v937_v57 = vunpack.c.l.b16 %v311_v32 }
 0x13b   : > { %4301 = vmatpush.bf16.msrb.mxu3 %v7099_v27  ;;  %v7011_v27 = vor.u32 %v7858_v52, %v7010_v18  ;;  %v7075_v39 = vor.u32 %v7874_v19, %v7074_v22  ;;  %v6930_v63 = vld [vmem:[%s8287_s5 + $0xe90] sm:$0xf]  ;;  %v7820_v18 = vld [vmem:[%s8287_s5 + $0xe04] sm:$0xf0]  ;;  %v6922_v52 = vld [vmem:[%s8287_s5 + $0xe80] sm:$0xf] }
 0x13c   : > { %4263 = vmatpush.bf16.msrb.mxu0 %v6899_v43  ;;  %v7840_v43 = vld [vmem:[%s8287_s5 + $0xea4] sm:$0xf0]  ;;  %v4012_v55 = vpop.f32.mrf.mxu0  ;;  %v8931_v58 = vadd.f32 %v4049_v51, %v4037_v50  ;;  %v7058_v7 = vld [vmem:[%s8287_s5 + $0xf90] sm:$0xf] }
 0x13d   : > { %4276 = vmatpush.bf16.msrb.mxu1 %v6963_v47  ;;  %v7002_v47 = vld [vmem:[%s8287_s5 + $0xf20] sm:$0xf]  ;;  %v6939_v59 = vor.u32 %v7840_v43, %v6938_v36  ;;  %v7836_v22 = vld [vmem:[%s8287_s5 + $0xe84] sm:$0xf0]  ;;  %v7234_v50 = vld [vmem:[%s8287_s5 + $0x10f0] sm:$0xf] }
 0x13e   : > { %4289 = vmatpush.bf16.msrb.mxu2 %v7027_v48  ;;  %v7856_v48 = vld [vmem:[%s8287_s5 + $0xf24] sm:$0xf0]  ;;  %v7050_v36 = vld [vmem:[%s8287_s5 + $0xf80] sm:$0xf]  ;;  %v7298_v55 = vld [vmem:[%s8287_s5 + $0x1170] sm:$0xf] }
 0x13f   : > { %4302 = vmatpush.bf16.msrb.mxu3 %v7091_v54  ;;  %v7872_v54 = vld [vmem:[%s8287_s5 + $0xfa4] sm:$0xf0]  ;;  %v7003_v60 = vor.u32 %v7856_v48, %v7002_v47  ;;  %v7170_v47 = vld [vmem:[%s8287_s5 + $0x1070] sm:$0xf]  ;;  %v7898_v48 = vld [vmem:[%s8287_s5 + $0x1074] sm:$0xf0] }
 0x140   : > { %4264 = vmatpush.bf16.msrb.mxu0 %v6891_v62  ;;  %v7822_v62 = vld [vmem:[%s8287_s5 + $0xe14] sm:$0xf0]  ;;  %v4038_v43 = vpop.f32.mrf.mxu2 }
 0x141   : > { %4277 = vmatpush.bf16.msrb.mxu1 %v6955_v0  ;;  %v7067_v0 = vor.u32 %v7872_v54, %v7066_v53  ;;  %v6867_v17 = vor.u32 %v7822_v62, %v6866_v61  ;;  %v4051_v51 = vpop.f32.mrf.mxu3  ;;  %v6859_v53 = vor.u32 %v7820_v18, %v6858_v14  ;;  %v7914_v54 = vld [vmem:[%s8287_s5 + $0x10f4] sm:$0xf0]  ;;  %v7362_v61 = vld [vmem:[%s8287_s5 + $0x11f0] sm:$0xf]  ;;  %v7162_v14 = vld [vmem:[%s8287_s5 + $0x1060] sm:$0xf] }
 0x142   : > { %4290 = vmatpush.bf16.msrb.mxu2 %v7019_v1  ;;  %v7838_v1 = vld [vmem:[%s8287_s5 + $0xe94] sm:$0xf0]  ;;  %v7226_v18 = vld [vmem:[%s8287_s5 + $0x10e0] sm:$0xf]  ;;  %v7218_v51 = vld [vmem:[%s8287_s5 + $0x10d0] sm:$0xf] }
 0x143   : > { %4303 = vmatpush.bf16.msrb.mxu3 %v7083_v11  ;;  %v7870_v11 = vld [vmem:[%s8287_s5 + $0xf94] sm:$0xf0]  ;;  %v6931_v19 = vor.u32 %v7838_v1, %v6930_v63  ;;  %v939_v63 = vunpack.c.l.b16 %v312_v40 }
 0x144   : > { %4265 = vmatpush.bf16.msrb.mxu0 %v6883_v24  ;;  %v6995_v24 = vor.u32 %v7854_v5, %v6994_v3  ;;  %v7059_v34 = vor.u32 %v7870_v11, %v7058_v7  ;;  %v7946_v62 = vld [vmem:[%s8287_s5 + $0x11f4] sm:$0xf0]  ;;  %v7171_v3 = vor.u32 %v7898_v48, %v7170_v47  ;;  %v940_v5 = vunpack.c.h.b16 %v312_v40  ;;  %v7154_v48 = vld [vmem:[%s8287_s5 + $0x1050] sm:$0xf] }
 0x145   : > { %4278 = vmatpush.bf16.msrb.mxu1 %v6947_v26  ;;  %v6986_v26 = vld [vmem:[%s8287_s5 + $0xf00] sm:$0xf]  ;;  %v7235_v7 = vor.u32 %v7914_v54, %v7234_v50  ;;  %v7894_v50 = vld [vmem:[%s8287_s5 + $0x1054] sm:$0xf0] }
 0x146   : > { %4291 = vmatpush.bf16.msrb.mxu2 %v7011_v27  ;;  %v7852_v27 = vld [vmem:[%s8287_s5 + $0xf04] sm:$0xf0]  ;;  %v7910_v54 = vld [vmem:[%s8287_s5 + $0x10d4] sm:$0xf0] }
 0x147   : > { %4304 = vmatpush.bf16.msrb.mxu3 %v7075_v39  ;;  %v7868_v39 = vld [vmem:[%s8287_s5 + $0xf84] sm:$0xf0] }
 0x148   : > { %4266 = vmatpush.bf16.msrb.mxu0 %v6875_v56  ;;  %v7930_v56 = vld [vmem:[%s8287_s5 + $0x1174] sm:$0xf0]  ;;  %v7051_v1 = vor.u32 %v7868_v39, %v7050_v36  ;;  %v7944_v36 = vld [vmem:[%s8287_s5 + $0x11e4] sm:$0xf0]  ;;  %v8977_v39 = vpack.c.b16 %v940_v5, %v940_v5 }
 0x149   : > { %4279 = vmatpush.bf16.msrb.mxu1 %v6939_v59  ;;  %v6923_v59 = vor.u32 %v7836_v22, %v6922_v52  ;;  %v7299_v11 = vor.u32 %v7930_v56, %v7298_v55  ;;  %v7363_v52 = vor.u32 %v7946_v62, %v7362_v61  ;;  %v8966_v22 = vpack.c.b16 %v937_v57, %v937_v57  ;;  %v7282_v55 = vld [vmem:[%s8287_s5 + $0x1150] sm:$0xf]  ;;  %v7926_v56 = vld [vmem:[%s8287_s5 + $0x1154] sm:$0xf0]  ;;  %v7908_v5 = vld [vmem:[%s8287_s5 + $0x10c4] sm:$0xf0] }
 0x14a   : > { %4292 = vmatpush.bf16.msrb.mxu2 %v7003_v60  ;;  %v6987_v60 = vor.u32 %v7852_v27, %v6986_v26  ;;  %v7928_v26 = vld [vmem:[%s8287_s5 + $0x1164] sm:$0xf0]  ;;  %v8971_v27 = vpack.c.b16 %v939_v63, %v939_v63  ;;  %9731 = vst [vmem:[#allocation9_spill] sm:$0xff] %v8977_v39  ;;  %v7346_v57 = vld [vmem:[%s8287_s5 + $0x11d0] sm:$0xf]  ;;  %v7219_v61 = vor.u32 %v7910_v54, %v7218_v51 }
 0x14b   : > { %4305 = vmatpush.bf16.msrb.mxu3 %v7067_v0  ;;  %v938_v0 = vunpack.c.h.b16 %v311_v32  ;;  %v7283_v62 = vor.u32 %v7926_v56, %v7282_v55  ;;  %v7146_v63 = vld [vmem:[%s8287_s5 + $0x1040] sm:$0xf]  ;;  %v7266_v51 = vld [vmem:[%s8287_s5 + $0x1130] sm:$0xf]  ;;  %v7938_v54 = vld [vmem:[%s8287_s5 + $0x11b4] sm:$0xf0] }
 0x14c   : > { %4267 = vmatpush.bf16.msrb.mxu0 %v6867_v17  ;;  %v7896_v17 = vld [vmem:[%s8287_s5 + $0x1064] sm:$0xf0] }
 0x14d   : > { %4280 = vmatpush.bf16.msrb.mxu1 %v6931_v19  ;;  %v7912_v19 = vld [vmem:[%s8287_s5 + $0x10e4] sm:$0xf0]  ;;  %v8973_v32 = vpack.c.b16 %v938_v0, %v938_v0  ;;  %v7163_v40 = vor.u32 %v7896_v17, %v7162_v14  ;;  %v7338_v17 = vld [vmem:[%s8287_s5 + $0x11c0] sm:$0xf] }
 0x14e   : > { %4293 = vmatpush.bf16.msrb.mxu2 %v6995_v24  ;;  %v7290_v24 = vld [vmem:[%s8287_s5 + $0x1160] sm:$0xf]  ;;  %v7227_v43 = vor.u32 %v7912_v19, %v7226_v18  ;;  %v7892_v0 = vld [vmem:[%s8287_s5 + $0x1044] sm:$0xf0] }
 0x14f   : > { %4306 = vmatpush.bf16.msrb.mxu3 %v7059_v34  ;;  %v7354_v34 = vld [vmem:[%s8287_s5 + $0x11e0] sm:$0xf]  ;;  %v7291_v47 = vor.u32 %v7928_v26, %v7290_v24  ;;  %v7940_v18 = vld [vmem:[%s8287_s5 + $0x11c4] sm:$0xf0]  ;;  %v7147_v19 = vor.u32 %v7892_v0, %v7146_v63 }
 0x150   : > { %4268 = vmatpush.bf16.msrb.mxu0 %v6859_v53  ;;  %v7355_v53 = vor.u32 %v7944_v36, %v7354_v34  ;;  %v4062_v14 = vpop.f32.mrf.mxu0  ;;  %v7138_v36 = vld [vmem:[%s8287_s5 + $0x1030] sm:$0xf]  ;;  %v7904_v0 = vld [vmem:[%s8287_s5 + $0x10a4] sm:$0xf0] }
 0x151   : > { %4281 = vmatpush.bf16.msrb.mxu1 %v6923_v59  ;;  %v7942_v59 = vld [vmem:[%s8287_s5 + $0x11d4] sm:$0xf0]  ;;  %v4075_v24 = vpop.f32.mrf.mxu1 }
 0x152   : > { %4294 = vmatpush.bf16.msrb.mxu2 %v6987_v60  ;;  %v7155_v60 = vor.u32 %v7894_v50, %v7154_v48  ;;  %v7906_v50 = vld [vmem:[%s8287_s5 + $0x10b4] sm:$0xf0] }
 0x153   : > { %4307 = vmatpush.bf16.msrb.mxu3 %v7051_v1  ;;  %4269 = vmatmul.bf16.vlgmr.msrb.gmra.mxu0 %v8966_v22  ;;  %v7210_v1 = vld [vmem:[%s8287_s5 + $0x10c0] sm:$0xf] }
 0x154   : > { %4313 = vmatpush.bf16.msra.mxu0 %v7171_v3  ;;  %4282 = vmatmul.bf16.vlgmr.msrb.gmra.mxu1 %v8973_v32  ;;  %v7347_v3 = vor.u32 %v7942_v59, %v7346_v57  ;;  %v7211_v26 = vor.u32 %v7908_v5, %v7210_v1  ;;  %v7130_v59 = vld [vmem:[%s8287_s5 + $0x1020] sm:$0xf] }
 0x155   : > { %4326 = vmatpush.bf16.msra.mxu1 %v7235_v7  ;;  %4295 = vmatmul.bf16.vlgmr.msrb.gmra.mxu2 %v8971_v27  ;;  %v7274_v7 = vld [vmem:[%s8287_s5 + $0x1140] sm:$0xf] }
 0x156   : > { %4339 = vmatpush.bf16.msra.mxu2 %v7299_v11  ;;  %4308 = vmatmul.bf16.vlgmr.msrb.gmra.mxu3 %v8977_v39  ;;  %v7924_v11 = vld [vmem:[%s8287_s5 + $0x1144] sm:$0xf0]  ;;  %v7258_v1 = vld [vmem:[%s8287_s5 + $0x1120] sm:$0xf]  ;;  %v5244_v39 = vld [vmem:[%s8287_s5 + $0x168] sm:$0xf0] }
 0x157   : > { %4352 = vmatpush.bf16.msra.mxu3 %v7363_v52  ;;  %v4063_v52 = vadd.f32 %v4062_v14, %v8931_v58  ;;  %v7275_v34 = vor.u32 %v7924_v11, %v7274_v7  ;;  %v7922_v58 = vld [vmem:[%s8287_s5 + $0x1134] sm:$0xf0]  ;;  %v7322_v11 = vld [vmem:[%s8287_s5 + $0x11a0] sm:$0xf]  ;;  %v7936_v14 = vld [vmem:[%s8287_s5 + $0x11a4] sm:$0xf0] }
 0x158   : > { %4314 = vmatpush.bf16.msra.mxu0 %v7163_v40  ;;  %v7890_v40 = vld [vmem:[%s8287_s5 + $0x1034] sm:$0xf0]  ;;  %v7267_v57 = vor.u32 %v7922_v58, %v7266_v51  ;;  %v4088_v63 = vpop.f32.mrf.mxu2  ;;  %v7314_v51 = vld [vmem:[%s8287_s5 + $0x1190] sm:$0xf] }
 0x159   : > { %4327 = vmatpush.bf16.msra.mxu1 %v7227_v43  ;;  %v7202_v43 = vld [vmem:[%s8287_s5 + $0x10b0] sm:$0xf]  ;;  %v4076_v48 = vadd.f32 %v4075_v24, %v4063_v52  ;;  %v7139_v55 = vor.u32 %v7890_v40, %v7138_v36  ;;  %v4101_v7 = vpop.f32.mrf.mxu3  ;;  %v4077_v52 = vpop.f32.mrf.mxu1  ;;  %v7886_v36 = vld [vmem:[%s8287_s5 + $0x1014] sm:$0xf0] }
 0x15a   : > { %4340 = vmatpush.bf16.msra.mxu2 %v7291_v47  ;;  %v7339_v47 = vor.u32 %v7940_v18, %v7338_v17  ;;  %v7203_v56 = vor.u32 %v7906_v50, %v7202_v43  ;;  %v4064_v17 = vpop.f32.mrf.mxu0  ;;  %v7186_v40 = vld [vmem:[%s8287_s5 + $0x1090] sm:$0xf]  ;;  %v7323_v43 = vor.u32 %v7936_v14, %v7322_v11  ;;  %v7918_v50 = vld [vmem:[%s8287_s5 + $0x1114] sm:$0xf0]  ;;  %v7385_v11 = vld [vmem:[%s8287_s5 + $0x74] sm:$0xf] }
 0x15b   : > { %4353 = vmatpush.bf16.msra.mxu3 %v7355_v53  ;;  %v7330_v53 = vld [vmem:[%s8287_s5 + $0x11b0] sm:$0xf]  ;;  %v4089_v5 = vadd.f32 %v4088_v63, %v4076_v48  ;;  %v7934_v58 = vld [vmem:[%s8287_s5 + $0x1194] sm:$0xf0]  ;;  %v313_v63 = vld [vmem:[%s9720_s0 + $0x80] sm:$0xff] }
 0x15c   : > { %4315 = vmatpush.bf16.msra.mxu0 %v7155_v60  ;;  %v7888_v60 = vld [vmem:[%s8287_s5 + $0x1024] sm:$0xf0]  ;;  %v7250_v48 = vld [vmem:[%s8287_s5 + $0x1110] sm:$0xf]  ;;  %v5124_v14 = vld [vmem:[%s8287_s5 + $0x78] sm:$0xf0] }
 0x15d   : > { %4328 = vmatpush.bf16.msra.mxu1 %v7219_v61  ;;  %v7194_v61 = vld [vmem:[%s8287_s5 + $0x10a0] sm:$0xf]  ;;  %v7131_v18 = vor.u32 %v7888_v60, %v7130_v59  ;;  %v7251_v60 = vor.u32 %v7918_v50, %v7250_v48  ;;  %v7401_v17 = vld [vmem:[%s8287_s5 + $0xf4] sm:$0xf]  ;;  %v5316_v48 = vld [vmem:[%s8287_s5 + $0x1f8] sm:$0xf0] }
 0x15e   : > { %4341 = vmatpush.bf16.msra.mxu2 %v7283_v62  ;;  %v7331_v62 = vor.u32 %v7938_v54, %v7330_v53  ;;  %v7195_v24 = vor.u32 %v7904_v0, %v7194_v61  ;;  %v7114_v53 = vld [vmem:[%s8287_s5 + $0x1000] sm:$0xf]  ;;  %v7315_v0 = vor.u32 %v7934_v58, %v7314_v51  ;;  %v942_v51 = vunpack.c.h.b16 %v313_v63 }
 0x15f   : > { %4354 = vmatpush.bf16.msra.mxu3 %v7347_v3  ;;  %v7920_v3 = vld [vmem:[%s8287_s5 + $0x1124] sm:$0xf0]  ;;  %v7242_v61 = vld [vmem:[%s8287_s5 + $0x1100] sm:$0xf] }
 0x160   : > { %4316 = vmatpush.bf16.msra.mxu0 %v7147_v19  ;;  %v9016_v19 = vadd.f32 %v4101_v7, %v4089_v5  ;;  %v314_v5 = vld [vmem:[%s9720_s0 + $0x88] sm:$0xff]  ;;  %v4090_v7 = vpop.f32.mrf.mxu2 }
 0x161   : > { %4329 = vmatpush.bf16.msra.mxu1 %v7211_v26  ;;  %v7259_v26 = vor.u32 %v7920_v3, %v7258_v1  ;;  %v7306_v1 = vld [vmem:[%s8287_s5 + $0x1180] sm:$0xf]  ;;  %v7932_v3 = vld [vmem:[%s8287_s5 + $0x1184] sm:$0xf0]  ;;  %v943_v50 = vunpack.c.l.b16 %v314_v5 }
 0x162   : > { %4342 = vmatpush.bf16.msra.mxu2 %v7275_v34  ;;  %v7122_v34 = vld [vmem:[%s8287_s5 + $0x1010] sm:$0xf]  ;;  %v7307_v58 = vor.u32 %v7932_v3, %v7306_v1  ;;  %v7431_v1 = vld [vmem:[%s8287_s5 + $0x1e4] sm:$0xf]  ;;  %v5308_v3 = vld [vmem:[%s8287_s5 + $0x1e8] sm:$0xf0] }
 0x163   : > { %4355 = vmatpush.bf16.msra.mxu3 %v7339_v47  ;;  %v7902_v47 = vld [vmem:[%s8287_s5 + $0x1094] sm:$0xf0]  ;;  %v7123_v54 = vor.u32 %v7886_v36, %v7122_v34  ;;  %v5252_v34 = vld [vmem:[%s8287_s5 + $0x178] sm:$0xf0]  ;;  %v941_v36 = vunpack.c.l.b16 %v313_v63  ;;  %v9056_v63 = vpack.c.b16 %v943_v50, %v943_v50 }
 0x164   : > { %4317 = vmatpush.bf16.msra.mxu0 %v7139_v55  ;;  %v7884_v55 = vld [vmem:[%s8287_s5 + $0x1004] sm:$0xf0]  ;;  %v7187_v59 = vor.u32 %v7902_v47, %v7186_v40  ;;  %v7433_v47 = vld [vmem:[%s8287_s5 + $0x1f4] sm:$0xf] }
 0x165   : > { %4330 = vmatpush.bf16.msra.mxu1 %v7203_v56  ;;  %v7178_v56 = vld [vmem:[%s8287_s5 + $0x1080] sm:$0xf]  ;;  %v7115_v52 = vor.u32 %v7884_v55, %v7114_v53  ;;  %v5127_v53 = vor.u32 %v7385_v11, %v5124_v14 }
 0x166   : > { %4343 = vmatpush.bf16.msra.mxu2 %v7267_v57  ;;  %v7900_v57 = vld [vmem:[%s8287_s5 + $0x1084] sm:$0xf0] }
 0x167   : > { %4356 = vmatpush.bf16.msra.mxu3 %v7331_v62  ;;  %v7916_v62 = vld [vmem:[%s8287_s5 + $0x1104] sm:$0xf0]  ;;  %v7179_v40 = vor.u32 %v7900_v57, %v7178_v56  ;;  %v5319_v56 = vor.u32 %v7433_v47, %v5316_v48  ;;  %v9051_v57 = vpack.c.b16 %v941_v36, %v941_v36  ;;  %v5172_v36 = vld [vmem:[%s8287_s5 + $0xd8] sm:$0xf0] }
 0x168   : > { %4318 = vmatpush.bf16.msra.mxu0 %v7131_v18  ;;  %v4103_v18 = vpop.f32.mrf.mxu3  ;;  %v5300_v47 = vld [vmem:[%s8287_s5 + $0x1d8] sm:$0xf0] }
 0x169   : > { %4331 = vmatpush.bf16.msra.mxu1 %v7195_v24  ;;  %v5188_v24 = vld [vmem:[%s8287_s5 + $0xf8] sm:$0xf0]  ;;  %v5116_v18 = vld [vmem:[%s8287_s5 + $0x68] sm:$0xf0] }
 0x16a   : > { %4344 = vmatpush.bf16.msra.mxu2 %v7259_v26  ;;  %v7417_v26 = vld [vmem:[%s8287_s5 + $0x174] sm:$0xf]  ;;  %v5191_v55 = vor.u32 %v7401_v17, %v5188_v24  ;;  %v5108_v24 = vld [vmem:[%s8287_s5 + $0x58] sm:$0xf0] }
 0x16b   : > { %4357 = vmatpush.bf16.msra.mxu3 %v7323_v43  ;;  %v7243_v43 = vor.u32 %v7916_v62, %v7242_v61  ;;  %v5255_v7 = vor.u32 %v7417_v26, %v5252_v34  ;;  %v5180_v61 = vld [vmem:[%s8287_s5 + $0xe8] sm:$0xf0]  ;;  %v7415_v62 = vld [vmem:[%s8287_s5 + $0x164] sm:$0xf]  ;;  %v7397_v26 = vld [vmem:[%s8287_s5 + $0xd4] sm:$0xf]  ;;  %v5311_v34 = vor.u32 %v7431_v1, %v5308_v3 }
 0x16c   : > { %4319 = vmatpush.bf16.msra.mxu0 %v7123_v54  ;;  %v944_v54 = vunpack.c.h.b16 %v314_v5  ;;  %v5247_v17 = vor.u32 %v7415_v62, %v5244_v39  ;;  %v7429_v39 = vld [vmem:[%s8287_s5 + $0x1d4] sm:$0xf]  ;;  %v5175_v50 = vor.u32 %v7397_v26, %v5172_v36  ;;  %v5156_v36 = vld [vmem:[%s8287_s5 + $0xb8] sm:$0xf0] }
 0x16d   : > { %4332 = vmatpush.bf16.msra.mxu1 %v7187_v59  ;;  %v7383_v59 = vld [vmem:[%s8287_s5 + $0x64] sm:$0xf] }
 0x16e   : > { %4345 = vmatpush.bf16.msra.mxu2 %v7251_v60  ;;  %v7399_v60 = vld [vmem:[%s8287_s5 + $0xe4] sm:$0xf]  ;;  %v9062_v5 = vpack.c.b16 %v944_v54, %v944_v54  ;;  %v5119_v11 = vor.u32 %v7383_v59, %v5116_v18  ;;  %v5228_v18 = vld [vmem:[%s8287_s5 + $0x148] sm:$0xf0] }
 0x16f   : > { %4358 = vmatpush.bf16.msra.mxu3 %v7315_v0  ;;  %v9058_v0 = vpack.c.b16 %v942_v51, %v942_v51  ;;  %v5183_v14 = vor.u32 %v7399_v60, %v5180_v61  ;;  %v7395_v54 = vld [vmem:[%s8287_s5 + $0xc4] sm:$0xf]  ;;  %v5292_v61 = vld [vmem:[%s8287_s5 + $0x1c8] sm:$0xf0] }
 0x170   : > { %4320 = vmatpush.bf16.msra.mxu0 %v7115_v52  ;;  %v7381_v52 = vld [vmem:[%s8287_s5 + $0x54] sm:$0xf]  ;;  %v7411_v59 = vld [vmem:[%s8287_s5 + $0x144] sm:$0xf]  ;;  %v4114_v60 = vpop.f32.mrf.mxu0 }
 0x171   : > { %4333 = vmatpush.bf16.msra.mxu1 %v7179_v40  ;;  %v7413_v40 = vld [vmem:[%s8287_s5 + $0x154] sm:$0xf]  ;;  %v5111_v48 = vor.u32 %v7381_v52, %v5108_v24  ;;  %v4115_v62 = vadd.f32 %v4114_v60, %v9016_v19  ;;  %v4127_v3 = vpop.f32.mrf.mxu1  ;;  %v5092_v52 = vld [vmem:[%s8287_s5 + $0x38] sm:$0xf0] }
 0x172   : > { %4346 = vmatpush.bf16.msra.mxu2 %v7243_v43  ;;  %v5236_v43 = vld [vmem:[%s8287_s5 + $0x158] sm:$0xf0]  ;;  %v7393_v24 = vld [vmem:[%s8287_s5 + $0xb4] sm:$0xf] }
 0x173   : > { %4359 = vmatpush.bf16.msra.mxu3 %v7307_v58  ;;  %4321 = vmatmul.bf16.vlgmr.msra.gmra.mxu0 %v9051_v57  ;;  %v5239_v51 = vor.u32 %v7413_v40, %v5236_v43  ;;  %v7379_v58 = vld [vmem:[%s8287_s5 + $0x44] sm:$0xf]  ;;  %v7409_v40 = vld [vmem:[%s8287_s5 + $0x134] sm:$0xf]  ;;  %v5220_v19 = vld [vmem:[%s8287_s5 + $0x138] sm:$0xf0] }
 0x174   : > { %4365 = vmatpush.bf16.msrb.mxu0 %v5127_v53  ;;  %4334 = vmatmul.bf16.vlgmr.msra.gmra.mxu1 %v9058_v0  ;;  %v5100_v53 = vld [vmem:[%s8287_s5 + $0x48] sm:$0xf0]  ;;  %v7425_v43 = vld [vmem:[%s8287_s5 + $0x1b4] sm:$0xf] }
 0x175   : > { %4378 = vmatpush.bf16.msrb.mxu1 %v5191_v55  ;;  %4347 = vmatmul.bf16.vlgmr.msra.gmra.mxu2 %v9056_v63  ;;  %v5303_v55 = vor.u32 %v7429_v39, %v5300_v47  ;;  %v5103_v1 = vor.u32 %v7379_v58, %v5100_v53  ;;  %v5284_v39 = vld [vmem:[%s8287_s5 + $0x1b8] sm:$0xf0]  ;;  %v5084_v58 = vld [vmem:[%s8287_s5 + $0x28] sm:$0xf0]  ;;  %v7391_v53 = vld [vmem:[%s8287_s5 + $0xa4] sm:$0xf] }
 0x176   : > { %4391 = vmatpush.bf16.msrb.mxu2 %v5255_v7  ;;  %4360 = vmatmul.bf16.vlgmr.msra.gmra.mxu3 %v9062_v5  ;;  %v5164_v7 = vld [vmem:[%s8287_s5 + $0xc8] sm:$0xf0] }
 0x177   : > { %4404 = vmatpush.bf16.msrb.mxu3 %v5319_v56  ;;  %v7427_v56 = vld [vmem:[%s8287_s5 + $0x1c4] sm:$0xf] }
 0x178   : > { %4366 = vmatpush.bf16.msrb.mxu0 %v5119_v11  ;;  %v5167_v11 = vor.u32 %v7395_v54, %v5164_v7  ;;  %v5295_v26 = vor.u32 %v7427_v56, %v5292_v61  ;;  %v5287_v54 = vor.u32 %v7425_v43, %v5284_v39  ;;  %v5148_v7 = vld [vmem:[%s8287_s5 + $0xa8] sm:$0xf0]  ;;  %v7423_v61 = vld [vmem:[%s8287_s5 + $0x1a4] sm:$0xf]  ;;  %v5204_v43 = vld [vmem:[%s8287_s5 + $0x118] sm:$0xf0] }
 0x179   : > { %4379 = vmatpush.bf16.msrb.mxu1 %v5183_v14  ;;  %v5231_v14 = vor.u32 %v7411_v59, %v5228_v18  ;;  %v7407_v59 = vld [vmem:[%s8287_s5 + $0x124] sm:$0xf]  ;;  %v5212_v18 = vld [vmem:[%s8287_s5 + $0x128] sm:$0xf0]  ;;  %v4153_v56 = vpop.f32.mrf.mxu3  ;;  %v7421_v39 = vld [vmem:[%s8287_s5 + $0x194] sm:$0xf] }
 0x17a   : > { %4392 = vmatpush.bf16.msrb.mxu2 %v5247_v17  ;;  %v7377_v17 = vld [vmem:[%s8287_s5 + $0x34] sm:$0xf] }
 0x17b   : > { %4405 = vmatpush.bf16.msrb.mxu3 %v5311_v34  ;;  %v4128_v34 = vadd.f32 %v4127_v3, %v4115_v62  ;;  %v5095_v47 = vor.u32 %v7377_v17, %v5092_v52  ;;  %v5276_v62 = vld [vmem:[%s8287_s5 + $0x1a8] sm:$0xf0]  ;;  %v5151_v17 = vor.u32 %v7391_v53, %v5148_v7  ;;  %v5215_v52 = vor.u32 %v7407_v59, %v5212_v18  ;;  %v7403_v7 = vld [vmem:[%s8287_s5 + $0x104] sm:$0xf] }
 0x17c   : > { %4367 = vmatpush.bf16.msrb.mxu0 %v5111_v48  ;;  %v5159_v48 = vor.u32 %v7393_v24, %v5156_v36  ;;  %v7373_v24 = vld [vmem:[%s8287_s5 + $0x14] sm:$0xf]  ;;  %v5279_v36 = vor.u32 %v7423_v61, %v5276_v62  ;;  %v5196_v18 = vld [vmem:[%s8287_s5 + $0x108] sm:$0xf0] }
 0x17d   : > { %4380 = vmatpush.bf16.msrb.mxu1 %v5175_v50  ;;  %v5223_v50 = vor.u32 %v7409_v40, %v5220_v19  ;;  %v5140_v40 = vld [vmem:[%s8287_s5 + $0x98] sm:$0xf0]  ;;  %v7405_v19 = vld [vmem:[%s8287_s5 + $0x114] sm:$0xf] }
 0x17e   : > { %4393 = vmatpush.bf16.msrb.mxu2 %v5239_v51  ;;  %v7375_v51 = vld [vmem:[%s8287_s5 + $0x24] sm:$0xf]  ;;  %v5207_v53 = vor.u32 %v7405_v19, %v5204_v43  ;;  %v7449_v62 = vld [vmem:[%s8287_s5 + $0x274] sm:$0xf]  ;;  %v5572_v19 = vld [vmem:[%s8287_s5 + $0x3f8] sm:$0xf0] }
 0x17f   : > { %4406 = vmatpush.bf16.msrb.mxu3 %v5303_v55  ;;  %v4140_v55 = vpop.f32.mrf.mxu2  ;;  %v5087_v3 = vor.u32 %v7375_v51, %v5084_v58  ;;  %v5068_v51 = vld [vmem:[%s8287_s5 + $0x8] sm:$0xf0] }
 0x180   : > { %4368 = vmatpush.bf16.msrb.mxu0 %v5103_v1  ;;  %v4141_v60 = vadd.f32 %v4140_v55, %v4128_v34  ;;  %v4116_v1 = vpop.f32.mrf.mxu0  ;;  %v7389_v34 = vld [vmem:[%s8287_s5 + $0x94] sm:$0xf]  ;;  %v5132_v55 = vld [vmem:[%s8287_s5 + $0x88] sm:$0xf0] }
 0x181   : > { %4381 = vmatpush.bf16.msrb.mxu1 %v5167_v11  ;;  %v4129_v11 = vpop.f32.mrf.mxu1  ;;  %v5143_v58 = vor.u32 %v7389_v34, %v5140_v40  ;;  %v5380_v1 = vld [vmem:[%s8287_s5 + $0x278] sm:$0xf0]  ;;  %v7497_v40 = vld [vmem:[%s8287_s5 + $0x3f4] sm:$0xf] }
 0x182   : > { %4394 = vmatpush.bf16.msrb.mxu2 %v5231_v14  ;;  %v9101_v14 = vadd.f32 %v4153_v56, %v4141_v60  ;;  %v7419_v60 = vld [vmem:[%s8287_s5 + $0x184] sm:$0xf]  ;;  %v5260_v56 = vld [vmem:[%s8287_s5 + $0x188] sm:$0xf0]  ;;  %v4155_v11 = vpop.f32.mrf.mxu3 }
 0x183   : > { %4407 = vmatpush.bf16.msrb.mxu3 %v5295_v26  ;;  %v5076_v26 = vld [vmem:[%s8287_s5 + $0x18] sm:$0xf0]  ;;  %v5263_v43 = vor.u32 %v7419_v60, %v5260_v56 }
 0x184   : > { %4369 = vmatpush.bf16.msrb.mxu0 %v5095_v47  ;;  %v5268_v47 = vld [vmem:[%s8287_s5 + $0x198] sm:$0xf0] }
 0x185   : > { %4382 = vmatpush.bf16.msrb.mxu1 %v5159_v48  ;;  %v5079_v48 = vor.u32 %v7373_v24, %v5076_v26  ;;  %v5271_v59 = vor.u32 %v7421_v39, %v5268_v47  ;;  %v7481_v24 = vld [vmem:[%s8287_s5 + $0x374] sm:$0xf]  ;;  %v5508_v26 = vld [vmem:[%s8287_s5 + $0x378] sm:$0xf0]  ;;  %v5383_v39 = vor.u32 %v7449_v62, %v5380_v1 }
 0x186   : > { %4395 = vmatpush.bf16.msrb.mxu2 %v5223_v50  ;;  %v7371_v50 = vld [vmem:[%s8287_s5 + $0x4] sm:$0xf]  ;;  %v7445_v62 = vld [vmem:[%s8287_s5 + $0x254] sm:$0xf]  ;;  %v5364_v1 = vld [vmem:[%s8287_s5 + $0x258] sm:$0xf0] }
 0x187   : > { %4408 = vmatpush.bf16.msrb.mxu3 %v5287_v54  ;;  %v7387_v54 = vld [vmem:[%s8287_s5 + $0x84] sm:$0xf]  ;;  %v4142_v61 = vpop.f32.mrf.mxu2 }
 0x188   : > { %4370 = vmatpush.bf16.msrb.mxu0 %v5087_v3  ;;  %v7465_v3 = vld [vmem:[%s8287_s5 + $0x2f4] sm:$0xf]  ;;  %v5135_v34 = vor.u32 %v7387_v54, %v5132_v55  ;;  %v7463_v61 = vld [vmem:[%s8287_s5 + $0x2e4] sm:$0xf]  ;;  %v5500_v55 = vld [vmem:[%s8287_s5 + $0x368] sm:$0xf0] }
 0x189   : > { %4383 = vmatpush.bf16.msrb.mxu1 %v5151_v17  ;;  %v5071_v17 = vor.u32 %v7371_v50, %v5068_v51  ;;  %v7447_v50 = vld [vmem:[%s8287_s5 + $0x264] sm:$0xf]  ;;  %v5372_v51 = vld [vmem:[%s8287_s5 + $0x268] sm:$0xf0] }
 0x18a   : > { %4396 = vmatpush.bf16.msrb.mxu2 %v5215_v52  ;;  %v5444_v52 = vld [vmem:[%s8287_s5 + $0x2f8] sm:$0xf0]  ;;  %v7479_v54 = vld [vmem:[%s8287_s5 + $0x364] sm:$0xf] }
 0x18b   : > { %4409 = vmatpush.bf16.msrb.mxu3 %v5279_v36  ;;  %v5199_v36 = vor.u32 %v7403_v7, %v5196_v18  ;;  %v5447_v47 = vor.u32 %v7465_v3, %v5444_v52  ;;  %v7495_v7 = vld [vmem:[%s8287_s5 + $0x3e4] sm:$0xf]  ;;  %v5375_v18 = vor.u32 %v7447_v50, %v5372_v51  ;;  %v5503_v56 = vor.u32 %v7479_v54, %v5500_v55  ;;  %v7461_v3 = vld [vmem:[%s8287_s5 + $0x2d4] sm:$0xf] }
 0x18c   : > { %4371 = vmatpush.bf16.msrb.mxu0 %v5079_v48  ;;  %v5511_v48 = vor.u32 %v7481_v24, %v5508_v26  ;;  %v7477_v52 = vld [vmem:[%s8287_s5 + $0x354] sm:$0xf]  ;;  %v5492_v24 = vld [vmem:[%s8287_s5 + $0x358] sm:$0xf0]  ;;  %v7491_v51 = vld [vmem:[%s8287_s5 + $0x3c4] sm:$0xf] }
 0x18d   : > { %4384 = vmatpush.bf16.msrb.mxu1 %v5143_v58  ;;  %v5575_v58 = vor.u32 %v7497_v40, %v5572_v19  ;;  %v7493_v26 = vld [vmem:[%s8287_s5 + $0x3d4] sm:$0xf]  ;;  %v5495_v19 = vor.u32 %v7477_v52, %v5492_v24 }
 0x18e   : > { %4397 = vmatpush.bf16.msrb.mxu2 %v5207_v53  ;;  %v5436_v53 = vld [vmem:[%s8287_s5 + $0x2e8] sm:$0xf0] }
 0x18f   : > { %4410 = vmatpush.bf16.msrb.mxu3 %v5271_v59  ;;  %v5564_v59 = vld [vmem:[%s8287_s5 + $0x3e8] sm:$0xf0]  ;;  %v5439_v60 = vor.u32 %v7463_v61, %v5436_v53 }
 0x190   : > { %4372 = vmatpush.bf16.msrb.mxu0 %v5071_v17  ;;  %v5567_v11 = vor.u32 %v7495_v7, %v5564_v59  ;;  %v5428_v17 = vld [vmem:[%s8287_s5 + $0x2d8] sm:$0xf0]  ;;  %v4166_v50 = vpop.f32.mrf.mxu0  ;;  %v5548_v61 = vld [vmem:[%s8287_s5 + $0x3c8] sm:$0xf0]  ;;  %v7441_v7 = vld [vmem:[%s8287_s5 + $0x234] sm:$0xf] }
 0x191   : > { %4385 = vmatpush.bf16.msrb.mxu1 %v5135_v34  ;;  %v5556_v34 = vld [vmem:[%s8287_s5 + $0x3d8] sm:$0xf0]  ;;  %v5431_v40 = vor.u32 %v7461_v3, %v5428_v17  ;;  %v4179_v53 = vpop.f32.mrf.mxu1  ;;  %v7489_v3 = vld [vmem:[%s8287_s5 + $0x3b4] sm:$0xf] }
 0x192   : > { %4398 = vmatpush.bf16.msrb.mxu2 %v5199_v36  ;;  %v5367_v36 = vor.u32 %v7445_v62, %v5364_v1  ;;  %v5348_v59 = vld [vmem:[%s8287_s5 + $0x238] sm:$0xf0]  ;;  %v7473_v1 = vld [vmem:[%s8287_s5 + $0x334] sm:$0xf] }
 0x193   : > { %4411 = vmatpush.bf16.msrb.mxu3 %v5263_v43  ;;  %4373 = vmatmul.bf16.vlgmr.msrb.gmra.mxu0 %v8410_v20  ;;  %v5356_v43 = vld [vmem:[%s8287_s5 + $0x248] sm:$0xf0]  ;;  %v5412_v62 = vld [vmem:[%s8287_s5 + $0x2b8] sm:$0xf0]  ;;  %v5351_v17 = vor.u32 %v7441_v7, %v5348_v59  ;;  %v7453_v7 = vld [vmem:[%s8287_s5 + $0x294] sm:$0xf] }
 0x194   : > { %4417 = vmatpush.bf16.msra.mxu0 %v5383_v39  ;;  %4386 = vmatmul.bf16.vlgmr.msrb.gmra.mxu1 %v8413_v21  ;;  %v7459_v39 = vld [vmem:[%s8287_s5 + $0x2c4] sm:$0xf]  ;;  %v5420_v20 = vld [vmem:[%s8287_s5 + $0x2c8] sm:$0xf0]  ;;  %v4167_v21 = vadd.f32 %v4166_v50, %v9101_v14  ;;  %v5476_v14 = vld [vmem:[%s8287_s5 + $0x338] sm:$0xf0] }
 0x195   : > { %4430 = vmatpush.bf16.msra.mxu1 %v5447_v47  ;;  %4399 = vmatmul.bf16.vlgmr.msrb.gmra.mxu2 %v8394_v4  ;;  %v7443_v4 = vld [vmem:[%s8287_s5 + $0x244] sm:$0xf]  ;;  %v5559_v47 = vor.u32 %v7493_v26, %v5556_v34  ;;  %v5423_v54 = vor.u32 %v7459_v39, %v5420_v20  ;;  %v5479_v24 = vor.u32 %v7473_v1, %v5476_v14  ;;  %v5340_v34 = vld [vmem:[%s8287_s5 + $0x228] sm:$0xf0]  ;;  %v5524_v1 = vld [vmem:[%s8287_s5 + $0x398] sm:$0xf0] }
 0x196   : > { %4443 = vmatpush.bf16.msra.mxu2 %v5511_v48  ;;  %4412 = vmatmul.bf16.vlgmr.msrb.gmra.mxu3 %v8399_v6  ;;  %v7475_v6 = vld [vmem:[%s8287_s5 + $0x344] sm:$0xf]  ;;  %v5484_v48 = vld [vmem:[%s8287_s5 + $0x348] sm:$0xf0] }
 0x197   : > { %4456 = vmatpush.bf16.msra.mxu3 %v5575_v58  ;;  %v5359_v58 = vor.u32 %v7443_v4, %v5356_v43  ;;  %v5487_v55 = vor.u32 %v7475_v6, %v5484_v48  ;;  %v7439_v26 = vld [vmem:[%s8287_s5 + $0x224] sm:$0xf]  ;;  %v5404_v4 = vld [vmem:[%s8287_s5 + $0x2a8] sm:$0xf0] }
 0x198   : > { %4418 = vmatpush.bf16.msra.mxu0 %v5375_v18  ;;  %v7457_v18 = vld [vmem:[%s8287_s5 + $0x2b4] sm:$0xf]  ;;  %v7471_v43 = vld [vmem:[%s8287_s5 + $0x324] sm:$0xf]  ;;  %v5468_v39 = vld [vmem:[%s8287_s5 + $0x328] sm:$0xf0]  ;;  %v4168_v50 = vpop.f32.mrf.mxu0 }
 0x199   : > { %4431 = vmatpush.bf16.msra.mxu1 %v5439_v60  ;;  %v5551_v60 = vor.u32 %v7491_v51, %v5548_v61  ;;  %v5415_v52 = vor.u32 %v7457_v18, %v5412_v62  ;;  %v4205_v20 = vpop.f32.mrf.mxu3  ;;  %v7487_v6 = vld [vmem:[%s8287_s5 + $0x3a4] sm:$0xf]  ;;  %v5532_v48 = vld [vmem:[%s8287_s5 + $0x3a8] sm:$0xf0]  ;;  %v5343_v51 = vor.u32 %v7439_v26, %v5340_v34  ;;  %v4181_v61 = vpop.f32.mrf.mxu1  ;;  %v5396_v18 = vld [vmem:[%s8287_s5 + $0x298] sm:$0xf0] }
 0x19a   : > { %4444 = vmatpush.bf16.msra.mxu2 %v5503_v56  ;;  %v4180_v56 = vadd.f32 %v4179_v53, %v4167_v21  ;;  %v5471_v53 = vor.u32 %v7471_v43, %v5468_v39  ;;  %v5535_v59 = vor.u32 %v7487_v6, %v5532_v48  ;;  %v7485_v62 = vld [vmem:[%s8287_s5 + $0x394] sm:$0xf]  ;;  %v5388_v26 = vld [vmem:[%s8287_s5 + $0x288] sm:$0xf0]  ;;  %v7467_v34 = vld [vmem:[%s8287_s5 + $0x304] sm:$0xf] }
 0x19b   : > { %4457 = vmatpush.bf16.msra.mxu3 %v5567_v11  ;;  %v5540_v11 = vld [vmem:[%s8287_s5 + $0x3b8] sm:$0xf0]  ;;  %v7513_v39 = vld [vmem:[%s8287_s5 + $0x474] sm:$0xf] }
 0x19c   : > { %4419 = vmatpush.bf16.msra.mxu0 %v5367_v36  ;;  %v7455_v36 = vld [vmem:[%s8287_s5 + $0x2a4] sm:$0xf]  ;;  %v5700_v50 = vld [vmem:[%s8287_s5 + $0x4f8] sm:$0xf0] }
 0x19d   : > { %4432 = vmatpush.bf16.msra.mxu1 %v5431_v40  ;;  %v5543_v40 = vor.u32 %v7489_v3, %v5540_v11  ;;  %v7435_v3 = vld [vmem:[%s8287_s5 + $0x204] sm:$0xf]  ;;  %v5324_v11 = vld [vmem:[%s8287_s5 + $0x208] sm:$0xf0]  ;;  %v5764_v61 = vld [vmem:[%s8287_s5 + $0x578] sm:$0xf0] }
 0x19e   : > { %4445 = vmatpush.bf16.msra.mxu2 %v5495_v19  ;;  %v4192_v19 = vpop.f32.mrf.mxu2  ;;  %v5327_v48 = vor.u32 %v7435_v3, %v5324_v11  ;;  %v5692_v3 = vld [vmem:[%s8287_s5 + $0x4e8] sm:$0xf0]  ;;  %v7543_v11 = vld [vmem:[%s8287_s5 + $0x564] sm:$0xf] }
 0x19f   : > { %4458 = vmatpush.bf16.msra.mxu3 %v5559_v47  ;;  %v4193_v47 = vadd.f32 %v4192_v19, %v4180_v56  ;;  %v5460_v56 = vld [vmem:[%s8287_s5 + $0x318] sm:$0xf0]  ;;  %v7483_v19 = vld [vmem:[%s8287_s5 + $0x384] sm:$0xf] }
 0x1a0   : > { %4420 = vmatpush.bf16.msra.mxu0 %v5359_v58  ;;  %v5407_v58 = vor.u32 %v7455_v36, %v5404_v4  ;;  %v5527_v36 = vor.u32 %v7485_v62, %v5524_v1  ;;  %v5516_v4 = vld [vmem:[%s8287_s5 + $0x388] sm:$0xf0]  ;;  %v7527_v1 = vld [vmem:[%s8287_s5 + $0x4e4] sm:$0xf] }
 0x1a1   : > { %4433 = vmatpush.bf16.msra.mxu1 %v5423_v54  ;;  %v9172_v21 = vadd.f32 %v4205_v20, %v4193_v47  ;;  %v7437_v54 = vld [vmem:[%s8287_s5 + $0x214] sm:$0xf]  ;;  %v5636_v47 = vld [vmem:[%s8287_s5 + $0x478] sm:$0xf0]  ;;  %v4207_v6 = vpop.f32.mrf.mxu3  ;;  %v5628_v62 = vld [vmem:[%s8287_s5 + $0x468] sm:$0xf0] }
 0x1a2   : > { %4446 = vmatpush.bf16.msra.mxu2 %v5487_v55  ;;  %v5332_v55 = vld [vmem:[%s8287_s5 + $0x218] sm:$0xf0]  ;;  %v7529_v20 = vld [vmem:[%s8287_s5 + $0x4f4] sm:$0xf] }
 0x1a3   : > { %4459 = vmatpush.bf16.msra.mxu3 %v5551_v60  ;;  %v7469_v60 = vld [vmem:[%s8287_s5 + $0x314] sm:$0xf]  ;;  %v5335_v14 = vor.u32 %v7437_v54, %v5332_v55  ;;  %v5828_v55 = vld [vmem:[%s8287_s5 + $0x5f8] sm:$0xf0] }
 0x1a4   : > { %4421 = vmatpush.bf16.msra.mxu0 %v5351_v17  ;;  %v5399_v17 = vor.u32 %v7453_v7, %v5396_v18  ;;  %v7561_v54 = vld [vmem:[%s8287_s5 + $0x5f4] sm:$0xf]  ;;  %v5519_v7 = vor.u32 %v7483_v19, %v5516_v4  ;;  %v5703_v18 = vor.u32 %v7529_v20, %v5700_v50  ;;  %v5620_v19 = vld [vmem:[%s8287_s5 + $0x458] sm:$0xf0] }
 0x1a5   : > { %4434 = vmatpush.bf16.msra.mxu1 %v5415_v52  ;;  %v5463_v52 = vor.u32 %v7469_v60, %v5460_v56  ;;  %v7511_v56 = vld [vmem:[%s8287_s5 + $0x464] sm:$0xf]  ;;  %v7525_v4 = vld [vmem:[%s8287_s5 + $0x4d4] sm:$0xf]  ;;  %v5748_v20 = vld [vmem:[%s8287_s5 + $0x558] sm:$0xf0] }
 0x1a6   : > { %4447 = vmatpush.bf16.msra.mxu2 %v5479_v24  ;;  %v7451_v24 = vld [vmem:[%s8287_s5 + $0x284] sm:$0xf]  ;;  %v4194_v43 = vpop.f32.mrf.mxu2  ;;  %v7557_v6 = vld [vmem:[%s8287_s5 + $0x5d4] sm:$0xf] }
 0x1a7   : > { %4460 = vmatpush.bf16.msra.mxu3 %v5543_v40  ;;  %v5452_v40 = vld [vmem:[%s8287_s5 + $0x308] sm:$0xf0] }
 0x1a8   : > { %4422 = vmatpush.bf16.msra.mxu0 %v5343_v51  ;;  %v7545_v51 = vld [vmem:[%s8287_s5 + $0x574] sm:$0xf] }
 0x1a9   : > { %4435 = vmatpush.bf16.msra.mxu1 %v5407_v58  ;;  %v5391_v58 = vor.u32 %v7451_v24, %v5388_v26  ;;  %v5767_v60 = vor.u32 %v7545_v51, %v5764_v61  ;;  %v5820_v24 = vld [vmem:[%s8287_s5 + $0x5e8] sm:$0xf0]  ;;  %v5631_v26 = vor.u32 %v7511_v56, %v5628_v62  ;;  %v7507_v61 = vld [vmem:[%s8287_s5 + $0x444] sm:$0xf] }
 0x1aa   : > { %4448 = vmatpush.bf16.msra.mxu2 %v5471_v53  ;;  %v5455_v53 = vor.u32 %v7467_v34, %v5452_v40  ;;  %v5695_v34 = vor.u32 %v7527_v1, %v5692_v3  ;;  %v7509_v40 = vld [vmem:[%s8287_s5 + $0x454] sm:$0xf]  ;;  %v5604_v3 = vld [vmem:[%s8287_s5 + $0x438] sm:$0xf0] }
 0x1ab   : > { %4461 = vmatpush.bf16.msra.mxu3 %v5535_v59  ;;  %v5639_v59 = vor.u32 %v7513_v39, %v5636_v47  ;;  %v5684_v39 = vld [vmem:[%s8287_s5 + $0x4d8] sm:$0xf0]  ;;  %v7541_v47 = vld [vmem:[%s8287_s5 + $0x554] sm:$0xf]  ;;  %v5623_v50 = vor.u32 %v7509_v40, %v5620_v19 }
 0x1ac   : > { %4423 = vmatpush.bf16.msra.mxu0 %v5335_v14  ;;  %v5831_v14 = vor.u32 %v7561_v54, %v5828_v55  ;;  %v5751_v51 = vor.u32 %v7541_v47, %v5748_v20  ;;  %v7539_v54 = vld [vmem:[%s8287_s5 + $0x544] sm:$0xf]  ;;  %v5740_v55 = vld [vmem:[%s8287_s5 + $0x548] sm:$0xf0] }
 0x1ad   : > { %4436 = vmatpush.bf16.msra.mxu1 %v5399_v17  ;;  %v5756_v17 = vld [vmem:[%s8287_s5 + $0x568] sm:$0xf0]  ;;  %v5743_v1 = vor.u32 %v7539_v54, %v5740_v55  ;;  %v7519_v47 = vld [vmem:[%s8287_s5 + $0x4a4] sm:$0xf] }
 0x1ae   : > { %4449 = vmatpush.bf16.msra.mxu2 %v5463_v52  ;;  %v7559_v52 = vld [vmem:[%s8287_s5 + $0x5e4] sm:$0xf] }
 0x1af   : > { %4462 = vmatpush.bf16.msra.mxu3 %v5527_v36  ;;  %v5759_v36 = vor.u32 %v7543_v11, %v5756_v17  ;;  %v5823_v43 = vor.u32 %v7559_v52, %v5820_v24  ;;  %v7521_v11 = vld [vmem:[%s8287_s5 + $0x4b4] sm:$0xf]  ;;  %v5668_v24 = vld [vmem:[%s8287_s5 + $0x4b8] sm:$0xf0] }
 0x1b0   : > { %4424 = vmatpush.bf16.msra.mxu0 %v5327_v48  ;;  %v5812_v48 = vld [vmem:[%s8287_s5 + $0x5d8] sm:$0xf0]  ;;  %v5671_v19 = vor.u32 %v7521_v11, %v5668_v24  ;;  %v5580_v24 = vld [vmem:[%s8287_s5 + $0x408] sm:$0xf0] }
 0x1b1   : > { %4437 = vmatpush.bf16.msra.mxu1 %v5391_v58  ;;  %v5612_v58 = vld [vmem:[%s8287_s5 + $0x448] sm:$0xf0]  ;;  %v4231_v56 = vpop.f32.mrf.mxu1  ;;  %v5780_v11 = vld [vmem:[%s8287_s5 + $0x598] sm:$0xf0] }
 0x1b2   : > { %4450 = vmatpush.bf16.msra.mxu2 %v5455_v53  ;;  %v5676_v53 = vld [vmem:[%s8287_s5 + $0x4c8] sm:$0xf0] }
 0x1b3   : > { %4463 = vmatpush.bf16.msra.mxu3 %v5519_v7  ;;  %4425 = vmatmul.bf16.vlgmr.msra.gmra.mxu0 %v8473_v41  ;;  %v7523_v41 = vld [vmem:[%s8287_s5 + $0x4c4] sm:$0xf]  ;;  %v4218_v7 = vpop.f32.mrf.mxu0 }
 0x1b4   : > { %4469 = vmatpush.bf16.msrb.mxu0 %v5639_v59  ;;  %4438 = vmatmul.bf16.vlgmr.msra.gmra.mxu1 %v8477_v44  ;;  %v7555_v59 = vld [vmem:[%s8287_s5 + $0x5c4] sm:$0xf]  ;;  %v4219_v44 = vadd.f32 %v4218_v7, %v9172_v21  ;;  %v5679_v62 = vor.u32 %v7523_v41, %v5676_v53  ;;  %v5732_v21 = vld [vmem:[%s8287_s5 + $0x538] sm:$0xf0]  ;;  %v5788_v41 = vld [vmem:[%s8287_s5 + $0x5a8] sm:$0xf0] }
 0x1b5   : > { %4482 = vmatpush.bf16.msrb.mxu1 %v5703_v18  ;;  %4451 = vmatmul.bf16.vlgmr.msra.gmra.mxu2 %v8469_v38  ;;  %v5687_v38 = vor.u32 %v7525_v4, %v5684_v39  ;;  %v5804_v18 = vld [vmem:[%s8287_s5 + $0x5c8] sm:$0xf0] }
 0x1b6   : > { %4495 = vmatpush.bf16.msrb.mxu2 %v5767_v60  ;;  %4464 = vmatmul.bf16.vlgmr.msra.gmra.mxu3 %v8475_v42  ;;  %v5815_v42 = vor.u32 %v7557_v6, %v5812_v48  ;;  %v5615_v60 = vor.u32 %v7507_v61, %v5612_v58  ;;  %v5807_v17 = vor.u32 %v7555_v59, %v5804_v18  ;;  %v5596_v39 = vld [vmem:[%s8287_s5 + $0x428] sm:$0xf0]  ;;  %v7551_v58 = vld [vmem:[%s8287_s5 + $0x5a4] sm:$0xf]  ;;  %v7501_v18 = vld [vmem:[%s8287_s5 + $0x414] sm:$0xf] }
 0x1b7   : > { %4508 = vmatpush.bf16.msrb.mxu3 %v5831_v14  ;;  %v7505_v14 = vld [vmem:[%s8287_s5 + $0x434] sm:$0xf]  ;;  %v4232_v52 = vadd.f32 %v4231_v56, %v4219_v44  ;;  %v5660_v48 = vld [vmem:[%s8287_s5 + $0x4a8] sm:$0xf0]  ;;  %v5588_v44 = vld [vmem:[%s8287_s5 + $0x418] sm:$0xf0]  ;;  %v5791_v56 = vor.u32 %v7551_v58, %v5788_v41 }
 0x1b8   : > { %4470 = vmatpush.bf16.msrb.mxu0 %v5631_v26  ;;  %v7537_v26 = vld [vmem:[%s8287_s5 + $0x534] sm:$0xf]  ;;  %v5607_v40 = vor.u32 %v7505_v14, %v5604_v3  ;;  %v4244_v6 = vpop.f32.mrf.mxu2  ;;  %v5663_v7 = vor.u32 %v7519_v47, %v5660_v48  ;;  %v5716_v14 = vld [vmem:[%s8287_s5 + $0x518] sm:$0xf0] }
 0x1b9   : > { %4483 = vmatpush.bf16.msrb.mxu1 %v5695_v34  ;;  %v7553_v34 = vld [vmem:[%s8287_s5 + $0x5b4] sm:$0xf]  ;;  %v5735_v4 = vor.u32 %v7537_v26, %v5732_v21  ;;  %v4257_v61 = vpop.f32.mrf.mxu3  ;;  %v4233_v54 = vpop.f32.mrf.mxu1  ;;  %v6020_v58 = vld [vmem:[%s8287_s5 + $0x778] sm:$0xf0] }
 0x1ba   : > { %4496 = vmatpush.bf16.msrb.mxu2 %v5759_v36  ;;  %v5796_v36 = vld [vmem:[%s8287_s5 + $0x5b8] sm:$0xf0]  ;;  %v7549_v3 = vld [vmem:[%s8287_s5 + $0x594] sm:$0xf] }
 0x1bb   : > { %4509 = vmatpush.bf16.msrb.mxu3 %v5823_v43  ;;  %v7503_v43 = vld [vmem:[%s8287_s5 + $0x424] sm:$0xf]  ;;  %v5799_v20 = vor.u32 %v7553_v34, %v5796_v36  ;;  %v5644_v36 = vld [vmem:[%s8287_s5 + $0x488] sm:$0xf0]  ;;  %v7593_v48 = vld [vmem:[%s8287_s5 + $0x6f4] sm:$0xf] }
 0x1bc   : > { %4471 = vmatpush.bf16.msrb.mxu0 %v5623_v50  ;;  %v7535_v50 = vld [vmem:[%s8287_s5 + $0x524] sm:$0xf]  ;;  %v5599_v53 = vor.u32 %v7503_v43, %v5596_v39  ;;  %v5772_v39 = vld [vmem:[%s8287_s5 + $0x588] sm:$0xf0]  ;;  %v6084_v54 = vld [vmem:[%s8287_s5 + $0x7f8] sm:$0xf0] }
 0x1bd   : > { %4484 = vmatpush.bf16.msrb.mxu1 %v5687_v38  ;;  %v5724_v38 = vld [vmem:[%s8287_s5 + $0x528] sm:$0xf0]  ;;  %v7515_v34 = vld [vmem:[%s8287_s5 + $0x484] sm:$0xf] }
 0x1be   : > { %4497 = vmatpush.bf16.msrb.mxu2 %v5751_v51  ;;  %v4245_v51 = vadd.f32 %v4244_v6, %v4232_v52  ;;  %v5727_v59 = vor.u32 %v7535_v50, %v5724_v38  ;;  %v7499_v52 = vld [vmem:[%s8287_s5 + $0x404] sm:$0xf]  ;;  %v5892_v6 = vld [vmem:[%s8287_s5 + $0x678] sm:$0xf0]  ;;  %v5647_v41 = vor.u32 %v7515_v34, %v5644_v36  ;;  %v7573_v34 = vld [vmem:[%s8287_s5 + $0x654] sm:$0xf] }
 0x1bf   : > { %4510 = vmatpush.bf16.msrb.mxu3 %v5815_v42  ;;  %v4220_v42 = vpop.f32.mrf.mxu0  ;;  %v7547_v43 = vld [vmem:[%s8287_s5 + $0x584] sm:$0xf]  ;;  %v5583_v38 = vor.u32 %v7499_v52, %v5580_v24  ;;  %v6076_v52 = vld [vmem:[%s8287_s5 + $0x7e8] sm:$0xf0]  ;;  %v5876_v36 = vld [vmem:[%s8287_s5 + $0x658] sm:$0xf0] }
 0x1c0   : > { %4472 = vmatpush.bf16.msrb.mxu0 %v5615_v60  ;;  %v9243_v55 = vadd.f32 %v4257_v61, %v4245_v51  ;;  %v7517_v60 = vld [vmem:[%s8287_s5 + $0x494] sm:$0xf]  ;;  %v4246_v47 = vpop.f32.mrf.mxu2  ;;  %v5956_v51 = vld [vmem:[%s8287_s5 + $0x6f8] sm:$0xf0] }
 0x1c1   : > { %4485 = vmatpush.bf16.msrb.mxu1 %v5679_v62  ;;  %v5652_v62 = vld [vmem:[%s8287_s5 + $0x498] sm:$0xf0]  ;;  %v4259_v50 = vpop.f32.mrf.mxu3  ;;  %v7609_v61 = vld [vmem:[%s8287_s5 + $0x774] sm:$0xf] }
 0x1c2   : > { %4498 = vmatpush.bf16.msrb.mxu2 %v5743_v1  ;;  %v7533_v1 = vld [vmem:[%s8287_s5 + $0x514] sm:$0xf]  ;;  %v5655_v26 = vor.u32 %v7517_v60, %v5652_v62  ;;  %v7575_v60 = vld [vmem:[%s8287_s5 + $0x664] sm:$0xf] }
 0x1c3   : > { %4511 = vmatpush.bf16.msrb.mxu3 %v5807_v17  ;;  %v5591_v17 = vor.u32 %v7501_v18, %v5588_v44  ;;  %v5719_v21 = vor.u32 %v7533_v1, %v5716_v14  ;;  %v5959_v18 = vor.u32 %v7593_v48, %v5956_v51  ;;  %v6023_v44 = vor.u32 %v7609_v61, %v6020_v58  ;;  %v7591_v62 = vld [vmem:[%s8287_s5 + $0x6e4] sm:$0xf]  ;;  %v5948_v14 = vld [vmem:[%s8287_s5 + $0x6e8] sm:$0xf0]  ;;  %v7621_v47 = vld [vmem:[%s8287_s5 + $0x7d4] sm:$0xf] }
 0x1c4   : > { %4473 = vmatpush.bf16.msrb.mxu0 %v5607_v40  ;;  %v7531_v40 = vld [vmem:[%s8287_s5 + $0x504] sm:$0xf]  ;;  %v5932_v51 = vld [vmem:[%s8287_s5 + $0x6c8] sm:$0xf0] }
 0x1c5   : > { %4486 = vmatpush.bf16.msrb.mxu1 %v5671_v19  ;;  %v5783_v19 = vor.u32 %v7549_v3, %v5780_v11  ;;  %v7607_v3 = vld [vmem:[%s8287_s5 + $0x764] sm:$0xf]  ;;  %v6012_v11 = vld [vmem:[%s8287_s5 + $0x768] sm:$0xf0] }
 0x1c6   : > { %4499 = vmatpush.bf16.msrb.mxu2 %v5735_v4  ;;  %v5708_v4 = vld [vmem:[%s8287_s5 + $0x508] sm:$0xf0]  ;;  %v7571_v50 = vld [vmem:[%s8287_s5 + $0x644] sm:$0xf] }
 0x1c7   : > { %4512 = vmatpush.bf16.msrb.mxu3 %v5799_v20  ;;  %v7577_v20 = vld [vmem:[%s8287_s5 + $0x674] sm:$0xf]  ;;  %v5711_v42 = vor.u32 %v7531_v40, %v5708_v4  ;;  %v5940_v4 = vld [vmem:[%s8287_s5 + $0x6d8] sm:$0xf0]  ;;  %v7603_v61 = vld [vmem:[%s8287_s5 + $0x744] sm:$0xf] }
 0x1c8   : > { %4474 = vmatpush.bf16.msrb.mxu0 %v5599_v53  ;;  %v7625_v53 = vld [vmem:[%s8287_s5 + $0x7f4] sm:$0xf]  ;;  %v5996_v58 = vld [vmem:[%s8287_s5 + $0x748] sm:$0xf0] }
 0x1c9   : > { %4487 = vmatpush.bf16.msrb.mxu1 %v5663_v7  ;;  %v5775_v7 = vor.u32 %v7547_v43, %v5772_v39  ;;  %v6087_v1 = vor.u32 %v7625_v53, %v6084_v54  ;;  %v7589_v40 = vld [vmem:[%s8287_s5 + $0x6d4] sm:$0xf]  ;;  %v6004_v39 = vld [vmem:[%s8287_s5 + $0x758] sm:$0xf0] }
 0x1ca   : > { %4500 = vmatpush.bf16.msrb.mxu2 %v5727_v59  ;;  %v5895_v59 = vor.u32 %v7577_v20, %v5892_v6  ;;  %v7605_v43 = vld [vmem:[%s8287_s5 + $0x754] sm:$0xf]  ;;  %v6068_v20 = vld [vmem:[%s8287_s5 + $0x7d8] sm:$0xf0]  ;;  %v5943_v6 = vor.u32 %v7589_v40, %v5940_v4  ;;  %v5916_v4 = vld [vmem:[%s8287_s5 + $0x6a8] sm:$0xf0] }
 0x1cb   : > { %4513 = vmatpush.bf16.msrb.mxu3 %v5791_v56  ;;  %v5884_v56 = vld [vmem:[%s8287_s5 + $0x668] sm:$0xf0]  ;;  %v6007_v48 = vor.u32 %v7605_v43, %v6004_v39  ;;  %v7599_v43 = vld [vmem:[%s8287_s5 + $0x724] sm:$0xf] }
 0x1cc   : > { %4475 = vmatpush.bf16.msrb.mxu0 %v5591_v17  ;;  %v7623_v17 = vld [vmem:[%s8287_s5 + $0x7e4] sm:$0xf]  ;;  %v5887_v24 = vor.u32 %v7575_v60, %v5884_v56  ;;  %v5860_v60 = vld [vmem:[%s8287_s5 + $0x638] sm:$0xf0]  ;;  %v7585_v56 = vld [vmem:[%s8287_s5 + $0x6b4] sm:$0xf] }
 0x1cd   : > { %4488 = vmatpush.bf16.msrb.mxu1 %v5655_v26  ;;  %v5951_v26 = vor.u32 %v7591_v62, %v5948_v14  ;;  %v5924_v14 = vld [vmem:[%s8287_s5 + $0x6b8] sm:$0xf0]  ;;  %v5980_v39 = vld [vmem:[%s8287_s5 + $0x728] sm:$0xf0] }
 0x1ce   : > { %4501 = vmatpush.bf16.msrb.mxu2 %v5719_v21  ;;  %v6015_v21 = vor.u32 %v7607_v3, %v6012_v11  ;;  %v7601_v3 = vld [vmem:[%s8287_s5 + $0x734] sm:$0xf] }
 0x1cf   : > { %4514 = vmatpush.bf16.msrb.mxu3 %v5783_v19  ;;  %v6079_v19 = vor.u32 %v7623_v17, %v6076_v52  ;;  %v7617_v11 = vld [vmem:[%s8287_s5 + $0x7b4] sm:$0xf]  ;;  %v6052_v17 = vld [vmem:[%s8287_s5 + $0x7b8] sm:$0xf0] }
 0x1d0   : > { %4476 = vmatpush.bf16.msrb.mxu0 %v5583_v38  ;;  %v5868_v38 = vld [vmem:[%s8287_s5 + $0x648] sm:$0xf0]  ;;  %v6055_v40 = vor.u32 %v7617_v11, %v6052_v17  ;;  %v7611_v17 = vld [vmem:[%s8287_s5 + $0x784] sm:$0xf] }
 0x1d1   : > { %4489 = vmatpush.bf16.msrb.mxu1 %v5647_v41  ;;  %v7619_v41 = vld [vmem:[%s8287_s5 + $0x7c4] sm:$0xf]  ;;  %v5871_v54 = vor.u32 %v7571_v50, %v5868_v38  ;;  %v5964_v11 = vld [vmem:[%s8287_s5 + $0x708] sm:$0xf0] }
 0x1d2   : > { %4502 = vmatpush.bf16.msrb.mxu2 %v5711_v42  ;;  %v6060_v42 = vld [vmem:[%s8287_s5 + $0x7c8] sm:$0xf0] }
 0x1d3   : > { %4515 = vmatpush.bf16.msrb.mxu3 %v5775_v7  ;;  %4477 = vmatmul.bf16.vlgmr.msrb.gmra.mxu0 %v8548_v25  ;;  %v5879_v25 = vor.u32 %v7573_v34, %v5876_v36  ;;  %v4283_v7 = vpop.f32.mrf.mxu1  ;;  %v6063_v62 = vor.u32 %v7619_v41, %v6060_v42  ;;  %v5852_v34 = vld [vmem:[%s8287_s5 + $0x628] sm:$0xf0]  ;;  %v7583_v36 = vld [vmem:[%s8287_s5 + $0x6a4] sm:$0xf]  ;;  %v5908_v42 = vld [vmem:[%s8287_s5 + $0x698] sm:$0xf0] }
 0x1d4   : > { %4521 = vmatpush.bf16.msra.mxu0 %v5895_v59  ;;  %4490 = vmatmul.bf16.vlgmr.msrb.gmra.mxu1 %v8555_v30  ;;  %v6071_v30 = vor.u32 %v7621_v47, %v6068_v20 }
 0x1d5   : > { %4534 = vmatpush.bf16.msra.mxu1 %v5959_v18  ;;  %4503 = vmatmul.bf16.vlgmr.msrb.gmra.mxu2 %v8553_v29  ;;  %v7587_v29 = vld [vmem:[%s8287_s5 + $0x6c4] sm:$0xf]  ;;  %v5999_v18 = vor.u32 %v7603_v61, %v5996_v58  ;;  %v7565_v61 = vld [vmem:[%s8287_s5 + $0x614] sm:$0xf]  ;;  %v5844_v58 = vld [vmem:[%s8287_s5 + $0x618] sm:$0xf0] }
 0x1d6   : > { %4547 = vmatpush.bf16.msra.mxu2 %v6023_v44  ;;  %4516 = vmatmul.bf16.vlgmr.msrb.gmra.mxu3 %v8559_v33  ;;  %v4270_v33 = vpop.f32.mrf.mxu0  ;;  %v5935_v59 = vor.u32 %v7587_v29, %v5932_v51  ;;  %v7569_v44 = vld [vmem:[%s8287_s5 + $0x634] sm:$0xf]  ;;  %v5983_v51 = vor.u32 %v7599_v43, %v5980_v39  ;;  %v6276_v43 = vld [vmem:[%s8287_s5 + $0x978] sm:$0xf0] }
 0x1d7   : > { %4560 = vmatpush.bf16.msra.mxu3 %v6087_v1  ;;  %v4271_v53 = vadd.f32 %v4270_v33, %v9243_v55  ;;  %v5988_v55 = vld [vmem:[%s8287_s5 + $0x738] sm:$0xf0]  ;;  %v5863_v52 = vor.u32 %v7569_v44, %v5860_v60  ;;  %v7581_v33 = vld [vmem:[%s8287_s5 + $0x694] sm:$0xf]  ;;  %v7563_v44 = vld [vmem:[%s8287_s5 + $0x604] sm:$0xf] }
 0x1d8   : > { %4522 = vmatpush.bf16.msra.mxu0 %v5887_v24  ;;  %v5927_v24 = vor.u32 %v7585_v56, %v5924_v14  ;;  %v5836_v60 = vld [vmem:[%s8287_s5 + $0x608] sm:$0xf0]  ;;  %v5911_v56 = vor.u32 %v7581_v33, %v5908_v42 }
 0x1d9   : > { %4535 = vmatpush.bf16.msra.mxu1 %v5951_v26  ;;  %v4284_v1 = vadd.f32 %v4283_v7, %v4271_v53  ;;  %v5991_v26 = vor.u32 %v7601_v3, %v5988_v55  ;;  %v4309_v20 = vpop.f32.mrf.mxu3  ;;  %v7597_v53 = vld [vmem:[%s8287_s5 + $0x714] sm:$0xf]  ;;  %v5900_v14 = vld [vmem:[%s8287_s5 + $0x688] sm:$0xf0]  ;;  %v7595_v3 = vld [vmem:[%s8287_s5 + $0x704] sm:$0xf] }
 0x1da   : > { %4548 = vmatpush.bf16.msra.mxu2 %v6015_v21  ;;  %v7567_v21 = vld [vmem:[%s8287_s5 + $0x624] sm:$0xf]  ;;  %v7613_v7 = vld [vmem:[%s8287_s5 + $0x794] sm:$0xf]  ;;  %v6204_v33 = vld [vmem:[%s8287_s5 + $0x8e8] sm:$0xf0] }
 0x1db   : > { %4561 = vmatpush.bf16.msra.mxu3 %v6079_v19  ;;  %v4296_v19 = vpop.f32.mrf.mxu2  ;;  %v5855_v50 = vor.u32 %v7567_v21, %v5852_v34  ;;  %v4285_v38 = vpop.f32.mrf.mxu1  ;;  %v6148_v21 = vld [vmem:[%s8287_s5 + $0x878] sm:$0xf0]  ;;  %v7657_v34 = vld [vmem:[%s8287_s5 + $0x8f4] sm:$0xf]  ;;  %v6268_v42 = vld [vmem:[%s8287_s5 + $0x968] sm:$0xf0] }
 0x1dc   : > { %4523 = vmatpush.bf16.msra.mxu0 %v5879_v25  ;;  %v4297_v47 = vadd.f32 %v4296_v19, %v4284_v1  ;;  %v7615_v25 = vld [vmem:[%s8287_s5 + $0x7a4] sm:$0xf]  ;;  %v6212_v19 = vld [vmem:[%s8287_s5 + $0x8f8] sm:$0xf0] }
 0x1dd   : > { %4536 = vmatpush.bf16.msra.mxu1 %v5943_v6  ;;  %v6044_v6 = vld [vmem:[%s8287_s5 + $0x7a8] sm:$0xf0]  ;;  %v7579_v1 = vld [vmem:[%s8287_s5 + $0x684] sm:$0xf] }
 0x1de   : > { %4549 = vmatpush.bf16.msra.mxu2 %v6007_v48  ;;  %v4272_v48 = vpop.f32.mrf.mxu0  ;;  %v9314_v29 = vadd.f32 %v4309_v20, %v4297_v47  ;;  %v6047_v41 = vor.u32 %v7615_v25, %v6044_v6  ;;  %v5903_v39 = vor.u32 %v7579_v1, %v5900_v14  ;;  %v5967_v47 = vor.u32 %v7595_v3, %v5964_v11  ;;  %v7689_v20 = vld [vmem:[%s8287_s5 + $0x9f4] sm:$0xf]  ;;  %v6340_v25 = vld [vmem:[%s8287_s5 + $0x9f8] sm:$0xf0] }
 0x1df   : > { %4562 = vmatpush.bf16.msra.mxu3 %v6071_v30  ;;  %v5919_v30 = vor.u32 %v7583_v36, %v5916_v4  ;;  %v7673_v4 = vld [vmem:[%s8287_s5 + $0x974] sm:$0xf]  ;;  %v6196_v1 = vld [vmem:[%s8287_s5 + $0x8d8] sm:$0xf0] }
 0x1e0   : > { %4524 = vmatpush.bf16.msra.mxu0 %v5871_v54  ;;  %v5972_v54 = vld [vmem:[%s8287_s5 + $0x718] sm:$0xf0]  ;;  %v6279_v38 = vor.u32 %v7673_v4, %v6276_v43  ;;  %v7669_v14 = vld [vmem:[%s8287_s5 + $0x954] sm:$0xf] }
 0x1e1   : > { %4537 = vmatpush.bf16.msra.mxu1 %v5935_v59  ;;  %v6036_v59 = vld [vmem:[%s8287_s5 + $0x798] sm:$0xf0]  ;;  %v4311_v36 = vpop.f32.mrf.mxu3 }
 0x1e2   : > { %4550 = vmatpush.bf16.msra.mxu2 %v5999_v18  ;;  %v5847_v18 = vor.u32 %v7565_v61, %v5844_v58  ;;  %v6039_v55 = vor.u32 %v7613_v7, %v6036_v59  ;;  %v7655_v61 = vld [vmem:[%s8287_s5 + $0x8e4] sm:$0xf]  ;;  %v6343_v58 = vor.u32 %v7689_v20, %v6340_v25  ;;  %v6260_v3 = vld [vmem:[%s8287_s5 + $0x958] sm:$0xf0]  ;;  %v6252_v36 = vld [vmem:[%s8287_s5 + $0x948] sm:$0xf0] }
 0x1e3   : > { %4563 = vmatpush.bf16.msra.mxu3 %v6063_v62  ;;  %v5975_v62 = vor.u32 %v7597_v53, %v5972_v54  ;;  %v7687_v53 = vld [vmem:[%s8287_s5 + $0x9e4] sm:$0xf]  ;;  %v6332_v54 = vld [vmem:[%s8287_s5 + $0x9e8] sm:$0xf0]  ;;  %v6207_v59 = vor.u32 %v7655_v61, %v6204_v33  ;;  %v6324_v11 = vld [vmem:[%s8287_s5 + $0x9d8] sm:$0xf0] }
 0x1e4   : > { %4525 = vmatpush.bf16.msra.mxu0 %v5863_v52  ;;  %v6028_v52 = vld [vmem:[%s8287_s5 + $0x788] sm:$0xf0]  ;;  %v7633_v25 = vld [vmem:[%s8287_s5 + $0x834] sm:$0xf] }
 0x1e5   : > { %4538 = vmatpush.bf16.msra.mxu1 %v5927_v24  ;;  %v4298_v24 = vpop.f32.mrf.mxu2  ;;  %v6031_v6 = vor.u32 %v7611_v17, %v6028_v52  ;;  %v6263_v52 = vor.u32 %v7669_v14, %v6260_v3  ;;  %v7681_v61 = vld [vmem:[%s8287_s5 + $0x9b4] sm:$0xf]  ;;  %v7679_v14 = vld [vmem:[%s8287_s5 + $0x9a4] sm:$0xf]  ;;  %v6300_v3 = vld [vmem:[%s8287_s5 + $0x9a8] sm:$0xf0] }
 0x1e6   : > { %4551 = vmatpush.bf16.msra.mxu2 %v5991_v26  ;;  %v7641_v26 = vld [vmem:[%s8287_s5 + $0x874] sm:$0xf]  ;;  %v7635_v24 = vld [vmem:[%s8287_s5 + $0x844] sm:$0xf] }
 0x1e7   : > { %4564 = vmatpush.bf16.msra.mxu3 %v6055_v40  ;;  %v5839_v40 = vor.u32 %v7563_v44, %v5836_v60  ;;  %v6151_v48 = vor.u32 %v7641_v26, %v6148_v21  ;;  %v7637_v44 = vld [vmem:[%s8287_s5 + $0x854] sm:$0xf]  ;;  %v6132_v60 = vld [vmem:[%s8287_s5 + $0x858] sm:$0xf0]  ;;  %v6124_v26 = vld [vmem:[%s8287_s5 + $0x848] sm:$0xf0] }
 0x1e8   : > { %4526 = vmatpush.bf16.msra.mxu0 %v5855_v50  ;;  %v6215_v50 = vor.u32 %v7657_v34, %v6212_v19  ;;  %v6188_v21 = vld [vmem:[%s8287_s5 + $0x8c8] sm:$0xf0]  ;;  %v7667_v34 = vld [vmem:[%s8287_s5 + $0x944] sm:$0xf]  ;;  %v6127_v43 = vor.u32 %v7635_v24, %v6124_v26  ;;  %v7629_v26 = vld [vmem:[%s8287_s5 + $0x814] sm:$0xf] }
 0x1e9   : > { %4539 = vmatpush.bf16.msra.mxu1 %v5919_v30  ;;  %v7639_v30 = vld [vmem:[%s8287_s5 + $0x864] sm:$0xf]  ;;  %v6316_v19 = vld [vmem:[%s8287_s5 + $0x9c8] sm:$0xf0]  ;;  %v6255_v20 = vor.u32 %v7667_v34, %v6252_v36  ;;  %v6164_v34 = vld [vmem:[%s8287_s5 + $0x898] sm:$0xf0] }
 0x1ea   : > { %4552 = vmatpush.bf16.msra.mxu2 %v5983_v51  ;;  %v6140_v51 = vld [vmem:[%s8287_s5 + $0x868] sm:$0xf0]  ;;  %v7661_v36 = vld [vmem:[%s8287_s5 + $0x914] sm:$0xf] }
 0x1eb   : > { %4565 = vmatpush.bf16.msra.mxu3 %v6047_v41  ;;  %v7671_v41 = vld [vmem:[%s8287_s5 + $0x964] sm:$0xf]  ;;  %v6143_v7 = vor.u32 %v7639_v30, %v6140_v51  ;;  %v6180_v30 = vld [vmem:[%s8287_s5 + $0x8b8] sm:$0xf0]  ;;  %v7665_v51 = vld [vmem:[%s8287_s5 + $0x934] sm:$0xf] }
 0x1ec   : > { %4527 = vmatpush.bf16.msra.mxu0 %v5847_v18  ;;  %v6271_v18 = vor.u32 %v7671_v41, %v6268_v42 }
 0x1ed   : > { %4540 = vmatpush.bf16.msra.mxu1 %v5911_v56  ;;  %v7653_v56 = vld [vmem:[%s8287_s5 + $0x8d4] sm:$0xf] }
 0x1ee   : > { %4553 = vmatpush.bf16.msra.mxu2 %v5975_v62  ;;  %v6335_v62 = vor.u32 %v7687_v53, %v6332_v54  ;;  %v6199_v17 = vor.u32 %v7653_v56, %v6196_v1  ;;  %v7631_v53 = vld [vmem:[%s8287_s5 + $0x824] sm:$0xf]  ;;  %v6108_v54 = vld [vmem:[%s8287_s5 + $0x828] sm:$0xf0] }
 0x1ef   : > { %4566 = vmatpush.bf16.msra.mxu3 %v6039_v55  ;;  %v7685_v55 = vld [vmem:[%s8287_s5 + $0x9d4] sm:$0xf]  ;;  %v6236_v56 = vld [vmem:[%s8287_s5 + $0x928] sm:$0xf0] }
 0x1f0   : > { %4528 = vmatpush.bf16.msra.mxu0 %v5839_v40  ;;  %v7683_v40 = vld [vmem:[%s8287_s5 + $0x9c4] sm:$0xf] }
 0x1f1   : > { %4541 = vmatpush.bf16.msra.mxu1 %v5903_v39  ;;  %v4335_v39 = vpop.f32.mrf.mxu1 }
 0x1f2   : > { %4554 = vmatpush.bf16.msra.mxu2 %v5967_v47 }
 0x1f3   : > { %4567 = vmatpush.bf16.msra.mxu3 %v6031_v6  ;;  %4529 = vmatmul.bf16.vlgmr.msra.gmra.mxu0 %v8630_v23  ;;  %v6135_v23 = vor.u32 %v7637_v44, %v6132_v60  ;;  %v6116_v6 = vld [vmem:[%s8287_s5 + $0x838] sm:$0xf0]  ;;  %v6172_v44 = vld [vmem:[%s8287_s5 + $0x8a8] sm:$0xf0]  ;;  %v7663_v60 = vld [vmem:[%s8287_s5 + $0x924] sm:$0xf] }
 0x1f4   : > { %4573 = vmatpush.bf16.msrb.mxu0 %v6151_v48  ;;  %4542 = vmatmul.bf16.vlgmr.msra.gmra.mxu1 %v8637_v31  ;;  %v6327_v31 = vor.u32 %v7685_v55, %v6324_v11  ;;  %v7649_v48 = vld [vmem:[%s8287_s5 + $0x8b4] sm:$0xf]  ;;  %v6119_v33 = vor.u32 %v7633_v25, %v6116_v6  ;;  %v6111_v11 = vor.u32 %v7631_v53, %v6108_v54  ;;  %v7643_v25 = vld [vmem:[%s8287_s5 + $0x884] sm:$0xf]  ;;  %v6156_v6 = vld [vmem:[%s8287_s5 + $0x888] sm:$0xf0] }
 0x1f5   : > { %4586 = vmatpush.bf16.msrb.mxu1 %v6215_v50  ;;  %4555 = vmatmul.bf16.vlgmr.msra.gmra.mxu2 %v8635_v28  ;;  %v7651_v28 = vld [vmem:[%s8287_s5 + $0x8c4] sm:$0xf]  ;;  %v6319_v50 = vor.u32 %v7683_v40, %v6316_v19  ;;  %v6183_v41 = vor.u32 %v7649_v48, %v6180_v30  ;;  %v6239_v24 = vor.u32 %v7663_v60, %v6236_v56  ;;  %v7677_v40 = vld [vmem:[%s8287_s5 + $0x994] sm:$0xf]  ;;  %v6292_v19 = vld [vmem:[%s8287_s5 + $0x998] sm:$0xf0] }
 0x1f6   : > { %4599 = vmatpush.bf16.msrb.mxu2 %v6279_v38  ;;  %4568 = vmatmul.bf16.vlgmr.msra.gmra.mxu3 %v8641_v35  ;;  %v4322_v35 = vpop.f32.mrf.mxu0  ;;  %v6191_v47 = vor.u32 %v7651_v28, %v6188_v21  ;;  %v6100_v28 = vld [vmem:[%s8287_s5 + $0x818] sm:$0xf0]  ;;  %v6303_v21 = vor.u32 %v7679_v14, %v6300_v3  ;;  %v7659_v48 = vld [vmem:[%s8287_s5 + $0x904] sm:$0xf]  ;;  %v7737_v54 = vld [vmem:[%s8287_s5 + $0xb74] sm:$0xf] }
 0x1f7   : > { %4612 = vmatpush.bf16.msrb.mxu3 %v6343_v58  ;;  %v4323_v4 = vadd.f32 %v4322_v35, %v9314_v29  ;;  %v6244_v29 = vld [vmem:[%s8287_s5 + $0x938] sm:$0xf0]  ;;  %v7675_v30 = vld [vmem:[%s8287_s5 + $0x984] sm:$0xf] }
 0x1f8   : > { %4574 = vmatpush.bf16.msrb.mxu0 %v6143_v7  ;;  %v6308_v58 = vld [vmem:[%s8287_s5 + $0x9b8] sm:$0xf0]  ;;  %v6247_v42 = vor.u32 %v7665_v51, %v6244_v29  ;;  %v7647_v7 = vld [vmem:[%s8287_s5 + $0x8a4] sm:$0xf]  ;;  %v6284_v51 = vld [vmem:[%s8287_s5 + $0x988] sm:$0xf0] }
 0x1f9   : > { %4587 = vmatpush.bf16.msrb.mxu1 %v6207_v59  ;;  %v4336_v38 = vadd.f32 %v4335_v39, %v4323_v4  ;;  %v6311_v59 = vor.u32 %v7681_v61, %v6308_v58  ;;  %v4361_v1 = vpop.f32.mrf.mxu3  ;;  %v6228_v35 = vld [vmem:[%s8287_s5 + $0x918] sm:$0xf0]  ;;  %v6103_v4 = vor.u32 %v7629_v26, %v6100_v28  ;;  %v6092_v39 = vld [vmem:[%s8287_s5 + $0x808] sm:$0xf0]  ;;  %v7705_v61 = vld [vmem:[%s8287_s5 + $0xa74] sm:$0xf]  ;;  %v6287_v56 = vor.u32 %v7675_v30, %v6284_v51 }
 0x1fa   : > { %4600 = vmatpush.bf16.msrb.mxu2 %v6271_v18  ;;  %v4348_v18 = vpop.f32.mrf.mxu2  ;;  %v6404_v58 = vld [vmem:[%s8287_s5 + $0xa78] sm:$0xf0]  ;;  %v7703_v3 = vld [vmem:[%s8287_s5 + $0xa64] sm:$0xf]  ;;  %v6524_v26 = vld [vmem:[%s8287_s5 + $0xb68] sm:$0xf0] }
 0x1fb   : > { %4613 = vmatpush.bf16.msrb.mxu3 %v6335_v62  ;;  %v4349_v62 = vadd.f32 %v4348_v18, %v4336_v38  ;;  %v6220_v38 = vld [vmem:[%s8287_s5 + $0x908] sm:$0xf0]  ;;  %v6468_v53 = vld [vmem:[%s8287_s5 + $0xaf8] sm:$0xf0]  ;;  %v7751_v28 = vld [vmem:[%s8287_s5 + $0xbe4] sm:$0xf] }
 0x1fc   : > { %4575 = vmatpush.bf16.msrb.mxu0 %v6135_v23  ;;  %v4337_v23 = vpop.f32.mrf.mxu1  ;;  %v6223_v18 = vor.u32 %v7659_v48, %v6220_v38  ;;  %v6596_v60 = vld [vmem:[%s8287_s5 + $0xbf8] sm:$0xf0]  ;;  %v6380_v38 = vld [vmem:[%s8287_s5 + $0xa48] sm:$0xf0]  ;;  %v7731_v51 = vld [vmem:[%s8287_s5 + $0xb44] sm:$0xf] }
 0x1fd   : > { %4588 = vmatpush.bf16.msrb.mxu1 %v6199_v17  ;;  %v9385_v17 = vadd.f32 %v4361_v1, %v4349_v62  ;;  %v6407_v62 = vor.u32 %v7705_v61, %v6404_v58  ;;  %v6444_v30 = vld [vmem:[%s8287_s5 + $0xac8] sm:$0xf0] }
 0x1fe   : > { %4601 = vmatpush.bf16.msrb.mxu2 %v6263_v52  ;;  %v4324_v55 = vpop.f32.mrf.mxu0  ;;  %v6175_v52 = vor.u32 %v7647_v7, %v6172_v44  ;;  %v6532_v7 = vld [vmem:[%s8287_s5 + $0xb78] sm:$0xf0]  ;;  %v7753_v44 = vld [vmem:[%s8287_s5 + $0xbf4] sm:$0xf]  ;;  %v6572_v61 = vld [vmem:[%s8287_s5 + $0xbc8] sm:$0xf0] }
 0x1ff   : > { %4614 = vmatpush.bf16.msrb.mxu3 %v6327_v31  ;;  %v7645_v31 = vld [vmem:[%s8287_s5 + $0x894] sm:$0xf]  ;;  %v6535_v14 = vor.u32 %v7737_v54, %v6532_v7  ;;  %v6396_v55 = vld [vmem:[%s8287_s5 + $0xa68] sm:$0xf0]  ;;  %v6599_v23 = vor.u32 %v7753_v44, %v6596_v60  ;;  %v6372_v54 = vld [vmem:[%s8287_s5 + $0xa38] sm:$0xf0] }
 0x200   : > { %4576 = vmatpush.bf16.msrb.mxu0 %v6127_v43  ;;  %v7627_v43 = vld [vmem:[%s8287_s5 + $0x804] sm:$0xf]  ;;  %v7713_v7 = vld [vmem:[%s8287_s5 + $0xab4] sm:$0xf]  ;;  %v6436_v44 = vld [vmem:[%s8287_s5 + $0xab8] sm:$0xf0] }
 0x201   : > { %4589 = vmatpush.bf16.msrb.mxu1 %v6191_v47  ;;  %v6167_v47 = vor.u32 %v7645_v31, %v6164_v34  ;;  %v6588_v31 = vld [vmem:[%s8287_s5 + $0xbe8] sm:$0xf0]  ;;  %v7729_v60 = vld [vmem:[%s8287_s5 + $0xb34] sm:$0xf] }
 0x202   : > { %4602 = vmatpush.bf16.msrb.mxu2 %v6255_v20  ;;  %v6231_v20 = vor.u32 %v7661_v36, %v6228_v35  ;;  %v4350_v29 = vpop.f32.mrf.mxu2  ;;  %v7701_v35 = vld [vmem:[%s8287_s5 + $0xa54] sm:$0xf] }
 0x203   : > { %4615 = vmatpush.bf16.msrb.mxu3 %v6319_v50  ;;  %v6295_v50 = vor.u32 %v7677_v40, %v6292_v19  ;;  %v6388_v40 = vld [vmem:[%s8287_s5 + $0xa58] sm:$0xf0]  ;;  %v7717_v19 = vld [vmem:[%s8287_s5 + $0xad4] sm:$0xf]  ;;  %v6508_v29 = vld [vmem:[%s8287_s5 + $0xb48] sm:$0xf0] }
 0x204   : > { %4577 = vmatpush.bf16.msrb.mxu0 %v6119_v33  ;;  %v7721_v33 = vld [vmem:[%s8287_s5 + $0xaf4] sm:$0xf] }
 0x205   : > { %4590 = vmatpush.bf16.msrb.mxu1 %v6183_v41  ;;  %v4363_v41 = vpop.f32.mrf.mxu3  ;;  %v6471_v1 = vor.u32 %v7721_v33, %v6468_v53  ;;  %v7697_v53 = vld [vmem:[%s8287_s5 + $0xa34] sm:$0xf] }
 0x206   : > { %4603 = vmatpush.bf16.msrb.mxu2 %v6247_v42  ;;  %v6095_v42 = vor.u32 %v7627_v43, %v6092_v39  ;;  %v6452_v43 = vld [vmem:[%s8287_s5 + $0xad8] sm:$0xf0]  ;;  %v7733_v39 = vld [vmem:[%s8287_s5 + $0xb54] sm:$0xf] }
 0x207   : > { %4616 = vmatpush.bf16.msrb.mxu3 %v6311_v59  ;;  %v6159_v59 = vor.u32 %v7643_v25, %v6156_v6  ;;  %v6580_v25 = vld [vmem:[%s8287_s5 + $0xbd8] sm:$0xf0]  ;;  %v6455_v6 = vor.u32 %v7717_v19, %v6452_v43  ;;  %v6556_v19 = vld [vmem:[%s8287_s5 + $0xba8] sm:$0xf0] }
 0x208   : > { %4578 = vmatpush.bf16.msrb.mxu0 %v6111_v11  ;;  %v7719_v11 = vld [vmem:[%s8287_s5 + $0xae4] sm:$0xf] }
 0x209   : > { %4591 = vmatpush.bf16.msrb.mxu1 %v6175_v52  ;;  %v6460_v52 = vld [vmem:[%s8287_s5 + $0xae8] sm:$0xf0] }
 0x20a   : > { %4604 = vmatpush.bf16.msrb.mxu2 %v6239_v24  ;;  %v7735_v24 = vld [vmem:[%s8287_s5 + $0xb64] sm:$0xf]  ;;  %v6463_v34 = vor.u32 %v7719_v11, %v6460_v52  ;;  %v6364_v52 = vld [vmem:[%s8287_s5 + $0xa28] sm:$0xf0] }
 0x20b   : > { %4617 = vmatpush.bf16.msrb.mxu3 %v6303_v21  ;;  %v6399_v21 = vor.u32 %v7703_v3, %v6396_v55  ;;  %v6527_v36 = vor.u32 %v7735_v24, %v6524_v26  ;;  %v6375_v3 = vor.u32 %v7697_v53, %v6372_v54  ;;  %v6439_v55 = vor.u32 %v7713_v7, %v6436_v44  ;;  %v7711_v24 = vld [vmem:[%s8287_s5 + $0xaa4] sm:$0xf]  ;;  %v6540_v44 = vld [vmem:[%s8287_s5 + $0xb88] sm:$0xf0] }
 0x20c   : > { %4579 = vmatpush.bf16.msrb.mxu0 %v6103_v4  ;;  %v6591_v4 = vor.u32 %v7751_v28, %v6588_v31  ;;  %v6428_v31 = vld [vmem:[%s8287_s5 + $0xaa8] sm:$0xf0]  ;;  %v7723_v53 = vld [vmem:[%s8287_s5 + $0xb04] sm:$0xf] }
 0x20d   : > { %4592 = vmatpush.bf16.msrb.mxu1 %v6167_v47  ;;  %v6516_v47 = vld [vmem:[%s8287_s5 + $0xb58] sm:$0xf0] }
 0x20e   : > { %4605 = vmatpush.bf16.msrb.mxu2 %v6231_v20  ;;  %v7749_v20 = vld [vmem:[%s8287_s5 + $0xbd4] sm:$0xf]  ;;  %v6519_v48 = vor.u32 %v7733_v39, %v6516_v47  ;;  %v6431_v47 = vor.u32 %v7711_v24, %v6428_v31 }
 0x20f   : > { %4618 = vmatpush.bf16.msrb.mxu3 %v6295_v50  ;;  %v7699_v50 = vld [vmem:[%s8287_s5 + $0xa44] sm:$0xf]  ;;  %v7817_v24 = vld [vmem:[%s8287_s5 + $0xdf4] sm:$0xf] }
 0x210   : > { %4580 = vmatpush.bf16.msrb.mxu0 %v6095_v42  ;;  %v6383_v58 = vor.u32 %v7699_v50, %v6380_v38  ;;  %v4374_v33 = vpop.f32.mrf.mxu0  ;;  %v6511_v42 = vor.u32 %v7731_v51, %v6508_v29  ;;  %v6420_v38 = vld [vmem:[%s8287_s5 + $0xa98] sm:$0xf0] }
 0x211   : > { %4593 = vmatpush.bf16.msrb.mxu1 %v6159_v59  ;;  %v4387_v59 = vpop.f32.mrf.mxu1  ;;  %v6548_v51 = vld [vmem:[%s8287_s5 + $0xb98] sm:$0xf0] }
 0x212   : > { %4606 = vmatpush.bf16.msrb.mxu2 %v6223_v18 }
 0x213   : > { %4619 = vmatpush.bf16.msrb.mxu3 %v6287_v56  ;;  %4581 = vmatmul.bf16.vlgmr.msrb.gmra.mxu0 %v8712_v37  ;;  %v6391_v37 = vor.u32 %v7701_v35, %v6388_v40  ;;  %v6500_v56 = vld [vmem:[%s8287_s5 + $0xb38] sm:$0xf0]  ;;  %v7743_v40 = vld [vmem:[%s8287_s5 + $0xba4] sm:$0xf] }
 0x214   : > { %4625 = vmatpush.bf16.msra.mxu0 %v6407_v62  ;;  %4594 = vmatmul.bf16.vlgmr.msrb.gmra.mxu1 %v8719_v46  ;;  %v6583_v46 = vor.u32 %v7749_v20, %v6580_v25  ;;  %v4388_v62 = vadd.f32 %v4387_v59, %v4374_v33  ;;  %v6503_v11 = vor.u32 %v7729_v60, %v6500_v56  ;;  %v7693_v25 = vld [vmem:[%s8287_s5 + $0xa14] sm:$0xf]  ;;  %v6476_v59 = vld [vmem:[%s8287_s5 + $0xb08] sm:$0xf0] }
 0x215   : > { %4638 = vmatpush.bf16.msra.mxu1 %v6471_v1  ;;  %4607 = vmatmul.bf16.vlgmr.msrb.gmra.mxu2 %v8717_v45  ;;  %v7715_v45 = vld [vmem:[%s8287_s5 + $0xac4] sm:$0xf]  ;;  %v7745_v1 = vld [vmem:[%s8287_s5 + $0xbb4] sm:$0xf]  ;;  %v6559_v50 = vor.u32 %v7743_v40, %v6556_v19 }
 0x216   : > { %4651 = vmatpush.bf16.msra.mxu2 %v6535_v14  ;;  %4620 = vmatmul.bf16.vlgmr.msrb.gmra.mxu3 %v8723_v49  ;;  %v7747_v49 = vld [vmem:[%s8287_s5 + $0xbc4] sm:$0xf]  ;;  %v6447_v41 = vor.u32 %v7715_v45, %v6444_v30  ;;  %v6564_v14 = vld [vmem:[%s8287_s5 + $0xbb8] sm:$0xf0]  ;;  %v7725_v45 = vld [vmem:[%s8287_s5 + $0xb14] sm:$0xf] }
 0x217   : > { %4664 = vmatpush.bf16.msra.mxu3 %v6599_v23  ;;  %v6575_v18 = vor.u32 %v7747_v49, %v6572_v61  ;;  %v7695_v23 = vld [vmem:[%s8287_s5 + $0xa24] sm:$0xf]  ;;  %v6567_v28 = vor.u32 %v7745_v1, %v6564_v14  ;;  %v7741_v30 = vld [vmem:[%s8287_s5 + $0xb94] sm:$0xf]  ;;  %v6348_v61 = vld [vmem:[%s8287_s5 + $0xa08] sm:$0xf0] }
 0x218   : > { %4626 = vmatpush.bf16.msra.mxu0 %v6399_v21  ;;  %v4400_v26 = vpop.f32.mrf.mxu2  ;;  %v7727_v21 = vld [vmem:[%s8287_s5 + $0xb24] sm:$0xf]  ;;  %v4376_v39 = vpop.f32.mrf.mxu0  ;;  %v6551_v7 = vor.u32 %v7741_v30, %v6548_v51  ;;  %v7769_v56 = vld [vmem:[%s8287_s5 + $0xc74] sm:$0xf]  ;;  %v6708_v30 = vld [vmem:[%s8287_s5 + $0xcd8] sm:$0xf0] }
 0x219   : > { %4639 = vmatpush.bf16.msra.mxu1 %v6463_v34  ;;  %v6492_v34 = vld [vmem:[%s8287_s5 + $0xb28] sm:$0xf0]  ;;  %v4413_v35 = vpop.f32.mrf.mxu3  ;;  %v7691_v49 = vld [vmem:[%s8287_s5 + $0xa04] sm:$0xf]  ;;  %v7785_v1 = vld [vmem:[%s8287_s5 + $0xcf4] sm:$0xf] }
 0x21a   : > { %4652 = vmatpush.bf16.msra.mxu2 %v6527_v36  ;;  %v4401_v36 = vadd.f32 %v4400_v26, %v4388_v62  ;;  %v6495_v20 = vor.u32 %v7727_v21, %v6492_v34  ;;  %v6660_v62 = vld [vmem:[%s8287_s5 + $0xc78] sm:$0xf0]  ;;  %v6351_v14 = vor.u32 %v7691_v49, %v6348_v61  ;;  %v7783_v40 = vld [vmem:[%s8287_s5 + $0xce4] sm:$0xf]  ;;  %v7797_v51 = vld [vmem:[%s8287_s5 + $0xd54] sm:$0xf] }
 0x21b   : > { %4665 = vmatpush.bf16.msra.mxu3 %v6591_v4  ;;  %v6367_v4 = vor.u32 %v7695_v23, %v6364_v52  ;;  %v6479_v52 = vor.u32 %v7723_v53, %v6476_v59  ;;  %v6852_v26 = vld [vmem:[%s8287_s5 + $0xdf8] sm:$0xf0]  ;;  %v6663_v31 = vor.u32 %v7769_v56, %v6660_v62  ;;  %v7799_v39 = vld [vmem:[%s8287_s5 + $0xd64] sm:$0xf]  ;;  %v7813_v49 = vld [vmem:[%s8287_s5 + $0xdd4] sm:$0xf] }
 0x21c   : > { %4627 = vmatpush.bf16.msra.mxu0 %v6391_v37  ;;  %v9455_v43 = vadd.f32 %v4413_v35, %v4401_v36  ;;  %v6356_v37 = vld [vmem:[%s8287_s5 + $0xa18] sm:$0xf0]  ;;  %v7767_v36 = vld [vmem:[%s8287_s5 + $0xc64] sm:$0xf]  ;;  %v6652_v35 = vld [vmem:[%s8287_s5 + $0xc68] sm:$0xf0]  ;;  %v6855_v19 = vor.u32 %v7817_v24, %v6852_v26 }
 0x21d   : > { %4640 = vmatpush.bf16.msra.mxu1 %v6455_v6  ;;  %v7709_v6 = vld [vmem:[%s8287_s5 + $0xa94] sm:$0xf]  ;;  %v6359_v29 = vor.u32 %v7693_v25, %v6356_v37  ;;  %v6844_v25 = vld [vmem:[%s8287_s5 + $0xde8] sm:$0xf0]  ;;  %v6655_v37 = vor.u32 %v7767_v36, %v6652_v35  ;;  %v6836_v61 = vld [vmem:[%s8287_s5 + $0xdd8] sm:$0xf0] }
 0x21e   : > { %4653 = vmatpush.bf16.msra.mxu2 %v6519_v48  ;;  %v4389_v48 = vpop.f32.mrf.mxu1  ;;  %v6700_v53 = vld [vmem:[%s8287_s5 + $0xcc8] sm:$0xf0]  ;;  %v7811_v59 = vld [vmem:[%s8287_s5 + $0xdc4] sm:$0xf]  ;;  %v7761_v62 = vld [vmem:[%s8287_s5 + $0xc34] sm:$0xf] }
 0x21f   : > { %4666 = vmatpush.bf16.msra.mxu3 %v6583_v46  ;;  %v6484_v46 = vld [vmem:[%s8287_s5 + $0xb18] sm:$0xf0]  ;;  %v7809_v26 = vld [vmem:[%s8287_s5 + $0xdb4] sm:$0xf]  ;;  %v7759_v36 = vld [vmem:[%s8287_s5 + $0xc24] sm:$0xf] }
 0x220   : > { %4628 = vmatpush.bf16.msra.mxu0 %v6383_v58  ;;  %v6423_v58 = vor.u32 %v7709_v6, %v6420_v38  ;;  %v6487_v33 = vor.u32 %v7725_v45, %v6484_v46  ;;  %v4402_v54 = vpop.f32.mrf.mxu2  ;;  %v6644_v38 = vld [vmem:[%s8287_s5 + $0xc58] sm:$0xf0]  ;;  %v7781_v45 = vld [vmem:[%s8287_s5 + $0xcd4] sm:$0xf]  ;;  %v6620_v35 = vld [vmem:[%s8287_s5 + $0xc28] sm:$0xf0] }
 0x221   : > { %4641 = vmatpush.bf16.msra.mxu1 %v6447_v41  ;;  %v7707_v41 = vld [vmem:[%s8287_s5 + $0xa84] sm:$0xf]  ;;  %v4415_v60 = vpop.f32.mrf.mxu3  ;;  %v6756_v24 = vld [vmem:[%s8287_s5 + $0xd38] sm:$0xf0] }
 0x222   : > { %4654 = vmatpush.bf16.msra.mxu2 %v6511_v42  ;;  %v6412_v42 = vld [vmem:[%s8287_s5 + $0xa88] sm:$0xf0]  ;;  %v7795_v54 = vld [vmem:[%s8287_s5 + $0xd44] sm:$0xf] }
 0x223   : > { %4667 = vmatpush.bf16.msra.mxu3 %v6575_v18  ;;  %v7739_v18 = vld [vmem:[%s8287_s5 + $0xb84] sm:$0xf]  ;;  %v6415_v23 = vor.u32 %v7707_v41, %v6412_v42  ;;  %v6636_v42 = vld [vmem:[%s8287_s5 + $0xc48] sm:$0xf0] }
 0x224   : > { %4629 = vmatpush.bf16.msra.mxu0 %v6375_v3  ;;  %v6724_v3 = vld [vmem:[%s8287_s5 + $0xcf8] sm:$0xf0]  ;;  %v7763_v41 = vld [vmem:[%s8287_s5 + $0xc44] sm:$0xf] }
 0x225   : > { %4642 = vmatpush.bf16.msra.mxu1 %v6439_v55  ;;  %v7801_v55 = vld [vmem:[%s8287_s5 + $0xd74] sm:$0xf]  ;;  %v6727_v21 = vor.u32 %v7785_v1, %v6724_v3  ;;  %v6628_v1 = vld [vmem:[%s8287_s5 + $0xc38] sm:$0xf0] }
 0x226   : > { %4655 = vmatpush.bf16.msra.mxu2 %v6503_v11  ;;  %v6788_v11 = vld [vmem:[%s8287_s5 + $0xd78] sm:$0xf0] }
 0x227   : > { %4668 = vmatpush.bf16.msra.mxu3 %v6567_v28  ;;  %v6543_v28 = vor.u32 %v7739_v18, %v6540_v44  ;;  %v6791_v34 = vor.u32 %v7801_v55, %v6788_v11  ;;  %v6639_v18 = vor.u32 %v7763_v41, %v6636_v42  ;;  %v6740_v41 = vld [vmem:[%s8287_s5 + $0xd18] sm:$0xf0]  ;;  %v7805_v42 = vld [vmem:[%s8287_s5 + $0xd94] sm:$0xf] }
 0x228   : > { %4630 = vmatpush.bf16.msra.mxu0 %v6367_v4  ;;  %v6716_v4 = vld [vmem:[%s8287_s5 + $0xce8] sm:$0xf0] }
 0x229   : > { %4643 = vmatpush.bf16.msra.mxu1 %v6431_v47  ;;  %v6780_v47 = vld [vmem:[%s8287_s5 + $0xd68] sm:$0xf0]  ;;  %v6719_v6 = vor.u32 %v7783_v40, %v6716_v4  ;;  %v7775_v40 = vld [vmem:[%s8287_s5 + $0xca4] sm:$0xf] }
 0x22a   : > { %4656 = vmatpush.bf16.msra.mxu2 %v6495_v20  ;;  %v7815_v20 = vld [vmem:[%s8287_s5 + $0xde4] sm:$0xf]  ;;  %v6783_v48 = vor.u32 %v7799_v39, %v6780_v47  ;;  %v6684_v39 = vld [vmem:[%s8287_s5 + $0xca8] sm:$0xf0] }
 0x22b   : > { %4669 = vmatpush.bf16.msra.mxu3 %v6559_v50  ;;  %v7765_v50 = vld [vmem:[%s8287_s5 + $0xc54] sm:$0xf]  ;;  %v6847_v46 = vor.u32 %v7815_v20, %v6844_v25  ;;  %v7791_v47 = vld [vmem:[%s8287_s5 + $0xd24] sm:$0xf]  ;;  %v6748_v20 = vld [vmem:[%s8287_s5 + $0xd28] sm:$0xf0] }
 0x22c   : > { %4631 = vmatpush.bf16.msra.mxu0 %v6359_v29  ;;  %v6772_v29 = vld [vmem:[%s8287_s5 + $0xd58] sm:$0xf0] }
 0x22d   : > { %4644 = vmatpush.bf16.msra.mxu1 %v6423_v58  ;;  %v6711_v58 = vor.u32 %v7781_v45, %v6708_v30  ;;  %v6751_v30 = vor.u32 %v7791_v47, %v6748_v20  ;;  %v7847_v47 = vld [vmem:[%s8287_s5 + $0xee4] sm:$0xf] }
 0x22e   : > { %4657 = vmatpush.bf16.msra.mxu2 %v6487_v33  ;;  %v6775_v33 = vor.u32 %v7797_v51, %v6772_v29  ;;  %v7757_v51 = vld [vmem:[%s8287_s5 + $0xc14] sm:$0xf]  ;;  %v6612_v29 = vld [vmem:[%s8287_s5 + $0xc18] sm:$0xf0] }
 0x22f   : > { %4670 = vmatpush.bf16.msra.mxu3 %v6551_v7  ;;  %v6764_v7 = vld [vmem:[%s8287_s5 + $0xd48] sm:$0xf0] }
 0x230   : > { %4632 = vmatpush.bf16.msra.mxu0 %v6351_v14  ;;  %v4426_v44 = vpop.f32.mrf.mxu0  ;;  %v6767_v56 = vor.u32 %v7795_v54, %v6764_v7  ;;  %v7777_v14 = vld [vmem:[%s8287_s5 + $0xcb4] sm:$0xf]  ;;  %v6604_v54 = vld [vmem:[%s8287_s5 + $0xc08] sm:$0xf0] }
 0x231   : > { %4645 = vmatpush.bf16.msra.mxu1 %v6415_v23  ;;  %v4427_v3 = vadd.f32 %v4426_v44, %v9455_v43  ;;  %v4439_v55 = vpop.f32.mrf.mxu1  ;;  %v6692_v23 = vld [vmem:[%s8287_s5 + $0xcb8] sm:$0xf0]  ;;  %v7787_v44 = vld [vmem:[%s8287_s5 + $0xd04] sm:$0xf] }
 0x232   : > { %4658 = vmatpush.bf16.msra.mxu2 %v6479_v52  ;;  %v7793_v52 = vld [vmem:[%s8287_s5 + $0xd34] sm:$0xf]  ;;  %v6695_v43 = vor.u32 %v7777_v14, %v6692_v23  ;;  %v6796_v14 = vld [vmem:[%s8287_s5 + $0xd88] sm:$0xf0] }
 0x233   : > { %4671 = vmatpush.bf16.msra.mxu3 %v6543_v28  ;;  %4633 = vmatmul.bf16.vlgmr.msra.gmra.mxu0 %v8796_v8  ;;  %v6647_v8 = vor.u32 %v7765_v50, %v6644_v38  ;;  %v6820_v28 = vld [vmem:[%s8287_s5 + $0xdb8] sm:$0xf0]  ;;  %v6623_v50 = vor.u32 %v7759_v36, %v6620_v35  ;;  %v7849_v23 = vld [vmem:[%s8287_s5 + $0xef4] sm:$0xf] }
 0x234   : > { %4677 = vmatpush.bf16.msrb.mxu0 %v6663_v31  ;;  %4646 = vmatmul.bf16.vlgmr.msra.gmra.mxu1 %v8803_v13  ;;  %v6839_v13 = vor.u32 %v7813_v49, %v6836_v61  ;;  %v4440_v31 = vadd.f32 %v4439_v55, %v4427_v3  ;;  %v6823_v4 = vor.u32 %v7809_v26, %v6820_v28  ;;  %v7773_v49 = vld [vmem:[%s8287_s5 + $0xc94] sm:$0xf]  ;;  %v7044_v28 = vld [vmem:[%s8287_s5 + $0xf78] sm:$0xf0] }
 0x235   : > { %4690 = vmatpush.bf16.msrb.mxu1 %v6727_v21  ;;  %4659 = vmatmul.bf16.vlgmr.msra.gmra.mxu2 %v8801_v12  ;;  %v7779_v12 = vld [vmem:[%s8287_s5 + $0xcc4] sm:$0xf]  ;;  %v6631_v21 = vor.u32 %v7761_v62, %v6628_v1  ;;  %v6732_v62 = vld [vmem:[%s8287_s5 + $0xd08] sm:$0xf0]  ;;  %v7833_v55 = vld [vmem:[%s8287_s5 + $0xe74] sm:$0xf] }
 0x236   : > { %4703 = vmatpush.bf16.msrb.mxu2 %v6791_v34  ;;  %4672 = vmatmul.bf16.vlgmr.msra.gmra.mxu3 %v8807_v16  ;;  %v6828_v16 = vld [vmem:[%s8287_s5 + $0xdc8] sm:$0xf0]  ;;  %v6703_v60 = vor.u32 %v7779_v12, %v6700_v53  ;;  %v6759_v34 = vor.u32 %v7793_v52, %v6756_v24  ;;  %v6804_v12 = vld [vmem:[%s8287_s5 + $0xd98] sm:$0xf0]  ;;  %v7755_v53 = vld [vmem:[%s8287_s5 + $0xc04] sm:$0xf] }
 0x237   : > { %4716 = vmatpush.bf16.msrb.mxu3 %v6855_v19  ;;  %v6831_v11 = vor.u32 %v7811_v59, %v6828_v16  ;;  %v7771_v16 = vld [vmem:[%s8287_s5 + $0xc84] sm:$0xf]  ;;  %v6607_v52 = vor.u32 %v7755_v53, %v6604_v54  ;;  %v6980_v24 = vld [vmem:[%s8287_s5 + $0xef8] sm:$0xf0]  ;;  %v7865_v26 = vld [vmem:[%s8287_s5 + $0xf74] sm:$0xf] }
 0x238   : > { %4678 = vmatpush.bf16.msrb.mxu0 %v6655_v37  ;;  %v4452_v19 = vpop.f32.mrf.mxu2  ;;  %v4428_v45 = vpop.f32.mrf.mxu0  ;;  %v7803_v1 = vld [vmem:[%s8287_s5 + $0xd84] sm:$0xf]  ;;  %v6892_v54 = vld [vmem:[%s8287_s5 + $0xe48] sm:$0xf0] }
 0x239   : > { %4691 = vmatpush.bf16.msrb.mxu1 %v6719_v6  ;;  %v4453_v25 = vadd.f32 %v4452_v19, %v4440_v31  ;;  %v4465_v37 = vpop.f32.mrf.mxu3  ;;  %v7807_v6 = vld [vmem:[%s8287_s5 + $0xda4] sm:$0xf]  ;;  %v4441_v61 = vpop.f32.mrf.mxu1  ;;  %v6799_v36 = vor.u32 %v7803_v1, %v6796_v14  ;;  %v7047_v19 = vor.u32 %v7865_v26, %v7044_v28  ;;  %v7857_v26 = vld [vmem:[%s8287_s5 + $0xf34] sm:$0xf] }
 0x23a   : > { %4704 = vmatpush.bf16.msrb.mxu2 %v6783_v48  ;;  %v6812_v48 = vld [vmem:[%s8287_s5 + $0xda8] sm:$0xf0]  ;;  %v7827_v53 = vld [vmem:[%s8287_s5 + $0xe44] sm:$0xf]  ;;  %v7873_v28 = vld [vmem:[%s8287_s5 + $0xfb4] sm:$0xf] }
 0x23b   : > { %4717 = vmatpush.bf16.msrb.mxu3 %v6847_v46  ;;  %v9526_v38 = vadd.f32 %v4465_v37, %v4453_v25  ;;  %v6687_v46 = vor.u32 %v7775_v40, %v6684_v39  ;;  %v6983_v40 = vor.u32 %v7849_v23, %v6980_v24  ;;  %v6908_v39 = vld [vmem:[%s8287_s5 + $0xe68] sm:$0xf0]  ;;  %v7863_v37 = vld [vmem:[%s8287_s5 + $0xf64] sm:$0xf]  ;;  %v6948_v24 = vld [vmem:[%s8287_s5 + $0xeb8] sm:$0xf0] }
 0x23c   : > { %4679 = vmatpush.bf16.msrb.mxu0 %v6647_v8  ;;  %v6815_v8 = vor.u32 %v7807_v6, %v6812_v48  ;;  %v6972_v25 = vld [vmem:[%s8287_s5 + $0xee8] sm:$0xf0]  ;;  %v7879_v48 = vld [vmem:[%s8287_s5 + $0xfe4] sm:$0xf] }
 0x23d   : > { %4692 = vmatpush.bf16.msrb.mxu1 %v6711_v58  ;;  %v6676_v58 = vld [vmem:[%s8287_s5 + $0xc98] sm:$0xf0]  ;;  %v7036_v6 = vld [vmem:[%s8287_s5 + $0xf68] sm:$0xf0] }
 0x23e   : > { %4705 = vmatpush.bf16.msrb.mxu2 %v6775_v33  ;;  %v7789_v33 = vld [vmem:[%s8287_s5 + $0xd14] sm:$0xf]  ;;  %v6679_v7 = vor.u32 %v7773_v49, %v6676_v58 }
 0x23f   : > { %4718 = vmatpush.bf16.msrb.mxu3 %v6839_v13  ;;  %v6615_v13 = vor.u32 %v7757_v51, %v6612_v29  ;;  %v6743_v59 = vor.u32 %v7789_v33, %v6740_v41  ;;  %v7829_v51 = vld [vmem:[%s8287_s5 + $0xe54] sm:$0xf]  ;;  %v6900_v29 = vld [vmem:[%s8287_s5 + $0xe58] sm:$0xf0] }
 0x240   : > { %4680 = vmatpush.bf16.msrb.mxu0 %v6639_v18  ;;  %v6668_v18 = vld [vmem:[%s8287_s5 + $0xc88] sm:$0xf0]  ;;  %v7845_v49 = vld [vmem:[%s8287_s5 + $0xed4] sm:$0xf]  ;;  %v7028_v33 = vld [vmem:[%s8287_s5 + $0xf58] sm:$0xf0] }
 0x241   : > { %4693 = vmatpush.bf16.msrb.mxu1 %v6703_v60  ;;  %v4454_v60 = vpop.f32.mrf.mxu2  ;;  %v4467_v3 = vpop.f32.mrf.mxu3  ;;  %v6671_v31 = vor.u32 %v7771_v16, %v6668_v18  ;;  %v7861_v58 = vld [vmem:[%s8287_s5 + $0xf54] sm:$0xf]  ;;  %v7020_v16 = vld [vmem:[%s8287_s5 + $0xf48] sm:$0xf0]  ;;  %v7875_v18 = vld [vmem:[%s8287_s5 + $0xfc4] sm:$0xf] }
 0x242   : > { %4706 = vmatpush.bf16.msrb.mxu2 %v6767_v56  ;;  %v6807_v56 = vor.u32 %v7805_v42, %v6804_v12  ;;  %v7877_v41 = vld [vmem:[%s8287_s5 + $0xfd4] sm:$0xf]  ;;  %v7092_v42 = vld [vmem:[%s8287_s5 + $0xfd8] sm:$0xf0] }
 0x243   : > { %4719 = vmatpush.bf16.msrb.mxu3 %v6831_v11  ;;  %v6916_v11 = vld [vmem:[%s8287_s5 + $0xe78] sm:$0xf0]  ;;  %v7825_v3 = vld [vmem:[%s8287_s5 + $0xe34] sm:$0xf] }
 0x244   : > { %4681 = vmatpush.bf16.msrb.mxu0 %v6631_v21  ;;  %v6735_v21 = vor.u32 %v7787_v44, %v6732_v62  ;;  %v6919_v35 = vor.u32 %v7833_v55, %v6916_v11  ;;  %v7084_v44 = vld [vmem:[%s8287_s5 + $0xfc8] sm:$0xf0]  ;;  %v6884_v55 = vld [vmem:[%s8287_s5 + $0xe38] sm:$0xf0]  ;;  %v7841_v11 = vld [vmem:[%s8287_s5 + $0xeb4] sm:$0xf] }
 0x245   : > { %4694 = vmatpush.bf16.msrb.mxu1 %v6695_v43  ;;  %v7881_v43 = vld [vmem:[%s8287_s5 + $0xff4] sm:$0xf]  ;;  %v7087_v23 = vor.u32 %v7875_v18, %v7084_v44  ;;  %v6988_v18 = vld [vmem:[%s8287_s5 + $0xf08] sm:$0xf0]  ;;  %v7867_v44 = vld [vmem:[%s8287_s5 + $0xf84] sm:$0xf] }
 0x246   : > { %4707 = vmatpush.bf16.msrb.mxu2 %v6759_v34  ;;  %v7108_v34 = vld [vmem:[%s8287_s5 + $0xff8] sm:$0xf0] }
 0x247   : > { %4720 = vmatpush.bf16.msrb.mxu3 %v6823_v4  ;;  %v7831_v4 = vld [vmem:[%s8287_s5 + $0xe64] sm:$0xf]  ;;  %v7111_v20 = vor.u32 %v7881_v43, %v7108_v34  ;;  %v6951_v43 = vor.u32 %v7841_v11, %v6948_v24  ;;  %v7236_v11 = vld [vmem:[%s8287_s5 + $0x10f8] sm:$0xf0] }
 0x248   : > { %4682 = vmatpush.bf16.msrb.mxu0 %v6623_v50  ;;  %v7100_v50 = vld [vmem:[%s8287_s5 + $0xfe8] sm:$0xf0]  ;;  %v6911_v45 = vor.u32 %v7831_v4, %v6908_v39 }
 0x249   : > { %4695 = vmatpush.bf16.msrb.mxu1 %v6687_v46  ;;  %v6975_v46 = vor.u32 %v7847_v47, %v6972_v25  ;;  %v7103_v61 = vor.u32 %v7879_v48, %v7100_v50  ;;  %v6940_v39 = vld [vmem:[%s8287_s5 + $0xea8] sm:$0xf0]  ;;  %v7855_v47 = vld [vmem:[%s8287_s5 + $0xf24] sm:$0xf] }
 0x24a   : > { %4708 = vmatpush.bf16.msrb.mxu2 %v6751_v30  ;;  %v7039_v30 = vor.u32 %v7863_v37, %v7036_v6  ;;  %v7871_v6 = vld [vmem:[%s8287_s5 + $0xfa4] sm:$0xf]  ;;  %v7068_v48 = vld [vmem:[%s8287_s5 + $0xfa8] sm:$0xf0] }
 0x24b   : > { %4721 = vmatpush.bf16.msrb.mxu3 %v6815_v8  ;;  %v6964_v8 = vld [vmem:[%s8287_s5 + $0xed8] sm:$0xf0] }
 0x24c   : > { %4683 = vmatpush.bf16.msrb.mxu0 %v6615_v13  ;;  %v6967_v12 = vor.u32 %v7845_v49, %v6964_v8  ;;  %v7031_v13 = vor.u32 %v7861_v58, %v7028_v33  ;;  %v7821_v49 = vld [vmem:[%s8287_s5 + $0xe14] sm:$0xf]  ;;  %v7071_v58 = vor.u32 %v7871_v6, %v7068_v48  ;;  %v6932_v33 = vld [vmem:[%s8287_s5 + $0xe98] sm:$0xf0] }
 0x24d   : > { %4696 = vmatpush.bf16.msrb.mxu1 %v6679_v7  ;;  %v6956_v7 = vld [vmem:[%s8287_s5 + $0xec8] sm:$0xf0]  ;;  %v7837_v8 = vld [vmem:[%s8287_s5 + $0xe94] sm:$0xf] }
 0x24e   : > { %4709 = vmatpush.bf16.msrb.mxu2 %v6743_v59  ;;  %v7859_v59 = vld [vmem:[%s8287_s5 + $0xf44] sm:$0xf] }
 0x24f   : > { %4722 = vmatpush.bf16.msrb.mxu3 %v6807_v56  ;;  %v6895_v56 = vor.u32 %v7827_v53, %v6892_v54  ;;  %v7023_v14 = vor.u32 %v7859_v59, %v7020_v16  ;;  %v7819_v53 = vld [vmem:[%s8287_s5 + $0xe04] sm:$0xf]  ;;  %v6860_v54 = vld [vmem:[%s8287_s5 + $0xe08] sm:$0xf0] }
 0x250   : > { %4684 = vmatpush.bf16.msrb.mxu0 %v6607_v52  ;;  %v6924_v59 = vld [vmem:[%s8287_s5 + $0xe88] sm:$0xf0]  ;;  %v7851_v16 = vld [vmem:[%s8287_s5 + $0xf04] sm:$0xf] }
 0x251   : > { %4697 = vmatpush.bf16.msrb.mxu1 %v6671_v31  ;;  %v4491_v62 = vpop.f32.mrf.mxu1  ;;  %v7076_v31 = vld [vmem:[%s8287_s5 + $0xfb8] sm:$0xf0] }
 0x252   : > { %4710 = vmatpush.bf16.msrb.mxu2 %v6735_v21  ;;  %v6887_v21 = vor.u32 %v7825_v3, %v6884_v55  ;;  %v6863_v55 = vor.u32 %v7819_v53, %v6860_v54  ;;  %v7923_v53 = vld [vmem:[%s8287_s5 + $0x1144] sm:$0xf]  ;;  %v7276_v54 = vld [vmem:[%s8287_s5 + $0x1148] sm:$0xf0] }
 0x253   : > { %4723 = vmatpush.bf16.msrb.mxu3 %v6799_v36  ;;  %4685 = vmatmul.bf16.vlgmr.msrb.gmra.mxu0 %v8881_v2  ;;  %v6903_v2 = vor.u32 %v7829_v51, %v6900_v29  ;;  %v7823_v36 = vld [vmem:[%s8287_s5 + $0xe24] sm:$0xf] }
 0x254   : > { %4729 = vmatpush.bf16.msra.mxu0 %v6919_v35  ;;  %4698 = vmatmul.bf16.vlgmr.msrb.gmra.mxu1 %v8888_v10  ;;  %v7095_v10 = vor.u32 %v7877_v41, %v7092_v42  ;;  %v6876_v35 = vld [vmem:[%s8287_s5 + $0xe28] sm:$0xf0]  ;;  %v7853_v41 = vld [vmem:[%s8287_s5 + $0xf14] sm:$0xf]  ;;  %v6996_v42 = vld [vmem:[%s8287_s5 + $0xf18] sm:$0xf0] }
 0x255   : > { %4742 = vmatpush.bf16.msra.mxu1 %v6983_v40  ;;  %4711 = vmatmul.bf16.vlgmr.msrb.gmra.mxu2 %v8886_v9  ;;  %v7843_v9 = vld [vmem:[%s8287_s5 + $0xec4] sm:$0xf] }
 0x256   : > { %4755 = vmatpush.bf16.msra.mxu2 %v7047_v19  ;;  %4724 = vmatmul.bf16.vlgmr.msrb.gmra.mxu3 %v8892_v15  ;;  %v4478_v15 = vpop.f32.mrf.mxu0  ;;  %v6959_v1 = vor.u32 %v7843_v9, %v6956_v7  ;;  %v7839_v40 = vld [vmem:[%s8287_s5 + $0xea4] sm:$0xf]  ;;  %v7079_v19 = vor.u32 %v7873_v28, %v7076_v31  ;;  %v6935_v9 = vor.u32 %v7837_v8, %v6932_v33  ;;  %v7364_v28 = vld [vmem:[%s8287_s5 + $0x11f8] sm:$0xf0]  ;;  %v7941_v8 = vld [vmem:[%s8287_s5 + $0x11d4] sm:$0xf] }
 0x257   : > { %4768 = vmatpush.bf16.msra.mxu3 %v7111_v20  ;;  %v4479_v60 = vadd.f32 %v4478_v15, %v9526_v38  ;;  %v7012_v38 = vld [vmem:[%s8287_s5 + $0xf38] sm:$0xf0]  ;;  %v7004_v20 = vld [vmem:[%s8287_s5 + $0xf28] sm:$0xf0]  ;;  %v6943_v51 = vor.u32 %v7839_v40, %v6940_v39  ;;  %v7835_v7 = vld [vmem:[%s8287_s5 + $0xe84] sm:$0xf] }
 0x258   : > { %4730 = vmatpush.bf16.msra.mxu0 %v6911_v45  ;;  %v7015_v34 = vor.u32 %v7857_v26, %v7012_v38  ;;  %v4504_v4 = vpop.f32.mrf.mxu2  ;;  %v6879_v45 = vor.u32 %v7823_v36, %v6876_v35  ;;  %v7007_v29 = vor.u32 %v7855_v47, %v7004_v20  ;;  %v6927_v24 = vor.u32 %v7835_v7, %v6924_v59  ;;  %v7945_v38 = vld [vmem:[%s8287_s5 + $0x11f4] sm:$0xf]  ;;  %v7895_v36 = vld [vmem:[%s8287_s5 + $0x1064] sm:$0xf]  ;;  %v7164_v35 = vld [vmem:[%s8287_s5 + $0x1068] sm:$0xf0] }
 0x259   : > { %4743 = vmatpush.bf16.msra.mxu1 %v6975_v46  ;;  %v4492_v52 = vadd.f32 %v4491_v62, %v4479_v60  ;;  %v4517_v37 = vpop.f32.mrf.mxu3  ;;  %v4493_v46 = vpop.f32.mrf.mxu1  ;;  %v7052_v60 = vld [vmem:[%s8287_s5 + $0xf88] sm:$0xf0]  ;;  %v7897_v62 = vld [vmem:[%s8287_s5 + $0x1074] sm:$0xf]  ;;  %v6991_v26 = vor.u32 %v7851_v16, %v6988_v18  ;;  %v7911_v40 = vld [vmem:[%s8287_s5 + $0x10e4] sm:$0xf] }
 0x25a   : > { %4756 = vmatpush.bf16.msra.mxu2 %v7039_v30  ;;  %v7055_v31 = vor.u32 %v7867_v44, %v7052_v60  ;;  %v7927_v39 = vld [vmem:[%s8287_s5 + $0x1164] sm:$0xf]  ;;  %v7292_v47 = vld [vmem:[%s8287_s5 + $0x1168] sm:$0xf0]  ;;  %v7909_v46 = vld [vmem:[%s8287_s5 + $0x10d4] sm:$0xf]  ;;  %v7279_v44 = vor.u32 %v7923_v53, %v7276_v54 }
 0x25b   : > { %4769 = vmatpush.bf16.msra.mxu3 %v7103_v61  ;;  %v4505_v25 = vadd.f32 %v4504_v4, %v4492_v52  ;;  %v6868_v61 = vld [vmem:[%s8287_s5 + $0xe18] sm:$0xf0]  ;;  %v7228_v4 = vld [vmem:[%s8287_s5 + $0x10e8] sm:$0xf0]  ;;  %v7943_v20 = vld [vmem:[%s8287_s5 + $0x11e4] sm:$0xf]  ;;  %v7295_v48 = vor.u32 %v7927_v39, %v7292_v47 }
 0x25c   : > { %4731 = vmatpush.bf16.msra.mxu0 %v6903_v2  ;;  %v7869_v2 = vld [vmem:[%s8287_s5 + $0xf94] sm:$0xf]  ;;  %v7300_v52 = vld [vmem:[%s8287_s5 + $0x1178] sm:$0xf0]  ;;  %v7231_v6 = vor.u32 %v7911_v40, %v7228_v4  ;;  %v9732_v33 = vld [vmem:[#allocation9_spill] sm:$0xff] }
 0x25d   : > { %4744 = vmatpush.bf16.msra.mxu1 %v6967_v12  ;;  %v9597_v30 = vadd.f32 %v4517_v37, %v4505_v25  ;;  %v7060_v12 = vld [vmem:[%s8287_s5 + $0xf98] sm:$0xf0]  ;;  %v7356_v25 = vld [vmem:[%s8287_s5 + $0x11e8] sm:$0xf0]  ;;  %v7167_v37 = vor.u32 %v7895_v36, %v7164_v35  ;;  %v7889_v60 = vld [vmem:[%s8287_s5 + $0x1034] sm:$0xf] }
 0x25e   : > { %4757 = vmatpush.bf16.msra.mxu2 %v7031_v13  ;;  %v4480_v50 = vpop.f32.mrf.mxu0  ;;  %v6871_v13 = vor.u32 %v7821_v49, %v6868_v61  ;;  %v7063_v15 = vor.u32 %v7869_v2, %v7060_v12  ;;  %v7925_v49 = vld [vmem:[%s8287_s5 + $0x1154] sm:$0xf]  ;;  %v7284_v61 = vld [vmem:[%s8287_s5 + $0x1158] sm:$0xf0]  ;;  %v7891_v2 = vld [vmem:[%s8287_s5 + $0x1044] sm:$0xf] }
 0x25f   : > { %4770 = vmatpush.bf16.msra.mxu3 %v7095_v10  ;;  %v6999_v10 = vor.u32 %v7853_v41, %v6996_v42  ;;  %v7893_v50 = vld [vmem:[%s8287_s5 + $0x1054] sm:$0xf]  ;;  %v7287_v42 = vor.u32 %v7925_v49, %v7284_v61  ;;  %v7148_v12 = vld [vmem:[%s8287_s5 + $0x1048] sm:$0xf0]  ;;  %v7919_v36 = vld [vmem:[%s8287_s5 + $0x1124] sm:$0xf] }
 0x260   : > { %4732 = vmatpush.bf16.msra.mxu0 %v6895_v56  ;;  %v4506_v56 = vpop.f32.mrf.mxu2  ;;  %v7340_v7 = vld [vmem:[%s8287_s5 + $0x11c8] sm:$0xf0]  ;;  %v7151_v16 = vor.u32 %v7891_v2, %v7148_v12  ;;  %v7935_v4 = vld [vmem:[%s8287_s5 + $0x11a4] sm:$0xf]  ;;  %v7917_v49 = vld [vmem:[%s8287_s5 + $0x1114] sm:$0xf] }
 0x261   : > { %4745 = vmatpush.bf16.msra.mxu1 %v6959_v1  ;;  %v7172_v1 = vld [vmem:[%s8287_s5 + $0x1078] sm:$0xf0]  ;;  %v4519_v3 = vpop.f32.mrf.mxu3  ;;  %v7260_v35 = vld [vmem:[%s8287_s5 + $0x1128] sm:$0xf0]  ;;  %v7899_v12 = vld [vmem:[%s8287_s5 + $0x1084] sm:$0xf] }
 0x262   : > { %4758 = vmatpush.bf16.msra.mxu2 %v7023_v14  ;;  %v7913_v14 = vld [vmem:[%s8287_s5 + $0x10f4] sm:$0xf]  ;;  %v7140_v56 = vld [vmem:[%s8287_s5 + $0x1038] sm:$0xf0]  ;;  %v7324_v39 = vld [vmem:[%s8287_s5 + $0x11a8] sm:$0xf0] }
 0x263   : > { %4771 = vmatpush.bf16.msra.mxu3 %v7087_v23  ;;  %v7929_v23 = vld [vmem:[%s8287_s5 + $0x1174] sm:$0xf]  ;;  %v7204_v3 = vld [vmem:[%s8287_s5 + $0x10b8] sm:$0xf0]  ;;  %v7116_v2 = vld [vmem:[%s8287_s5 + $0x1008] sm:$0xf0] }
 0x264   : > { %4733 = vmatpush.bf16.msra.mxu0 %v6887_v21  ;;  %v7175_v21 = vor.u32 %v7897_v62, %v7172_v1  ;;  %v7905_v62 = vld [vmem:[%s8287_s5 + $0x10b4] sm:$0xf]  ;;  %v7252_v61 = vld [vmem:[%s8287_s5 + $0x1118] sm:$0xf0]  ;;  %v7244_v53 = vld [vmem:[%s8287_s5 + $0x1108] sm:$0xf0] }
 0x265   : > { %4746 = vmatpush.bf16.msra.mxu1 %v6951_v43  ;;  %v7239_v43 = vor.u32 %v7913_v14, %v7236_v11  ;;  %v7937_v11 = vld [vmem:[%s8287_s5 + $0x11b4] sm:$0xf] }
 0x266   : > { %4759 = vmatpush.bf16.msra.mxu2 %v7015_v34  ;;  %v7303_v34 = vor.u32 %v7929_v23, %v7300_v52  ;;  %v7332_v23 = vld [vmem:[%s8287_s5 + $0x11b8] sm:$0xf0]  ;;  %v7143_v52 = vor.u32 %v7889_v60, %v7140_v56 }
 0x267   : > { %4772 = vmatpush.bf16.msra.mxu3 %v7079_v19  ;;  %v7367_v19 = vor.u32 %v7945_v38, %v7364_v28  ;;  %v7887_v38 = vld [vmem:[%s8287_s5 + $0x1024] sm:$0xf]  ;;  %v7132_v28 = vld [vmem:[%s8287_s5 + $0x1028] sm:$0xf0] }
 0x268   : > { %4734 = vmatpush.bf16.msra.mxu0 %v6879_v45  ;;  %v7156_v45 = vld [vmem:[%s8287_s5 + $0x1058] sm:$0xf0] }
 0x269   : > { %4747 = vmatpush.bf16.msra.mxu1 %v6943_v51  ;;  %v7359_v51 = vor.u32 %v7943_v20, %v7356_v25  ;;  %v7135_v20 = vor.u32 %v7887_v38, %v7132_v28 }
 0x26a   : > { %4760 = vmatpush.bf16.msra.mxu2 %v7007_v29  ;;  %v7220_v29 = vld [vmem:[%s8287_s5 + $0x10d8] sm:$0xf0] }
 0x26b   : > { %4773 = vmatpush.bf16.msra.mxu3 %v7071_v58  ;;  %v7348_v58 = vld [vmem:[%s8287_s5 + $0x11d8] sm:$0xf0]  ;;  %v7223_v41 = vor.u32 %v7909_v46, %v7220_v29  ;;  %v7901_v46 = vld [vmem:[%s8287_s5 + $0x1094] sm:$0xf] }
 0x26c   : > { %4735 = vmatpush.bf16.msra.mxu0 %v6871_v13  ;;  %v7212_v13 = vld [vmem:[%s8287_s5 + $0x10c8] sm:$0xf0]  ;;  %v7188_v29 = vld [vmem:[%s8287_s5 + $0x1098] sm:$0xf0] }
 0x26d   : > { %4748 = vmatpush.bf16.msra.mxu1 %v6935_v9 }
 0x26e   : > { %4761 = vmatpush.bf16.msra.mxu2 %v6999_v10  ;;  %v7939_v10 = vld [vmem:[%s8287_s5 + $0x11c4] sm:$0xf] }
 0x26f   : > { %4774 = vmatpush.bf16.msra.mxu3 %v7063_v15  ;;  %v7343_v1 = vor.u32 %v7939_v10, %v7340_v7  ;;  %v7308_v10 = vld [vmem:[%s8287_s5 + $0x1188] sm:$0xf0] }
 0x270   : > { %4736 = vmatpush.bf16.msra.mxu0 %v6863_v55  ;;  %v4530_v9 = vpop.f32.mrf.mxu0  ;;  %v7921_v55 = vld [vmem:[%s8287_s5 + $0x1134] sm:$0xf] }
 0x271   : > { %4749 = vmatpush.bf16.msra.mxu1 %v6927_v24  ;;  %v4531_v59 = vadd.f32 %v4530_v9, %v9597_v30  ;;  %v4543_v15 = vpop.f32.mrf.mxu1  ;;  %v7268_v30 = vld [vmem:[%s8287_s5 + $0x1138] sm:$0xf0]  ;;  %v7207_v24 = vor.u32 %v7905_v62, %v7204_v3  ;;  %v7931_v9 = vld [vmem:[%s8287_s5 + $0x1184] sm:$0xf] }
 0x272   : > { %4762 = vmatpush.bf16.msra.mxu2 %v6991_v26  ;;  %v7271_v26 = vor.u32 %v7921_v55, %v7268_v30 }
 0x273   : > { %4775 = vmatpush.bf16.msra.mxu3 %v7055_v31  ;;  %4737 = vmatmul.bf16.vlgmr.msra.gmra.mxu0 %v8966_v22  ;;  %v7159_v22 = vor.u32 %v7893_v50, %v7156_v45  ;;  %v4544_v14 = vadd.f32 %v4543_v15, %v4531_v59  ;;  %v7903_v31 = vld [vmem:[%s8287_s5 + $0x10a4] sm:$0xf]  ;;  %v7885_v50 = vld [vmem:[%s8287_s5 + $0x1014] sm:$0xf]  ;;  %v7124_v45 = vld [vmem:[%s8287_s5 + $0x1018] sm:$0xf0] }
 0x274   : > { %4781 = vmatpush.bf16.msrb.mxu0 %v7175_v21  ;;  %4750 = vmatmul.bf16.vlgmr.msra.gmra.mxu1 %v8973_v32  ;;  %v7351_v32 = vor.u32 %v7941_v8, %v7348_v58  ;;  %v7335_v21 = vor.u32 %v7937_v11, %v7332_v23  ;;  %v7933_v8 = vld [vmem:[%s8287_s5 + $0x1194] sm:$0xf]  ;;  %v7316_v58 = vld [vmem:[%s8287_s5 + $0x1198] sm:$0xf0] }
 0x275   : > { %4794 = vmatpush.bf16.msrb.mxu1 %v7239_v43  ;;  %4763 = vmatmul.bf16.vlgmr.msra.gmra.mxu2 %v8971_v27  ;;  %v7907_v27 = vld [vmem:[%s8287_s5 + $0x10c4] sm:$0xf] }
 0x276   : > { %4807 = vmatpush.bf16.msrb.mxu2 %v7303_v34  ;;  %4776 = vmatmul.bf16.vlgmr.msra.gmra.mxu3 %v9732_v33  ;;  %v7215_v18 = vor.u32 %v7907_v27, %v7212_v13  ;;  %v7196_v34 = vld [vmem:[%s8287_s5 + $0x10a8] sm:$0xf0]  ;;  %v7127_v33 = vor.u32 %v7885_v50, %v7124_v45  ;;  %v7319_v27 = vor.u32 %v7933_v8, %v7316_v58  ;;  %v7915_v13 = vld [vmem:[%s8287_s5 + $0x1104] sm:$0xf] }
 0x277   : > { %4820 = vmatpush.bf16.msrb.mxu3 %v7367_v19  ;;  %v7247_v15 = vor.u32 %v7915_v13, %v7244_v53 }
 0x278   : > { %4782 = vmatpush.bf16.msrb.mxu0 %v7167_v37  ;;  %v4556_v43 = vpop.f32.mrf.mxu2  ;;  %v4532_v47 = vpop.f32.mrf.mxu0 }
 0x279   : > { %4795 = vmatpush.bf16.msrb.mxu1 %v7231_v6  ;;  %v4557_v40 = vadd.f32 %v4556_v43, %v4544_v14  ;;  %v4569_v19 = vpop.f32.mrf.mxu3  ;;  %v4545_v25 = vpop.f32.mrf.mxu1  ;;  %v7199_v6 = vor.u32 %v7903_v31, %v7196_v34 }
 0x27a   : > { %4808 = vmatpush.bf16.msrb.mxu2 %v7295_v48  ;;  %v7263_v48 = vor.u32 %v7919_v36, %v7260_v35 }
 0x27b   : > { %4821 = vmatpush.bf16.msrb.mxu3 %v7359_v51  ;;  %v4570_v37 = vadd.f32 %v4569_v19, %v4557_v40  ;;  %v7327_v51 = vor.u32 %v7935_v4, %v7324_v39 }
 0x27c   : > { %4783 = vmatpush.bf16.msrb.mxu0 %v7159_v22  ;;  %v7191_v22 = vor.u32 %v7901_v46, %v7188_v29 }
 0x27d   : > { %4796 = vmatpush.bf16.msrb.mxu1 %v7223_v41  ;;  %v7255_v41 = vor.u32 %v7917_v49, %v7252_v61 }
 0x27e   : > { %4809 = vmatpush.bf16.msrb.mxu2 %v7287_v42  ;;  %v7883_v42 = vld [vmem:[%s8287_s5 + $0x1004] sm:$0xf] }
 0x27f   : > { %4822 = vmatpush.bf16.msrb.mxu3 %v7351_v32  ;;  %v7180_v32 = vld [vmem:[%s8287_s5 + $0x1088] sm:$0xf0]  ;;  %v7119_v59 = vor.u32 %v7883_v42, %v7116_v2  ;;  %s254_s5 = scalar_lea.vmem [#allocation6], %s5061_s13 }
 0x280   : > { %4784 = vmatpush.bf16.msrb.mxu0 %v7151_v16  ;;  %v4558_v54 = vpop.f32.mrf.mxu2  ;;  %v7183_v16 = vor.u32 %v7899_v12, %v7180_v32 }
 0x281   : > { %4797 = vmatpush.bf16.msrb.mxu1 %v7215_v18  ;;  %v4571_v7 = vpop.f32.mrf.mxu3  ;;  %v7311_v18 = vor.u32 %v7931_v9, %v7308_v10 }
 0x282   : > { %4810 = vmatpush.bf16.msrb.mxu2 %v7279_v44 }
 0x283   : > { %4823 = vmatpush.bf16.msrb.mxu3 %v7343_v1 }
 0x284   : > { %4785 = vmatpush.bf16.msrb.mxu0 %v7143_v52 }
 0x285   : > { %4798 = vmatpush.bf16.msrb.mxu1 %v7207_v24 }
 0x286   : > { %4811 = vmatpush.bf16.msrb.mxu2 %v7271_v26 }
 0x287   : > { %4824 = vmatpush.bf16.msrb.mxu3 %v7335_v21 }
 0x288   : > { %4786 = vmatpush.bf16.msrb.mxu0 %v7135_v20 }
 0x289   : > { %4799 = vmatpush.bf16.msrb.mxu1 %v7199_v6  ;;  %v4833_v6 = vrot.slane %v9385_v17, 4 }
 0x28a   : > { %4812 = vmatpush.bf16.msrb.mxu2 %v7263_v48  ;;  %v4845_v48 = vmul.f32 %v9385_v17, %v9385_v17 }
 0x28b   : > { %4825 = vmatpush.bf16.msrb.mxu3 %v7327_v51  ;;  %v4834_v29 = vadd.f32 %v4833_v6, %v9385_v17 }
 0x28c   : > { %4787 = vmatpush.bf16.msrb.mxu0 %v7127_v33  ;;  %v4847_v49 = vrot.slane %v4845_v48, 4 }
 0x28d   : > { %4800 = vmatpush.bf16.msrb.mxu1 %v7191_v22  ;;  %v4835_v58 = vrot.slane %v4834_v29, 2 }
 0x28e   : > { %4813 = vmatpush.bf16.msrb.mxu2 %v7255_v41  ;;  %v4848_v33 = vadd.f32 %v4847_v49, %v4845_v48 }
 0x28f   : > { %4826 = vmatpush.bf16.msrb.mxu3 %v7319_v27  ;;  %v4836_v2 = vadd.f32 %v4835_v58, %v4834_v29  ;;  %v4891_v58 = vld [vmem:[%s8297_s26] sm:$0x3]  ;;  %s5063_s26 = sshll.u32 %s8182_s19, 1 }
 0x290   : > { %4788 = vmatpush.bf16.msrb.mxu0 %v7119_v59  ;;  %v4582_v44 = vpop.f32.mrf.mxu0  ;;  %v4849_v12 = vrot.slane %v4848_v33, 2  ;;  %p293_p7 = scmp.lt.s32.totalorder %s5063_s26, 3 }
 0x291   : > { %4801 = vmatpush.bf16.msrb.mxu1 %v7183_v16  ;;  %v4583_v60 = vadd.f32 %v4582_v44, %v4570_v37  ;;  %v4595_v56 = vpop.f32.mrf.mxu1  ;;  %v4837_v13 = vrot.slane %v4836_v2, 1 }
 0x292   : > { %4814 = vmatpush.bf16.msrb.mxu2 %v7247_v15  ;;  %v4850_v53 = vadd.f32 %v4849_v12, %v4848_v33  ;;  %s9738_s26 = smov (!%p293_p7, %s5063_s26), 3 }
 0x293   : > { %4827 = vmatpush.bf16.msrb.mxu3 %v7311_v18  ;;  %4789 = vmatmul.bf16.vlgmr.msrb.gmra.mxu0 %v9051_v57  ;;  %v4596_v62 = vadd.f32 %v4595_v56, %v4583_v60  ;;  %v4838_v9 = vadd.f32 %v4837_v13, %v4836_v2  ;;  %s295_s24 = scalar_lea.vmem %s9724_s4, %s9738_s26 }
 0x294   : > { %4802 = vmatmul.bf16.vlgmr.msrb.gmra.mxu1 %v9058_v0  ;;  %v4851_v10 = vrot.slane %v4850_v53, 1 }
 0x295   : > { %4815 = vmatmul.bf16.vlgmr.msrb.gmra.mxu2 %v9056_v63  ;;  %v9692_v16 = vmul.f32 0.125, %v4838_v9  ;;  %v4899_v9 = vld [vmem:[%s254_s5] sm:$0x3] }
 0x296   : > { %4828 = vmatmul.bf16.vlgmr.msrb.gmra.mxu3 %v9062_v5  ;;  %v4852_v59 = vadd.f32 %v4851_v10, %v4850_v53 }
 0x298   : > { %v4608_v1 = vpop.f32.mrf.mxu2  ;;  %v4584_v55 = vpop.f32.mrf.mxu0  ;;  %v4861_v56 = vmul.f32 0.125, %v4852_v59 }
 0x299   : > { %v4609_v14 = vadd.f32 %v4608_v1, %v4596_v62  ;;  %v4621_v3 = vpop.f32.mrf.mxu3  ;;  %v4597_v30 = vpop.f32.mrf.mxu1  ;;  %v4863_v62 = vmul.f32 %v9692_v16, %v9692_v16 }
 0x29b   : > { %v4622_v11 = vadd.f32 %v4621_v3, %v4609_v14  ;;  %v4865_v3 = vsub.f32 %v4861_v56, %v4863_v62 }
 0x2a0   : > { %v4610_v23 = vpop.f32.mrf.mxu2 }
 0x2a1   : > { %v4623_v52 = vpop.f32.mrf.mxu3 }
 0x2b0   : > { %v4634_v24 = vpop.f32.mrf.mxu0 }
 0x2b1   : > { %v4635_v57 = vadd.f32 %v4634_v24, %v4622_v11  ;;  %v4647_v26 = vpop.f32.mrf.mxu1  ;;  %v4867_v24 = vmax.f32 %v4865_v3, 0.0 }
 0x2b3   : > { %v4648_v0 = vadd.f32 %v4647_v26, %v4635_v57 }
 0x2b8   : > { %v4660_v38 = vpop.f32.mrf.mxu2  ;;  %v4636_v5 = vpop.f32.mrf.mxu0 }
 0x2b9   : > { %v4661_v63 = vadd.f32 %v4660_v38, %v4648_v0  ;;  %v4673_v28 = vpop.f32.mrf.mxu3  ;;  %v4649_v31 = vpop.f32.mrf.mxu1 }
 0x2bb   : > { %v4674_v21 = vadd.f32 %v4673_v28, %v4661_v63  ;;  %v4869_v28 = vadd.f32 1e-05, %v4867_v24 }
 0x2bd   : > { %8001 = vrsqrt.f32 %v4869_v28  ;;  %vm4877_vm1 = vweird.f32 %v4869_v28 }
 0x2c0   : > { %v4662_v43 = vpop.f32.mrf.mxu2 }
 0x2c1   : > { %v4675_v34 = vpop.f32.mrf.mxu3 }
 0x2d0   : > { %v4686_v36 = vpop.f32.mrf.mxu0 }
 0x2d1   : > { %v4699_v35 = vpop.f32.mrf.mxu1  ;;  %v4687_v50 = vadd.f32 %v4686_v36, %v4674_v21 }
 0x2d3   : > { %v4700_v8 = vadd.f32 %v4699_v35, %v4687_v50 }
 0x2d8   : > { %v4712_v40 = vpop.f32.mrf.mxu2  ;;  %v4688_v4 = vpop.f32.mrf.mxu0 }
 0x2d9   : > { %v4725_v19 = vpop.f32.mrf.mxu3  ;;  %v4701_v39 = vpop.f32.mrf.mxu1  ;;  %v4713_v22 = vadd.f32 %v4712_v40, %v4700_v8 }
 0x2db   : > { %v4726_v27 = vadd.f32 %v4725_v19, %v4713_v22 }
 0x2e0   : > { %v4714_v47 = vpop.f32.mrf.mxu2 }
 0x2e1   : > { %v4727_v20 = vpop.f32.mrf.mxu3  ;;  %v8002_v47 = vpop.eup %8001 }
 0x2e2   : > { %v4872_v6 = vmul.f32 %v8002_v47, %v4869_v28  ;;  %vm4878_vm0 = vweird.f32 %v8002_v47 }
 0x2e3   : > { %vm4879_vm3 = vmor %vm4877_vm1, %vm4878_vm0 }
 0x2f0   : > { %v4738_v25 = vpop.f32.mrf.mxu0 }
 0x2f1   : > { %v4751_v37 = vpop.f32.mrf.mxu1  ;;  %v4739_v32 = vadd.f32 %v4738_v25, %v4726_v27 }
 0x2f3   : > { %v4752_v54 = vadd.f32 %v4751_v37, %v4739_v32 }
 0x2f8   : > { %v4764_v45 = vpop.f32.mrf.mxu2  ;;  %v4740_v51 = vpop.f32.mrf.mxu0 }
 0x2f9   : > { %v4777_v46 = vpop.f32.mrf.mxu3  ;;  %v4753_v61 = vpop.f32.mrf.mxu1  ;;  %v4765_v7 = vadd.f32 %v4764_v45, %v4752_v54  ;;  %v4873_v45 = vmul.f32 %v8002_v47, %v4872_v6 }
 0x2fb   : > { %v4778_v15 = vadd.f32 %v4777_v46, %v4765_v7  ;;  %v4874_v46 = vmul.f32 0.5, %v4873_v45 }
 0x2fd   : > { %v4875_v29 = vsub.f32 1.5, %v4874_v46 }
 0x2ff   : > { %v4876_v8 = vmul.f32 %v8002_v47, %v4875_v29 }
 0x300   : > { %v4766_v41 = vpop.f32.mrf.mxu2 }
 0x301   : > { %v4779_v42 = vpop.f32.mrf.mxu3  ;;  %v4893_v41 = vperm.slane %v4891_v58, 0  ;;  %v4880_v2 = vsel %vm4879_vm3, %v8002_v47, %v4876_v8 }
 0x302   : > { %v4894_v42 = vperm.slane %v4891_v58, 1 }
 0x303   : > { %v4897_v32 = vmul.f32 %v4893_v41, %v4880_v2 }
 0x305   : > { %v4900_v54 = vmul.f32 %v4897_v32, %v9692_v16  ;;  %v4909_v7 = vperm.slane %v4897_v32, 0 }
 0x310   : > { %v4790_v18 = vpop.f32.mrf.mxu0 }
 0x311   : > { %v4803_v44 = vpop.f32.mrf.mxu1  ;;  %v4791_v60 = vadd.f32 %v4790_v18, %v4778_v15 }
 0x313   : > { %v4804_v1 = vadd.f32 %v4803_v44, %v4791_v60  ;;  %v4911_v44 = vmul.f32 %v4909_v7, %v9385_v17 }
 0x318   : > { %v4816_v14 = vpop.f32.mrf.mxu2  ;;  %v4792_v11 = vpop.f32.mrf.mxu0 }
 0x319   : > { %v4817_v55 = vadd.f32 %v4816_v14, %v4804_v1  ;;  %v4829_v30 = vpop.f32.mrf.mxu3  ;;  %v4805_v23 = vpop.f32.mrf.mxu1 }
 0x31b   : > { %v4830_v52 = vadd.f32 %v4829_v30, %v4817_v55 }
 0x31d   : > { %v4839_v57 = vrot.slane %v4830_v52, 4  ;;  %v4846_v26 = vmul.f32 %v4830_v52, %v4830_v52 }
 0x31f   : > { %v4840_v0 = vadd.f32 %v4839_v57, %v4830_v52  ;;  %v4853_v38 = vrot.slane %v4846_v26, 4 }
 0x320   : > { %v4818_v63 = vpop.f32.mrf.mxu2 }
 0x321   : > { %v4841_v5 = vrot.slane %v4840_v0, 2  ;;  %v4854_v31 = vadd.f32 %v4853_v38, %v4846_v26  ;;  %v4831_v21 = vpop.f32.mrf.mxu3 }
 0x323   : > { %v4842_v43 = vadd.f32 %v4841_v5, %v4840_v0  ;;  %v4855_v34 = vrot.slane %v4854_v31, 2 }
 0x325   : > { %v4843_v36 = vrot.slane %v4842_v43, 1  ;;  %v4856_v35 = vadd.f32 %v4855_v34, %v4854_v31 }
 0x327   : > { %v4844_v40 = vadd.f32 %v4843_v36, %v4842_v43  ;;  %v4857_v19 = vrot.slane %v4856_v35, 1 }
 0x329   : > { %v4858_v4 = vadd.f32 %v4857_v19, %v4856_v35  ;;  %v4860_v39 = vmul.f32 0.125, %v4844_v40 }
 0x32b   : > { %v4862_v20 = vmul.f32 0.125, %v4858_v4  ;;  %v4864_v25 = vmul.f32 %v4860_v39, %v4860_v39 }
 0x32d   : > { %v4866_v37 = vsub.f32 %v4862_v20, %v4864_v25 }
 0x32f   : > { %v4868_v48 = vmax.f32 %v4866_v37, 0.0 }
 0x331   : > { %v4870_v50 = vadd.f32 1e-05, %v4868_v48 }
 0x333   : > { %8003 = vrsqrt.f32 %v4870_v50  ;;  %vm4887_vm4 = vweird.f32 %v4870_v50 }
 0x339   : > { %v8004_v51 = vpop.eup %8003 }
 0x33a   : > { %v4882_v49 = vmul.f32 %v8004_v51, %v4870_v50  ;;  %vm4888_vm2 = vweird.f32 %v8004_v51 }
 0x33b   : > { %vm4889_vm5 = vmor %vm4887_vm4, %vm4888_vm2 }
 0x33c   : > { %v4883_v61 = vmul.f32 %v8004_v51, %v4882_v49 }
 0x33e   : > { %v4884_v33 = vmul.f32 0.5, %v4883_v61 }
 0x340   : > { %v4885_v22 = vsub.f32 1.5, %v4884_v33 }
 0x342   : > { %v4886_v12 = vmul.f32 %v8004_v51, %v4885_v22 }
 0x344   : > { %v4890_v27 = vsel %vm4889_vm5, %v8004_v51, %v4886_v12 }
 0x345   : > { %v4898_v13 = vmul.f32 %v4894_v42, %v4890_v27 }
 0x347   : > { %v4901_v53 = vmul.f32 %v4898_v13, %v4860_v39  ;;  %v4910_v59 = vperm.slane %v4898_v13, 0 }
 0x349   : > { %v4904_v10 = vrot.slane %v4901_v53, 7  ;;  %v4912_v60 = vmul.f32 %v4910_v59, %v4830_v52 }
 0x34b   : > { %v4906_v15 = vsel %vm4905_vm6, %v4900_v54, %v4904_v10 }
 0x34c   : > { %v4908_v18 = vsub.f32 %v4899_v9, %v4906_v15 }
 0x34e   : > { %v4914_v56 = vperm.slane %v4908_v18, 0  ;;  %v4915_v62 = vperm.slane %v4908_v18, 1 }
 0x350   : > { %v4918_v1 = vadd.f32 %v4914_v56, %v4911_v44  ;;  %v4919_v14 = vadd.f32 %v4915_v62, %v4912_v60 }
 0x352   : > { %v4920_v3 = vmax.f32 %v4918_v1, 0.0  ;;  %v4921_v55 = vmax.f32 %v4919_v14, 0.0 }
 0x354   : > { %v4924_v16 = vrot.slane %v4920_v3, 2  ;;  %v4925_v30 = vrot.slane %v4921_v55, 2 }
 0x356   : > { %v4928_v11 = vmax.f32 %v4920_v3, %v4924_v16  ;;  %v4929_v23 = vmax.f32 %v4921_v55, %v4925_v30 }
 0x358   : > { %v4932_v24 = vrot.slane %v4928_v11, 4  ;;  %v4933_v57 = vrot.slane %v4929_v23, 4 }
 0x35a   : > { %v4936_v26 = vmax.f32 %v4928_v11, %v4932_v24  ;;  %v4937_v0 = vmax.f32 %v4929_v23, %v4933_v57 }
 0x35c   : > { %v4938_v38 = vpack.c.bf16 %v4937_v0, %v4936_v26 }
 0x35e   : > { %v4940_v17 = vrot.slane %v4938_v38, 3 }
 0x360   : > { %v4943_v52 = vsel %vm4905_vm6, %v4938_v38, %v4940_v17 }
 0x361   : > { %4945 = vst [vmem:[%s295_s24] sm:$0x3] %v4943_v52 }
 0x362 PF: > { %p17_p8 = scmp.ge.s32.totalorder %s8185_s20, 4   ;;  %s9733_s15 = smov %s8125_s16 }
 0x363   : > { %s9734_s16 = smov %s8129_s17  ;;  %s9735_s17 = smov %s8195_s23 }
 0x364   : > { %s9736_s18 = smov %s8185_s20  ;;  %19 = sbr.rel (!%p17_p8) target bundleno = 7 (0x7), region = 100 }
 0x369   :  { %4966 = vsyncpa [#allocation3], 1 }
 0x36a   :  { %4968 = vsyncpa [#allocation3 + $0x1], 1 }
 0x36b   :  { %4969 = vsyncpa [#allocation5], 1 }
 0x36c   :  { %4971 = vsyncpa [#allocation5 + $0x1], 1 }

</bundles_post_ra>
